<compile_context>
chip_gen: v6e
topology: v6e:2x2x1
jax: 0.10.0
libtpu: 0.0.40
codegen_flags: <defaults>
</compile_context>

<pallas_src>
import numpy as np
import jax
import jax.numpy as jnp
from jax.experimental import pallas as pl
from jax.experimental.pallas import tpu as pltpu


# --------------------------------------------------------------------------
# Pallas kernel
# --------------------------------------------------------------------------
def make_htcn_kernel(sub_no, M_no, T_no, T_blk, level_sizes, level_has_leaf):
    HALO = T_no - 1                                    # causal look-back rows
    HPAD = ((HALO + 7) // 8) * 8 if HALO > 0 else 0    # sublane-aligned carry
    n_levels = len(level_sizes)
    ncols1 = sub_no * M_no

    def kernel(*args):
        (se_ref, si_ref, cse_t_ref, csi_t_ref,
         w1e_ref, w1i_ref, bias_ref) = args[:7]
        pos = 7
        lvl_refs = []
        for li in range(n_levels):
            l_ref = None
            if level_has_leaf[li]:
                l_ref = args[pos]
                pos += 1
            w2_ref = args[pos]
            mxp_ref = args[pos + 1]
            pos += 2
            lvl_refs.append((l_ref, w2_ref, mxp_ref))
        out_ref = args[pos]; pos += 1
        xe_buf = args[pos]; xi_buf = args[pos + 1]; pos += 2
        n1_bufs = args[pos:pos + n_levels]

        step = pl.program_id(0)

        # zero the carry region (rows [0, HPAD)) before the first time block
        if HPAD > 0:
            @pl.when(step == 0)
            def _zero_carry():
                xe_buf[0:HPAD, :] = jnp.zeros((HPAD, sub_no), jnp.float32)
                xi_buf[0:HPAD, :] = jnp.zeros((HPAD, sub_no), jnp.float32)
                for li in range(n_levels):
                    n1_bufs[li][0:HPAD, :] = jnp.zeros(
                        (HPAD, level_sizes[li] * M_no), jnp.float32)

        # ---- synapse -> subunit aggregation (MXU) ----
        # buffer row HPAD + t holds time (block_start + t)
        xe_buf[HPAD:HPAD + T_blk, :] = jnp.dot(
            se_ref[...], cse_t_ref[...], preferred_element_type=jnp.float32)
        xi_buf[HPAD:HPAD + T_blk, :] = jnp.dot(
            si_ref[...], csi_t_ref[...], preferred_element_type=jnp.float32)

        # ---- causal grouped conv1: sum of per-tap MXU matmuls ----
        # tap d multiplies x[t - d]
        s_conv = jnp.zeros((T_blk, ncols1), jnp.float32)
        for d in range(T_no):
            lo = HPAD - d
            s_conv = s_conv + jnp.dot(xe_buf[lo:lo + T_blk, :], w1e_ref[d],
                                      preferred_element_type=jnp.float32)
            s_conv = s_conv + jnp.dot(xi_buf[lo:lo + T_blk, :], w1i_ref[d],
                                      preferred_element_type=jnp.float32)

        # subunit outputs, pre-loaded with the multiplex bias (each subunit gets
        # its bias exactly once; parents only ever read fully-finished children)
        sub_out = bias_ref[...] + jnp.zeros((T_blk, sub_no), jnp.float32)

        # ---- dendritic tree, one level (equal-height subunits) at a time ----
        off = 0
        for li, (l_ref, w2_ref, mxp_ref) in enumerate(lvl_refs):
            CL = level_sizes[li] * M_no
            syn = s_conv[:, off:off + CL]
            if l_ref is not None:                          # children input
                syn = syn + jnp.dot(sub_out, l_ref[...],
                                    preferred_element_type=jnp.float32)
            nonlin1 = jnp.tanh(syn)

            buf = n1_bufs[li]
            buf[HPAD:HPAD + T_blk, :] = nonlin1
            conv2 = jnp.zeros((T_blk, CL), jnp.float32)
            for d in range(T_no):                          # causal depthwise conv2
                lo = HPAD - d
                conv2 = conv2 + jnp.dot(buf[lo:lo + T_blk, :], w2_ref[d],
                                        preferred_element_type=jnp.float32)
            nonlin2 = jnp.tanh(conv2)
            # multiplex readout + scatter into this level's subunit columns
            sub_out = sub_out + jnp.dot(nonlin2, mxp_ref[...],
                                        preferred_element_type=jnp.float32)

            if HPAD > 0:                                   # carry for next block
                buf[0:HPAD, :] = buf[T_blk:T_blk + HPAD, :]
            off += CL

        if HPAD > 0:
            xe_buf[0:HPAD, :] = xe_buf[T_blk:T_blk + HPAD, :]
            xi_buf[0:HPAD, :] = xi_buf[T_blk:T_blk + HPAD, :]

        out_ref[...] = sub_out

    return kernel


# --------------------------------------------------------------------------
# Wrapper: parameter glue (weight combination, tree levels) in plain JAX,
# all time-domain compute inside the Pallas kernel.
# --------------------------------------------------------------------------
def conv2_htcn_forward(S_e, S_i, params, C_den, T_blk=128, interpret=False):
    C_den_np = np.asarray(C_den)
    sub_no = int(C_den_np.shape[0])
    T_data = int(S_e.shape[0])
    E_no = int(S_e.shape[1])
    I_no = int(S_i.shape[1])
    B_no, T_no = (int(x) for x in params["conv1_e_bases"].shape)
    M_no = int(params["leaf_linear"].shape[1])
    f32 = jnp.float32

    # ---- static tree structure (only children with index > parent ever
    #      contribute in the original forward; others read zeros) ----
    children = [[int(l) for l in np.where(C_den_np[j] == 1)[0] if l > j]
                for j in range(sub_no)]
    height = [-1] * sub_no

    def _height(j):
        if height[j] < 0:
            height[j] = 0 if not children[j] else 1 + max(_height(c)
                                                          for c in children[j])
        return height[j]

    for j in range(sub_no):
        _height(j)
    n_levels = max(height) + 1
    levels = [[j for j in range(sub_no) if height[j] == lv]
              for lv in range(n_levels)]
    order = [j for lv in levels for j in lv]
    level_sizes = [len(lv) for lv in levels]
    level_has_leaf = [any(children[j] for j in lv) for lv in levels]

    # ---- combined, time-reversed conv kernels (tap d multiplies x[t-d]) ----
    ke = jnp.dot(params["conv1_e_weights"], params["conv1_e_bases"]).astype(f32)
    ki = jnp.dot(params["conv1_i_weights"], params["conv1_i_bases"]).astype(f32)
    k2 = jnp.dot(params["conv2_weights"], params["conv2_bases"]).astype(f32)
    ke_rev = ke.reshape(sub_no, M_no, T_no)[:, :, ::-1]     # [s, m, d]
    ki_rev = ki.reshape(sub_no, M_no, T_no)[:, :, ::-1]
    k2_rev = k2.reshape(sub_no, M_no, T_no)[:, :, ::-1]

    ncols1 = sub_no * M_no
    W1e = jnp.zeros((T_no, sub_no, ncols1), f32)
    W1i = jnp.zeros((T_no, sub_no, ncols1), f32)
    for p, s in enumerate(order):           # output columns in processing order
        W1e = W1e.at[:, s, p * M_no:(p + 1) * M_no].set(jnp.transpose(ke_rev[s]))
        W1i = W1i.at[:, s, p * M_no:(p + 1) * M_no].set(jnp.transpose(ki_rev[s]))

    exp_leaf = jnp.exp(params["leaf_linear"]).astype(f32)
    exp_mult = jnp.exp(params["multiplex_linear"]).astype(f32)
    bias_row = params["multiplex_bias"].reshape(1, sub_no).astype(f32)

    level_inputs = []
    for lv, subs in enumerate(levels):
        n_l = len(subs)
        CL = n_l * M_no
        if level_has_leaf[lv]:
            L = jnp.zeros((sub_no, CL), f32)
            for jj, j in enumerate(subs):
                for l in children[j]:
                    L = L.at[l, jj * M_no:(jj + 1) * M_no].set(exp_leaf[l, :])
            level_inputs.append(L)
        taps = jnp.concatenate([k2_rev[j] for j in subs], axis=0)   # (CL, T_no)
        W2 = jax.vmap(jnp.diag)(jnp.transpose(taps)).astype(f32)    # (T_no, CL, CL)
        level_inputs.append(W2)
        MxP = jnp.zeros((CL, sub_no), f32)                          # readout+scatter
        for jj, j in enumerate(subs):
            MxP = MxP.at[jj * M_no:(jj + 1) * M_no, j].set(exp_mult[j, :])
        level_inputs.append(MxP)

    # ---- time tiling ----
    T_blk = int(min(T_blk, max(8, ((T_data + 7) // 8) * 8)))
    T_blk = max(8, (T_blk // 8) * 8)
    nb = -(-T_data // T_blk)
    T_pad = nb * T_blk
    Se = S_e.astype(f32)
    Si = S_i.astype(f32)
    if T_pad != T_data:
        Se = jnp.pad(Se, ((0, T_pad - T_data), (0, 0)))
        Si = jnp.pad(Si, ((0, T_pad - T_data), (0, 0)))

    inputs = [Se, Si,
              jnp.transpose(params["C_syn_e"]).astype(f32),
              jnp.transpose(params["C_syn_i"]).astype(f32),
              W1e, W1i, bias_row] + level_inputs

    def _const_spec(a):
        nd = a.ndim
        return pl.BlockSpec(a.shape, lambda i, _nd=nd: (0,) * _nd)

    in_specs = ([pl.BlockSpec((T_blk, E_no), lambda i: (i, 0)),
                 pl.BlockSpec((T_blk, I_no), lambda i: (i, 0))]
                + [_const_spec(a) for a in inputs[2:]])

    HALO = T_no - 1
    HPAD = ((HALO + 7) // 8) * 8 if HALO > 0 else 0
    scratch = [pltpu.VMEM((T_blk + HPAD, sub_no), f32),
               pltpu.VMEM((T_blk + HPAD, sub_no), f32)]
    scratch += [pltpu.VMEM((T_blk + HPAD, n * M_no), f32) for n in level_sizes]

    kernel = make_htcn_kernel(sub_no, M_no, T_no, T_blk,
                              level_sizes, level_has_leaf)
    out = pl.pallas_call(
        kernel,
        out_shape=jax.ShapeDtypeStruct((T_pad, sub_no), f32),
        grid=(nb,),
        in_specs=in_specs,
        out_specs=pl.BlockSpec((T_blk, sub_no), lambda i: (i, 0)),
        scratch_shapes=scratch,
        compiler_params=pltpu.CompilerParams(
            dimension_semantics=("arbitrary",)),   # carry serializes time axis
        interpret=interpret,
    )(*inputs)
    return out[:T_data, 0]


# --------------------------------------------------------------------------
# Pure-numpy reference (mirrors the PyTorch forward exactly)
# --------------------------------------------------------------------------
def ref_forward(S_e, S_i, p, C_den):
    sub_no = C_den.shape[0]
    T = S_e.shape[0]
    M_no = p["leaf_linear"].shape[1]
    T_no = p["conv1_e_bases"].shape[1]
    x_e = S_e @ p["C_syn_e"].T
    x_i = S_i @ p["C_syn_i"].T
    ke = p["conv1_e_weights"] @ p["conv1_e_bases"]
    ki = p["conv1_i_weights"] @ p["conv1_i_bases"]
    k2 = p["conv2_weights"] @ p["conv2_bases"]

    def causal_conv_col(x_col, w_row):
        out = np.zeros(T)
        for t in range(T):
            for k in range(T_no):
                tt = t - (T_no - 1) + k
                if tt >= 0:
                    out[t] += x_col[tt] * w_row[k]
        return out

    S_conv = np.zeros((T, sub_no, M_no))
    for s in range(sub_no):
        for m in range(M_no):
            S_conv[:, s, m] = (causal_conv_col(x_e[:, s], ke[s * M_no + m]) +
                               causal_conv_col(x_i[:, s], ki[s * M_no + m]))

    sub_out = np.zeros((T, sub_no))
    for step in range(sub_no):
        j = sub_no - 1 - step
        leaf_idx = np.where(C_den[j] == 1)[0]
        syn_in = S_conv[:, j, :]
        if len(leaf_idx):
            leaf_in = sub_out[:, leaf_idx] @ np.exp(p["leaf_linear"][leaf_idx, :])
        else:
            leaf_in = 0.0
        nonlin1 = np.tanh(syn_in + leaf_in)
        conv2 = np.zeros((T, M_no))
        for m in range(M_no):
            conv2[:, m] = causal_conv_col(nonlin1[:, m], k2[j * M_no + m])
        nonlin2 = np.tanh(conv2)
        sub_out[:, j] = sub_out[:, j] + nonlin2 @ np.exp(p["multiplex_linear"][j, :]) \
                        + p["multiplex_bias"][j]
    return sub_out[:, 0]


# --------------------------------------------------------------------------
if __name__ == "__main__":
    key = jax.random.PRNGKey(0)
    T_data, sub_no = 256, 4
    E_no, I_no = 8, 8
    T_no, M_no, B_no = 8, 4, 3
    T_blk = 128            # 2 time blocks -> exercises the cross-block carry

    # dendritic tree: subunit 0 is root (children 1,2), subunit 1 has child 3.
    C_den = np.array([[0, 1, 1, 0],
                      [0, 0, 0, 1],
                      [0, 0, 0, 0],
                      [0, 0, 0, 0]], dtype=np.float32)
    # one-hot synapse -> subunit assignment matrices
    C_syn_e = np.zeros((sub_no, E_no), np.float32)
    C_syn_e[np.arange(E_no) % sub_no, np.arange(E_no)] = 1.0
    C_syn_i = np.zeros((sub_no, I_no), np.float32)
    C_syn_i[np.arange(I_no) % sub_no, np.arange(I_no)] = 1.0

    keys = jax.random.split(key, 11)
    params = {
        "conv1_e_bases":    jax.random.normal(keys[0], (B_no, T_no), jnp.float32),
        "conv1_e_weights":  jax.random.normal(keys[1], (M_no * sub_no, B_no), jnp.float32),
        "conv1_i_bases":    jax.random.normal(keys[2], (B_no, T_no), jnp.float32),
        "conv1_i_weights":  jax.random.normal(keys[3], (M_no * sub_no, B_no), jnp.float32),
        "conv2_bases":      jax.random.normal(keys[4], (B_no, T_no), jnp.float32),
        "conv2_weights":    jax.random.normal(keys[5], (M_no * sub_no, B_no), jnp.float32),
        "leaf_linear":      jax.random.normal(keys[6], (sub_no, M_no), jnp.float32),
        "multiplex_linear": jax.random.normal(keys[7], (sub_no, M_no), jnp.float32),
        "multiplex_bias":   jax.random.normal(keys[8], (sub_no,), jnp.float32),
        "C_syn_e": jnp.asarray(C_syn_e),
        "C_syn_i": jnp.asarray(C_syn_i),
    }

    # synaptic spike trains
    S_e = (jax.random.uniform(keys[9], (T_data, E_no)) < 0.3).astype(jnp.float32)
    S_i = (jax.random.uniform(keys[10], (T_data, I_no)) < 0.3).astype(jnp.float32)

    out = conv2_htcn_forward(S_e, S_i, params, C_den, T_blk=T_blk)
    out = jax.block_until_ready(out)

    ref = ref_forward(np.asarray(S_e), np.asarray(S_i),
                      {k: np.asarray(v) for k, v in params.items()}, C_den)
    assert out.shape == (T_data,)
    np.testing.assert_allclose(np.asarray(out), ref, rtol=2e-3, atol=2e-3)
    print("KERNEL_OK")
</pallas_src>

<mosaic_0001>
module attributes {stable_mosaic.version = 11 : i64} {
  func.func @kernel(%arg0: i32, %arg1: memref<128x8xf32, #tpu.memory_space<vmem>>, %arg2: memref<128x8xf32, #tpu.memory_space<vmem>>, %arg3: memref<8x4xf32, #tpu.memory_space<vmem>>, %arg4: memref<8x4xf32, #tpu.memory_space<vmem>>, %arg5: memref<8x4x16xf32, #tpu.memory_space<vmem>>, %arg6: memref<8x4x16xf32, #tpu.memory_space<vmem>>, %arg7: memref<1x4xf32, #tpu.memory_space<vmem>>, %arg8: memref<8x8x8xf32, #tpu.memory_space<vmem>>, %arg9: memref<8x4xf32, #tpu.memory_space<vmem>>, %arg10: memref<4x4xf32, #tpu.memory_space<vmem>>, %arg11: memref<8x4x4xf32, #tpu.memory_space<vmem>>, %arg12: memref<4x4xf32, #tpu.memory_space<vmem>>, %arg13: memref<4x4xf32, #tpu.memory_space<vmem>>, %arg14: memref<8x4x4xf32, #tpu.memory_space<vmem>>, %arg15: memref<4x4xf32, #tpu.memory_space<vmem>>, %arg16: memref<128x4xf32, #tpu.memory_space<vmem>>, %arg17: memref<136x4xf32, #tpu.memory_space<vmem>>, %arg18: memref<136x4xf32, #tpu.memory_space<vmem>>, %arg19: memref<136x8xf32, #tpu.memory_space<vmem>>, %arg20: memref<136x4xf32, #tpu.memory_space<vmem>>, %arg21: memref<136x4xf32, #tpu.memory_space<vmem>>) attributes {dimension_semantics = [#tpu.dimension_semantics<arbitrary>], iteration_bounds = array<i64: 2>, scalar_prefetch = 0 : i64, scratch_operands = 5 : i64, tpu.core_type = #tpu.core_type<tc>, window_params = [{transform_indices = @transform_0, window_bounds = array<i64: 128, 8>}, {transform_indices = @transform_1, window_bounds = array<i64: 128, 8>}, {pipeline_mode = #tpu.pipeline_mode<synchronous>, transform_indices = @transform_2, window_bounds = array<i64: 8, 4>}, {pipeline_mode = #tpu.pipeline_mode<synchronous>, transform_indices = @transform_3, window_bounds = array<i64: 8, 4>}, {pipeline_mode = #tpu.pipeline_mode<synchronous>, transform_indices = @transform_4, window_bounds = array<i64: 8, 4, 16>}, {pipeline_mode = #tpu.pipeline_mode<synchronous>, transform_indices = @transform_5, window_bounds = array<i64: 8, 4, 16>}, {pipeline_mode = #tpu.pipeline_mode<synchronous>, transform_indices = @transform_6, window_bounds = array<i64: 1, 4>}, {pipeline_mode = #tpu.pipeline_mode<synchronous>, transform_indices = @transform_7, window_bounds = array<i64: 8, 8, 8>}, {pipeline_mode = #tpu.pipeline_mode<synchronous>, transform_indices = @transform_8, window_bounds = array<i64: 8, 4>}, {pipeline_mode = #tpu.pipeline_mode<synchronous>, transform_indices = @transform_9, window_bounds = array<i64: 4, 4>}, {pipeline_mode = #tpu.pipeline_mode<synchronous>, transform_indices = @transform_10, window_bounds = array<i64: 8, 4, 4>}, {pipeline_mode = #tpu.pipeline_mode<synchronous>, transform_indices = @transform_11, window_bounds = array<i64: 4, 4>}, {pipeline_mode = #tpu.pipeline_mode<synchronous>, transform_indices = @transform_12, window_bounds = array<i64: 4, 4>}, {pipeline_mode = #tpu.pipeline_mode<synchronous>, transform_indices = @transform_13, window_bounds = array<i64: 8, 4, 4>}, {pipeline_mode = #tpu.pipeline_mode<synchronous>, transform_indices = @transform_14, window_bounds = array<i64: 4, 4>}, {transform_indices = @transform_15, window_bounds = array<i64: 128, 4>}]} {
    %c0_i32 = arith.constant 0 : i32
    %0 = arith.cmpi eq, %arg0, %c0_i32 : i32
    %1 = arith.extui %0 : i1 to i32
    %c0_i32_0 = arith.constant 0 : i32
    %2 = arith.cmpi ne, %1, %c0_i32_0 : i32
    scf.if %2 {
      %cst_294 = arith.constant 0.000000e+00 : f32
      %257 = vector.broadcast %cst_294 : f32 to vector<8x4xf32>
      %c0_295 = arith.constant 0 : index
      %c0_296 = arith.constant 0 : index
      %258 = vector.load %arg17[%c0_295, %c0_296] : memref<136x4xf32, #tpu.memory_space<vmem>>, vector<8x4xf32>
      tpu.vector_store %arg17[%c0_295, %c0_296], %257 {strides = array<i32>} : memref<136x4xf32, #tpu.memory_space<vmem>>, vector<8x4xf32>,
      %cst_297 = arith.constant 0.000000e+00 : f32
      %259 = vector.broadcast %cst_297 : f32 to vector<8x4xf32>
      %c0_298 = arith.constant 0 : index
      %c0_299 = arith.constant 0 : index
      %260 = vector.load %arg18[%c0_298, %c0_299] : memref<136x4xf32, #tpu.memory_space<vmem>>, vector<8x4xf32>
      tpu.vector_store %arg18[%c0_298, %c0_299], %259 {strides = array<i32>} : memref<136x4xf32, #tpu.memory_space<vmem>>, vector<8x4xf32>,
      %cst_300 = arith.constant 0.000000e+00 : f32
      %261 = vector.broadcast %cst_300 : f32 to vector<8x8xf32>
      %c0_301 = arith.constant 0 : index
      %c0_302 = arith.constant 0 : index
      %262 = vector.load %arg19[%c0_301, %c0_302] : memref<136x8xf32, #tpu.memory_space<vmem>>, vector<8x8xf32>
      tpu.vector_store %arg19[%c0_301, %c0_302], %261 {strides = array<i32>} : memref<136x8xf32, #tpu.memory_space<vmem>>, vector<8x8xf32>,
      %cst_303 = arith.constant 0.000000e+00 : f32
      %263 = vector.broadcast %cst_303 : f32 to vector<8x4xf32>
      %c0_304 = arith.constant 0 : index
      %c0_305 = arith.constant 0 : index
      %264 = vector.load %arg20[%c0_304, %c0_305] : memref<136x4xf32, #tpu.memory_space<vmem>>, vector<8x4xf32>
      tpu.vector_store %arg20[%c0_304, %c0_305], %263 {strides = array<i32>} : memref<136x4xf32, #tpu.memory_space<vmem>>, vector<8x4xf32>,
      %cst_306 = arith.constant 0.000000e+00 : f32
      %265 = vector.broadcast %cst_306 : f32 to vector<8x4xf32>
      %c0_307 = arith.constant 0 : index
      %c0_308 = arith.constant 0 : index
      %266 = vector.load %arg21[%c0_307, %c0_308] : memref<136x4xf32, #tpu.memory_space<vmem>>, vector<8x4xf32>
      tpu.vector_store %arg21[%c0_307, %c0_308], %265 {strides = array<i32>} : memref<136x4xf32, #tpu.memory_space<vmem>>, vector<8x4xf32>,
    } else {
    }
    %c0 = arith.constant 0 : index
    %c0_1 = arith.constant 0 : index
    %3 = vector.load %arg1[%c0, %c0_1] : memref<128x8xf32, #tpu.memory_space<vmem>>, vector<128x8xf32>
    %c0_2 = arith.constant 0 : index
    %c0_3 = arith.constant 0 : index
    %4 = vector.load %arg3[%c0_2, %c0_3] : memref<8x4xf32, #tpu.memory_space<vmem>>, vector<8x4xf32>
    %cst = arith.constant dense<0.000000e+00> : vector<128x4xf32>
    %5 = tpu.matmul %3, %4, %cst {dimension_numbers = #tpu.dot_dimension_numbers<[1], [0], [0], [1], [0, 0, 1, 1], [], []>} : vector<128x8xf32>, vector<8x4xf32>, vector<128x4xf32> -> vector<128x4xf32>
    %c8 = arith.constant 8 : index
    %c0_4 = arith.constant 0 : index
    %6 = vector.load %arg17[%c8, %c0_4] : memref<136x4xf32, #tpu.memory_space<vmem>>, vector<128x4xf32>
    tpu.vector_store %arg17[%c8, %c0_4], %5 {strides = array<i32>} : memref<136x4xf32, #tpu.memory_space<vmem>>, vector<128x4xf32>,
    %c0_5 = arith.constant 0 : index
    %c0_6 = arith.constant 0 : index
    %7 = vector.load %arg2[%c0_5, %c0_6] : memref<128x8xf32, #tpu.memory_space<vmem>>, vector<128x8xf32>
    %c0_7 = arith.constant 0 : index
    %c0_8 = arith.constant 0 : index
    %8 = vector.load %arg4[%c0_7, %c0_8] : memref<8x4xf32, #tpu.memory_space<vmem>>, vector<8x4xf32>
    %cst_9 = arith.constant dense<0.000000e+00> : vector<128x4xf32>
    %9 = tpu.matmul %7, %8, %cst_9 {dimension_numbers = #tpu.dot_dimension_numbers<[1], [0], [0], [1], [0, 0, 1, 1], [], []>} : vector<128x8xf32>, vector<8x4xf32>, vector<128x4xf32> -> vector<128x4xf32>
    %c8_10 = arith.constant 8 : index
    %c0_11 = arith.constant 0 : index
    %10 = vector.load %arg18[%c8_10, %c0_11] : memref<136x4xf32, #tpu.memory_space<vmem>>, vector<128x4xf32>
    tpu.vector_store %arg18[%c8_10, %c0_11], %9 {strides = array<i32>} : memref<136x4xf32, #tpu.memory_space<vmem>>, vector<128x4xf32>,
    %cst_12 = arith.constant 0.000000e+00 : f32
    %11 = vector.broadcast %cst_12 : f32 to vector<128x16xf32>
    %c8_13 = arith.constant 8 : index
    %c0_14 = arith.constant 0 : index
    %12 = vector.load %arg17[%c8_13, %c0_14] : memref<136x4xf32, #tpu.memory_space<vmem>>, vector<128x4xf32>
    %c0_15 = arith.constant 0 : index
    %c0_16 = arith.constant 0 : index
    %c0_17 = arith.constant 0 : index
    %13 = vector.load %arg5[%c0_15, %c0_16, %c0_17] : memref<8x4x16xf32, #tpu.memory_space<vmem>>, vector<1x4x16xf32>
    %14 = vector.shape_cast %13 : vector<1x4x16xf32> to vector<4x16xf32>
    %cst_18 = arith.constant dense<0.000000e+00> : vector<128x16xf32>
    %15 = tpu.matmul %12, %14, %cst_18 {dimension_numbers = #tpu.dot_dimension_numbers<[1], [0], [0], [1], [0, 0, 1, 1], [], []>} : vector<128x4xf32>, vector<4x16xf32>, vector<128x16xf32> -> vector<128x16xf32>
    %16 = arith.addf %11, %15 : vector<128x16xf32>
    %c8_19 = arith.constant 8 : index
    %c0_20 = arith.constant 0 : index
    %17 = vector.load %arg18[%c8_19, %c0_20] : memref<136x4xf32, #tpu.memory_space<vmem>>, vector<128x4xf32>
    %c0_21 = arith.constant 0 : index
    %c0_22 = arith.constant 0 : index
    %c0_23 = arith.constant 0 : index
    %18 = vector.load %arg6[%c0_21, %c0_22, %c0_23] : memref<8x4x16xf32, #tpu.memory_space<vmem>>, vector<1x4x16xf32>
    %19 = vector.shape_cast %18 : vector<1x4x16xf32> to vector<4x16xf32>
    %cst_24 = arith.constant dense<0.000000e+00> : vector<128x16xf32>
    %20 = tpu.matmul %17, %19, %cst_24 {dimension_numbers = #tpu.dot_dimension_numbers<[1], [0], [0], [1], [0, 0, 1, 1], [], []>} : vector<128x4xf32>, vector<4x16xf32>, vector<128x16xf32> -> vector<128x16xf32>
    %21 = arith.addf %16, %20 : vector<128x16xf32>
    %c7 = arith.constant 7 : index
    %c0_25 = arith.constant 0 : index
    %22 = vector.load %arg17[%c7, %c0_25] : memref<136x4xf32, #tpu.memory_space<vmem>>, vector<128x4xf32>
    %c1 = arith.constant 1 : index
    %c0_26 = arith.constant 0 : index
    %c0_27 = arith.constant 0 : index
    %23 = vector.load %arg5[%c1, %c0_26, %c0_27] : memref<8x4x16xf32, #tpu.memory_space<vmem>>, vector<1x4x16xf32>
    %24 = vector.shape_cast %23 : vector<1x4x16xf32> to vector<4x16xf32>
    %cst_28 = arith.constant dense<0.000000e+00> : vector<128x16xf32>
    %25 = tpu.matmul %22, %24, %cst_28 {dimension_numbers = #tpu.dot_dimension_numbers<[1], [0], [0], [1], [0, 0, 1, 1], [], []>} : vector<128x4xf32>, vector<4x16xf32>, vector<128x16xf32> -> vector<128x16xf32>
    %26 = arith.addf %21, %25 : vector<128x16xf32>
    %c7_29 = arith.constant 7 : index
    %c0_30 = arith.constant 0 : index
    %27 = vector.load %arg18[%c7_29, %c0_30] : memref<136x4xf32, #tpu.memory_space<vmem>>, vector<128x4xf32>
    %c1_31 = arith.constant 1 : index
    %c0_32 = arith.constant 0 : index
    %c0_33 = arith.constant 0 : index
    %28 = vector.load %arg6[%c1_31, %c0_32, %c0_33] : memref<8x4x16xf32, #tpu.memory_space<vmem>>, vector<1x4x16xf32>
    %29 = vector.shape_cast %28 : vector<1x4x16xf32> to vector<4x16xf32>
    %cst_34 = arith.constant dense<0.000000e+00> : vector<128x16xf32>
    %30 = tpu.matmul %27, %29, %cst_34 {dimension_numbers = #tpu.dot_dimension_numbers<[1], [0], [0], [1], [0, 0, 1, 1], [], []>} : vector<128x4xf32>, vector<4x16xf32>, vector<128x16xf32> -> vector<128x16xf32>
    %31 = arith.addf %26, %30 : vector<128x16xf32>
    %c6 = arith.constant 6 : index
    %c0_35 = arith.constant 0 : index
    %32 = vector.load %arg17[%c6, %c0_35] : memref<136x4xf32, #tpu.memory_space<vmem>>, vector<128x4xf32>
    %c2 = arith.constant 2 : index
    %c0_36 = arith.constant 0 : index
    %c0_37 = arith.constant 0 : index
    %33 = vector.load %arg5[%c2, %c0_36, %c0_37] : memref<8x4x16xf32, #tpu.memory_space<vmem>>, vector<1x4x16xf32>
    %34 = vector.shape_cast %33 : vector<1x4x16xf32> to vector<4x16xf32>
    %cst_38 = arith.constant dense<0.000000e+00> : vector<128x16xf32>
    %35 = tpu.matmul %32, %34, %cst_38 {dimension_numbers = #tpu.dot_dimension_numbers<[1], [0], [0], [1], [0, 0, 1, 1], [], []>} : vector<128x4xf32>, vector<4x16xf32>, vector<128x16xf32> -> vector<128x16xf32>
    %36 = arith.addf %31, %35 : vector<128x16xf32>
    %c6_39 = arith.constant 6 : index
    %c0_40 = arith.constant 0 : index
    %37 = vector.load %arg18[%c6_39, %c0_40] : memref<136x4xf32, #tpu.memory_space<vmem>>, vector<128x4xf32>
    %c2_41 = arith.constant 2 : index
    %c0_42 = arith.constant 0 : index
    %c0_43 = arith.constant 0 : index
    %38 = vector.load %arg6[%c2_41, %c0_42, %c0_43] : memref<8x4x16xf32, #tpu.memory_space<vmem>>, vector<1x4x16xf32>
    %39 = vector.shape_cast %38 : vector<1x4x16xf32> to vector<4x16xf32>
    %cst_44 = arith.constant dense<0.000000e+00> : vector<128x16xf32>
    %40 = tpu.matmul %37, %39, %cst_44 {dimension_numbers = #tpu.dot_dimension_numbers<[1], [0], [0], [1], [0, 0, 1, 1], [], []>} : vector<128x4xf32>, vector<4x16xf32>, vector<128x16xf32> -> vector<128x16xf32>
    %41 = arith.addf %36, %40 : vector<128x16xf32>
    %c5 = arith.constant 5 : index
    %c0_45 = arith.constant 0 : index
    %42 = vector.load %arg17[%c5, %c0_45] : memref<136x4xf32, #tpu.memory_space<vmem>>, vector<128x4xf32>
    %c3 = arith.constant 3 : index
    %c0_46 = arith.constant 0 : index
    %c0_47 = arith.constant 0 : index
    %43 = vector.load %arg5[%c3, %c0_46, %c0_47] : memref<8x4x16xf32, #tpu.memory_space<vmem>>, vector<1x4x16xf32>
    %44 = vector.shape_cast %43 : vector<1x4x16xf32> to vector<4x16xf32>
    %cst_48 = arith.constant dense<0.000000e+00> : vector<128x16xf32>
    %45 = tpu.matmul %42, %44, %cst_48 {dimension_numbers = #tpu.dot_dimension_numbers<[1], [0], [0], [1], [0, 0, 1, 1], [], []>} : vector<128x4xf32>, vector<4x16xf32>, vector<128x16xf32> -> vector<128x16xf32>
    %46 = arith.addf %41, %45 : vector<128x16xf32>
    %c5_49 = arith.constant 5 : index
    %c0_50 = arith.constant 0 : index
    %47 = vector.load %arg18[%c5_49, %c0_50] : memref<136x4xf32, #tpu.memory_space<vmem>>, vector<128x4xf32>
    %c3_51 = arith.constant 3 : index
    %c0_52 = arith.constant 0 : index
    %c0_53 = arith.constant 0 : index
    %48 = vector.load %arg6[%c3_51, %c0_52, %c0_53] : memref<8x4x16xf32, #tpu.memory_space<vmem>>, vector<1x4x16xf32>
    %49 = vector.shape_cast %48 : vector<1x4x16xf32> to vector<4x16xf32>
    %cst_54 = arith.constant dense<0.000000e+00> : vector<128x16xf32>
    %50 = tpu.matmul %47, %49, %cst_54 {dimension_numbers = #tpu.dot_dimension_numbers<[1], [0], [0], [1], [0, 0, 1, 1], [], []>} : vector<128x4xf32>, vector<4x16xf32>, vector<128x16xf32> -> vector<128x16xf32>
    %51 = arith.addf %46, %50 : vector<128x16xf32>
    %c4 = arith.constant 4 : index
    %c0_55 = arith.constant 0 : index
    %52 = vector.load %arg17[%c4, %c0_55] : memref<136x4xf32, #tpu.memory_space<vmem>>, vector<128x4xf32>
    %c4_56 = arith.constant 4 : index
    %c0_57 = arith.constant 0 : index
    %c0_58 = arith.constant 0 : index
    %53 = vector.load %arg5[%c4_56, %c0_57, %c0_58] : memref<8x4x16xf32, #tpu.memory_space<vmem>>, vector<1x4x16xf32>
    %54 = vector.shape_cast %53 : vector<1x4x16xf32> to vector<4x16xf32>
    %cst_59 = arith.constant dense<0.000000e+00> : vector<128x16xf32>
    %55 = tpu.matmul %52, %54, %cst_59 {dimension_numbers = #tpu.dot_dimension_numbers<[1], [0], [0], [1], [0, 0, 1, 1], [], []>} : vector<128x4xf32>, vector<4x16xf32>, vector<128x16xf32> -> vector<128x16xf32>
    %56 = arith.addf %51, %55 : vector<128x16xf32>
    %c4_60 = arith.constant 4 : index
    %c0_61 = arith.constant 0 : index
    %57 = vector.load %arg18[%c4_60, %c0_61] : memref<136x4xf32, #tpu.memory_space<vmem>>, vector<128x4xf32>
    %c4_62 = arith.constant 4 : index
    %c0_63 = arith.constant 0 : index
    %c0_64 = arith.constant 0 : index
    %58 = vector.load %arg6[%c4_62, %c0_63, %c0_64] : memref<8x4x16xf32, #tpu.memory_space<vmem>>, vector<1x4x16xf32>
    %59 = vector.shape_cast %58 : vector<1x4x16xf32> to vector<4x16xf32>
    %cst_65 = arith.constant dense<0.000000e+00> : vector<128x16xf32>
    %60 = tpu.matmul %57, %59, %cst_65 {dimension_numbers = #tpu.dot_dimension_numbers<[1], [0], [0], [1], [0, 0, 1, 1], [], []>} : vector<128x4xf32>, vector<4x16xf32>, vector<128x16xf32> -> vector<128x16xf32>
    %61 = arith.addf %56, %60 : vector<128x16xf32>
    %c3_66 = arith.constant 3 : index
    %c0_67 = arith.constant 0 : index
    %62 = vector.load %arg17[%c3_66, %c0_67] : memref<136x4xf32, #tpu.memory_space<vmem>>, vector<128x4xf32>
    %c5_68 = arith.constant 5 : index
    %c0_69 = arith.constant 0 : index
    %c0_70 = arith.constant 0 : index
    %63 = vector.load %arg5[%c5_68, %c0_69, %c0_70] : memref<8x4x16xf32, #tpu.memory_space<vmem>>, vector<1x4x16xf32>
    %64 = vector.shape_cast %63 : vector<1x4x16xf32> to vector<4x16xf32>
    %cst_71 = arith.constant dense<0.000000e+00> : vector<128x16xf32>
    %65 = tpu.matmul %62, %64, %cst_71 {dimension_numbers = #tpu.dot_dimension_numbers<[1], [0], [0], [1], [0, 0, 1, 1], [], []>} : vector<128x4xf32>, vector<4x16xf32>, vector<128x16xf32> -> vector<128x16xf32>
    %66 = arith.addf %61, %65 : vector<128x16xf32>
    %c3_72 = arith.constant 3 : index
    %c0_73 = arith.constant 0 : index
    %67 = vector.load %arg18[%c3_72, %c0_73] : memref<136x4xf32, #tpu.memory_space<vmem>>, vector<128x4xf32>
    %c5_74 = arith.constant 5 : index
    %c0_75 = arith.constant 0 : index
    %c0_76 = arith.constant 0 : index
    %68 = vector.load %arg6[%c5_74, %c0_75, %c0_76] : memref<8x4x16xf32, #tpu.memory_space<vmem>>, vector<1x4x16xf32>
    %69 = vector.shape_cast %68 : vector<1x4x16xf32> to vector<4x16xf32>
    %cst_77 = arith.constant dense<0.000000e+00> : vector<128x16xf32>
    %70 = tpu.matmul %67, %69, %cst_77 {dimension_numbers = #tpu.dot_dimension_numbers<[1], [0], [0], [1], [0, 0, 1, 1], [], []>} : vector<128x4xf32>, vector<4x16xf32>, vector<128x16xf32> -> vector<128x16xf32>
    %71 = arith.addf %66, %70 : vector<128x16xf32>
    %c2_78 = arith.constant 2 : index
    %c0_79 = arith.constant 0 : index
    %72 = vector.load %arg17[%c2_78, %c0_79] : memref<136x4xf32, #tpu.memory_space<vmem>>, vector<128x4xf32>
    %c6_80 = arith.constant 6 : index
    %c0_81 = arith.constant 0 : index
    %c0_82 = arith.constant 0 : index
    %73 = vector.load %arg5[%c6_80, %c0_81, %c0_82] : memref<8x4x16xf32, #tpu.memory_space<vmem>>, vector<1x4x16xf32>
    %74 = vector.shape_cast %73 : vector<1x4x16xf32> to vector<4x16xf32>
    %cst_83 = arith.constant dense<0.000000e+00> : vector<128x16xf32>
    %75 = tpu.matmul %72, %74, %cst_83 {dimension_numbers = #tpu.dot_dimension_numbers<[1], [0], [0], [1], [0, 0, 1, 1], [], []>} : vector<128x4xf32>, vector<4x16xf32>, vector<128x16xf32> -> vector<128x16xf32>
    %76 = arith.addf %71, %75 : vector<128x16xf32>
    %c2_84 = arith.constant 2 : index
    %c0_85 = arith.constant 0 : index
    %77 = vector.load %arg18[%c2_84, %c0_85] : memref<136x4xf32, #tpu.memory_space<vmem>>, vector<128x4xf32>
    %c6_86 = arith.constant 6 : index
    %c0_87 = arith.constant 0 : index
    %c0_88 = arith.constant 0 : index
    %78 = vector.load %arg6[%c6_86, %c0_87, %c0_88] : memref<8x4x16xf32, #tpu.memory_space<vmem>>, vector<1x4x16xf32>
    %79 = vector.shape_cast %78 : vector<1x4x16xf32> to vector<4x16xf32>
    %cst_89 = arith.constant dense<0.000000e+00> : vector<128x16xf32>
    %80 = tpu.matmul %77, %79, %cst_89 {dimension_numbers = #tpu.dot_dimension_numbers<[1], [0], [0], [1], [0, 0, 1, 1], [], []>} : vector<128x4xf32>, vector<4x16xf32>, vector<128x16xf32> -> vector<128x16xf32>
    %81 = arith.addf %76, %80 : vector<128x16xf32>
    %c1_90 = arith.constant 1 : index
    %c0_91 = arith.constant 0 : index
    %82 = vector.load %arg17[%c1_90, %c0_91] : memref<136x4xf32, #tpu.memory_space<vmem>>, vector<128x4xf32>
    %c7_92 = arith.constant 7 : index
    %c0_93 = arith.constant 0 : index
    %c0_94 = arith.constant 0 : index
    %83 = vector.load %arg5[%c7_92, %c0_93, %c0_94] : memref<8x4x16xf32, #tpu.memory_space<vmem>>, vector<1x4x16xf32>
    %84 = vector.shape_cast %83 : vector<1x4x16xf32> to vector<4x16xf32>
    %cst_95 = arith.constant dense<0.000000e+00> : vector<128x16xf32>
    %85 = tpu.matmul %82, %84, %cst_95 {dimension_numbers = #tpu.dot_dimension_numbers<[1], [0], [0], [1], [0, 0, 1, 1], [], []>} : vector<128x4xf32>, vector<4x16xf32>, vector<128x16xf32> -> vector<128x16xf32>
    %86 = arith.addf %81, %85 : vector<128x16xf32>
    %c1_96 = arith.constant 1 : index
    %c0_97 = arith.constant 0 : index
    %87 = vector.load %arg18[%c1_96, %c0_97] : memref<136x4xf32, #tpu.memory_space<vmem>>, vector<128x4xf32>
    %c7_98 = arith.constant 7 : index
    %c0_99 = arith.constant 0 : index
    %c0_100 = arith.constant 0 : index
    %88 = vector.load %arg6[%c7_98, %c0_99, %c0_100] : memref<8x4x16xf32, #tpu.memory_space<vmem>>, vector<1x4x16xf32>
    %89 = vector.shape_cast %88 : vector<1x4x16xf32> to vector<4x16xf32>
    %cst_101 = arith.constant dense<0.000000e+00> : vector<128x16xf32>
    %90 = tpu.matmul %87, %89, %cst_101 {dimension_numbers = #tpu.dot_dimension_numbers<[1], [0], [0], [1], [0, 0, 1, 1], [], []>} : vector<128x4xf32>, vector<4x16xf32>, vector<128x16xf32> -> vector<128x16xf32>
    %91 = arith.addf %86, %90 : vector<128x16xf32>
    %c0_102 = arith.constant 0 : index
    %c0_103 = arith.constant 0 : index
    %92 = vector.load %arg7[%c0_102, %c0_103] : memref<1x4xf32, #tpu.memory_space<vmem>>, vector<1x4xf32>
    %cst_104 = arith.constant 0.000000e+00 : f32
    %93 = vector.broadcast %cst_104 : f32 to vector<128x4xf32>
    %94 = vector.broadcast %92 : vector<1x4xf32> to vector<128x4xf32>
    %95 = arith.addf %94, %93 : vector<128x4xf32>
    %96 = vector.extract_strided_slice %91 {offsets = [0, 0], sizes = [128, 8], strides = [1, 1]} : vector<128x16xf32> to vector<128x8xf32>
    %97 = math.tanh %96 : vector<128x8xf32>
    %c8_105 = arith.constant 8 : index
    %c0_106 = arith.constant 0 : index
    %98 = vector.load %arg19[%c8_105, %c0_106] : memref<136x8xf32, #tpu.memory_space<vmem>>, vector<128x8xf32>
    tpu.vector_store %arg19[%c8_105, %c0_106], %97 {strides = array<i32>} : memref<136x8xf32, #tpu.memory_space<vmem>>, vector<128x8xf32>,
    %cst_107 = arith.constant 0.000000e+00 : f32
    %99 = vector.broadcast %cst_107 : f32 to vector<128x8xf32>
    %c8_108 = arith.constant 8 : index
    %c0_109 = arith.constant 0 : index
    %100 = vector.load %arg19[%c8_108, %c0_109] : memref<136x8xf32, #tpu.memory_space<vmem>>, vector<128x8xf32>
    %c0_110 = arith.constant 0 : index
    %c0_111 = arith.constant 0 : index
    %c0_112 = arith.constant 0 : index
    %101 = vector.load %arg8[%c0_110, %c0_111, %c0_112] : memref<8x8x8xf32, #tpu.memory_space<vmem>>, vector<1x8x8xf32>
    %102 = vector.shape_cast %101 : vector<1x8x8xf32> to vector<8x8xf32>
    %cst_113 = arith.constant dense<0.000000e+00> : vector<128x8xf32>
    %103 = tpu.matmul %100, %102, %cst_113 {dimension_numbers = #tpu.dot_dimension_numbers<[1], [0], [0], [1], [0, 0, 1, 1], [], []>} : vector<128x8xf32>, vector<8x8xf32>, vector<128x8xf32> -> vector<128x8xf32>
    %104 = arith.addf %99, %103 : vector<128x8xf32>
    %c7_114 = arith.constant 7 : index
    %c0_115 = arith.constant 0 : index
    %105 = vector.load %arg19[%c7_114, %c0_115] : memref<136x8xf32, #tpu.memory_space<vmem>>, vector<128x8xf32>
    %c1_116 = arith.constant 1 : index
    %c0_117 = arith.constant 0 : index
    %c0_118 = arith.constant 0 : index
    %106 = vector.load %arg8[%c1_116, %c0_117, %c0_118] : memref<8x8x8xf32, #tpu.memory_space<vmem>>, vector<1x8x8xf32>
    %107 = vector.shape_cast %106 : vector<1x8x8xf32> to vector<8x8xf32>
    %cst_119 = arith.constant dense<0.000000e+00> : vector<128x8xf32>
    %108 = tpu.matmul %105, %107, %cst_119 {dimension_numbers = #tpu.dot_dimension_numbers<[1], [0], [0], [1], [0, 0, 1, 1], [], []>} : vector<128x8xf32>, vector<8x8xf32>, vector<128x8xf32> -> vector<128x8xf32>
    %109 = arith.addf %104, %108 : vector<128x8xf32>
    %c6_120 = arith.constant 6 : index
    %c0_121 = arith.constant 0 : index
    %110 = vector.load %arg19[%c6_120, %c0_121] : memref<136x8xf32, #tpu.memory_space<vmem>>, vector<128x8xf32>
    %c2_122 = arith.constant 2 : index
    %c0_123 = arith.constant 0 : index
    %c0_124 = arith.constant 0 : index
    %111 = vector.load %arg8[%c2_122, %c0_123, %c0_124] : memref<8x8x8xf32, #tpu.memory_space<vmem>>, vector<1x8x8xf32>
    %112 = vector.shape_cast %111 : vector<1x8x8xf32> to vector<8x8xf32>
    %cst_125 = arith.constant dense<0.000000e+00> : vector<128x8xf32>
    %113 = tpu.matmul %110, %112, %cst_125 {dimension_numbers = #tpu.dot_dimension_numbers<[1], [0], [0], [1], [0, 0, 1, 1], [], []>} : vector<128x8xf32>, vector<8x8xf32>, vector<128x8xf32> -> vector<128x8xf32>
    %114 = arith.addf %109, %113 : vector<128x8xf32>
    %c5_126 = arith.constant 5 : index
    %c0_127 = arith.constant 0 : index
    %115 = vector.load %arg19[%c5_126, %c0_127] : memref<136x8xf32, #tpu.memory_space<vmem>>, vector<128x8xf32>
    %c3_128 = arith.constant 3 : index
    %c0_129 = arith.constant 0 : index
    %c0_130 = arith.constant 0 : index
    %116 = vector.load %arg8[%c3_128, %c0_129, %c0_130] : memref<8x8x8xf32, #tpu.memory_space<vmem>>, vector<1x8x8xf32>
    %117 = vector.shape_cast %116 : vector<1x8x8xf32> to vector<8x8xf32>
    %cst_131 = arith.constant dense<0.000000e+00> : vector<128x8xf32>
    %118 = tpu.matmul %115, %117, %cst_131 {dimension_numbers = #tpu.dot_dimension_numbers<[1], [0], [0], [1], [0, 0, 1, 1], [], []>} : vector<128x8xf32>, vector<8x8xf32>, vector<128x8xf32> -> vector<128x8xf32>
    %119 = arith.addf %114, %118 : vector<128x8xf32>
    %c4_132 = arith.constant 4 : index
    %c0_133 = arith.constant 0 : index
    %120 = vector.load %arg19[%c4_132, %c0_133] : memref<136x8xf32, #tpu.memory_space<vmem>>, vector<128x8xf32>
    %c4_134 = arith.constant 4 : index
    %c0_135 = arith.constant 0 : index
    %c0_136 = arith.constant 0 : index
    %121 = vector.load %arg8[%c4_134, %c0_135, %c0_136] : memref<8x8x8xf32, #tpu.memory_space<vmem>>, vector<1x8x8xf32>
    %122 = vector.shape_cast %121 : vector<1x8x8xf32> to vector<8x8xf32>
    %cst_137 = arith.constant dense<0.000000e+00> : vector<128x8xf32>
    %123 = tpu.matmul %120, %122, %cst_137 {dimension_numbers = #tpu.dot_dimension_numbers<[1], [0], [0], [1], [0, 0, 1, 1], [], []>} : vector<128x8xf32>, vector<8x8xf32>, vector<128x8xf32> -> vector<128x8xf32>
    %124 = arith.addf %119, %123 : vector<128x8xf32>
    %c3_138 = arith.constant 3 : index
    %c0_139 = arith.constant 0 : index
    %125 = vector.load %arg19[%c3_138, %c0_139] : memref<136x8xf32, #tpu.memory_space<vmem>>, vector<128x8xf32>
    %c5_140 = arith.constant 5 : index
    %c0_141 = arith.constant 0 : index
    %c0_142 = arith.constant 0 : index
    %126 = vector.load %arg8[%c5_140, %c0_141, %c0_142] : memref<8x8x8xf32, #tpu.memory_space<vmem>>, vector<1x8x8xf32>
    %127 = vector.shape_cast %126 : vector<1x8x8xf32> to vector<8x8xf32>
    %cst_143 = arith.constant dense<0.000000e+00> : vector<128x8xf32>
    %128 = tpu.matmul %125, %127, %cst_143 {dimension_numbers = #tpu.dot_dimension_numbers<[1], [0], [0], [1], [0, 0, 1, 1], [], []>} : vector<128x8xf32>, vector<8x8xf32>, vector<128x8xf32> -> vector<128x8xf32>
    %129 = arith.addf %124, %128 : vector<128x8xf32>
    %c2_144 = arith.constant 2 : index
    %c0_145 = arith.constant 0 : index
    %130 = vector.load %arg19[%c2_144, %c0_145] : memref<136x8xf32, #tpu.memory_space<vmem>>, vector<128x8xf32>
    %c6_146 = arith.constant 6 : index
    %c0_147 = arith.constant 0 : index
    %c0_148 = arith.constant 0 : index
    %131 = vector.load %arg8[%c6_146, %c0_147, %c0_148] : memref<8x8x8xf32, #tpu.memory_space<vmem>>, vector<1x8x8xf32>
    %132 = vector.shape_cast %131 : vector<1x8x8xf32> to vector<8x8xf32>
    %cst_149 = arith.constant dense<0.000000e+00> : vector<128x8xf32>
    %133 = tpu.matmul %130, %132, %cst_149 {dimension_numbers = #tpu.dot_dimension_numbers<[1], [0], [0], [1], [0, 0, 1, 1], [], []>} : vector<128x8xf32>, vector<8x8xf32>, vector<128x8xf32> -> vector<128x8xf32>
    %134 = arith.addf %129, %133 : vector<128x8xf32>
    %c1_150 = arith.constant 1 : index
    %c0_151 = arith.constant 0 : index
    %135 = vector.load %arg19[%c1_150, %c0_151] : memref<136x8xf32, #tpu.memory_space<vmem>>, vector<128x8xf32>
    %c7_152 = arith.constant 7 : index
    %c0_153 = arith.constant 0 : index
    %c0_154 = arith.constant 0 : index
    %136 = vector.load %arg8[%c7_152, %c0_153, %c0_154] : memref<8x8x8xf32, #tpu.memory_space<vmem>>, vector<1x8x8xf32>
    %137 = vector.shape_cast %136 : vector<1x8x8xf32> to vector<8x8xf32>
    %cst_155 = arith.constant dense<0.000000e+00> : vector<128x8xf32>
    %138 = tpu.matmul %135, %137, %cst_155 {dimension_numbers = #tpu.dot_dimension_numbers<[1], [0], [0], [1], [0, 0, 1, 1], [], []>} : vector<128x8xf32>, vector<8x8xf32>, vector<128x8xf32> -> vector<128x8xf32>
    %139 = arith.addf %134, %138 : vector<128x8xf32>
    %140 = math.tanh %139 : vector<128x8xf32>
    %c0_156 = arith.constant 0 : index
    %c0_157 = arith.constant 0 : index
    %141 = vector.load %arg9[%c0_156, %c0_157] : memref<8x4xf32, #tpu.memory_space<vmem>>, vector<8x4xf32>
    %cst_158 = arith.constant dense<0.000000e+00> : vector<128x4xf32>
    %142 = tpu.matmul %140, %141, %cst_158 {dimension_numbers = #tpu.dot_dimension_numbers<[1], [0], [0], [1], [0, 0, 1, 1], [], []>} : vector<128x8xf32>, vector<8x4xf32>, vector<128x4xf32> -> vector<128x4xf32>
    %143 = arith.addf %95, %142 : vector<128x4xf32>
    %c128 = arith.constant 128 : index
    %c0_159 = arith.constant 0 : index
    %144 = vector.load %arg19[%c128, %c0_159] : memref<136x8xf32, #tpu.memory_space<vmem>>, vector<8x8xf32>
    %c0_160 = arith.constant 0 : index
    %c0_161 = arith.constant 0 : index
    %145 = vector.load %arg19[%c0_160, %c0_161] : memref<136x8xf32, #tpu.memory_space<vmem>>, vector<8x8xf32>
    tpu.vector_store %arg19[%c0_160, %c0_161], %144 {strides = array<i32>} : memref<136x8xf32, #tpu.memory_space<vmem>>, vector<8x8xf32>,
    %146 = vector.extract_strided_slice %91 {offsets = [0, 8], sizes = [128, 4], strides = [1, 1]} : vector<128x16xf32> to vector<128x4xf32>
    %c0_162 = arith.constant 0 : index
    %c0_163 = arith.constant 0 : index
    %147 = vector.load %arg10[%c0_162, %c0_163] : memref<4x4xf32, #tpu.memory_space<vmem>>, vector<4x4xf32>
    %cst_164 = arith.constant dense<0.000000e+00> : vector<128x4xf32>
    %148 = tpu.matmul %143, %147, %cst_164 {dimension_numbers = #tpu.dot_dimension_numbers<[1], [0], [0], [1], [0, 0, 1, 1], [], []>} : vector<128x4xf32>, vector<4x4xf32>, vector<128x4xf32> -> vector<128x4xf32>
    %149 = arith.addf %146, %148 : vector<128x4xf32>
    %150 = math.tanh %149 : vector<128x4xf32>
    %c8_165 = arith.constant 8 : index
    %c0_166 = arith.constant 0 : index
    %151 = vector.load %arg20[%c8_165, %c0_166] : memref<136x4xf32, #tpu.memory_space<vmem>>, vector<128x4xf32>
    tpu.vector_store %arg20[%c8_165, %c0_166], %150 {strides = array<i32>} : memref<136x4xf32, #tpu.memory_space<vmem>>, vector<128x4xf32>,
    %cst_167 = arith.constant 0.000000e+00 : f32
    %152 = vector.broadcast %cst_167 : f32 to vector<128x4xf32>
    %c8_168 = arith.constant 8 : index
    %c0_169 = arith.constant 0 : index
    %153 = vector.load %arg20[%c8_168, %c0_169] : memref<136x4xf32, #tpu.memory_space<vmem>>, vector<128x4xf32>
    %c0_170 = arith.constant 0 : index
    %c0_171 = arith.constant 0 : index
    %c0_172 = arith.constant 0 : index
    %154 = vector.load %arg11[%c0_170, %c0_171, %c0_172] : memref<8x4x4xf32, #tpu.memory_space<vmem>>, vector<1x4x4xf32>
    %155 = vector.shape_cast %154 : vector<1x4x4xf32> to vector<4x4xf32>
    %cst_173 = arith.constant dense<0.000000e+00> : vector<128x4xf32>
    %156 = tpu.matmul %153, %155, %cst_173 {dimension_numbers = #tpu.dot_dimension_numbers<[1], [0], [0], [1], [0, 0, 1, 1], [], []>} : vector<128x4xf32>, vector<4x4xf32>, vector<128x4xf32> -> vector<128x4xf32>
    %157 = arith.addf %152, %156 : vector<128x4xf32>
    %c7_174 = arith.constant 7 : index
    %c0_175 = arith.constant 0 : index
    %158 = vector.load %arg20[%c7_174, %c0_175] : memref<136x4xf32, #tpu.memory_space<vmem>>, vector<128x4xf32>
    %c1_176 = arith.constant 1 : index
    %c0_177 = arith.constant 0 : index
    %c0_178 = arith.constant 0 : index
    %159 = vector.load %arg11[%c1_176, %c0_177, %c0_178] : memref<8x4x4xf32, #tpu.memory_space<vmem>>, vector<1x4x4xf32>
    %160 = vector.shape_cast %159 : vector<1x4x4xf32> to vector<4x4xf32>
    %cst_179 = arith.constant dense<0.000000e+00> : vector<128x4xf32>
    %161 = tpu.matmul %158, %160, %cst_179 {dimension_numbers = #tpu.dot_dimension_numbers<[1], [0], [0], [1], [0, 0, 1, 1], [], []>} : vector<128x4xf32>, vector<4x4xf32>, vector<128x4xf32> -> vector<128x4xf32>
    %162 = arith.addf %157, %161 : vector<128x4xf32>
    %c6_180 = arith.constant 6 : index
    %c0_181 = arith.constant 0 : index
    %163 = vector.load %arg20[%c6_180, %c0_181] : memref<136x4xf32, #tpu.memory_space<vmem>>, vector<128x4xf32>
    %c2_182 = arith.constant 2 : index
    %c0_183 = arith.constant 0 : index
    %c0_184 = arith.constant 0 : index
    %164 = vector.load %arg11[%c2_182, %c0_183, %c0_184] : memref<8x4x4xf32, #tpu.memory_space<vmem>>, vector<1x4x4xf32>
    %165 = vector.shape_cast %164 : vector<1x4x4xf32> to vector<4x4xf32>
    %cst_185 = arith.constant dense<0.000000e+00> : vector<128x4xf32>
    %166 = tpu.matmul %163, %165, %cst_185 {dimension_numbers = #tpu.dot_dimension_numbers<[1], [0], [0], [1], [0, 0, 1, 1], [], []>} : vector<128x4xf32>, vector<4x4xf32>, vector<128x4xf32> -> vector<128x4xf32>
    %167 = arith.addf %162, %166 : vector<128x4xf32>
    %c5_186 = arith.constant 5 : index
    %c0_187 = arith.constant 0 : index
    %168 = vector.load %arg20[%c5_186, %c0_187] : memref<136x4xf32, #tpu.memory_space<vmem>>, vector<128x4xf32>
    %c3_188 = arith.constant 3 : index
    %c0_189 = arith.constant 0 : index
    %c0_190 = arith.constant 0 : index
    %169 = vector.load %arg11[%c3_188, %c0_189, %c0_190] : memref<8x4x4xf32, #tpu.memory_space<vmem>>, vector<1x4x4xf32>
    %170 = vector.shape_cast %169 : vector<1x4x4xf32> to vector<4x4xf32>
    %cst_191 = arith.constant dense<0.000000e+00> : vector<128x4xf32>
    %171 = tpu.matmul %168, %170, %cst_191 {dimension_numbers = #tpu.dot_dimension_numbers<[1], [0], [0], [1], [0, 0, 1, 1], [], []>} : vector<128x4xf32>, vector<4x4xf32>, vector<128x4xf32> -> vector<128x4xf32>
    %172 = arith.addf %167, %171 : vector<128x4xf32>
    %c4_192 = arith.constant 4 : index
    %c0_193 = arith.constant 0 : index
    %173 = vector.load %arg20[%c4_192, %c0_193] : memref<136x4xf32, #tpu.memory_space<vmem>>, vector<128x4xf32>
    %c4_194 = arith.constant 4 : index
    %c0_195 = arith.constant 0 : index
    %c0_196 = arith.constant 0 : index
    %174 = vector.load %arg11[%c4_194, %c0_195, %c0_196] : memref<8x4x4xf32, #tpu.memory_space<vmem>>, vector<1x4x4xf32>
    %175 = vector.shape_cast %174 : vector<1x4x4xf32> to vector<4x4xf32>
    %cst_197 = arith.constant dense<0.000000e+00> : vector<128x4xf32>
    %176 = tpu.matmul %173, %175, %cst_197 {dimension_numbers = #tpu.dot_dimension_numbers<[1], [0], [0], [1], [0, 0, 1, 1], [], []>} : vector<128x4xf32>, vector<4x4xf32>, vector<128x4xf32> -> vector<128x4xf32>
    %177 = arith.addf %172, %176 : vector<128x4xf32>
    %c3_198 = arith.constant 3 : index
    %c0_199 = arith.constant 0 : index
    %178 = vector.load %arg20[%c3_198, %c0_199] : memref<136x4xf32, #tpu.memory_space<vmem>>, vector<128x4xf32>
    %c5_200 = arith.constant 5 : index
    %c0_201 = arith.constant 0 : index
    %c0_202 = arith.constant 0 : index
    %179 = vector.load %arg11[%c5_200, %c0_201, %c0_202] : memref<8x4x4xf32, #tpu.memory_space<vmem>>, vector<1x4x4xf32>
    %180 = vector.shape_cast %179 : vector<1x4x4xf32> to vector<4x4xf32>
    %cst_203 = arith.constant dense<0.000000e+00> : vector<128x4xf32>
    %181 = tpu.matmul %178, %180, %cst_203 {dimension_numbers = #tpu.dot_dimension_numbers<[1], [0], [0], [1], [0, 0, 1, 1], [], []>} : vector<128x4xf32>, vector<4x4xf32>, vector<128x4xf32> -> vector<128x4xf32>
    %182 = arith.addf %177, %181 : vector<128x4xf32>
    %c2_204 = arith.constant 2 : index
    %c0_205 = arith.constant 0 : index
    %183 = vector.load %arg20[%c2_204, %c0_205] : memref<136x4xf32, #tpu.memory_space<vmem>>, vector<128x4xf32>
    %c6_206 = arith.constant 6 : index
    %c0_207 = arith.constant 0 : index
    %c0_208 = arith.constant 0 : index
    %184 = vector.load %arg11[%c6_206, %c0_207, %c0_208] : memref<8x4x4xf32, #tpu.memory_space<vmem>>, vector<1x4x4xf32>
    %185 = vector.shape_cast %184 : vector<1x4x4xf32> to vector<4x4xf32>
    %cst_209 = arith.constant dense<0.000000e+00> : vector<128x4xf32>
    %186 = tpu.matmul %183, %185, %cst_209 {dimension_numbers = #tpu.dot_dimension_numbers<[1], [0], [0], [1], [0, 0, 1, 1], [], []>} : vector<128x4xf32>, vector<4x4xf32>, vector<128x4xf32> -> vector<128x4xf32>
    %187 = arith.addf %182, %186 : vector<128x4xf32>
    %c1_210 = arith.constant 1 : index
    %c0_211 = arith.constant 0 : index
    %188 = vector.load %arg20[%c1_210, %c0_211] : memref<136x4xf32, #tpu.memory_space<vmem>>, vector<128x4xf32>
    %c7_212 = arith.constant 7 : index
    %c0_213 = arith.constant 0 : index
    %c0_214 = arith.constant 0 : index
    %189 = vector.load %arg11[%c7_212, %c0_213, %c0_214] : memref<8x4x4xf32, #tpu.memory_space<vmem>>, vector<1x4x4xf32>
    %190 = vector.shape_cast %189 : vector<1x4x4xf32> to vector<4x4xf32>
    %cst_215 = arith.constant dense<0.000000e+00> : vector<128x4xf32>
    %191 = tpu.matmul %188, %190, %cst_215 {dimension_numbers = #tpu.dot_dimension_numbers<[1], [0], [0], [1], [0, 0, 1, 1], [], []>} : vector<128x4xf32>, vector<4x4xf32>, vector<128x4xf32> -> vector<128x4xf32>
    %192 = arith.addf %187, %191 : vector<128x4xf32>
    %193 = math.tanh %192 : vector<128x4xf32>
    %c0_216 = arith.constant 0 : index
    %c0_217 = arith.constant 0 : index
    %194 = vector.load %arg12[%c0_216, %c0_217] : memref<4x4xf32, #tpu.memory_space<vmem>>, vector<4x4xf32>
    %cst_218 = arith.constant dense<0.000000e+00> : vector<128x4xf32>
    %195 = tpu.matmul %193, %194, %cst_218 {dimension_numbers = #tpu.dot_dimension_numbers<[1], [0], [0], [1], [0, 0, 1, 1], [], []>} : vector<128x4xf32>, vector<4x4xf32>, vector<128x4xf32> -> vector<128x4xf32>
    %196 = arith.addf %143, %195 : vector<128x4xf32>
    %c128_219 = arith.constant 128 : index
    %c0_220 = arith.constant 0 : index
    %197 = vector.load %arg20[%c128_219, %c0_220] : memref<136x4xf32, #tpu.memory_space<vmem>>, vector<8x4xf32>
    %c0_221 = arith.constant 0 : index
    %c0_222 = arith.constant 0 : index
    %198 = vector.load %arg20[%c0_221, %c0_222] : memref<136x4xf32, #tpu.memory_space<vmem>>, vector<8x4xf32>
    tpu.vector_store %arg20[%c0_221, %c0_222], %197 {strides = array<i32>} : memref<136x4xf32, #tpu.memory_space<vmem>>, vector<8x4xf32>,
    %199 = vector.extract_strided_slice %91 {offsets = [0, 12], sizes = [128, 4], strides = [1, 1]} : vector<128x16xf32> to vector<128x4xf32>
    %c0_223 = arith.constant 0 : index
    %c0_224 = arith.constant 0 : index
    %200 = vector.load %arg13[%c0_223, %c0_224] : memref<4x4xf32, #tpu.memory_space<vmem>>, vector<4x4xf32>
    %cst_225 = arith.constant dense<0.000000e+00> : vector<128x4xf32>
    %201 = tpu.matmul %196, %200, %cst_225 {dimension_numbers = #tpu.dot_dimension_numbers<[1], [0], [0], [1], [0, 0, 1, 1], [], []>} : vector<128x4xf32>, vector<4x4xf32>, vector<128x4xf32> -> vector<128x4xf32>
    %202 = arith.addf %199, %201 : vector<128x4xf32>
    %203 = math.tanh %202 : vector<128x4xf32>
    %c8_226 = arith.constant 8 : index
    %c0_227 = arith.constant 0 : index
    %204 = vector.load %arg21[%c8_226, %c0_227] : memref<136x4xf32, #tpu.memory_space<vmem>>, vector<128x4xf32>
    tpu.vector_store %arg21[%c8_226, %c0_227], %203 {strides = array<i32>} : memref<136x4xf32, #tpu.memory_space<vmem>>, vector<128x4xf32>,
    %cst_228 = arith.constant 0.000000e+00 : f32
    %205 = vector.broadcast %cst_228 : f32 to vector<128x4xf32>
    %c8_229 = arith.constant 8 : index
    %c0_230 = arith.constant 0 : index
    %206 = vector.load %arg21[%c8_229, %c0_230] : memref<136x4xf32, #tpu.memory_space<vmem>>, vector<128x4xf32>
    %c0_231 = arith.constant 0 : index
    %c0_232 = arith.constant 0 : index
    %c0_233 = arith.constant 0 : index
    %207 = vector.load %arg14[%c0_231, %c0_232, %c0_233] : memref<8x4x4xf32, #tpu.memory_space<vmem>>, vector<1x4x4xf32>
    %208 = vector.shape_cast %207 : vector<1x4x4xf32> to vector<4x4xf32>
    %cst_234 = arith.constant dense<0.000000e+00> : vector<128x4xf32>
    %209 = tpu.matmul %206, %208, %cst_234 {dimension_numbers = #tpu.dot_dimension_numbers<[1], [0], [0], [1], [0, 0, 1, 1], [], []>} : vector<128x4xf32>, vector<4x4xf32>, vector<128x4xf32> -> vector<128x4xf32>
    %210 = arith.addf %205, %209 : vector<128x4xf32>
    %c7_235 = arith.constant 7 : index
    %c0_236 = arith.constant 0 : index
    %211 = vector.load %arg21[%c7_235, %c0_236] : memref<136x4xf32, #tpu.memory_space<vmem>>, vector<128x4xf32>
    %c1_237 = arith.constant 1 : index
    %c0_238 = arith.constant 0 : index
    %c0_239 = arith.constant 0 : index
    %212 = vector.load %arg14[%c1_237, %c0_238, %c0_239] : memref<8x4x4xf32, #tpu.memory_space<vmem>>, vector<1x4x4xf32>
    %213 = vector.shape_cast %212 : vector<1x4x4xf32> to vector<4x4xf32>
    %cst_240 = arith.constant dense<0.000000e+00> : vector<128x4xf32>
    %214 = tpu.matmul %211, %213, %cst_240 {dimension_numbers = #tpu.dot_dimension_numbers<[1], [0], [0], [1], [0, 0, 1, 1], [], []>} : vector<128x4xf32>, vector<4x4xf32>, vector<128x4xf32> -> vector<128x4xf32>
    %215 = arith.addf %210, %214 : vector<128x4xf32>
    %c6_241 = arith.constant 6 : index
    %c0_242 = arith.constant 0 : index
    %216 = vector.load %arg21[%c6_241, %c0_242] : memref<136x4xf32, #tpu.memory_space<vmem>>, vector<128x4xf32>
    %c2_243 = arith.constant 2 : index
    %c0_244 = arith.constant 0 : index
    %c0_245 = arith.constant 0 : index
    %217 = vector.load %arg14[%c2_243, %c0_244, %c0_245] : memref<8x4x4xf32, #tpu.memory_space<vmem>>, vector<1x4x4xf32>
    %218 = vector.shape_cast %217 : vector<1x4x4xf32> to vector<4x4xf32>
    %cst_246 = arith.constant dense<0.000000e+00> : vector<128x4xf32>
    %219 = tpu.matmul %216, %218, %cst_246 {dimension_numbers = #tpu.dot_dimension_numbers<[1], [0], [0], [1], [0, 0, 1, 1], [], []>} : vector<128x4xf32>, vector<4x4xf32>, vector<128x4xf32> -> vector<128x4xf32>
    %220 = arith.addf %215, %219 : vector<128x4xf32>
    %c5_247 = arith.constant 5 : index
    %c0_248 = arith.constant 0 : index
    %221 = vector.load %arg21[%c5_247, %c0_248] : memref<136x4xf32, #tpu.memory_space<vmem>>, vector<128x4xf32>
    %c3_249 = arith.constant 3 : index
    %c0_250 = arith.constant 0 : index
    %c0_251 = arith.constant 0 : index
    %222 = vector.load %arg14[%c3_249, %c0_250, %c0_251] : memref<8x4x4xf32, #tpu.memory_space<vmem>>, vector<1x4x4xf32>
    %223 = vector.shape_cast %222 : vector<1x4x4xf32> to vector<4x4xf32>
    %cst_252 = arith.constant dense<0.000000e+00> : vector<128x4xf32>
    %224 = tpu.matmul %221, %223, %cst_252 {dimension_numbers = #tpu.dot_dimension_numbers<[1], [0], [0], [1], [0, 0, 1, 1], [], []>} : vector<128x4xf32>, vector<4x4xf32>, vector<128x4xf32> -> vector<128x4xf32>
    %225 = arith.addf %220, %224 : vector<128x4xf32>
    %c4_253 = arith.constant 4 : index
    %c0_254 = arith.constant 0 : index
    %226 = vector.load %arg21[%c4_253, %c0_254] : memref<136x4xf32, #tpu.memory_space<vmem>>, vector<128x4xf32>
    %c4_255 = arith.constant 4 : index
    %c0_256 = arith.constant 0 : index
    %c0_257 = arith.constant 0 : index
    %227 = vector.load %arg14[%c4_255, %c0_256, %c0_257] : memref<8x4x4xf32, #tpu.memory_space<vmem>>, vector<1x4x4xf32>
    %228 = vector.shape_cast %227 : vector<1x4x4xf32> to vector<4x4xf32>
    %cst_258 = arith.constant dense<0.000000e+00> : vector<128x4xf32>
    %229 = tpu.matmul %226, %228, %cst_258 {dimension_numbers = #tpu.dot_dimension_numbers<[1], [0], [0], [1], [0, 0, 1, 1], [], []>} : vector<128x4xf32>, vector<4x4xf32>, vector<128x4xf32> -> vector<128x4xf32>
    %230 = arith.addf %225, %229 : vector<128x4xf32>
    %c3_259 = arith.constant 3 : index
    %c0_260 = arith.constant 0 : index
    %231 = vector.load %arg21[%c3_259, %c0_260] : memref<136x4xf32, #tpu.memory_space<vmem>>, vector<128x4xf32>
    %c5_261 = arith.constant 5 : index
    %c0_262 = arith.constant 0 : index
    %c0_263 = arith.constant 0 : index
    %232 = vector.load %arg14[%c5_261, %c0_262, %c0_263] : memref<8x4x4xf32, #tpu.memory_space<vmem>>, vector<1x4x4xf32>
    %233 = vector.shape_cast %232 : vector<1x4x4xf32> to vector<4x4xf32>
    %cst_264 = arith.constant dense<0.000000e+00> : vector<128x4xf32>
    %234 = tpu.matmul %231, %233, %cst_264 {dimension_numbers = #tpu.dot_dimension_numbers<[1], [0], [0], [1], [0, 0, 1, 1], [], []>} : vector<128x4xf32>, vector<4x4xf32>, vector<128x4xf32> -> vector<128x4xf32>
    %235 = arith.addf %230, %234 : vector<128x4xf32>
    %c2_265 = arith.constant 2 : index
    %c0_266 = arith.constant 0 : index
    %236 = vector.load %arg21[%c2_265, %c0_266] : memref<136x4xf32, #tpu.memory_space<vmem>>, vector<128x4xf32>
    %c6_267 = arith.constant 6 : index
    %c0_268 = arith.constant 0 : index
    %c0_269 = arith.constant 0 : index
    %237 = vector.load %arg14[%c6_267, %c0_268, %c0_269] : memref<8x4x4xf32, #tpu.memory_space<vmem>>, vector<1x4x4xf32>
    %238 = vector.shape_cast %237 : vector<1x4x4xf32> to vector<4x4xf32>
    %cst_270 = arith.constant dense<0.000000e+00> : vector<128x4xf32>
    %239 = tpu.matmul %236, %238, %cst_270 {dimension_numbers = #tpu.dot_dimension_numbers<[1], [0], [0], [1], [0, 0, 1, 1], [], []>} : vector<128x4xf32>, vector<4x4xf32>, vector<128x4xf32> -> vector<128x4xf32>
    %240 = arith.addf %235, %239 : vector<128x4xf32>
    %c1_271 = arith.constant 1 : index
    %c0_272 = arith.constant 0 : index
    %241 = vector.load %arg21[%c1_271, %c0_272] : memref<136x4xf32, #tpu.memory_space<vmem>>, vector<128x4xf32>
    %c7_273 = arith.constant 7 : index
    %c0_274 = arith.constant 0 : index
    %c0_275 = arith.constant 0 : index
    %242 = vector.load %arg14[%c7_273, %c0_274, %c0_275] : memref<8x4x4xf32, #tpu.memory_space<vmem>>, vector<1x4x4xf32>
    %243 = vector.shape_cast %242 : vector<1x4x4xf32> to vector<4x4xf32>
    %cst_276 = arith.constant dense<0.000000e+00> : vector<128x4xf32>
    %244 = tpu.matmul %241, %243, %cst_276 {dimension_numbers = #tpu.dot_dimension_numbers<[1], [0], [0], [1], [0, 0, 1, 1], [], []>} : vector<128x4xf32>, vector<4x4xf32>, vector<128x4xf32> -> vector<128x4xf32>
    %245 = arith.addf %240, %244 : vector<128x4xf32>
    %246 = math.tanh %245 : vector<128x4xf32>
    %c0_277 = arith.constant 0 : index
    %c0_278 = arith.constant 0 : index
    %247 = vector.load %arg15[%c0_277, %c0_278] : memref<4x4xf32, #tpu.memory_space<vmem>>, vector<4x4xf32>
    %cst_279 = arith.constant dense<0.000000e+00> : vector<128x4xf32>
    %248 = tpu.matmul %246, %247, %cst_279 {dimension_numbers = #tpu.dot_dimension_numbers<[1], [0], [0], [1], [0, 0, 1, 1], [], []>} : vector<128x4xf32>, vector<4x4xf32>, vector<128x4xf32> -> vector<128x4xf32>
    %249 = arith.addf %196, %248 : vector<128x4xf32>
    %c128_280 = arith.constant 128 : index
    %c0_281 = arith.constant 0 : index
    %250 = vector.load %arg21[%c128_280, %c0_281] : memref<136x4xf32, #tpu.memory_space<vmem>>, vector<8x4xf32>
    %c0_282 = arith.constant 0 : index
    %c0_283 = arith.constant 0 : index
    %251 = vector.load %arg21[%c0_282, %c0_283] : memref<136x4xf32, #tpu.memory_space<vmem>>, vector<8x4xf32>
    tpu.vector_store %arg21[%c0_282, %c0_283], %250 {strides = array<i32>} : memref<136x4xf32, #tpu.memory_space<vmem>>, vector<8x4xf32>,
    %c128_284 = arith.constant 128 : index
    %c0_285 = arith.constant 0 : index
    %252 = vector.load %arg17[%c128_284, %c0_285] : memref<136x4xf32, #tpu.memory_space<vmem>>, vector<8x4xf32>
    %c0_286 = arith.constant 0 : index
    %c0_287 = arith.constant 0 : index
    %253 = vector.load %arg17[%c0_286, %c0_287] : memref<136x4xf32, #tpu.memory_space<vmem>>, vector<8x4xf32>
    tpu.vector_store %arg17[%c0_286, %c0_287], %252 {strides = array<i32>} : memref<136x4xf32, #tpu.memory_space<vmem>>, vector<8x4xf32>,
    %c128_288 = arith.constant 128 : index
    %c0_289 = arith.constant 0 : index
    %254 = vector.load %arg18[%c128_288, %c0_289] : memref<136x4xf32, #tpu.memory_space<vmem>>, vector<8x4xf32>
    %c0_290 = arith.constant 0 : index
    %c0_291 = arith.constant 0 : index
    %255 = vector.load %arg18[%c0_290, %c0_291] : memref<136x4xf32, #tpu.memory_space<vmem>>, vector<8x4xf32>
    tpu.vector_store %arg18[%c0_290, %c0_291], %254 {strides = array<i32>} : memref<136x4xf32, #tpu.memory_space<vmem>>, vector<8x4xf32>,
    %c0_292 = arith.constant 0 : index
    %c0_293 = arith.constant 0 : index
    %256 = vector.load %arg16[%c0_292, %c0_293] : memref<128x4xf32, #tpu.memory_space<vmem>>, vector<128x4xf32>
    tpu.vector_store %arg16[%c0_292, %c0_293], %249 {strides = array<i32>} : memref<128x4xf32, #tpu.memory_space<vmem>>, vector<128x4xf32>,
    return
  }
  func.func @transform_0(%arg0: i32) -> (i32, i32) {
    %c0_i32 = arith.constant 0 : i32
    %c0_i32_0 = arith.constant 0 : i32
    return %arg0, %c0_i32 : i32, i32
  }
  func.func @transform_1(%arg0: i32) -> (i32, i32) {
    %c0_i32 = arith.constant 0 : i32
    %c0_i32_0 = arith.constant 0 : i32
    return %arg0, %c0_i32 : i32, i32
  }
  func.func @transform_2(%arg0: i32) -> (i32, i32) {
    %c0_i32 = arith.constant 0 : i32
    %c0_i32_0 = arith.constant 0 : i32
    %c0_i32_1 = arith.constant 0 : i32
    return %c0_i32, %c0_i32_0 : i32, i32
  }
  func.func @transform_3(%arg0: i32) -> (i32, i32) {
    %c0_i32 = arith.constant 0 : i32
    %c0_i32_0 = arith.constant 0 : i32
    %c0_i32_1 = arith.constant 0 : i32
    return %c0_i32, %c0_i32_0 : i32, i32
  }
  func.func @transform_4(%arg0: i32) -> (i32, i32, i32) {
    %c0_i32 = arith.constant 0 : i32
    %c0_i32_0 = arith.constant 0 : i32
    %c0_i32_1 = arith.constant 0 : i32
    %c0_i32_2 = arith.constant 0 : i32
    return %c0_i32, %c0_i32_0, %c0_i32_1 : i32, i32, i32
  }
  func.func @transform_5(%arg0: i32) -> (i32, i32, i32) {
    %c0_i32 = arith.constant 0 : i32
    %c0_i32_0 = arith.constant 0 : i32
    %c0_i32_1 = arith.constant 0 : i32
    %c0_i32_2 = arith.constant 0 : i32
    return %c0_i32, %c0_i32_0, %c0_i32_1 : i32, i32, i32
  }
  func.func @transform_6(%arg0: i32) -> (i32, i32) {
    %c0_i32 = arith.constant 0 : i32
    %c0_i32_0 = arith.constant 0 : i32
    %c0_i32_1 = arith.constant 0 : i32
    return %c0_i32, %c0_i32_0 : i32, i32
  }
  func.func @transform_7(%arg0: i32) -> (i32, i32, i32) {
    %c0_i32 = arith.constant 0 : i32
    %c0_i32_0 = arith.constant 0 : i32
    %c0_i32_1 = arith.constant 0 : i32
    %c0_i32_2 = arith.constant 0 : i32
    return %c0_i32, %c0_i32_0, %c0_i32_1 : i32, i32, i32
  }
  func.func @transform_8(%arg0: i32) -> (i32, i32) {
    %c0_i32 = arith.constant 0 : i32
    %c0_i32_0 = arith.constant 0 : i32
    %c0_i32_1 = arith.constant 0 : i32
    return %c0_i32, %c0_i32_0 : i32, i32
  }
  func.func @transform_9(%arg0: i32) -> (i32, i32) {
    %c0_i32 = arith.constant 0 : i32
    %c0_i32_0 = arith.constant 0 : i32
    %c0_i32_1 = arith.constant 0 : i32
    return %c0_i32, %c0_i32_0 : i32, i32
  }
  func.func @transform_10(%arg0: i32) -> (i32, i32, i32) {
    %c0_i32 = arith.constant 0 : i32
    %c0_i32_0 = arith.constant 0 : i32
    %c0_i32_1 = arith.constant 0 : i32
    %c0_i32_2 = arith.constant 0 : i32
    return %c0_i32, %c0_i32_0, %c0_i32_1 : i32, i32, i32
  }
  func.func @transform_11(%arg0: i32) -> (i32, i32) {
    %c0_i32 = arith.constant 0 : i32
    %c0_i32_0 = arith.constant 0 : i32
    %c0_i32_1 = arith.constant 0 : i32
    return %c0_i32, %c0_i32_0 : i32, i32
  }
  func.func @transform_12(%arg0: i32) -> (i32, i32) {
    %c0_i32 = arith.constant 0 : i32
    %c0_i32_0 = arith.constant 0 : i32
    %c0_i32_1 = arith.constant 0 : i32
    return %c0_i32, %c0_i32_0 : i32, i32
  }
  func.func @transform_13(%arg0: i32) -> (i32, i32, i32) {
    %c0_i32 = arith.constant 0 : i32
    %c0_i32_0 = arith.constant 0 : i32
    %c0_i32_1 = arith.constant 0 : i32
    %c0_i32_2 = arith.constant 0 : i32
    return %c0_i32, %c0_i32_0, %c0_i32_1 : i32, i32, i32
  }
  func.func @transform_14(%arg0: i32) -> (i32, i32) {
    %c0_i32 = arith.constant 0 : i32
    %c0_i32_0 = arith.constant 0 : i32
    %c0_i32_1 = arith.constant 0 : i32
    return %c0_i32, %c0_i32_0 : i32, i32
  }
  func.func @transform_15(%arg0: i32) -> (i32, i32) {
    %c0_i32 = arith.constant 0 : i32
    %c0_i32_0 = arith.constant 0 : i32
    return %arg0, %c0_i32 : i32, i32
  }
}

</mosaic_0001>

<bundles_post_ra>
// kernel: tpu_custom_call.1
= control target key start
LH: loop header
LB: loop body
LE: loop exit
PB: predicated region body
PF: predicated region fallthrough
CT: control target
= control target key end

     0   :  { %s14749_s18 = smov 0   ;;  %s17477_s0 = inlined_call_operand.vmem [shape: f32[256,8], index: 0, kind: input, shape index: {}]   ;;  %s17478_s1 = inlined_call_operand.vmem [shape: f32[256,8], index: 1, kind: input, shape index: {}]   ;;  %s17479_s2 = inlined_call_operand.vmem [shape: f32[8,4], index: 2, kind: input, shape index: {}]   ;;  %s17480_s3 = inlined_call_operand.vmem [shape: f32[8,4], index: 3, kind: input, shape index: {}]   ;;  %s17481_s4 = inlined_call_operand.vmem [shape: f32[8,4,16], index: 4, kind: input, shape index: {}]   ;;  %s17482_s5 = inlined_call_operand.vmem [shape: f32[8,4,16], index: 5, kind: input, shape index: {}]   ;;  %s17483_s6 = inlined_call_operand.vmem [shape: f32[1,4], index: 6, kind: input, shape index: {}]   ;;  %s17484_s7 = inlined_call_operand.vmem [shape: f32[8,8,8], index: 7, kind: input, shape index: {}]   ;;  %s17485_s8 = inlined_call_operand.vmem [shape: f32[8,4], index: 8, kind: input, shape index: {}]   ;;  %s17486_s9 = inlined_call_operand.vmem [shape: f32[4,4], index: 9, kind: input, shape index: {}]   ;;  %s17487_s10 = inlined_call_operand.vmem [shape: f32[8,4,4], index: 10, kind: input, shape index: {}]   ;;  %s17488_s11 = inlined_call_operand.vmem [shape: f32[4,4], index: 11, kind: input, shape index: {}]   ;;  %s17489_s12 = inlined_call_operand.vmem [shape: f32[4,4], index: 12, kind: input, shape index: {}]   ;;  %s17490_s13 = inlined_call_operand.vmem [shape: f32[8,4,4], index: 13, kind: input, shape index: {}]   ;;  %s17491_s14 = inlined_call_operand.vmem [shape: f32[4,4], index: 14, kind: input, shape index: {}]   ;;  %s17492_s15 = inlined_call_operand.vmem [shape: f32[256,4], index: 15, kind: output, shape index: {}]  }
   0x1 LB: > { %s11590_s19 = sadd.s32 4294967295, %s14662_s18   ;;  %p11594_p0 = scmp.ge.s32.totalorder %s14662_s18, 1  ;;  %s14662_s18 = sphi %s14749_s18, %s25_s18  }
   0x2   : > { %p449_p1 = scmp.lt.s32.totalorder %s14662_s18, 3 }
   0x4   : > { %p450_p2 = pnand %p11594_p0, %p449_p1 }
   0x6   : > { %453 = sbr.rel (%p450_p2) target bundleno = 3147 (0xc4b), region = 80 }
   0xb   : > { %s11595_s20 = sshll.u32 %s11590_s19, 4  ;;  %p11601_p4 = scmp.ne.s32.totalorder %s11590_s19, 0 }
   0xc   : > { %p503_p3 = scmp.lt.s32.totalorder %s11595_s20, 31 }
   0xd   : > { %523 = sbr.rel (%p11601_p4) target bundleno = 22 (0x16), region = 84 }
   0xe   : > { %s17960_s20 = smov (!%p503_p3, %s11595_s20), 31 }
   0xf   : > { %s11596_s21 = sshll.u32 %s17960_s20, 3 }
  0x10   : > { %s14760_s24 = scalar_lea.vmem %s17477_s0, %s11596_s21  ;;  %s14765_s27 = scalar_lea.vmem %s17478_s1, %s11596_s21 }
  0x11   : > { %s14770_s30 = scalar_lea.vmem %s17492_s15, %s11596_s21 }
  0x12   : > { %vm524_vm0 = vcmask 31744   ;;  %vm527_vm1 = vcmask 64512   ;;  %v14664_v0 = vmov 0.0  }
  0x13   : > { %525 = vst.msk [vmem:[#allocation2] sm:$0xff] %vm524_vm0, %v14664_v0  ;;  %526 = vst.msk [vmem:[#allocation3] sm:$0xff] %vm524_vm0, %v14664_v0 }
  0x14   : > { %529 = vst.msk [vmem:[#allocation5] sm:$0xff] %vm524_vm0, %v14664_v0  ;;  %530 = vst.msk [vmem:[#allocation6] sm:$0xff] %vm524_vm0, %v14664_v0 }
  0x15   : > { %528 = vst.msk [vmem:[#allocation4] sm:$0xff] %vm527_vm1, %v14664_v0 }
  0x16 PF: > { %v547_v1 = vld [vmem:[%s17479_s2] sm:$0xff]  ;;  %vm548_vm2 = vcmask 64512   ;;  %v532_v4 = vld [vmem:[%s14760_s24 + $0x8] sm:$0xff]  ;;  %v533_v7 = vld [vmem:[%s14760_s24 + $0x10] sm:$0xff]  ;;  %vm1067_vm3 = vcmask 1043456   ;;  %vm742_vm4 = vcmask 31744  }
  0x17   : > { %v531_v2 = vld [vmem:[%s14760_s24] sm:$0xff]  ;;  %13227 = vmatprep.subr.mxu0 %v547_v1  ;;  %14449 = vmatprep.subr.mxu1 %v547_v1  ;;  %v540_v5 = vld [vmem:[%s14760_s24 + $0x48] sm:$0xff]  ;;  %v541_v8 = vld [vmem:[%s14760_s24 + $0x50] sm:$0xff]  ;;  %s14665_s23 = smov 8   ;;  %s14667_s19 = smov 12  }
  0x18   : > { %v539_v3 = vld [vmem:[%s14760_s24 + $0x40] sm:$0xff]  ;;  %13228 = vmatpush3.msra.mxu0 %v547_v1  ;;  %14450 = vmatpush3.msra.mxu1 %v547_v1  ;;  %v534_v9 = vld [vmem:[%s14760_s24 + $0x18] sm:$0xff]  ;;  %v536_v13 = vld [vmem:[%s14760_s24 + $0x28] sm:$0xff] }
  0x19   : > { %v775_v6 = vld [vmem:[%s17480_s3] sm:$0xff]  ;;  %13229 = vmatprep.mubr.msk.f32.mxu0 %vm548_vm2, %v531_v2  ;;  %13241 = vmatprep.mubr.msk.f32.mxu1 %vm548_vm2, %v539_v3  ;;  %v542_v10 = vld [vmem:[%s14760_s24 + $0x58] sm:$0xff]  ;;  %v544_v14 = vld [vmem:[%s14760_s24 + $0x68] sm:$0xff] }
  0x1a   : > { %13230 = vmatmul.mubr.msk.f32.vlgmr.msra.gmra.mxu0 %vm548_vm2, %v532_v4  ;;  %13242 = vmatmul.mubr.msk.f32.vlgmr.msra.gmra.mxu1 %vm548_vm2, %v540_v5  ;;  %v535_v11 = vld [vmem:[%s14760_s24 + $0x20] sm:$0xff]  ;;  %v537_v15 = vld [vmem:[%s14760_s24 + $0x30] sm:$0xff]  ;;  %v538_v18 = vld [vmem:[%s14760_s24 + $0x38] sm:$0xff] }
  0x1b   : > { %13253 = vmatprep.subr.mxu1 %v775_v6  ;;  %13232 = vmatprep.mubr.msk.f32.mxu0 %vm548_vm2, %v533_v7  ;;  %v543_v12 = vld [vmem:[%s14760_s24 + $0x60] sm:$0xff]  ;;  %v545_v16 = vld [vmem:[%s14760_s24 + $0x70] sm:$0xff]  ;;  %v546_v19 = vld [vmem:[%s14760_s24 + $0x78] sm:$0xff] }
  0x1c   : > { %13254 = vmatpush3.msra.mxu1 %v775_v6  ;;  %13244 = vmatprep.mubr.msk.f32.mxu1 %vm548_vm2, %v541_v8  ;;  %v1001_v17 = vld [vmem:[%s17481_s4] sm:$0xf]  ;;  %v760_v21 = vld [vmem:[%s14765_s27 + $0x8] sm:$0xff]  ;;  %v761_v22 = vld [vmem:[%s14765_s27 + $0x10] sm:$0xff] }
  0x1d   : > { %v759_v20 = vld [vmem:[%s14765_s27] sm:$0xff]  ;;  %13305 = vmatprep.subr.msk.mxu1 %vm1067_vm3, %v1001_v17  ;;  %v762_v23 = vld [vmem:[%s14765_s27 + $0x18] sm:$0xff]  ;;  %v764_v25 = vld [vmem:[%s14765_s27 + $0x28] sm:$0xff] }
  0x1e   : > { %13233 = vmatmul.mubr.msk.f32.gmra.mxu0 %vm548_vm2, %v534_v9  ;;  %13245 = vmatmul.mubr.msk.f32.gmra.mxu1 %vm548_vm2, %v542_v10  ;;  %v763_v24 = vld [vmem:[%s14765_s27 + $0x20] sm:$0xff]  ;;  %v765_v26 = vld [vmem:[%s14765_s27 + $0x30] sm:$0xff]  ;;  %v766_v27 = vld [vmem:[%s14765_s27 + $0x38] sm:$0xff] }
  0x1f   : > { %13235 = vmatprep.mubr.msk.f32.mxu0 %vm548_vm2, %v535_v11  ;;  %13247 = vmatprep.mubr.msk.f32.mxu1 %vm548_vm2, %v543_v12  ;;  %v767_v28 = vld [vmem:[%s14765_s27 + $0x40] sm:$0xff]  ;;  %v768_v29 = vld [vmem:[%s14765_s27 + $0x48] sm:$0xff]  ;;  %v769_v30 = vld [vmem:[%s14765_s27 + $0x50] sm:$0xff] }
  0x20   : > { %v770_v31 = vld [vmem:[%s14765_s27 + $0x58] sm:$0xff]  ;;  %v771_v32 = vld [vmem:[%s14765_s27 + $0x60] sm:$0xff]  ;;  %v772_v33 = vld [vmem:[%s14765_s27 + $0x68] sm:$0xff] }
  0x21   : > { %v773_v34 = vld [vmem:[%s14765_s27 + $0x70] sm:$0xff]  ;;  %v774_v35 = vld [vmem:[%s14765_s27 + $0x78] sm:$0xff]  ;;  %v1018_v36 = vld [vmem:[%s17482_s5] sm:$0xf]  ;;  %s14666_s27 = smov 120  }
  0x22   : > { %13236 = vmatmul.mubr.msk.f32.gmra.mxu0 %vm548_vm2, %v536_v13  ;;  %13248 = vmatmul.mubr.msk.f32.gmra.mxu1 %vm548_vm2, %v544_v14  ;;  %v14855_v37 = vld [vmem:[%s17481_s4 + $0x4] sm:$0xf]  ;;  %v14879_v53 = vld [vmem:[%s17482_s5 + $0x8] sm:$0xf] }
  0x23   : > { %13238 = vmatprep.mubr.msk.f32.mxu0 %vm548_vm2, %v537_v15  ;;  %13250 = vmatprep.mubr.msk.f32.mxu1 %vm548_vm2, %v545_v16  ;;  %v11686_v38 = vld [vmem:[%s17482_s5 + $0x4] sm:$0xf]  ;;  %v14906_v10 = vld [vmem:[%s17481_s4 + $0x8] sm:$0xf] }
  0x24   : > { %13279 = vmatprep.subr.msk.mxu0 %vm1067_vm3, %v1018_v36 }
  0x25   : > { %13280 = vmatpush3.msk.msra.mxu0 %vm1067_vm3, %v1018_v36 }
  0x26   : > { %13239 = vmatmul.mubr.msk.f32.gmra.mxu0 %vm548_vm2, %v538_v18  ;;  %13251 = vmatmul.mubr.msk.f32.gmra.mxu1 %vm548_vm2, %v546_v19 }
  0x27   : > { %13255 = vmatprep.mubr.msk.f32.mxu1 %vm548_vm2, %v759_v20  ;;  %13331 = vmatprep.subr.msk.mxu0 %vm1067_vm3, %v14855_v37 }
  0x2a   : > { %13256 = vmatmul.mubr.msk.f32.vlgmr.msra.gmra.mxu1 %vm548_vm2, %v760_v21 }
  0x2b   : > { %13258 = vmatprep.mubr.msk.f32.mxu1 %vm548_vm2, %v761_v22  ;;  %13306 = vmatpush3.msk.msra.mxu1 %vm1067_vm3, %v1001_v17 }
  0x2c   : > { %13357 = vmatprep.subr.msk.mxu1 %vm1067_vm3, %v11686_v38 }
  0x2e   : > { %13259 = vmatmul.mubr.msk.f32.gmra.mxu1 %vm548_vm2, %v762_v23 }
  0x2f   : > { %13261 = vmatprep.mubr.msk.f32.mxu1 %vm548_vm2, %v763_v24 }
  0x32   : > { %13262 = vmatmul.mubr.msk.f32.gmra.mxu1 %vm548_vm2, %v764_v25 }
  0x33   : > { %13264 = vmatprep.mubr.msk.f32.mxu1 %vm548_vm2, %v765_v26 }
  0x36   : > { %13265 = vmatmul.mubr.msk.f32.gmra.mxu1 %vm548_vm2, %v766_v27 }
  0x37   : > { %13267 = vmatprep.mubr.msk.f32.mxu1 %vm548_vm2, %v767_v28 }
  0x3a   : > { %13268 = vmatmul.mubr.msk.f32.gmra.mxu1 %vm548_vm2, %v768_v29 }
  0x3b   : > { %13270 = vmatprep.mubr.msk.f32.mxu1 %vm548_vm2, %v769_v30 }
  0x3e   : > { %13271 = vmatmul.mubr.msk.f32.gmra.mxu1 %vm548_vm2, %v770_v31 }
  0x3f   : > { %13273 = vmatprep.mubr.msk.f32.mxu1 %vm548_vm2, %v771_v32 }
  0x42   : > { %13274 = vmatmul.mubr.msk.f32.gmra.mxu1 %vm548_vm2, %v772_v33 }
  0x43   : > { %13276 = vmatprep.mubr.msk.f32.mxu1 %vm548_vm2, %v773_v34 }
  0x46   : > { %13277 = vmatmul.mubr.msk.f32.gmra.mxu1 %vm548_vm2, %v774_v35  ;;  %v14942_v35 = vld [vmem:[%s17482_s5 + $0xc] sm:$0xf] }
  0xda   : > { %v13231_v39 = vpop.f32.mrf.mxu0  ;;  %v13243_v40 = vpop.f32.mrf.mxu1 }
  0xdb   : > { %744 = vst.msk [vmem:[#allocation2 + $0x10] sm:$0xff] %vm742_vm4, %v13231_v39  ;;  %752 = vst.msk [vmem:[#allocation2 + $0x50] sm:$0xff] %vm742_vm4, %v13243_v40 }
  0xdc   : > { %v663_v41 = vpop.f32.mrf.mxu0  ;;  %v703_v42 = vpop.f32.mrf.mxu1 }
  0xdd   : > { %743 = vst.msk [vmem:[#allocation2 + $0x8] sm:$0xff] %vm742_vm4, %v663_v41  ;;  %751 = vst.msk [vmem:[#allocation2 + $0x48] sm:$0xff] %vm742_vm4, %v703_v42 }
  0xde   : > { %v13234_v43 = vpop.f32.mrf.mxu0  ;;  %v13246_v44 = vpop.f32.mrf.mxu1 }
  0xdf   : > { %746 = vst.msk [vmem:[#allocation2 + $0x20] sm:$0xff] %vm742_vm4, %v13234_v43  ;;  %754 = vst.msk [vmem:[#allocation2 + $0x60] sm:$0xff] %vm742_vm4, %v13246_v44 }
  0xe0   : > { %v673_v45 = vpop.f32.mrf.mxu0  ;;  %v713_v46 = vpop.f32.mrf.mxu1 }
  0xe1   : > { %745 = vst.msk [vmem:[#allocation2 + $0x18] sm:$0xff] %vm742_vm4, %v673_v45  ;;  %753 = vst.msk [vmem:[#allocation2 + $0x58] sm:$0xff] %vm742_vm4, %v713_v46 }
  0xe2   : > { %v13237_v47 = vpop.f32.mrf.mxu0  ;;  %v13249_v48 = vpop.f32.mrf.mxu1  ;;  %v986_v49 = vld [vmem:[#allocation2 + $0x10] sm:$0xff] }
  0xe3   : > { %748 = vst.msk [vmem:[#allocation2 + $0x30] sm:$0xff] %vm742_vm4, %v13237_v47  ;;  %756 = vst.msk [vmem:[#allocation2 + $0x70] sm:$0xff] %vm742_vm4, %v13249_v48  ;;  %v994_v9 = vld [vmem:[#allocation2 + $0x50] sm:$0xff] }
  0xe4   : > { %v683_v50 = vpop.f32.mrf.mxu0  ;;  %v723_v51 = vpop.f32.mrf.mxu1  ;;  %v985_v52 = vld [vmem:[#allocation2 + $0x8] sm:$0xff] }
  0xe5   : > { %747 = vst.msk [vmem:[#allocation2 + $0x28] sm:$0xff] %vm742_vm4, %v683_v50  ;;  %755 = vst.msk [vmem:[#allocation2 + $0x68] sm:$0xff] %vm742_vm4, %v723_v51  ;;  %13307 = vmatprep.mubr.msk.f32.mxu1 %vm742_vm4, %v985_v52  ;;  %v993_v5 = vld [vmem:[#allocation2 + $0x48] sm:$0xff] }
  0xe6   : > { %v13240_v54 = vpop.f32.mrf.mxu0  ;;  %v13252_v55 = vpop.f32.mrf.mxu1  ;;  %13308 = vmatmul.mubr.msk.f32.vlgmr.msra.gmra.mxu1 %vm742_vm4, %v986_v49  ;;  %v988_v56 = vld [vmem:[#allocation2 + $0x20] sm:$0xff]  ;;  %v1413_v52 = vld [vmem:[#allocation2 + $0xf] sm:$0xff] }
  0xe7   : > { %750 = vst.msk [vmem:[#allocation2 + $0x40] sm:$0xff] %vm742_vm4, %v13240_v54  ;;  %758 = vst.msk [vmem:[#allocation2 + $0x80] sm:$0xff] %vm742_vm4, %v13252_v55  ;;  %13358 = vmatpush3.msk.msra.mxu1 %vm1067_vm3, %v11686_v38  ;;  %v996_v16 = vld [vmem:[#allocation2 + $0x60] sm:$0xff] }
  0xe8   : > { %v693_v57 = vpop.f32.mrf.mxu0  ;;  %v733_v58 = vpop.f32.mrf.mxu1  ;;  %v987_v59 = vld [vmem:[#allocation2 + $0x18] sm:$0xff]  ;;  %13409 = vmatprep.subr.msk.mxu1 %vm1067_vm3, %v14879_v53  ;;  %v1412_v50 = vld [vmem:[#allocation2 + $0x7] sm:$0xff] }
  0xe9   : > { %749 = vst.msk [vmem:[#allocation2 + $0x38] sm:$0xff] %vm742_vm4, %v693_v57  ;;  %757 = vst.msk [vmem:[#allocation2 + $0x78] sm:$0xff] %vm742_vm4, %v733_v58  ;;  %13310 = vmatprep.mubr.msk.f32.mxu1 %vm742_vm4, %v987_v59  ;;  %v995_v12 = vld [vmem:[#allocation2 + $0x58] sm:$0xff] }
  0xea   : > { %v13257_v60 = vpop.f32.mrf.mxu1  ;;  %13311 = vmatmul.mubr.msk.f32.gmra.mxu1 %vm742_vm4, %v988_v56  ;;  %v990_v61 = vld [vmem:[#allocation2 + $0x30] sm:$0xff]  ;;  %v14974_v56 = vld [vmem:[%s17481_s4 + $0xc] sm:$0xf]  ;;  %v1415_v57 = vld [vmem:[#allocation2 + $0x1f] sm:$0xff] }
  0xeb   : > { %970 = vst.msk [vmem:[#allocation3 + $0x10] sm:$0xff] %vm742_vm4, %v13257_v60  ;;  %v998_v22 = vld [vmem:[#allocation2 + $0x70] sm:$0xff] }
  0xec   : > { %v890_v62 = vpop.f32.mrf.mxu1  ;;  %v989_v63 = vld [vmem:[#allocation2 + $0x28] sm:$0xff]  ;;  %v1414_v54 = vld [vmem:[#allocation2 + $0x17] sm:$0xff] }
  0xed   : > { %969 = vst.msk [vmem:[#allocation3 + $0x8] sm:$0xff] %vm742_vm4, %v890_v62  ;;  %13313 = vmatprep.mubr.msk.f32.mxu1 %vm742_vm4, %v989_v63  ;;  %v997_v18 = vld [vmem:[#allocation2 + $0x68] sm:$0xff] }
  0xee   : > { %v13260_v0 = vpop.f32.mrf.mxu1  ;;  %13314 = vmatmul.mubr.msk.f32.gmra.mxu1 %vm742_vm4, %v990_v61  ;;  %v992_v1 = vld [vmem:[#allocation2 + $0x40] sm:$0xff]  ;;  %v1417_v61 = vld [vmem:[#allocation2 + $0x2f] sm:$0xff] }
  0xef   : > { %972 = vst.msk [vmem:[#allocation3 + $0x20] sm:$0xff] %vm742_vm4, %v13260_v0  ;;  %v14928_v27 = vld [vmem:[#allocation2 + $0x80] sm:$0xff] }
  0xf0   : > { %v900_v2 = vpop.f32.mrf.mxu1  ;;  %v991_v3 = vld [vmem:[#allocation2 + $0x38] sm:$0xff]  ;;  %v1416_v59 = vld [vmem:[#allocation2 + $0x27] sm:$0xff] }
  0xf1   : > { %971 = vst.msk [vmem:[#allocation3 + $0x18] sm:$0xff] %vm742_vm4, %v900_v2  ;;  %13316 = vmatprep.mubr.msk.f32.mxu1 %vm742_vm4, %v991_v3  ;;  %v999_v24 = vld [vmem:[#allocation2 + $0x78] sm:$0xff]  ;;  %v1420_v3 = vld [vmem:[#allocation2 + $0x47] sm:$0xff] }
  0xf2   : > { %v13263_v4 = vpop.f32.mrf.mxu1  ;;  %13317 = vmatmul.mubr.msk.f32.gmra.mxu1 %vm742_vm4, %v992_v1  ;;  %v1003_v8 = vld [vmem:[#allocation3 + $0x10] sm:$0xff] }
  0xf3   : > { %974 = vst.msk [vmem:[#allocation3 + $0x30] sm:$0xff] %vm742_vm4, %v13263_v4  ;;  %13319 = vmatprep.mubr.msk.f32.mxu1 %vm742_vm4, %v993_v5  ;;  %v1418_v63 = vld [vmem:[#allocation2 + $0x37] sm:$0xff]  ;;  %v1419_v1 = vld [vmem:[#allocation2 + $0x3f] sm:$0xff]  ;;  %v1421_v5 = vld [vmem:[#allocation2 + $0x4f] sm:$0xff] }
  0xf4   : > { %v910_v6 = vpop.f32.mrf.mxu1  ;;  %v1002_v7 = vld [vmem:[#allocation3 + $0x8] sm:$0xff] }
  0xf5   : > { %973 = vst.msk [vmem:[#allocation3 + $0x28] sm:$0xff] %vm742_vm4, %v910_v6  ;;  %13281 = vmatprep.mubr.msk.f32.mxu0 %vm742_vm4, %v1002_v7  ;;  %v1642_v30 = vld [vmem:[#allocation3 + $0x7] sm:$0xff]  ;;  %v1643_v34 = vld [vmem:[#allocation3 + $0xf] sm:$0xff] }
  0xf6   : > { %v13266_v11 = vpop.f32.mrf.mxu1  ;;  %13282 = vmatmul.mubr.msk.f32.vlgmr.msra.gmra.mxu0 %vm742_vm4, %v1003_v8  ;;  %13320 = vmatmul.mubr.msk.f32.gmra.mxu1 %vm742_vm4, %v994_v9  ;;  %v1005_v15 = vld [vmem:[#allocation3 + $0x20] sm:$0xff]  ;;  %v2103_v6 = vld [vmem:[#allocation3 + $0xe] sm:$0xff]  ;;  %v14999_v9 = vld [vmem:[%s17482_s5 + $0x10] sm:$0xf] }
  0xf7   : > { %976 = vst.msk [vmem:[#allocation3 + $0x40] sm:$0xff] %vm742_vm4, %v13266_v11  ;;  %13322 = vmatprep.mubr.msk.f32.mxu1 %vm742_vm4, %v995_v12  ;;  %13332 = vmatpush3.msk.msra.mxu0 %vm1067_vm3, %v14855_v37  ;;  %v2102_v4 = vld [vmem:[#allocation3 + $0x6] sm:$0xff]  ;;  %v1422_v7 = vld [vmem:[#allocation2 + $0x57] sm:$0xff] }
  0xf8   : > { %v920_v13 = vpop.f32.mrf.mxu1  ;;  %v1004_v14 = vld [vmem:[#allocation3 + $0x18] sm:$0xff]  ;;  %13383 = vmatprep.subr.msk.mxu0 %vm1067_vm3, %v14906_v10 }
  0xf9   : > { %975 = vst.msk [vmem:[#allocation3 + $0x38] sm:$0xff] %vm742_vm4, %v920_v13  ;;  %13284 = vmatprep.mubr.msk.f32.mxu0 %vm742_vm4, %v1004_v14  ;;  %v1644_v37 = vld [vmem:[#allocation3 + $0x17] sm:$0xff]  ;;  %v1645_v41 = vld [vmem:[#allocation3 + $0x1f] sm:$0xff]  ;;  %v1425_v14 = vld [vmem:[#allocation2 + $0x6f] sm:$0xff] }
  0xfa   : > { %v13269_v17 = vpop.f32.mrf.mxu1  ;;  %13285 = vmatmul.mubr.msk.f32.gmra.mxu0 %vm742_vm4, %v1005_v15  ;;  %13323 = vmatmul.mubr.msk.f32.gmra.mxu1 %vm742_vm4, %v996_v16  ;;  %v1007_v21 = vld [vmem:[#allocation3 + $0x30] sm:$0xff]  ;;  %v2105_v11 = vld [vmem:[#allocation3 + $0x1e] sm:$0xff] }
  0xfb   : > { %978 = vst.msk [vmem:[#allocation3 + $0x50] sm:$0xff] %vm742_vm4, %v13269_v17  ;;  %13325 = vmatprep.mubr.msk.f32.mxu1 %vm742_vm4, %v997_v18  ;;  %v2104_v8 = vld [vmem:[#allocation3 + $0x16] sm:$0xff]  ;;  %v1424_v12 = vld [vmem:[#allocation2 + $0x67] sm:$0xff] }
  0xfc   : > { %v930_v19 = vpop.f32.mrf.mxu1  ;;  %v1006_v20 = vld [vmem:[#allocation3 + $0x28] sm:$0xff] }
  0xfd   : > { %977 = vst.msk [vmem:[#allocation3 + $0x48] sm:$0xff] %vm742_vm4, %v930_v19  ;;  %13287 = vmatprep.mubr.msk.f32.mxu0 %vm742_vm4, %v1006_v20  ;;  %v1646_v42 = vld [vmem:[#allocation3 + $0x27] sm:$0xff]  ;;  %v1647_v45 = vld [vmem:[#allocation3 + $0x2f] sm:$0xff] }
  0xfe   : > { %v13272_v23 = vpop.f32.mrf.mxu1  ;;  %13288 = vmatmul.mubr.msk.f32.gmra.mxu0 %vm742_vm4, %v1007_v21  ;;  %13326 = vmatmul.mubr.msk.f32.gmra.mxu1 %vm742_vm4, %v998_v22  ;;  %v1009_v28 = vld [vmem:[#allocation3 + $0x40] sm:$0xff]  ;;  %v2107_v15 = vld [vmem:[#allocation3 + $0x2e] sm:$0xff] }
  0xff   : > { %980 = vst.msk [vmem:[#allocation3 + $0x60] sm:$0xff] %vm742_vm4, %v13272_v23  ;;  %13328 = vmatprep.mubr.msk.f32.mxu1 %vm742_vm4, %v999_v24  ;;  %v2106_v13 = vld [vmem:[#allocation3 + $0x26] sm:$0xff]  ;;  %v1426_v21 = vld [vmem:[#allocation2 + $0x77] sm:$0xff]  ;;  %v1872_v23 = vld [vmem:[#allocation2 + $0x6] sm:$0xff] }
 0x100   : > { %v940_v25 = vpop.f32.mrf.mxu1  ;;  %v1008_v26 = vld [vmem:[#allocation3 + $0x38] sm:$0xff]  ;;  %v2562_v16 = vld [vmem:[#allocation3 + $0x5] sm:$0xff] }
 0x101   : > { %979 = vst.msk [vmem:[#allocation3 + $0x58] sm:$0xff] %vm742_vm4, %v940_v25  ;;  %13290 = vmatprep.mubr.msk.f32.mxu0 %vm742_vm4, %v1008_v26  ;;  %v1648_v46 = vld [vmem:[#allocation3 + $0x37] sm:$0xff]  ;;  %v1649_v49 = vld [vmem:[#allocation3 + $0x3f] sm:$0xff] }
 0x102   : > { %v13275_v29 = vpop.f32.mrf.mxu1  ;;  %13291 = vmatmul.mubr.msk.f32.gmra.mxu0 %vm742_vm4, %v1009_v28  ;;  %13329 = vmatmul.mubr.msk.f32.gmra.mxu1 %vm742_vm4, %v14928_v27  ;;  %v1011_v33 = vld [vmem:[#allocation3 + $0x50] sm:$0xff]  ;;  %v15011_v17 = vld [vmem:[#allocation3 + $0x4] sm:$0xff]  ;;  %v15027_v25 = vld [vmem:[#allocation2 + $0x4] sm:$0xff] }
 0x103   : > { %982 = vst.msk [vmem:[#allocation3 + $0x70] sm:$0xff] %vm742_vm4, %v13275_v29  ;;  %13359 = vmatprep.mubr.msk.f32.mxu1 %vm742_vm4, %v1642_v30  ;;  %v15013_v18 = vld [vmem:[#allocation3 + $0x3] sm:$0xff]  ;;  %v2108_v22 = vld [vmem:[#allocation3 + $0x36] sm:$0xff] }
 0x104   : > { %v950_v31 = vpop.f32.mrf.mxu1  ;;  %v1010_v32 = vld [vmem:[#allocation3 + $0x48] sm:$0xff]  ;;  %v15025_v24 = vld [vmem:[#allocation2 + $0x5] sm:$0xff] }
 0x105   : > { %981 = vst.msk [vmem:[#allocation3 + $0x68] sm:$0xff] %vm742_vm4, %v950_v31  ;;  %13293 = vmatprep.mubr.msk.f32.mxu0 %vm742_vm4, %v1010_v32  ;;  %v1650_v51 = vld [vmem:[#allocation3 + $0x47] sm:$0xff]  ;;  %v15029_v26 = vld [vmem:[#allocation2 + $0x3] sm:$0xff] }
 0x106   : > { %v13278_v36 = vpop.f32.mrf.mxu1  ;;  %13294 = vmatmul.mubr.msk.f32.gmra.mxu0 %vm742_vm4, %v1011_v33  ;;  %13360 = vmatmul.mubr.msk.f32.vlgmr.msra.gmra.mxu1 %vm742_vm4, %v1643_v34  ;;  %v1013_v40 = vld [vmem:[#allocation3 + $0x60] sm:$0xff]  ;;  %v1427_v29 = vld [vmem:[#allocation2 + $0x7f] sm:$0xff]  ;;  %v2111_v34 = vld [vmem:[#allocation3 + $0x4e] sm:$0xff] }
 0x107   : > { %984 = vst.msk [vmem:[#allocation3 + $0x80] sm:$0xff] %vm742_vm4, %v13278_v36  ;;  %13362 = vmatprep.mubr.msk.f32.mxu1 %vm742_vm4, %v1644_v37  ;;  %13410 = vmatpush3.msk.msra.mxu1 %vm1067_vm3, %v14879_v53  ;;  %v1651_v53 = vld [vmem:[#allocation3 + $0x4f] sm:$0xff]  ;;  %v15015_v19 = vld [vmem:[#allocation3 + $0x2] sm:$0xff]  ;;  %v15031_v28 = vld [vmem:[#allocation2 + $0x2] sm:$0xff] }
 0x108   : > { %v960_v38 = vpop.f32.mrf.mxu1  ;;  %v1012_v39 = vld [vmem:[#allocation3 + $0x58] sm:$0xff]  ;;  %13461 = vmatprep.subr.msk.mxu1 %vm1067_vm3, %v14942_v35  ;;  %v15017_v20 = vld [vmem:[#allocation3 + $0x1] sm:$0xff] }
 0x109   : > { %983 = vst.msk [vmem:[#allocation3 + $0x78] sm:$0xff] %vm742_vm4, %v960_v38  ;;  %13296 = vmatprep.mubr.msk.f32.mxu0 %vm742_vm4, %v1012_v39  ;;  %v1652_v55 = vld [vmem:[#allocation3 + $0x57] sm:$0xff]  ;;  %v1653_v58 = vld [vmem:[#allocation3 + $0x5f] sm:$0xff]  ;;  %v15046_v37 = vld [vmem:[%s17481_s4 + $0x10] sm:$0xf] }
 0x10a   : > { %13297 = vmatmul.mubr.msk.f32.gmra.mxu0 %vm742_vm4, %v1013_v40  ;;  %13363 = vmatmul.mubr.msk.f32.gmra.mxu1 %vm742_vm4, %v1645_v41  ;;  %v1015_v44 = vld [vmem:[#allocation3 + $0x70] sm:$0xff]  ;;  %v2109_v30 = vld [vmem:[#allocation3 + $0x3e] sm:$0xff]  ;;  %v2110_v31 = vld [vmem:[#allocation3 + $0x46] sm:$0xff] }
 0x10b   : > { %13365 = vmatprep.mubr.msk.f32.mxu1 %vm742_vm4, %v1646_v42  ;;  %v15035_v32 = vld [vmem:[#allocation2 + $0x1] sm:$0xff]  ;;  %v1873_v33 = vld [vmem:[#allocation2 + $0xe] sm:$0xff] }
 0x10c   : > { %v1014_v43 = vld [vmem:[#allocation3 + $0x68] sm:$0xff]  ;;  %11503 = vst.msk [vmem:[#allocation2] sm:$0xff] %vm742_vm4, %v14928_v27  ;;  %v2112_v36 = vld [vmem:[#allocation3 + $0x56] sm:$0xff]  ;;  %v2113_v38 = vld [vmem:[#allocation3 + $0x5e] sm:$0xff] }
 0x10d   : > { %13299 = vmatprep.mubr.msk.f32.mxu0 %vm742_vm4, %v1014_v43  ;;  %v1654_v60 = vld [vmem:[#allocation3 + $0x67] sm:$0xff]  ;;  %v1655_v62 = vld [vmem:[#allocation3 + $0x6f] sm:$0xff]  ;;  %v1876_v39 = vld [vmem:[#allocation2 + $0x26] sm:$0xff] }
 0x10e   : > { %13300 = vmatmul.mubr.msk.f32.gmra.mxu0 %vm742_vm4, %v1015_v44  ;;  %13366 = vmatmul.mubr.msk.f32.gmra.mxu1 %vm742_vm4, %v1647_v45  ;;  %v14961_v48 = vld [vmem:[#allocation3 + $0x80] sm:$0xff]  ;;  %v1875_v27 = vld [vmem:[#allocation2 + $0x1e] sm:$0xff]  ;;  %v2115_v42 = vld [vmem:[#allocation3 + $0x6e] sm:$0xff] }
 0x10f   : > { %13368 = vmatprep.mubr.msk.f32.mxu1 %vm742_vm4, %v1648_v46  ;;  %11505 = vst.msk [vmem:[#allocation3] sm:$0xff] %vm742_vm4, %v14961_v48  ;;  %v2114_v40 = vld [vmem:[#allocation3 + $0x66] sm:$0xff]  ;;  %v1878_v43 = vld [vmem:[#allocation2 + $0x36] sm:$0xff]  ;;  %v1879_v45 = vld [vmem:[#allocation2 + $0x3e] sm:$0xff] }
 0x110   : > { %v1016_v47 = vld [vmem:[#allocation3 + $0x78] sm:$0xff]  ;;  %v1877_v41 = vld [vmem:[#allocation2 + $0x2e] sm:$0xff] }
 0x111   : > { %13302 = vmatprep.mubr.msk.f32.mxu0 %vm742_vm4, %v1016_v47  ;;  %v1656_v0 = vld [vmem:[#allocation3 + $0x77] sm:$0xff]  ;;  %v1657_v2 = vld [vmem:[#allocation3 + $0x7f] sm:$0xff] }
 0x112   : > { %13303 = vmatmul.mubr.msk.f32.gmra.mxu0 %vm742_vm4, %v14961_v48  ;;  %13369 = vmatmul.mubr.msk.f32.gmra.mxu1 %vm742_vm4, %v1649_v49  ;;  %v2116_v44 = vld [vmem:[#allocation3 + $0x76] sm:$0xff]  ;;  %v2117_v46 = vld [vmem:[#allocation3 + $0x7e] sm:$0xff]  ;;  %v1881_v48 = vld [vmem:[#allocation2 + $0x4e] sm:$0xff] }
 0x113   : > { %13333 = vmatprep.mubr.msk.f32.mxu0 %vm742_vm4, %v1412_v50  ;;  %13371 = vmatprep.mubr.msk.f32.mxu1 %vm742_vm4, %v1650_v51  ;;  %v1880_v47 = vld [vmem:[#allocation2 + $0x46] sm:$0xff]  ;;  %v2563_v49 = vld [vmem:[#allocation3 + $0xd] sm:$0xff]  ;;  %v2564_v51 = vld [vmem:[#allocation3 + $0x15] sm:$0xff] }
 0x114   : > { %v1882_v50 = vld [vmem:[#allocation2 + $0x56] sm:$0xff] }
 0x116   : > { %13334 = vmatmul.mubr.msk.f32.vlgmr.msra.gmra.mxu0 %vm742_vm4, %v1413_v52  ;;  %13372 = vmatmul.mubr.msk.f32.gmra.mxu1 %vm742_vm4, %v1651_v53  ;;  %v15071_v52 = vld [vmem:[%s17482_s5 + $0x14] sm:$0xf]  ;;  %v1883_v53 = vld [vmem:[#allocation2 + $0x5e] sm:$0xff] }
 0x117   : > { %13336 = vmatprep.mubr.msk.f32.mxu0 %vm742_vm4, %v1414_v54  ;;  %13374 = vmatprep.mubr.msk.f32.mxu1 %vm742_vm4, %v1652_v55  ;;  %v2565_v54 = vld [vmem:[#allocation3 + $0x1d] sm:$0xff] }
 0x118   : > { %13384 = vmatpush3.msk.msra.mxu0 %vm1067_vm3, %v14906_v10  ;;  %v1423_v10 = vld [vmem:[#allocation2 + $0x5f] sm:$0xff] }
 0x119   : > { %13435 = vmatprep.subr.msk.mxu0 %vm1067_vm3, %v14974_v56  ;;  %v1884_v55 = vld [vmem:[#allocation2 + $0x66] sm:$0xff] }
 0x11a   : > { %13337 = vmatmul.mubr.msk.f32.gmra.mxu0 %vm742_vm4, %v1415_v57  ;;  %13375 = vmatmul.mubr.msk.f32.gmra.mxu1 %vm742_vm4, %v1653_v58  ;;  %v1885_v57 = vld [vmem:[#allocation2 + $0x6e] sm:$0xff] }
 0x11b   : > { %13339 = vmatprep.mubr.msk.f32.mxu0 %vm742_vm4, %v1416_v59  ;;  %13377 = vmatprep.mubr.msk.f32.mxu1 %vm742_vm4, %v1654_v60  ;;  %v2567_v58 = vld [vmem:[#allocation3 + $0x2d] sm:$0xff]  ;;  %v2568_v60 = vld [vmem:[#allocation3 + $0x35] sm:$0xff] }
 0x11c   : > { %v1886_v59 = vld [vmem:[#allocation2 + $0x76] sm:$0xff] }
 0x11e   : > { %13340 = vmatmul.mubr.msk.f32.gmra.mxu0 %vm742_vm4, %v1417_v61  ;;  %13378 = vmatmul.mubr.msk.f32.gmra.mxu1 %vm742_vm4, %v1655_v62  ;;  %v1887_v61 = vld [vmem:[#allocation2 + $0x7e] sm:$0xff] }
 0x11f   : > { %13342 = vmatprep.mubr.msk.f32.mxu0 %vm742_vm4, %v1418_v63  ;;  %13380 = vmatprep.mubr.msk.f32.mxu1 %vm742_vm4, %v1656_v0  ;;  %v2569_v62 = vld [vmem:[#allocation3 + $0x3d] sm:$0xff]  ;;  %v2570_v63 = vld [vmem:[#allocation3 + $0x45] sm:$0xff] }
 0x120   : > { %v2333_v0 = vld [vmem:[#allocation2 + $0xd] sm:$0xff] }
 0x122   : > { %13343 = vmatmul.mubr.msk.f32.gmra.mxu0 %vm742_vm4, %v1419_v1  ;;  %13381 = vmatmul.mubr.msk.f32.gmra.mxu1 %vm742_vm4, %v1657_v2  ;;  %v2571_v1 = vld [vmem:[#allocation3 + $0x4d] sm:$0xff] }
 0x123   : > { %13345 = vmatprep.mubr.msk.f32.mxu0 %vm742_vm4, %v1420_v3  ;;  %13411 = vmatprep.mubr.msk.f32.mxu1 %vm742_vm4, %v2102_v4  ;;  %v2334_v2 = vld [vmem:[#allocation2 + $0x15] sm:$0xff]  ;;  %v2572_v3 = vld [vmem:[#allocation3 + $0x55] sm:$0xff] }
 0x124   : > { %v15097_v4 = vld [vmem:[%s17481_s4 + $0x14] sm:$0xf] }
 0x126   : > { %13346 = vmatmul.mubr.msk.f32.gmra.mxu0 %vm742_vm4, %v1421_v5  ;;  %13412 = vmatmul.mubr.msk.f32.vlgmr.msra.gmra.mxu1 %vm742_vm4, %v2103_v6  ;;  %v2335_v5 = vld [vmem:[#allocation2 + $0x1d] sm:$0xff]  ;;  %v2573_v6 = vld [vmem:[#allocation3 + $0x5d] sm:$0xff] }
 0x127   : > { %13348 = vmatprep.mubr.msk.f32.mxu0 %vm742_vm4, %v1422_v7  ;;  %13414 = vmatprep.mubr.msk.f32.mxu1 %vm742_vm4, %v2104_v8  ;;  %v2336_v7 = vld [vmem:[#allocation2 + $0x25] sm:$0xff]  ;;  %v2574_v8 = vld [vmem:[#allocation3 + $0x65] sm:$0xff] }
 0x128   : > { %13462 = vmatpush3.msk.msra.mxu1 %vm1067_vm3, %v14942_v35  ;;  %v1874_v35 = vld [vmem:[#allocation2 + $0x16] sm:$0xff] }
 0x129   : > { %13513 = vmatprep.subr.msk.mxu1 %vm1067_vm3, %v14999_v9 }
 0x12a   : > { %13349 = vmatmul.mubr.msk.f32.gmra.mxu0 %vm742_vm4, %v1423_v10  ;;  %13415 = vmatmul.mubr.msk.f32.gmra.mxu1 %vm742_vm4, %v2105_v11  ;;  %v2575_v10 = vld [vmem:[#allocation3 + $0x6d] sm:$0xff] }
 0x12b   : > { %13351 = vmatprep.mubr.msk.f32.mxu0 %vm742_vm4, %v1424_v12  ;;  %13417 = vmatprep.mubr.msk.f32.mxu1 %vm742_vm4, %v2106_v13  ;;  %v2338_v11 = vld [vmem:[#allocation2 + $0x35] sm:$0xff]  ;;  %v2576_v12 = vld [vmem:[#allocation3 + $0x75] sm:$0xff] }
 0x12c   : > { %v2339_v13 = vld [vmem:[#allocation2 + $0x3d] sm:$0xff] }
 0x12e   : > { %13352 = vmatmul.mubr.msk.f32.gmra.mxu0 %vm742_vm4, %v1425_v14  ;;  %13418 = vmatmul.mubr.msk.f32.gmra.mxu1 %vm742_vm4, %v2107_v15  ;;  %v2577_v14 = vld [vmem:[#allocation3 + $0x7d] sm:$0xff] }
 0x12f   : > { %13354 = vmatprep.mubr.msk.f32.mxu0 %vm742_vm4, %v1426_v21  ;;  %13420 = vmatprep.mubr.msk.f32.mxu1 %vm742_vm4, %v2108_v22  ;;  %v2340_v15 = vld [vmem:[#allocation2 + $0x45] sm:$0xff]  ;;  %v3023_v21 = vld [vmem:[#allocation3 + $0xc] sm:$0xff] }
 0x130   : > { %v2342_v22 = vld [vmem:[#allocation2 + $0x55] sm:$0xff] }
 0x132   : > { %13355 = vmatmul.mubr.msk.f32.gmra.mxu0 %vm742_vm4, %v1427_v29  ;;  %13421 = vmatmul.mubr.msk.f32.gmra.mxu1 %vm742_vm4, %v2109_v30  ;;  %v3025_v29 = vld [vmem:[#allocation3 + $0x1c] sm:$0xff] }
 0x133   : > { %13385 = vmatprep.mubr.msk.f32.mxu0 %vm742_vm4, %v1872_v23  ;;  %13423 = vmatprep.mubr.msk.f32.mxu1 %vm742_vm4, %v2110_v31  ;;  %v3024_v23 = vld [vmem:[#allocation3 + $0x14] sm:$0xff]  ;;  %v2344_v30 = vld [vmem:[#allocation2 + $0x65] sm:$0xff] }
 0x134   : > { %v3026_v31 = vld [vmem:[#allocation3 + $0x24] sm:$0xff] }
 0x136   : > { %13386 = vmatmul.mubr.msk.f32.vlgmr.msra.gmra.mxu0 %vm742_vm4, %v1873_v33  ;;  %13424 = vmatmul.mubr.msk.f32.gmra.mxu1 %vm742_vm4, %v2111_v34  ;;  %v2345_v33 = vld [vmem:[#allocation2 + $0x6d] sm:$0xff] }
 0x137   : > { %13388 = vmatprep.mubr.msk.f32.mxu0 %vm742_vm4, %v1874_v35  ;;  %13426 = vmatprep.mubr.msk.f32.mxu1 %vm742_vm4, %v2112_v36  ;;  %v3027_v34 = vld [vmem:[#allocation3 + $0x2c] sm:$0xff]  ;;  %v3028_v36 = vld [vmem:[#allocation3 + $0x34] sm:$0xff] }
 0x138   : > { %13436 = vmatpush3.msk.msra.mxu0 %vm1067_vm3, %v14974_v56  ;;  %v2566_v56 = vld [vmem:[#allocation3 + $0x25] sm:$0xff]  ;;  %v2346_v35 = vld [vmem:[#allocation2 + $0x75] sm:$0xff] }
 0x139   : > { %13487 = vmatprep.subr.msk.mxu0 %vm1067_vm3, %v15046_v37 }
 0x13a   : > { %13389 = vmatmul.mubr.msk.f32.gmra.mxu0 %vm742_vm4, %v1875_v27  ;;  %13427 = vmatmul.mubr.msk.f32.gmra.mxu1 %vm742_vm4, %v2113_v38  ;;  %v3029_v27 = vld [vmem:[#allocation3 + $0x3c] sm:$0xff]  ;;  %v3030_v38 = vld [vmem:[#allocation3 + $0x44] sm:$0xff] }
 0x13b   : > { %13391 = vmatprep.mubr.msk.f32.mxu0 %vm742_vm4, %v1876_v39  ;;  %13429 = vmatprep.mubr.msk.f32.mxu1 %vm742_vm4, %v2114_v40  ;;  %v2793_v39 = vld [vmem:[#allocation2 + $0xc] sm:$0xff]  ;;  %v3031_v40 = vld [vmem:[#allocation3 + $0x4c] sm:$0xff] }
 0x13e   : > { %13392 = vmatmul.mubr.msk.f32.gmra.mxu0 %vm742_vm4, %v1877_v41  ;;  %13430 = vmatmul.mubr.msk.f32.gmra.mxu1 %vm742_vm4, %v2115_v42  ;;  %v2794_v41 = vld [vmem:[#allocation2 + $0x14] sm:$0xff]  ;;  %v3032_v42 = vld [vmem:[#allocation3 + $0x54] sm:$0xff] }
 0x13f   : > { %13394 = vmatprep.mubr.msk.f32.mxu0 %vm742_vm4, %v1878_v43  ;;  %13432 = vmatprep.mubr.msk.f32.mxu1 %vm742_vm4, %v2116_v44  ;;  %v15149_v43 = vld [vmem:[%s17481_s4 + $0x18] sm:$0xf]  ;;  %v3033_v44 = vld [vmem:[#allocation3 + $0x5c] sm:$0xff] }
 0x142   : > { %13395 = vmatmul.mubr.msk.f32.gmra.mxu0 %vm742_vm4, %v1879_v45  ;;  %13433 = vmatmul.mubr.msk.f32.gmra.mxu1 %vm742_vm4, %v2117_v46  ;;  %v2796_v45 = vld [vmem:[#allocation2 + $0x24] sm:$0xff]  ;;  %v3034_v46 = vld [vmem:[#allocation3 + $0x64] sm:$0xff] }
 0x143   : > { %13397 = vmatprep.mubr.msk.f32.mxu0 %vm742_vm4, %v1880_v47  ;;  %13463 = vmatprep.mubr.msk.f32.mxu1 %vm742_vm4, %v2562_v16  ;;  %v2341_v16 = vld [vmem:[#allocation2 + $0x4d] sm:$0xff] }
 0x144   : > { %v2797_v47 = vld [vmem:[#allocation2 + $0x2c] sm:$0xff] }
 0x146   : > { %13398 = vmatmul.mubr.msk.f32.gmra.mxu0 %vm742_vm4, %v1881_v48  ;;  %13464 = vmatmul.mubr.msk.f32.vlgmr.msra.gmra.mxu1 %vm742_vm4, %v2563_v49  ;;  %v3035_v48 = vld [vmem:[#allocation3 + $0x6c] sm:$0xff] }
 0x147   : > { %13400 = vmatprep.mubr.msk.f32.mxu0 %vm742_vm4, %v1882_v50  ;;  %13466 = vmatprep.mubr.msk.f32.mxu1 %vm742_vm4, %v2564_v51  ;;  %v2798_v49 = vld [vmem:[#allocation2 + $0x34] sm:$0xff]  ;;  %v3036_v50 = vld [vmem:[#allocation3 + $0x74] sm:$0xff] }
 0x148   : > { %13514 = vmatpush3.msk.msra.mxu1 %vm1067_vm3, %v14999_v9  ;;  %v2337_v9 = vld [vmem:[#allocation2 + $0x2d] sm:$0xff]  ;;  %v2799_v51 = vld [vmem:[#allocation2 + $0x3c] sm:$0xff] }
 0x149   : > { %13565 = vmatprep.subr.msk.mxu1 %vm1067_vm3, %v15071_v52 }
 0x14a   : > { %13401 = vmatmul.mubr.msk.f32.gmra.mxu0 %vm742_vm4, %v1883_v53  ;;  %13467 = vmatmul.mubr.msk.f32.gmra.mxu1 %vm742_vm4, %v2565_v54  ;;  %v2800_v53 = vld [vmem:[#allocation2 + $0x44] sm:$0xff]  ;;  %v2801_v54 = vld [vmem:[#allocation2 + $0x4c] sm:$0xff] }
 0x14b   : > { %13403 = vmatprep.mubr.msk.f32.mxu0 %vm742_vm4, %v1884_v55  ;;  %13469 = vmatprep.mubr.msk.f32.mxu1 %vm742_vm4, %v2566_v56  ;;  %v3483_v55 = vld [vmem:[#allocation3 + $0xb] sm:$0xff] }
 0x14c   : > { %v2802_v56 = vld [vmem:[#allocation2 + $0x54] sm:$0xff] }
 0x14e   : > { %13404 = vmatmul.mubr.msk.f32.gmra.mxu0 %vm742_vm4, %v1885_v57  ;;  %13470 = vmatmul.mubr.msk.f32.gmra.mxu1 %vm742_vm4, %v2567_v58  ;;  %v3484_v57 = vld [vmem:[#allocation3 + $0x13] sm:$0xff] }
 0x14f   : > { %13406 = vmatprep.mubr.msk.f32.mxu0 %vm742_vm4, %v1886_v59  ;;  %13472 = vmatprep.mubr.msk.f32.mxu1 %vm742_vm4, %v2568_v60  ;;  %v15175_v58 = vld [vmem:[%s17482_s5 + $0x1c] sm:$0xf]  ;;  %v3485_v59 = vld [vmem:[#allocation3 + $0x1b] sm:$0xff] }
 0x150   : > { %v2804_v60 = vld [vmem:[#allocation2 + $0x64] sm:$0xff] }
 0x152   : > { %13407 = vmatmul.mubr.msk.f32.gmra.mxu0 %vm742_vm4, %v1887_v61  ;;  %13473 = vmatmul.mubr.msk.f32.gmra.mxu1 %vm742_vm4, %v2569_v62  ;;  %v3486_v61 = vld [vmem:[#allocation3 + $0x23] sm:$0xff] }
 0x153   : > { %13437 = vmatprep.mubr.msk.f32.mxu0 %vm742_vm4, %v15025_v24  ;;  %13475 = vmatprep.mubr.msk.f32.mxu1 %vm742_vm4, %v2570_v63  ;;  %v15123_v24 = vld [vmem:[%s17482_s5 + $0x18] sm:$0xf]  ;;  %v2805_v62 = vld [vmem:[#allocation2 + $0x6c] sm:$0xff] }
 0x154   : > { %v3487_v63 = vld [vmem:[#allocation3 + $0x2b] sm:$0xff] }
 0x156   : > { %13438 = vmatmul.mubr.msk.f32.vlgmr.msra.gmra.mxu0 %vm742_vm4, %v2333_v0  ;;  %13476 = vmatmul.mubr.msk.f32.gmra.mxu1 %vm742_vm4, %v2571_v1  ;;  %v2806_v0 = vld [vmem:[#allocation2 + $0x74] sm:$0xff] }
 0x157   : > { %13440 = vmatprep.mubr.msk.f32.mxu0 %vm742_vm4, %v2334_v2  ;;  %13478 = vmatprep.mubr.msk.f32.mxu1 %vm742_vm4, %v2572_v3  ;;  %v3488_v1 = vld [vmem:[#allocation3 + $0x33] sm:$0xff]  ;;  %v3489_v3 = vld [vmem:[#allocation3 + $0x3b] sm:$0xff] }
 0x158   : > { %13488 = vmatpush3.msk.msra.mxu0 %vm1067_vm3, %v15046_v37  ;;  %v2347_v37 = vld [vmem:[#allocation2 + $0x7d] sm:$0xff] }
 0x159   : > { %13539 = vmatprep.subr.msk.mxu0 %vm1067_vm3, %v15097_v4  ;;  %v2807_v2 = vld [vmem:[#allocation2 + $0x7c] sm:$0xff] }
 0x15a   : > { %13441 = vmatmul.mubr.msk.f32.gmra.mxu0 %vm742_vm4, %v2335_v5  ;;  %13479 = vmatmul.mubr.msk.f32.gmra.mxu1 %vm742_vm4, %v2573_v6  ;;  %v3253_v5 = vld [vmem:[#allocation2 + $0xb] sm:$0xff]  ;;  %v3491_v6 = vld [vmem:[#allocation3 + $0x4b] sm:$0xff] }
 0x15b   : > { %13443 = vmatprep.mubr.msk.f32.mxu0 %vm742_vm4, %v2336_v7  ;;  %13481 = vmatprep.mubr.msk.f32.mxu1 %vm742_vm4, %v2574_v8  ;;  %v3254_v7 = vld [vmem:[#allocation2 + $0x13] sm:$0xff]  ;;  %v3492_v8 = vld [vmem:[#allocation3 + $0x53] sm:$0xff] }
 0x15e   : > { %13444 = vmatmul.mubr.msk.f32.gmra.mxu0 %vm742_vm4, %v2337_v9  ;;  %13482 = vmatmul.mubr.msk.f32.gmra.mxu1 %vm742_vm4, %v2575_v10  ;;  %v15201_v9 = vld [vmem:[%s17481_s4 + $0x1c] sm:$0xf]  ;;  %v3493_v10 = vld [vmem:[#allocation3 + $0x5b] sm:$0xff] }
 0x15f   : > { %13446 = vmatprep.mubr.msk.f32.mxu0 %vm742_vm4, %v2338_v11  ;;  %13484 = vmatprep.mubr.msk.f32.mxu1 %vm742_vm4, %v2576_v12  ;;  %v3256_v11 = vld [vmem:[#allocation2 + $0x23] sm:$0xff]  ;;  %v3494_v12 = vld [vmem:[#allocation3 + $0x63] sm:$0xff] }
 0x162   : > { %13447 = vmatmul.mubr.msk.f32.gmra.mxu0 %vm742_vm4, %v2339_v13  ;;  %13485 = vmatmul.mubr.msk.f32.gmra.mxu1 %vm742_vm4, %v2577_v14  ;;  %v3257_v13 = vld [vmem:[#allocation2 + $0x2b] sm:$0xff]  ;;  %v3495_v14 = vld [vmem:[#allocation3 + $0x6b] sm:$0xff] }
 0x163   : > { %13449 = vmatprep.mubr.msk.f32.mxu0 %vm742_vm4, %v2340_v15  ;;  %13515 = vmatprep.mubr.msk.f32.mxu1 %vm742_vm4, %v15011_v17  ;;  %v2343_v17 = vld [vmem:[#allocation2 + $0x5d] sm:$0xff]  ;;  %v3258_v15 = vld [vmem:[#allocation2 + $0x33] sm:$0xff] }
 0x166   : > { %13450 = vmatmul.mubr.msk.f32.gmra.mxu0 %vm742_vm4, %v2341_v16  ;;  %13516 = vmatmul.mubr.msk.f32.vlgmr.msra.gmra.mxu1 %vm742_vm4, %v3023_v21  ;;  %v3496_v16 = vld [vmem:[#allocation3 + $0x73] sm:$0xff] }
 0x167   : > { %13452 = vmatprep.mubr.msk.f32.mxu0 %vm742_vm4, %v2342_v22  ;;  %13518 = vmatprep.mubr.msk.f32.mxu1 %vm742_vm4, %v3024_v23  ;;  %v3259_v21 = vld [vmem:[#allocation2 + $0x3b] sm:$0xff]  ;;  %v3497_v22 = vld [vmem:[#allocation3 + $0x7b] sm:$0xff] }
 0x168   : > { %13566 = vmatpush3.msk.msra.mxu1 %vm1067_vm3, %v15071_v52  ;;  %v3037_v52 = vld [vmem:[#allocation3 + $0x7c] sm:$0xff] }
 0x169   : > { %13617 = vmatprep.subr.msk.mxu1 %vm1067_vm3, %v15123_v24  ;;  %v3260_v23 = vld [vmem:[#allocation2 + $0x43] sm:$0xff] }
 0x16a   : > { %13453 = vmatmul.mubr.msk.f32.gmra.mxu0 %vm742_vm4, %v2343_v17  ;;  %13519 = vmatmul.mubr.msk.f32.gmra.mxu1 %vm742_vm4, %v3025_v29  ;;  %v3943_v17 = vld [vmem:[#allocation3 + $0xa] sm:$0xff] }
 0x16b   : > { %13455 = vmatprep.mubr.msk.f32.mxu0 %vm742_vm4, %v2344_v30  ;;  %13521 = vmatprep.mubr.msk.f32.mxu1 %vm742_vm4, %v3026_v31  ;;  %v3262_v30 = vld [vmem:[#allocation2 + $0x53] sm:$0xff] }
 0x16c   : > { %v3944_v31 = vld [vmem:[#allocation3 + $0x12] sm:$0xff] }
 0x16e   : > { %13456 = vmatmul.mubr.msk.f32.gmra.mxu0 %vm742_vm4, %v2345_v33  ;;  %13522 = vmatmul.mubr.msk.f32.gmra.mxu1 %vm742_vm4, %v3027_v34  ;;  %v3263_v34 = vld [vmem:[#allocation2 + $0x5b] sm:$0xff] }
 0x16f   : > { %13458 = vmatprep.mubr.msk.f32.mxu0 %vm742_vm4, %v2346_v35  ;;  %13524 = vmatprep.mubr.msk.f32.mxu1 %vm742_vm4, %v3028_v36  ;;  %v3945_v35 = vld [vmem:[#allocation3 + $0x1a] sm:$0xff] }
 0x170   : > { %v3264_v36 = vld [vmem:[#allocation2 + $0x63] sm:$0xff] }
 0x172   : > { %13459 = vmatmul.mubr.msk.f32.gmra.mxu0 %vm742_vm4, %v2347_v37  ;;  %13525 = vmatmul.mubr.msk.f32.gmra.mxu1 %vm742_vm4, %v3029_v27  ;;  %v3946_v37 = vld [vmem:[#allocation3 + $0x22] sm:$0xff] }
 0x173   : > { %13489 = vmatprep.mubr.msk.f32.mxu0 %vm742_vm4, %v15027_v25  ;;  %13527 = vmatprep.mubr.msk.f32.mxu1 %vm742_vm4, %v3030_v38  ;;  %v2795_v25 = vld [vmem:[#allocation2 + $0x1c] sm:$0xff]  ;;  %v3265_v38 = vld [vmem:[#allocation2 + $0x6b] sm:$0xff] }
 0x176   : > { %13490 = vmatmul.mubr.msk.f32.vlgmr.msra.gmra.mxu0 %vm742_vm4, %v2793_v39  ;;  %13528 = vmatmul.mubr.msk.f32.gmra.mxu1 %vm742_vm4, %v3031_v40  ;;  %v3947_v39 = vld [vmem:[#allocation3 + $0x2a] sm:$0xff] }
 0x177   : > { %13492 = vmatprep.mubr.msk.f32.mxu0 %vm742_vm4, %v2794_v41  ;;  %13530 = vmatprep.mubr.msk.f32.mxu1 %vm742_vm4, %v3032_v42  ;;  %v3266_v41 = vld [vmem:[#allocation2 + $0x73] sm:$0xff] }
 0x178   : > { %13540 = vmatpush3.msk.msra.mxu0 %vm1067_vm3, %v15097_v4  ;;  %v3490_v4 = vld [vmem:[#allocation3 + $0x43] sm:$0xff]  ;;  %v3948_v42 = vld [vmem:[#allocation3 + $0x32] sm:$0xff] }
 0x179   : > { %13591 = vmatprep.subr.msk.mxu0 %vm1067_vm3, %v15149_v43 }
 0x17a   : > { %13493 = vmatmul.mubr.msk.f32.gmra.mxu0 %vm742_vm4, %v2795_v25  ;;  %13531 = vmatmul.mubr.msk.f32.gmra.mxu1 %vm742_vm4, %v3033_v44  ;;  %v3267_v25 = vld [vmem:[#allocation2 + $0x7b] sm:$0xff] }
 0x17b   : > { %13495 = vmatprep.mubr.msk.f32.mxu0 %vm742_vm4, %v2796_v45  ;;  %13533 = vmatprep.mubr.msk.f32.mxu1 %vm742_vm4, %v3034_v46  ;;  %v3949_v44 = vld [vmem:[#allocation3 + $0x3a] sm:$0xff]  ;;  %v3950_v46 = vld [vmem:[#allocation3 + $0x42] sm:$0xff] }
 0x17e   : > { %13496 = vmatmul.mubr.msk.f32.gmra.mxu0 %vm742_vm4, %v2797_v47  ;;  %13534 = vmatmul.mubr.msk.f32.gmra.mxu1 %vm742_vm4, %v3035_v48  ;;  %v3713_v48 = vld [vmem:[#allocation2 + $0xa] sm:$0xff] }
 0x17f   : > { %13498 = vmatprep.mubr.msk.f32.mxu0 %vm742_vm4, %v2798_v49  ;;  %13536 = vmatprep.mubr.msk.f32.mxu1 %vm742_vm4, %v3036_v50  ;;  %v3951_v49 = vld [vmem:[#allocation3 + $0x4a] sm:$0xff] }
 0x182   : > { %13499 = vmatmul.mubr.msk.f32.gmra.mxu0 %vm742_vm4, %v2799_v51  ;;  %13537 = vmatmul.mubr.msk.f32.gmra.mxu1 %vm742_vm4, %v3037_v52  ;;  %v3714_v52 = vld [vmem:[#allocation2 + $0x12] sm:$0xff] }
 0x183   : > { %13501 = vmatprep.mubr.msk.f32.mxu0 %vm742_vm4, %v2800_v53  ;;  %13567 = vmatprep.mubr.msk.f32.mxu1 %vm742_vm4, %v15013_v18  ;;  %v2803_v18 = vld [vmem:[#allocation2 + $0x5c] sm:$0xff] }
 0x184   : > { %v3952_v53 = vld [vmem:[#allocation3 + $0x52] sm:$0xff] }
 0x186   : > { %13502 = vmatmul.mubr.msk.f32.gmra.mxu0 %vm742_vm4, %v2801_v54  ;;  %13568 = vmatmul.mubr.msk.f32.vlgmr.msra.gmra.mxu1 %vm742_vm4, %v3483_v55 }
 0x187   : > { %13504 = vmatprep.mubr.msk.f32.mxu0 %vm742_vm4, %v2802_v56  ;;  %13570 = vmatprep.mubr.msk.f32.mxu1 %vm742_vm4, %v3484_v57  ;;  %v3715_v57 = vld [vmem:[#allocation2 + $0x1a] sm:$0xff] }
 0x188   : > { %13618 = vmatpush3.msk.msra.mxu1 %vm1067_vm3, %v15123_v24  ;;  %v3261_v24 = vld [vmem:[#allocation2 + $0x4b] sm:$0xff] }
 0x189   : > { %13669 = vmatprep.subr.msk.mxu1 %vm1067_vm3, %v15175_v58 }
 0x18a   : > { %13505 = vmatmul.mubr.msk.f32.gmra.mxu0 %vm742_vm4, %v2803_v18  ;;  %13571 = vmatmul.mubr.msk.f32.gmra.mxu1 %vm742_vm4, %v3485_v59 }
 0x18b   : > { %13507 = vmatprep.mubr.msk.f32.mxu0 %vm742_vm4, %v2804_v60  ;;  %13573 = vmatprep.mubr.msk.f32.mxu1 %vm742_vm4, %v3486_v61  ;;  %v3716_v60 = vld [vmem:[#allocation2 + $0x22] sm:$0xff]  ;;  %v3954_v61 = vld [vmem:[#allocation3 + $0x62] sm:$0xff] }
 0x18e   : > { %13508 = vmatmul.mubr.msk.f32.gmra.mxu0 %vm742_vm4, %v2805_v62  ;;  %13574 = vmatmul.mubr.msk.f32.gmra.mxu1 %vm742_vm4, %v3487_v63 }
 0x18f   : > { %13510 = vmatprep.mubr.msk.f32.mxu0 %vm742_vm4, %v2806_v0  ;;  %13576 = vmatprep.mubr.msk.f32.mxu1 %vm742_vm4, %v3488_v1 }
 0x192   : > { %13511 = vmatmul.mubr.msk.f32.gmra.mxu0 %vm742_vm4, %v2807_v2  ;;  %13577 = vmatmul.mubr.msk.f32.gmra.mxu1 %vm742_vm4, %v3489_v3  ;;  %v3717_v2 = vld [vmem:[#allocation2 + $0x2a] sm:$0xff]  ;;  %v3955_v3 = vld [vmem:[#allocation3 + $0x6a] sm:$0xff] }
 0x193   : > { %13541 = vmatprep.mubr.msk.f32.mxu0 %vm742_vm4, %v15029_v26  ;;  %13579 = vmatprep.mubr.msk.f32.mxu1 %vm742_vm4, %v3490_v4  ;;  %v3255_v26 = vld [vmem:[#allocation2 + $0x1b] sm:$0xff] }
 0x196   : > { %13542 = vmatmul.mubr.msk.f32.vlgmr.msra.gmra.mxu0 %vm742_vm4, %v3253_v5  ;;  %13580 = vmatmul.mubr.msk.f32.gmra.mxu1 %vm742_vm4, %v3491_v6  ;;  %v3718_v6 = vld [vmem:[#allocation2 + $0x32] sm:$0xff] }
 0x197   : > { %13544 = vmatprep.mubr.msk.f32.mxu0 %vm742_vm4, %v3254_v7  ;;  %13582 = vmatprep.mubr.msk.f32.mxu1 %vm742_vm4, %v3492_v8  ;;  %v3956_v7 = vld [vmem:[#allocation3 + $0x72] sm:$0xff] }
 0x198   : > { %13592 = vmatpush3.msk.msra.mxu0 %vm1067_vm3, %v15149_v43 }
 0x199   : > { %13643 = vmatprep.subr.msk.mxu0 %vm1067_vm3, %v15201_v9 }
 0x19a   : > { %13545 = vmatmul.mubr.msk.f32.gmra.mxu0 %vm742_vm4, %v3255_v26  ;;  %13583 = vmatmul.mubr.msk.f32.gmra.mxu1 %vm742_vm4, %v3493_v10 }
 0x19b   : > { %13547 = vmatprep.mubr.msk.f32.mxu0 %vm742_vm4, %v3256_v11  ;;  %13585 = vmatprep.mubr.msk.f32.mxu1 %vm742_vm4, %v3494_v12  ;;  %v3719_v11 = vld [vmem:[#allocation2 + $0x3a] sm:$0xff]  ;;  %v3957_v12 = vld [vmem:[#allocation3 + $0x7a] sm:$0xff] }
 0x19e   : > { %13548 = vmatmul.mubr.msk.f32.gmra.mxu0 %vm742_vm4, %v3257_v13  ;;  %13586 = vmatmul.mubr.msk.f32.gmra.mxu1 %vm742_vm4, %v3495_v14 }
 0x19f   : > { %13550 = vmatprep.mubr.msk.f32.mxu0 %vm742_vm4, %v3258_v15  ;;  %13588 = vmatprep.mubr.msk.f32.mxu1 %vm742_vm4, %v3496_v16  ;;  %v3720_v15 = vld [vmem:[#allocation2 + $0x42] sm:$0xff] }
 0x1a2   : > { %13551 = vmatmul.mubr.msk.f32.gmra.mxu0 %vm742_vm4, %v3259_v21  ;;  %13589 = vmatmul.mubr.msk.f32.gmra.mxu1 %vm742_vm4, %v3497_v22 }
 0x1a3   : > { %13553 = vmatprep.mubr.msk.f32.mxu0 %vm742_vm4, %v3260_v23  ;;  %13619 = vmatprep.mubr.msk.f32.mxu1 %vm742_vm4, %v15015_v19 }
 0x1a6   : > { %v13309_v29 = vpop.f32.mrf.mxu1  ;;  %13554 = vmatmul.mubr.msk.f32.gmra.mxu0 %vm742_vm4, %v3261_v24  ;;  %13620 = vmatmul.mubr.msk.f32.vlgmr.msra.gmra.mxu1 %vm742_vm4, %v3943_v17  ;;  %v3721_v24 = vld [vmem:[#allocation2 + $0x4a] sm:$0xff] }
 0x1a7   : > { %13556 = vmatprep.mubr.msk.f32.mxu0 %vm742_vm4, %v3262_v30  ;;  %13622 = vmatprep.mubr.msk.f32.mxu1 %vm742_vm4, %v3944_v31  ;;  %v4403_v17 = vld [vmem:[#allocation3 + $0x9] sm:$0xff] }
 0x1a8   : > { %v1333_v33 = vpop.f32.mrf.mxu1  ;;  %13670 = vmatpush3.msk.msra.mxu1 %vm1067_vm3, %v15175_v58  ;;  %v3953_v58 = vld [vmem:[#allocation3 + $0x5a] sm:$0xff]  ;;  %v3722_v31 = vld [vmem:[#allocation2 + $0x52] sm:$0xff] }
 0x1aa   : > { %v13312_v19 = vpop.f32.mrf.mxu1  ;;  %13557 = vmatmul.mubr.msk.f32.gmra.mxu0 %vm742_vm4, %v3263_v34  ;;  %13623 = vmatmul.mubr.msk.f32.gmra.mxu1 %vm742_vm4, %v3945_v35 }
 0x1ab   : > { %13559 = vmatprep.mubr.msk.f32.mxu0 %vm742_vm4, %v3264_v36  ;;  %13625 = vmatprep.mubr.msk.f32.mxu1 %vm742_vm4, %v3946_v37  ;;  %v3723_v36 = vld [vmem:[#allocation2 + $0x5a] sm:$0xff] }
 0x1ac   : > { %v1343_v27 = vpop.f32.mrf.mxu1  ;;  %v4405_v37 = vld [vmem:[#allocation3 + $0x19] sm:$0xff] }
 0x1ae   : > { %v13315_v40 = vpop.f32.mrf.mxu1  ;;  %13560 = vmatmul.mubr.msk.f32.gmra.mxu0 %vm742_vm4, %v3265_v38  ;;  %13626 = vmatmul.mubr.msk.f32.gmra.mxu1 %vm742_vm4, %v3947_v39  ;;  %v3724_v39 = vld [vmem:[#allocation2 + $0x62] sm:$0xff] }
 0x1af   : > { %13562 = vmatprep.mubr.msk.f32.mxu0 %vm742_vm4, %v3266_v41  ;;  %13628 = vmatprep.mubr.msk.f32.mxu1 %vm742_vm4, %v3948_v42 }
 0x1b0   : > { %v1353_v43 = vpop.f32.mrf.mxu1 }
 0x1b2   : > { %v13318_v45 = vpop.f32.mrf.mxu1  ;;  %13563 = vmatmul.mubr.msk.f32.gmra.mxu0 %vm742_vm4, %v3267_v25  ;;  %13629 = vmatmul.mubr.msk.f32.gmra.mxu1 %vm742_vm4, %v3949_v44  ;;  %v3725_v44 = vld [vmem:[#allocation2 + $0x6a] sm:$0xff] }
 0x1b3   : > { %13593 = vmatprep.mubr.msk.f32.mxu0 %vm742_vm4, %v15031_v28  ;;  %13631 = vmatprep.mubr.msk.f32.mxu1 %vm742_vm4, %v3950_v46 }
 0x1b4   : > { %v1363_v47 = vpop.f32.mrf.mxu1 }
 0x1b6   : > { %v13283_v50 = vpop.f32.mrf.mxu0  ;;  %v13321_v51 = vpop.f32.mrf.mxu1  ;;  %13594 = vmatmul.mubr.msk.f32.vlgmr.msra.gmra.mxu0 %vm742_vm4, %v3713_v48  ;;  %13632 = vmatmul.mubr.msk.f32.gmra.mxu1 %vm742_vm4, %v3951_v49  ;;  %v3726_v48 = vld [vmem:[#allocation2 + $0x72] sm:$0xff] }
 0x1b7   : > { %v15243_v54 = vadd.f32 %v13309_v29, %v13283_v50  ;;  %13596 = vmatprep.mubr.msk.f32.mxu0 %vm742_vm4, %v3714_v52  ;;  %13634 = vmatprep.mubr.msk.f32.mxu1 %vm742_vm4, %v3952_v53  ;;  %v4408_v49 = vld [vmem:[#allocation3 + $0x31] sm:$0xff] }
 0x1b8   : > { %13644 = vmatpush3.msk.msra.mxu0 %vm1067_vm3, %v15201_v9  ;;  %v1137_v28 = vpop.f32.mrf.mxu0  ;;  %v1373_v55 = vpop.f32.mrf.mxu1 }
 0x1b9   : > { %v15249_v56 = vadd.f32 %v1333_v33, %v1137_v28  ;;  %v4404_v33 = vld [vmem:[#allocation3 + $0x11] sm:$0xff] }
 0x1ba   : > { %v13286_v18 = vpop.f32.mrf.mxu0  ;;  %v13324_v59 = vpop.f32.mrf.mxu1  ;;  %13597 = vmatmul.mubr.msk.f32.gmra.mxu0 %vm742_vm4, %v3715_v57  ;;  %13635 = vmatmul.mubr.msk.f32.gmra.mxu1 %vm742_vm4, %v3953_v58  ;;  %v3727_v28 = vld [vmem:[#allocation2 + $0x7a] sm:$0xff] }
 0x1bb   : > { %v15253_v62 = vadd.f32 %v13312_v19, %v13286_v18  ;;  %13599 = vmatprep.mubr.msk.f32.mxu0 %vm742_vm4, %v3716_v60  ;;  %13637 = vmatprep.mubr.msk.f32.mxu1 %vm742_vm4, %v3954_v61  ;;  %v4410_v18 = vld [vmem:[#allocation3 + $0x41] sm:$0xff] }
 0x1bc   : > { %v1147_v63 = vpop.f32.mrf.mxu0  ;;  %v1383_v0 = vpop.f32.mrf.mxu1 }
 0x1bd   : > { %v15257_v1 = vadd.f32 %v1343_v27, %v1147_v63 }
 0x1be   : > { %v13289_v4 = vpop.f32.mrf.mxu0  ;;  %v13327_v5 = vpop.f32.mrf.mxu1  ;;  %13600 = vmatmul.mubr.msk.f32.gmra.mxu0 %vm742_vm4, %v3717_v2  ;;  %13638 = vmatmul.mubr.msk.f32.gmra.mxu1 %vm742_vm4, %v3955_v3  ;;  %v4411_v2 = vld [vmem:[#allocation3 + $0x49] sm:$0xff] }
 0x1bf   : > { %v15261_v8 = vadd.f32 %v13315_v40, %v13289_v4  ;;  %13602 = vmatprep.mubr.msk.f32.mxu0 %vm742_vm4, %v3718_v6  ;;  %13640 = vmatprep.mubr.msk.f32.mxu1 %vm742_vm4, %v3956_v7  ;;  %v4406_v40 = vld [vmem:[#allocation3 + $0x21] sm:$0xff]  ;;  %v4412_v6 = vld [vmem:[#allocation3 + $0x51] sm:$0xff] }
 0x1c0   : > { %v1157_v9 = vpop.f32.mrf.mxu0  ;;  %v1393_v26 = vpop.f32.mrf.mxu1 }
 0x1c1   : > { %v15265_v10 = vadd.f32 %v1353_v43, %v1157_v9 }
 0x1c2   : > { %v13292_v13 = vpop.f32.mrf.mxu0  ;;  %v13330_v14 = vpop.f32.mrf.mxu1  ;;  %13603 = vmatmul.mubr.msk.f32.gmra.mxu0 %vm742_vm4, %v3719_v11  ;;  %13641 = vmatmul.mubr.msk.f32.gmra.mxu1 %vm742_vm4, %v3957_v12  ;;  %v4413_v11 = vld [vmem:[#allocation3 + $0x59] sm:$0xff] }
 0x1c3   : > { %v15269_v16 = vadd.f32 %v13318_v45, %v13292_v13  ;;  %13605 = vmatprep.mubr.msk.f32.mxu0 %vm742_vm4, %v3720_v15  ;;  %13671 = vmatprep.mubr.msk.f32.mxu1 %vm742_vm4, %v15017_v20  ;;  %v4407_v45 = vld [vmem:[#allocation3 + $0x29] sm:$0xff]  ;;  %v4414_v15 = vld [vmem:[#allocation3 + $0x61] sm:$0xff] }
 0x1c4   : > { %v1167_v21 = vpop.f32.mrf.mxu0  ;;  %v1403_v22 = vpop.f32.mrf.mxu1 }
 0x1c5   : > { %v15274_v23 = vadd.f32 %v1363_v47, %v1167_v21 }
 0x1c6   : > { %v13295_v29 = vpop.f32.mrf.mxu0  ;;  %v15276_v30 = vpop.f32.mrf.mxu1  ;;  %13606 = vmatmul.mubr.msk.f32.gmra.mxu0 %vm742_vm4, %v3721_v24  ;;  %13672 = vmatmul.mubr.msk.f32.vlgmr.msra.gmra.mxu1 %vm742_vm4, %v4403_v17  ;;  %v4177_v17 = vld [vmem:[#allocation2 + $0x29] sm:$0xff] }
 0x1c7   : > { %v15280_v34 = vadd.f32 %v13321_v51, %v13295_v29  ;;  %13608 = vmatprep.mubr.msk.f32.mxu0 %vm742_vm4, %v3722_v31  ;;  %13674 = vmatprep.mubr.msk.f32.mxu1 %vm742_vm4, %v4404_v33  ;;  %v4415_v29 = vld [vmem:[#allocation3 + $0x69] sm:$0xff] }
 0x1c8   : > { %v1177_v20 = vpop.f32.mrf.mxu0  ;;  %v15284_v35 = vpop.f32.mrf.mxu1 }
 0x1c9   : > { %v15286_v19 = vadd.f32 %v1373_v55, %v1177_v20  ;;  %v4409_v55 = vld [vmem:[#allocation3 + $0x39] sm:$0xff]  ;;  %v4416_v20 = vld [vmem:[#allocation3 + $0x71] sm:$0xff] }
 0x1ca   : > { %v13298_v27 = vpop.f32.mrf.mxu0  ;;  %v15288_v38 = vpop.f32.mrf.mxu1  ;;  %13609 = vmatmul.mubr.msk.f32.gmra.mxu0 %vm742_vm4, %v3723_v36  ;;  %13675 = vmatmul.mubr.msk.f32.gmra.mxu1 %vm742_vm4, %v4405_v37 }
 0x1cb   : > { %v15292_v41 = vadd.f32 %v13324_v59, %v13298_v27  ;;  %13611 = vmatprep.mubr.msk.f32.mxu0 %vm742_vm4, %v3724_v39  ;;  %13677 = vmatprep.mubr.msk.f32.mxu1 %vm742_vm4, %v4406_v40  ;;  %v4417_v39 = vld [vmem:[#allocation3 + $0x79] sm:$0xff] }
 0x1cc   : > { %v1187_v42 = vpop.f32.mrf.mxu0  ;;  %v15296_v43 = vpop.f32.mrf.mxu1 }
 0x1cd   : > { %v15298_v25 = vadd.f32 %v1383_v0, %v1187_v42  ;;  %v4173_v0 = vld [vmem:[#allocation2 + $0x9] sm:$0xff] }
 0x1ce   : > { %v13301_v46 = vpop.f32.mrf.mxu0  ;;  %v15300_v47 = vpop.f32.mrf.mxu1  ;;  %13612 = vmatmul.mubr.msk.f32.gmra.mxu0 %vm742_vm4, %v3725_v44  ;;  %13678 = vmatmul.mubr.msk.f32.gmra.mxu1 %vm742_vm4, %v4407_v45 }
 0x1cf   : > { %v15304_v50 = vadd.f32 %v13327_v5, %v13301_v46  ;;  %13614 = vmatprep.mubr.msk.f32.mxu0 %vm742_vm4, %v3726_v48  ;;  %13680 = vmatprep.mubr.msk.f32.mxu1 %vm742_vm4, %v4408_v49  ;;  %v4174_v5 = vld [vmem:[#allocation2 + $0x11] sm:$0xff]  ;;  %v4181_v49 = vld [vmem:[#allocation2 + $0x49] sm:$0xff] }
 0x1d0   : > { %v1197_v51 = vpop.f32.mrf.mxu0  ;;  %v15308_v52 = vpop.f32.mrf.mxu1 }
 0x1d1   : > { %v15310_v53 = vadd.f32 %v1393_v26, %v1197_v51  ;;  %v4175_v26 = vld [vmem:[#allocation2 + $0x19] sm:$0xff] }
 0x1d2   : > { %v13304_v57 = vpop.f32.mrf.mxu0  ;;  %v15312_v58 = vpop.f32.mrf.mxu1  ;;  %13615 = vmatmul.mubr.msk.f32.gmra.mxu0 %vm742_vm4, %v3727_v28  ;;  %13681 = vmatmul.mubr.msk.f32.gmra.mxu1 %vm742_vm4, %v4409_v55  ;;  %v4182_v55 = vld [vmem:[#allocation2 + $0x51] sm:$0xff] }
 0x1d3   : > { %v15316_v59 = vadd.f32 %v13330_v14, %v13304_v57  ;;  %13645 = vmatprep.mubr.msk.f32.mxu0 %vm742_vm4, %v15035_v32  ;;  %13683 = vmatprep.mubr.msk.f32.mxu1 %vm742_vm4, %v4410_v18 }
 0x1d4   : > { %v1207_v60 = vpop.f32.mrf.mxu0  ;;  %v15321_v61 = vpop.f32.mrf.mxu1 }
 0x1d5   : > { %v15323_v63 = vadd.f32 %v1403_v22, %v1207_v60  ;;  %v4183_v60 = vld [vmem:[#allocation2 + $0x59] sm:$0xff] }
 0x1d6   : > { %v13335_v3 = vpop.f32.mrf.mxu0  ;;  %v13373_v4 = vpop.f32.mrf.mxu1  ;;  %13646 = vmatmul.mubr.msk.f32.vlgmr.msra.gmra.mxu0 %vm742_vm4, %v4173_v0  ;;  %13684 = vmatmul.mubr.msk.f32.gmra.mxu1 %vm742_vm4, %v4411_v2 }
 0x1d7   : > { %v1627_v7 = vadd.f32 %v13335_v3, %v15243_v54  ;;  %13648 = vmatprep.mubr.msk.f32.mxu0 %vm742_vm4, %v4174_v5  ;;  %13686 = vmatprep.mubr.msk.f32.mxu1 %vm742_vm4, %v4412_v6  ;;  %v4176_v54 = vld [vmem:[#allocation2 + $0x21] sm:$0xff] }
 0x1d8   : > { %v15330_v32 = vpop.f32.mrf.mxu0  ;;  %v15332_v9 = vpop.f32.mrf.mxu1 }
 0x1d9   : > { %v15335_v12 = vadd.f32 %v15276_v30, %v1627_v7  ;;  %v4185_v7 = vld [vmem:[#allocation2 + $0x69] sm:$0xff] }
 0x1da   : > { %v13338_v13 = vpop.f32.mrf.mxu0  ;;  %v13376_v14 = vpop.f32.mrf.mxu1  ;;  %13649 = vmatmul.mubr.msk.f32.gmra.mxu0 %vm742_vm4, %v4175_v26  ;;  %13687 = vmatmul.mubr.msk.f32.gmra.mxu1 %vm742_vm4, %v4413_v11 }
 0x1db   : > { %v1629_v21 = vadd.f32 %v13338_v13, %v15253_v62  ;;  %13651 = vmatprep.mubr.msk.f32.mxu0 %vm742_vm4, %v4176_v54  ;;  %13689 = vmatprep.mubr.msk.f32.mxu1 %vm742_vm4, %v4414_v15  ;;  %v4178_v62 = vld [vmem:[#allocation2 + $0x31] sm:$0xff] }
 0x1dc   : > { %v15342_v22 = vpop.f32.mrf.mxu0  ;;  %v15344_v24 = vpop.f32.mrf.mxu1 }
 0x1dd   : > { %v15347_v30 = vadd.f32 %v15288_v38, %v1629_v21  ;;  %v4179_v38 = vld [vmem:[#allocation2 + $0x39] sm:$0xff] }
 0x1de   : > { %v13341_v31 = vpop.f32.mrf.mxu0  ;;  %v13379_v33 = vpop.f32.mrf.mxu1  ;;  %13652 = vmatmul.mubr.msk.f32.gmra.mxu0 %vm742_vm4, %v4177_v17  ;;  %13690 = vmatmul.mubr.msk.f32.gmra.mxu1 %vm742_vm4, %v4415_v29  ;;  %v4187_v21 = vld [vmem:[#allocation2 + $0x79] sm:$0xff] }
 0x1df   : > { %v1631_v36 = vadd.f32 %v13341_v31, %v15261_v8  ;;  %13654 = vmatprep.mubr.msk.f32.mxu0 %vm742_vm4, %v4178_v62  ;;  %13692 = vmatprep.mubr.msk.f32.mxu1 %vm742_vm4, %v4416_v20  ;;  %v4180_v8 = vld [vmem:[#allocation2 + $0x41] sm:$0xff] }
 0x1e0   : > { %v15354_v37 = vpop.f32.mrf.mxu0  ;;  %v15356_v27 = vpop.f32.mrf.mxu1 }
 0x1e1   : > { %17559 = vst [vmem:[#allocation7_spill] sm:$0xff] %v15356_v27  ;;  %v15359_v40 = vadd.f32 %v15300_v47, %v1631_v36 }
 0x1e2   : > { %v13344_v42 = vpop.f32.mrf.mxu0  ;;  %v13382_v44 = vpop.f32.mrf.mxu1  ;;  %13655 = vmatmul.mubr.msk.f32.gmra.mxu0 %vm742_vm4, %v4179_v38  ;;  %13693 = vmatmul.mubr.msk.f32.gmra.mxu1 %vm742_vm4, %v4417_v39 }
 0x1e3   : > { %v1633_v45 = vadd.f32 %v13344_v42, %v15269_v16  ;;  %13657 = vmatprep.mubr.msk.f32.mxu0 %vm742_vm4, %v4180_v8 }
 0x1e4   : > { %v15365_v46 = vpop.f32.mrf.mxu0  ;;  %v15367_v48 = vpop.f32.mrf.mxu1 }
 0x1e5   : > { %17560 = vst [vmem:[#allocation8_spill] sm:$0xff] %v15367_v48  ;;  %v1863_v51 = vadd.f32 %v15312_v58, %v1633_v45  ;;  %v4184_v58 = vld [vmem:[#allocation2 + $0x61] sm:$0xff] }
 0x1e6   : > { %v13347_v47 = vpop.f32.mrf.mxu0  ;;  %v13413_v28 = vpop.f32.mrf.mxu1  ;;  %13658 = vmatmul.mubr.msk.f32.gmra.mxu0 %vm742_vm4, %v4181_v49 }
 0x1e7   : > { %v1635_v57 = vadd.f32 %v13347_v47, %v15280_v34  ;;  %13660 = vmatprep.mubr.msk.f32.mxu0 %vm742_vm4, %v4182_v55 }
 0x1e8   : > { %v15373_v18 = vpop.f32.mrf.mxu0  ;;  %v15375_v16 = vpop.f32.mrf.mxu1 }
 0x1e9   : > { %v1865_v0 = vadd.f32 %v13373_v4, %v1635_v57  ;;  %v4186_v4 = vld [vmem:[#allocation2 + $0x71] sm:$0xff] }
 0x1ea   : > { %v13350_v2 = vpop.f32.mrf.mxu0  ;;  %v13416_v3 = vpop.f32.mrf.mxu1  ;;  %13661 = vmatmul.mubr.msk.f32.gmra.mxu0 %vm742_vm4, %v4183_v60 }
 0x1eb   : > { %v1637_v5 = vadd.f32 %v13350_v2, %v15292_v41  ;;  %13663 = vmatprep.mubr.msk.f32.mxu0 %vm742_vm4, %v4184_v58 }
 0x1ec   : > { %v15380_v6 = vpop.f32.mrf.mxu0  ;;  %v15382_v34 = vpop.f32.mrf.mxu1 }
 0x1ed   : > { %v1867_v26 = vadd.f32 %v13376_v14, %v1637_v5 }
 0x1ee   : > { %v13353_v11 = vpop.f32.mrf.mxu0  ;;  %v13419_v13 = vpop.f32.mrf.mxu1  ;;  %13664 = vmatmul.mubr.msk.f32.gmra.mxu0 %vm742_vm4, %v4185_v7 }
 0x1ef   : > { %v1639_v54 = vadd.f32 %v13353_v11, %v15304_v50  ;;  %13666 = vmatprep.mubr.msk.f32.mxu0 %vm742_vm4, %v4186_v4 }
 0x1f0   : > { %v15387_v15 = vpop.f32.mrf.mxu0  ;;  %v15389_v41 = vpop.f32.mrf.mxu1 }
 0x1f1   : > { %v1869_v17 = vadd.f32 %v13379_v33, %v1639_v54 }
 0x1f2   : > { %v13356_v29 = vpop.f32.mrf.mxu0  ;;  %v13422_v31 = vpop.f32.mrf.mxu1  ;;  %13667 = vmatmul.mubr.msk.f32.gmra.mxu0 %vm742_vm4, %v4187_v21 }
 0x1f3   : > { %v1641_v14 = vadd.f32 %v13356_v29, %v15316_v59 }
 0x1f4   : > { %v15393_v62 = vpop.f32.mrf.mxu0  ;;  %v15395_v20 = vpop.f32.mrf.mxu1 }
 0x1f5   : > { %17561 = vst [vmem:[#allocation9_spill] sm:$0xff] %v15395_v20  ;;  %v1871_v36 = vadd.f32 %v13382_v44, %v1641_v14 }
 0x1f6   : > { %v13387_v50 = vpop.f32.mrf.mxu0  ;;  %v13425_v38 = vpop.f32.mrf.mxu1 }
 0x1f7   : > { %v2087_v39 = vadd.f32 %v13387_v50, %v15335_v12 }
 0x1f8   : > { %v15398_v42 = vpop.f32.mrf.mxu0  ;;  %v15400_v8 = vpop.f32.mrf.mxu1 }
 0x1f9   : > { %17562 = vst [vmem:[#allocation10_spill] sm:$0xff] %v15400_v8  ;;  %v2317_v33 = vadd.f32 %v13413_v28, %v2087_v39 }
 0x1fa   : > { %v13390_v45 = vpop.f32.mrf.mxu0  ;;  %v13428_v49 = vpop.f32.mrf.mxu1 }
 0x1fb   : > { %v2089_v47 = vadd.f32 %v13390_v45, %v15347_v30 }
 0x1fc   : > { %v15403_v55 = vpop.f32.mrf.mxu0  ;;  %v15405_v59 = vpop.f32.mrf.mxu1 }
 0x1fd   : > { %17563 = vst [vmem:[#allocation11_spill] sm:$0xff] %v15405_v59  ;;  %v2319_v57 = vadd.f32 %v13416_v3, %v2089_v47 }
 0x1fe   : > { %v13393_v60 = vpop.f32.mrf.mxu0  ;;  %v13431_v44 = vpop.f32.mrf.mxu1 }
 0x1ff   : > { %v2091_v2 = vadd.f32 %v13393_v60, %v15359_v40 }
 0x200   : > { %v15408_v58 = vpop.f32.mrf.mxu0  ;;  %v15410_v12 = vpop.f32.mrf.mxu1 }
 0x201   : > { %17564 = vst [vmem:[#allocation12_spill] sm:$0xff] %v15410_v12  ;;  %v2321_v5 = vadd.f32 %v13419_v13, %v2091_v2 }
 0x202   : > { %v13396_v7 = vpop.f32.mrf.mxu0  ;;  %v13434_v28 = vpop.f32.mrf.mxu1 }
 0x203   : > { %v2093_v11 = vadd.f32 %v13396_v7, %v1863_v51 }
 0x204   : > { %v15412_v4 = vpop.f32.mrf.mxu0  ;;  %v15414_v30 = vpop.f32.mrf.mxu1 }
 0x205   : > { %17565 = vst [vmem:[#allocation13_spill] sm:$0xff] %v15414_v30  ;;  %v2323_v54 = vadd.f32 %v13422_v31, %v2093_v11 }
 0x206   : > { %v13399_v21 = vpop.f32.mrf.mxu0  ;;  %v13465_v29 = vpop.f32.mrf.mxu1 }
 0x207   : > { %v2095_v3 = vadd.f32 %v13399_v21, %v1865_v0 }
 0x208   : > { %v15416_v14 = vpop.f32.mrf.mxu0  ;;  %v15418_v50 = vpop.f32.mrf.mxu1 }
 0x209   : > { %v2325_v40 = vadd.f32 %v13425_v38, %v2095_v3 }
 0x20a   : > { %v13402_v39 = vpop.f32.mrf.mxu0  ;;  %v13468_v45 = vpop.f32.mrf.mxu1 }
 0x20b   : > { %v2097_v47 = vadd.f32 %v13402_v39, %v1867_v26 }
 0x20c   : > { %v15420_v13 = vpop.f32.mrf.mxu0  ;;  %v15422_v60 = vpop.f32.mrf.mxu1 }
 0x20d   : > { %17566 = vst [vmem:[#allocation14_spill] sm:$0xff] %v15420_v13  ;;  %v2327_v51 = vadd.f32 %v13428_v49, %v2097_v47  ;;  %v11921_v49 = vld [vmem:[%s17484_s7 + $0x8] sm:$0xff] }
 0x20e   : > { %v13405_v2 = vpop.f32.mrf.mxu0  ;;  %v13471_v7 = vpop.f32.mrf.mxu1  ;;  %13695 = vmatprep.subr.mxu0 %v11921_v49 }
 0x20f   : > { %v2099_v30 = vadd.f32 %v13405_v2, %v1869_v17  ;;  %13696 = vmatpush3.msra.mxu0 %v11921_v49 }
 0x210   : > { %v15424_v31 = vpop.f32.mrf.mxu0  ;;  %v15426_v11 = vpop.f32.mrf.mxu1 }
 0x211   : > { %17567 = vst [vmem:[#allocation15_spill] sm:$0xff] %v15424_v31  ;;  %17568 = vst [vmem:[#allocation16_spill] sm:$0xff] %v15426_v11  ;;  %v2329_v0 = vadd.f32 %v13431_v44, %v2099_v30 }
 0x212   : > { %v13408_v21 = vpop.f32.mrf.mxu0  ;;  %v13474_v12 = vpop.f32.mrf.mxu1 }
 0x213   : > { %v2101_v59 = vadd.f32 %v13408_v21, %v1871_v36 }
 0x214   : > { %v15428_v38 = vpop.f32.mrf.mxu0  ;;  %v15430_v3 = vpop.f32.mrf.mxu1 }
 0x215   : > { %17569 = vst [vmem:[#allocation17_spill] sm:$0xff] %v15428_v38  ;;  %17570 = vst [vmem:[#allocation18_spill] sm:$0xff] %v15430_v3  ;;  %v2331_v26 = vadd.f32 %v13434_v28, %v2101_v59 }
 0x216   : > { %v13439_v39 = vpop.f32.mrf.mxu0  ;;  %v13477_v47 = vpop.f32.mrf.mxu1 }
 0x217   : > { %v2547_v17 = vadd.f32 %v13439_v39, %v2317_v33 }
 0x218   : > { %v15435_v2 = vpop.f32.mrf.mxu0  ;;  %v15437_v44 = vpop.f32.mrf.mxu1 }
 0x219   : > { %17571 = vst [vmem:[#allocation19_spill] sm:$0xff] %v15437_v44  ;;  %v2777_v30 = vadd.f32 %v13465_v29, %v2547_v17 }
 0x21a   : > { %v13442_v36 = vpop.f32.mrf.mxu0  ;;  %v13480_v21 = vpop.f32.mrf.mxu1 }
 0x21b   : > { %v2549_v8 = vadd.f32 %v13442_v36, %v2319_v57 }
 0x21c   : > { %v15439_v38 = vpop.f32.mrf.mxu0  ;;  %v15441_v59 = vpop.f32.mrf.mxu1 }
 0x21d   : > { %17572 = vst [vmem:[#allocation20_spill] sm:$0xff] %v15441_v59  ;;  %v2779_v28 = vadd.f32 %v13468_v45, %v2549_v8 }
 0x21e   : > { %v13445_v3 = vpop.f32.mrf.mxu0  ;;  %v13483_v11 = vpop.f32.mrf.mxu1 }
 0x21f   : > { %v2551_v31 = vadd.f32 %v13445_v3, %v2321_v5 }
 0x220   : > { %v15443_v13 = vpop.f32.mrf.mxu0  ;;  %v15445_v33 = vpop.f32.mrf.mxu1 }
 0x221   : > { %17573 = vst [vmem:[#allocation21_spill] sm:$0xff] %v15445_v33  ;;  %v2781_v49 = vadd.f32 %v13471_v7, %v2551_v31  ;;  %v4688_v7 = vld [vmem:[%s17484_s7] sm:$0xff] }
 0x222   : > { %v13448_v39 = vpop.f32.mrf.mxu0  ;;  %v13486_v48 = vpop.f32.mrf.mxu1  ;;  %13721 = vmatprep.subr.mxu1 %v4688_v7 }
 0x223   : > { %v2553_v44 = vadd.f32 %v13448_v39, %v2323_v54  ;;  %13722 = vmatpush3.msra.mxu1 %v4688_v7 }
 0x224   : > { %v15447_v29 = vpop.f32.mrf.mxu0  ;;  %v15449_v17 = vpop.f32.mrf.mxu1 }
 0x225   : > { %17574 = vst [vmem:[#allocation22_spill] sm:$0xff] %v15447_v29  ;;  %17575 = vst [vmem:[#allocation23_spill] sm:$0xff] %v15449_v17  ;;  %v2783_v57 = vadd.f32 %v13474_v12, %v2553_v44 }
 0x226   : > { %v13451_v36 = vpop.f32.mrf.mxu0  ;;  %v13517_v20 = vpop.f32.mrf.mxu1 }
 0x227   : > { %v2555_v59 = vadd.f32 %v13451_v36, %v2325_v40 }
 0x228   : > { %v15451_v8 = vpop.f32.mrf.mxu0  ;;  %v15453_v45 = vpop.f32.mrf.mxu1 }
 0x229   : > { %17576 = vst [vmem:[#allocation24_spill] sm:$0xff] %v15451_v8  ;;  %17577 = vst [vmem:[#allocation25_spill] sm:$0xff] %v15453_v45  ;;  %v2785_v5 = vadd.f32 %v13477_v47, %v2555_v59 }
 0x22a   : > { %v13454_v31 = vpop.f32.mrf.mxu0  ;;  %v13520_v3 = vpop.f32.mrf.mxu1 }
 0x22b   : > { %v2557_v54 = vadd.f32 %v13454_v31, %v2327_v51 }
 0x22c   : > { %v15458_v39 = vpop.f32.mrf.mxu0  ;;  %v15460_v12 = vpop.f32.mrf.mxu1 }
 0x22d   : > { %17578 = vst [vmem:[#allocation26_spill] sm:$0xff] %v15458_v39  ;;  %17579 = vst [vmem:[#allocation27_spill] sm:$0xff] %v15460_v12  ;;  %v2787_v44 = vadd.f32 %v13480_v21, %v2557_v54 }
 0x22e   : > { %v13457_v40 = vpop.f32.mrf.mxu0  ;;  %v13523_v36 = vpop.f32.mrf.mxu1 }
 0x22f   : > { %v2559_v17 = vadd.f32 %v13457_v40, %v2329_v0 }
 0x230   : > { %v15462_v33 = vpop.f32.mrf.mxu0  ;;  %v15464_v47 = vpop.f32.mrf.mxu1 }
 0x231   : > { %17580 = vst [vmem:[#allocation28_spill] sm:$0xff] %v15462_v33  ;;  %17581 = vst [vmem:[#allocation29_spill] sm:$0xff] %v15464_v47  ;;  %v2789_v59 = vadd.f32 %v13483_v11, %v2559_v17 }
 0x232   : > { %v13460_v8 = vpop.f32.mrf.mxu0  ;;  %v13526_v29 = vpop.f32.mrf.mxu1 }
 0x233   : > { %v2561_v45 = vadd.f32 %v13460_v8, %v2331_v26 }
 0x234   : > { %v15466_v27 = vpop.f32.mrf.mxu0  ;;  %v15468_v51 = vpop.f32.mrf.mxu1 }
 0x235   : > { %17582 = vst [vmem:[#allocation30_spill] sm:$0xff] %v15466_v27  ;;  %17583 = vst [vmem:[#allocation31_spill] sm:$0xff] %v15468_v51  ;;  %v2791_v7 = vadd.f32 %v13486_v48, %v2561_v45 }
 0x236   : > { %v13491_v31 = vpop.f32.mrf.mxu0  ;;  %v13529_v39 = vpop.f32.mrf.mxu1 }
 0x237   : > { %v3007_v12 = vadd.f32 %v13491_v31, %v2777_v30 }
 0x238   : > { %v15470_v21 = vpop.f32.mrf.mxu0  ;;  %v15472_v54 = vpop.f32.mrf.mxu1 }
 0x239   : > { %17584 = vst [vmem:[#allocation32_spill] sm:$0xff] %v15472_v54  ;;  %v15474_v0 = vadd.f32 %v13517_v20, %v3007_v12 }
 0x23a   : > { %v13494_v40 = vpop.f32.mrf.mxu0  ;;  %v13532_v33 = vpop.f32.mrf.mxu1 }
 0x23b   : > { %v3009_v11 = vadd.f32 %v13494_v40, %v2779_v28 }
 0x23c   : > { %v15476_v17 = vpop.f32.mrf.mxu0  ;;  %v15478_v26 = vpop.f32.mrf.mxu1 }
 0x23d   : > { %17585 = vst [vmem:[#allocation33_spill] sm:$0xff] %v15478_v26  ;;  %v15480_v8 = vadd.f32 %v13520_v3, %v3009_v11 }
 0x23e   : > { %v13497_v51 = vpop.f32.mrf.mxu0  ;;  %v13535_v48 = vpop.f32.mrf.mxu1 }
 0x23f   : > { %v3011_v45 = vadd.f32 %v13497_v51, %v2781_v49  ;;  %v15499_v49 = vld [vmem:[%s17484_s7 + $0x10] sm:$0xff] }
 0x240   : > { %v15482_v27 = vpop.f32.mrf.mxu0  ;;  %v15484_v30 = vpop.f32.mrf.mxu1  ;;  %17590 = vst [vmem:[#allocation38_spill] sm:$0xff] %v15499_v49  ;;  %13747 = vmatprep.subr.mxu0 %v15499_v49 }
 0x241   : > { %17586 = vst [vmem:[#allocation34_spill] sm:$0xff] %v15484_v30  ;;  %v15486_v31 = vadd.f32 %v13523_v36, %v3011_v45  ;;  %v15504_v36 = vld [vmem:[%s17484_s7 + $0x18] sm:$0xff] }
 0x242   : > { %v13500_v20 = vpop.f32.mrf.mxu0  ;;  %v13538_v12 = vpop.f32.mrf.mxu1  ;;  %17591 = vst [vmem:[#allocation39_spill] sm:$0xff] %v15504_v36  ;;  %13773 = vmatprep.subr.mxu1 %v15504_v36 }
 0x243   : > { %17587 = vst [vmem:[#allocation35_spill] sm:$0xff] %v15486_v31  ;;  %v3013_v54 = vadd.f32 %v13500_v20, %v2783_v57 }
 0x244   : > { %v15488_v47 = vpop.f32.mrf.mxu0  ;;  %v15490_v28 = vpop.f32.mrf.mxu1 }
 0x245   : > { %17588 = vst [vmem:[#allocation36_spill] sm:$0xff] %v15490_v28  ;;  %v15492_v40 = vadd.f32 %v13526_v29, %v3013_v54 }
 0x246   : > { %v13503_v3 = vpop.f32.mrf.mxu0  ;;  %v15494_v11 = vpop.f32.mrf.mxu1 }
 0x247   : > { %17589 = vst [vmem:[#allocation37_spill] sm:$0xff] %v15492_v40  ;;  %v3015_v26 = vadd.f32 %v13503_v3, %v2785_v5 }
 0x248   : > { %v15506_v57 = vpop.f32.mrf.mxu0  ;;  %v15508_v51 = vpop.f32.mrf.mxu1 }
 0x249   : > { %17592 = vst [vmem:[#allocation40_spill] sm:$0xff] %v15506_v57  ;;  %v15512_v29 = vadd.f32 %v13529_v39, %v3015_v26 }
 0x24a   : > { %v13506_v5 = vpop.f32.mrf.mxu0  ;;  %v15514_v54 = vpop.f32.mrf.mxu1 }
 0x24b   : > { %17593 = vst [vmem:[#allocation41_spill] sm:$0xff] %v15512_v29  ;;  %v3017_v45 = vadd.f32 %v13506_v5, %v2787_v44 }
 0x24c   : > { %v15516_v20 = vpop.f32.mrf.mxu0  ;;  %v15518_v3 = vpop.f32.mrf.mxu1 }
 0x24d   : > { %17594 = vst [vmem:[#allocation42_spill] sm:$0xff] %v15516_v20  ;;  %v15520_v28 = vadd.f32 %v13532_v33, %v3017_v45 }
 0x24e   : > { %v13509_v30 = vpop.f32.mrf.mxu0  ;;  %v15522_v40 = vpop.f32.mrf.mxu1 }
 0x24f   : > { %17595 = vst [vmem:[#allocation43_spill] sm:$0xff] %v15520_v28  ;;  %17596 = vst [vmem:[#allocation44_spill] sm:$0xff] %v15522_v40  ;;  %v3019_v57 = vadd.f32 %v13509_v30, %v2789_v59 }
 0x250   : > { %v15524_v31 = vpop.f32.mrf.mxu0  ;;  %v15526_v49 = vpop.f32.mrf.mxu1 }
 0x251   : > { %17597 = vst [vmem:[#allocation45_spill] sm:$0xff] %v15524_v31  ;;  %17598 = vst [vmem:[#allocation46_spill] sm:$0xff] %v15526_v49  ;;  %v15528_v39 = vadd.f32 %v13535_v48, %v3019_v57 }
 0x252   : > { %v13512_v26 = vpop.f32.mrf.mxu0  ;;  %v15530_v36 = vpop.f32.mrf.mxu1 }
 0x253   : > { %17599 = vst [vmem:[#allocation47_spill] sm:$0xff] %v15528_v39  ;;  %17600 = vst [vmem:[#allocation48_spill] sm:$0xff] %v15530_v36  ;;  %v3021_v44 = vadd.f32 %v13512_v26, %v2791_v7 }
 0x254   : > { %v15532_v5 = vpop.f32.mrf.mxu0  ;;  %v15534_v29 = vpop.f32.mrf.mxu1 }
 0x255   : > { %17601 = vst [vmem:[#allocation49_spill] sm:$0xff] %v15532_v5  ;;  %17602 = vst [vmem:[#allocation50_spill] sm:$0xff] %v15534_v29  ;;  %v15536_v33 = vadd.f32 %v13538_v12, %v3021_v44 }
 0x256   : > { %v15538_v45 = vpop.f32.mrf.mxu0  ;;  %v15540_v28 = vpop.f32.mrf.mxu1 }
 0x257   : > { %17603 = vst [vmem:[#allocation51_spill] sm:$0xff] %v15536_v33  ;;  %17604 = vst [vmem:[#allocation52_spill] sm:$0xff] %v15540_v28 }
 0x258   : > { %v15542_v59 = vpop.f32.mrf.mxu0  ;;  %v15544_v30 = vpop.f32.mrf.mxu1 }
 0x259   : > { %17605 = vst [vmem:[#allocation53_spill] sm:$0xff] %v15544_v30 }
 0x25a   : > { %v15546_v48 = vpop.f32.mrf.mxu0  ;;  %v15548_v57 = vpop.f32.mrf.mxu1 }
 0x25b   : > { %17606 = vst [vmem:[#allocation54_spill] sm:$0xff] %v15548_v57 }
 0x25c   : > { %v15550_v39 = vpop.f32.mrf.mxu0  ;;  %v15552_v7 = vpop.f32.mrf.mxu1 }
 0x25d   : > { %17607 = vst [vmem:[#allocation55_spill] sm:$0xff] %v15552_v7 }
 0x25e   : > { %v15554_v26 = vpop.f32.mrf.mxu0  ;;  %v15556_v12 = vpop.f32.mrf.mxu1 }
 0x25f   : > { %17608 = vst [vmem:[#allocation56_spill] sm:$0xff] %v15556_v12 }
 0x260   : > { %v15558_v44 = vpop.f32.mrf.mxu0  ;;  %v15560_v33 = vpop.f32.mrf.mxu1 }
 0x261   : > { %17609 = vst [vmem:[#allocation57_spill] sm:$0xff] %v15560_v33 }
 0x262   : > { %v15562_v5 = vpop.f32.mrf.mxu0  ;;  %v15564_v28 = vpop.f32.mrf.mxu1 }
 0x263   : > { %17610 = vst [vmem:[#allocation58_spill] sm:$0xff] %v15564_v28 }
 0x264   : > { %v15566_v30 = vpop.f32.mrf.mxu0  ;;  %v15568_v29 = vpop.f32.mrf.mxu1 }
 0x265   : > { %17611 = vst [vmem:[#allocation59_spill] sm:$0xff] %v15566_v30  ;;  %17612 = vst [vmem:[#allocation60_spill] sm:$0xff] %v15568_v29 }
 0x266   : > { %v15570_v57 = vpop.f32.mrf.mxu0  ;;  %v15572_v31 = vpop.f32.mrf.mxu1 }
 0x267   : > { %17613 = vst [vmem:[#allocation61_spill] sm:$0xff] %v15570_v57 }
 0x268   : > { %v15574_v7 = vpop.f32.mrf.mxu0  ;;  %v15576_v36 = vpop.f32.mrf.mxu1 }
 0x269   : > { %17614 = vst [vmem:[#allocation62_spill] sm:$0xff] %v15574_v7  ;;  %17615 = vst [vmem:[#allocation63_spill] sm:$0xff] %v15576_v36 }
 0x26a   : > { %v15578_v12 = vpop.f32.mrf.mxu0  ;;  %v15580_v20 = vpop.f32.mrf.mxu1 }
 0x26b   : > { %17616 = vst [vmem:[#allocation64_spill] sm:$0xff] %v15578_v12  ;;  %17617 = vst [vmem:[#allocation65_spill] sm:$0xff] %v15580_v20 }
 0x26c   : > { %v15582_v33 = vpop.f32.mrf.mxu0  ;;  %v15584_v49 = vpop.f32.mrf.mxu1 }
 0x26d   : > { %17618 = vst [vmem:[#allocation66_spill] sm:$0xff] %v15582_v33  ;;  %17619 = vst [vmem:[#allocation67_spill] sm:$0xff] %v15584_v49  ;;  %v1626_v33 = vadd.f32 %v15330_v32, %v15249_v56  ;;  %v1630_v56 = vadd.f32 %v15354_v37, %v15265_v10 }
 0x26e   : > { %v15586_v28 = vpop.f32.mrf.mxu0  ;;  %v15588_v30 = vpop.f32.mrf.mxu1 }
 0x26f   : > { %17620 = vst [vmem:[#allocation68_spill] sm:$0xff] %v15586_v28  ;;  %17621 = vst [vmem:[#allocation69_spill] sm:$0xff] %v15588_v30 }
 0x270   : > { %v15590_v29 = vpop.f32.mrf.mxu0  ;;  %v15592_v57 = vpop.f32.mrf.mxu1 }
 0x271   : > { %17622 = vst [vmem:[#allocation70_spill] sm:$0xff] %v15590_v29  ;;  %17623 = vst [vmem:[#allocation71_spill] sm:$0xff] %v15592_v57 }
 0x272   : > { %v15594_v40 = vpop.f32.mrf.mxu0  ;;  %v15596_v7 = vpop.f32.mrf.mxu1 }
 0x273   : > { %17624 = vst [vmem:[#allocation72_spill] sm:$0xff] %v15594_v40  ;;  %17625 = vst [vmem:[#allocation73_spill] sm:$0xff] %v15596_v7  ;;  %v1628_v40 = vadd.f32 %v15342_v22, %v15257_v1  ;;  %v1856_v7 = vadd.f32 %v15284_v35, %v1626_v33  ;;  %v1860_v33 = vadd.f32 %v15308_v52, %v1630_v56 }
 0x274   : > { %v15598_v36 = vpop.f32.mrf.mxu0  ;;  %v15600_v12 = vpop.f32.mrf.mxu1  ;;  %v1640_v56 = vadd.f32 %v15393_v62, %v15323_v63 }
 0x275   : > { %17626 = vst [vmem:[#allocation74_spill] sm:$0xff] %v15598_v36  ;;  %17627 = vst [vmem:[#allocation75_spill] sm:$0xff] %v15600_v12  ;;  %v2086_v12 = vadd.f32 %v15398_v42, %v1856_v7  ;;  %v1632_v42 = vadd.f32 %v15365_v46, %v15274_v23 }
 0x276   : > { %v15604_v49 = vpop.f32.mrf.mxu0  ;;  %v15606_v28 = vpop.f32.mrf.mxu1 }
 0x277   : > { %17628 = vst [vmem:[#allocation76_spill] sm:$0xff] %v15606_v28  ;;  %v2316_v22 = vadd.f32 %v15375_v16, %v2086_v12  ;;  %v1634_v16 = vadd.f32 %v15373_v18, %v15286_v19  ;;  %v1862_v23 = vadd.f32 %v15321_v61, %v1632_v42  ;;  %v1638_v12 = vadd.f32 %v15387_v15, %v15310_v53  ;;  %v17632_v42 = vld [vmem:[#allocation9_spill] sm:$0xff] }
 0x278   : > { %v15608_v30 = vpop.f32.mrf.mxu0  ;;  %v15610_v29 = vpop.f32.mrf.mxu1 }
 0x279   : > { %17629 = vst [vmem:[#allocation77_spill] sm:$0xff] %v15610_v29  ;;  %v1858_v29 = vadd.f32 %v15296_v43, %v1628_v40  ;;  %v2546_v7 = vadd.f32 %v15435_v2, %v2316_v22  ;;  %v2090_v43 = vadd.f32 %v15408_v58, %v1860_v33  ;;  %v1636_v58 = vadd.f32 %v15380_v6, %v15298_v25 }
 0x27a   : > { %v15615_v57 = vpop.f32.mrf.mxu0  ;;  %v15617_v36 = vpop.f32.mrf.mxu1  ;;  %v2092_v19 = vadd.f32 %v15412_v4, %v1862_v23  ;;  %v17637_v23 = vld [vmem:[#allocation22_spill] sm:$0xff] }
 0x27b   : > { %v2088_v35 = vadd.f32 %v15403_v55, %v1858_v29  ;;  %v2776_v2 = vadd.f32 %v15418_v50, %v2546_v7  ;;  %v2320_v18 = vadd.f32 %v15389_v41, %v2090_v43  ;;  %v1866_v4 = vadd.f32 %v15344_v24, %v1636_v58  ;;  %v17636_v24 = vld [vmem:[#allocation15_spill] sm:$0xff] }
 0x27c   : > { %v15622_v32 = vpop.f32.mrf.mxu0  ;;  %v15624_v28 = vpop.f32.mrf.mxu1  ;;  %v2322_v63 = vadd.f32 %v17632_v42, %v2092_v19  ;;  %v3467_v7 = vadd.f32 %v15538_v45, %v15474_v0 }
 0x27d   : > { %v2318_v55 = vadd.f32 %v15382_v34, %v2088_v35  ;;  %v3006_v50 = vadd.f32 %v15470_v21, %v2776_v2  ;;  %v2550_v25 = vadd.f32 %v15443_v13, %v2320_v18  ;;  %v17631_v35 = vld [vmem:[#allocation7_spill] sm:$0xff]  ;;  %v17633_v21 = vld [vmem:[#allocation8_spill] sm:$0xff]  ;;  %v17639_v18 = vld [vmem:[#allocation17_spill] sm:$0xff] }
 0x27e   : > { %v15627_v20 = vpop.f32.mrf.mxu0  ;;  %v15629_v1 = vpop.f32.mrf.mxu1  ;;  %v1868_v22 = vadd.f32 %v17631_v35, %v1638_v12  ;;  %v1870_v13 = vadd.f32 %v17633_v21, %v1640_v56  ;;  %v17638_v2 = vld [vmem:[#allocation16_spill] sm:$0xff]  ;;  %v17643_v21 = vld [vmem:[#allocation11_spill] sm:$0xff] }
 0x27f   : > { %17630 = vst [vmem:[#allocation78_spill] sm:$0xff] %v15629_v1  ;;  %v2548_v29 = vadd.f32 %v15439_v38, %v2318_v55  ;;  %v1864_v38 = vadd.f32 %v15332_v9, %v1634_v16  ;;  %v2780_v58 = vadd.f32 %v17638_v2, %v2550_v25  ;;  %v3469_v25 = vadd.f32 %v15546_v48, %v15480_v8 }
 0x280   : > { %v15636_v10 = vpop.f32.mrf.mxu0  ;;  %v15638_v37 = vpop.f32.mrf.mxu1  ;;  %v2098_v55 = vadd.f32 %v17636_v24, %v1868_v22  ;;  %v2100_v56 = vadd.f32 %v17639_v18, %v1870_v13  ;;  %v17642_v22 = vld [vmem:[#allocation27_spill] sm:$0xff]  ;;  %v17646_v24 = vld [vmem:[#allocation13_spill] sm:$0xff] }
 0x281   : > { %v2094_v15 = vadd.f32 %v15416_v14, %v1864_v38  ;;  %v2778_v41 = vadd.f32 %v15422_v60, %v2548_v29  ;;  %v17634_v14 = vld [vmem:[#allocation25_spill] sm:$0xff]  ;;  %v17635_v60 = vld [vmem:[#allocation14_spill] sm:$0xff]  ;;  %v2552_v29 = vadd.f32 %v17637_v23, %v2322_v63  ;;  %v3010_v45 = vadd.f32 %v15482_v27, %v2780_v58 }
 0x282   : > { %v15642_v40 = vpop.f32.mrf.mxu0  ;;  %v15644_v1 = vpop.f32.mrf.mxu1  ;;  %v3236_v43 = vadd.f32 %v17634_v14, %v3006_v50  ;;  %v2096_v16 = vadd.f32 %v17635_v60, %v1866_v4  ;;  %v17641_v4 = vld [vmem:[#allocation24_spill] sm:$0xff]  ;;  %v3697_v63 = vadd.f32 %v15494_v11, %v3467_v7  ;;  %v2330_v23 = vadd.f32 %v17646_v24, %v2100_v56 }
 0x283   : > { %v3008_v33 = vadd.f32 %v15476_v17, %v2778_v41  ;;  %v17640_v17 = vld [vmem:[#allocation10_spill] sm:$0xff]  ;;  %v17650_v56 = vld [vmem:[#allocation28_spill] sm:$0xff] }
 0x284   : > { %v15650_v52 = vpop.f32.mrf.mxu0  ;;  %v15652_v46 = vpop.f32.mrf.mxu1  ;;  %v2324_v38 = vadd.f32 %v17640_v17, %v2094_v15  ;;  %v3466_v0 = vadd.f32 %v15542_v59, %v3236_v43  ;;  %v2326_v13 = vadd.f32 %v17643_v21, %v2096_v16  ;;  %v17644_v15 = vld [vmem:[#allocation12_spill] sm:$0xff]  ;;  %v17645_v59 = vld [vmem:[#allocation18_spill] sm:$0xff]  ;;  %v3927_v8 = vadd.f32 %v15604_v49, %v3697_v63  ;;  %v17648_v16 = vld [vmem:[#allocation35_spill] sm:$0xff] }
 0x285   : > { %v3238_v42 = vadd.f32 %v17642_v22, %v3008_v33  ;;  %v2328_v14 = vadd.f32 %v17644_v15, %v2098_v55  ;;  %v2782_v43 = vadd.f32 %v17645_v59, %v2552_v29  ;;  %v17647_v33 = vld [vmem:[#allocation26_spill] sm:$0xff]  ;;  %v3471_v55 = vadd.f32 %v15554_v26, %v17648_v16  ;;  %v17649_v29 = vld [vmem:[#allocation29_spill] sm:$0xff]  ;;  %v17653_v26 = vld [vmem:[#allocation40_spill] sm:$0xff] }
 0x286   : > { %v15662_v34 = vpop.f32.mrf.mxu0  ;;  %v15664_v61 = vpop.f32.mrf.mxu1  ;;  %v2554_v35 = vadd.f32 %v17641_v4, %v2324_v38  ;;  %v3696_v48 = vadd.f32 %v15508_v51, %v3466_v0  ;;  %v2556_v11 = vadd.f32 %v17647_v33, %v2326_v13  ;;  %v3240_v58 = vadd.f32 %v17649_v29, %v3010_v45  ;;  %v17652_v0 = vld [vmem:[#allocation30_spill] sm:$0xff]  ;;  %v17654_v15 = vld [vmem:[#allocation20_spill] sm:$0xff] }
 0x287   : > { %v3468_v2 = vadd.f32 %v15550_v39, %v3238_v42  ;;  %v3012_v7 = vadd.f32 %v15488_v47, %v2782_v43  ;;  %v2558_v38 = vadd.f32 %v17650_v56, %v2328_v14  ;;  %v17651_v39 = vld [vmem:[#allocation19_spill] sm:$0xff]  ;;  %v3699_v51 = vadd.f32 %v15514_v54, %v3469_v25  ;;  %v17655_v14 = vld [vmem:[#allocation37_spill] sm:$0xff]  ;;  %v17657_v59 = vld [vmem:[#allocation44_spill] sm:$0xff] }
 0x288   : > { %v15671_v6 = vpop.f32.mrf.mxu0  ;;  %v15673_v53 = vpop.f32.mrf.mxu1  ;;  %v2784_v4 = vadd.f32 %v17651_v39, %v2554_v35  ;;  %v3926_v49 = vadd.f32 %v15608_v30, %v3696_v48  ;;  %v2560_v22 = vadd.f32 %v17652_v0, %v2330_v23  ;;  %v3470_v47 = vadd.f32 %v15558_v44, %v3240_v58  ;;  %v17656_v54 = vld [vmem:[#allocation31_spill] sm:$0xff]  ;;  %v17658_v23 = vld [vmem:[#allocation21_spill] sm:$0xff]  ;;  %v17662_v29 = vld [vmem:[#allocation46_spill] sm:$0xff] }
 0x289   : > { %v3929_v63 = vadd.f32 %v15615_v57, %v3699_v51  ;;  %v3698_v21 = vadd.f32 %v15518_v3, %v3468_v2  ;;  %v4157_v13 = vadd.f32 %v15572_v31, %v3927_v8  ;;  %v2786_v35 = vadd.f32 %v17654_v15, %v2556_v11  ;;  %v17659_v3 = vld [vmem:[#allocation63_spill] sm:$0xff]  ;;  %v17666_v51 = vld [vmem:[#allocation42_spill] sm:$0xff] }
 0x28a   : > { %v15680_v62 = vpop.f32.mrf.mxu0  ;;  %v15682_v9 = vpop.f32.mrf.mxu1  ;;  %v3014_v45 = vadd.f32 %v17653_v26, %v2784_v4  ;;  %v3473_v30 = vadd.f32 %v15562_v5, %v17655_v14  ;;  %v3242_v25 = vadd.f32 %v17656_v54, %v3012_v7  ;;  %v3701_v43 = vadd.f32 %v17657_v59, %v3471_v55  ;;  %v17660_v31 = vld [vmem:[#allocation23_spill] sm:$0xff]  ;;  %v17663_v55 = vld [vmem:[#allocation32_spill] sm:$0xff]  ;;  %v17665_v4 = vld [vmem:[#allocation65_spill] sm:$0xff] }
 0x28b   : > { %v2788_v48 = vadd.f32 %v17658_v23, %v2558_v38  ;;  %v3928_v57 = vadd.f32 %v15622_v32, %v3698_v21  ;;  %v4156_v2 = vadd.f32 %v17659_v3, %v3926_v49  ;;  %v2790_v8 = vadd.f32 %v17660_v31, %v2560_v22  ;;  %v17661_v11 = vld [vmem:[#allocation59_spill] sm:$0xff]  ;;  %v17667_v49 = vld [vmem:[#allocation41_spill] sm:$0xff]  ;;  %v17678_v31 = vld [vmem:[#allocation64_spill] sm:$0xff] }
 0x28c   : > { %v15693_v12 = vpop.f32.mrf.mxu0  ;;  %v15695_v19 = vpop.f32.mrf.mxu1  ;;  %v3472_v16 = vadd.f32 %v17661_v11, %v3242_v25  ;;  %v3931_v5 = vadd.f32 %v15627_v20, %v3701_v43  ;;  %v3700_v7 = vadd.f32 %v17662_v29, %v3470_v47  ;;  %v3244_v56 = vadd.f32 %v17663_v55, %v3014_v45  ;;  %v17668_v26 = vld [vmem:[#allocation61_spill] sm:$0xff]  ;;  %v17671_v14 = vld [vmem:[#allocation67_spill] sm:$0xff]  ;;  %v17673_v25 = vld [vmem:[#allocation62_spill] sm:$0xff] }
 0x28d   : > { %v4159_v32 = vadd.f32 %v17665_v4, %v3929_v63  ;;  %v3016_v0 = vadd.f32 %v17666_v51, %v2786_v35  ;;  %v3475_v22 = vadd.f32 %v17668_v26, %v17667_v49  ;;  %v4158_v63 = vadd.f32 %v17671_v14, %v3928_v57  ;;  %v17672_v54 = vld [vmem:[#allocation45_spill] sm:$0xff]  ;;  %v17674_v43 = vld [vmem:[#allocation50_spill] sm:$0xff]  ;;  %v17680_v29 = vld [vmem:[#allocation52_spill] sm:$0xff] }
 0x28e   : > { %v15701_v50 = vpop.f32.mrf.mxu0  ;;  %v15703_v41 = vpop.f32.mrf.mxu1  ;;  %v3930_v21 = vadd.f32 %v15636_v10, %v3700_v7  ;;  %v3018_v35 = vadd.f32 %v17672_v54, %v2788_v48  ;;  %v3474_v59 = vadd.f32 %v17673_v25, %v3244_v56  ;;  %v17675_v23 = vld [vmem:[#allocation69_spill] sm:$0xff]  ;;  %v17681_v55 = vld [vmem:[#allocation71_spill] sm:$0xff]  ;;  %v17690_v14 = vld [vmem:[#allocation68_spill] sm:$0xff] }
 0x28f   : > { %v17679_v11 = vld [vmem:[#allocation33_spill] sm:$0xff]  ;;  %v3705_v7 = vadd.f32 %v17680_v29, %v3475_v22 }
 0x290   : > { %v15713_v27 = vpop.f32.mrf.mxu0  ;;  %v15715_v60 = vpop.f32.mrf.mxu1  ;;  %v3246_v48 = vadd.f32 %v17679_v11, %v3016_v0  ;;  %v4160_v56 = vadd.f32 %v17681_v55, %v3930_v21  ;;  %v17685_v49 = vld [vmem:[#allocation53_spill] sm:$0xff]  ;;  %v17701_v55 = vld [vmem:[#allocation56_spill] sm:$0xff] }
 0x291   : > { %v3935_v0 = vadd.f32 %v15662_v34, %v3705_v7  ;;  %v3704_v26 = vadd.f32 %v17685_v49, %v3474_v59  ;;  %v17700_v7 = vld [vmem:[#allocation36_spill] sm:$0xff] }
 0x292   : > { %v15726_v18 = vpop.f32.mrf.mxu0  ;;  %v15728_v17 = vpop.f32.mrf.mxu1 }
 0x293   : > { %v3934_v54 = vadd.f32 %v15671_v6, %v3704_v26 }
 0x294   : > { %v15736_v42 = vpop.f32.mrf.mxu0  ;;  %v15747_v44 = vpop.f32.mrf.mxu1 }
 0x296   : > { %v13647_v24 = vpop.f32.mrf.mxu0  ;;  %v15766_v15 = vpop.f32.mrf.mxu1 }
 0x297   : > { %v4387_v33 = vadd.f32 %v13647_v24, %v4157_v13  ;;  %v17669_v13 = vld [vmem:[#allocation48_spill] sm:$0xff]  ;;  %v3702_v24 = vadd.f32 %v17674_v43, %v3472_v16 }
 0x298   : > { %v4307_v58 = vpop.f32.mrf.mxu0  ;;  %v3703_v20 = vadd.f32 %v17669_v13, %v3473_v30  ;;  %v4161_v30 = vadd.f32 %v17675_v23, %v3931_v5  ;;  %v17687_v13 = vld [vmem:[#allocation73_spill] sm:$0xff]  ;;  %v17694_v23 = vld [vmem:[#allocation70_spill] sm:$0xff] }
 0x299   : > { %v15758_v39 = vadd.f32 %v15664_v61, %v4387_v33  ;;  %v4386_v38 = vadd.f32 %v4307_v58, %v4156_v2  ;;  %v17677_v2 = vld [vmem:[#allocation43_spill] sm:$0xff]  ;;  %v4577_v58 = vpop.f32.mrf.mxu1  ;;  %v3932_v5 = vadd.f32 %v15650_v52, %v3702_v24 }
 0x29a   : > { %v13650_v47 = vpop.f32.mrf.mxu0  ;;  %v3933_v33 = vadd.f32 %v15642_v40, %v3703_v20  ;;  %v3477_v57 = vadd.f32 %v17678_v31, %v17677_v2  ;;  %v17693_v24 = vld [vmem:[#allocation75_spill] sm:$0xff]  ;;  %v17696_v2 = vld [vmem:[#allocation76_spill] sm:$0xff] }
 0x29b   : > { %17664 = vst [vmem:[#allocation7_spill] sm:$0xff] %v15758_v39  ;;  %14464 = vtanh.f32 %v15758_v39  ;;  %v15770_v61 = vadd.f32 %v15673_v53, %v4386_v38  ;;  %v4389_v45 = vadd.f32 %v13650_v47, %v4159_v32  ;;  %v17683_v38 = vld [vmem:[#allocation66_spill] sm:$0xff]  ;;  %v13688_v25 = vpop.f32.mrf.mxu1  ;;  %v4165_v31 = vadd.f32 %v17696_v2, %v3935_v0 }
 0x29c   : > { %v4317_v10 = vpop.f32.mrf.mxu0  ;;  %v3476_v4 = vadd.f32 %v17683_v38, %v3246_v48  ;;  %v17684_v32 = vld [vmem:[#allocation34_spill] sm:$0xff]  ;;  %v4163_v20 = vadd.f32 %v17687_v13, %v3933_v33  ;;  %v17699_v48 = vld [vmem:[#allocation72_spill] sm:$0xff]  ;;  %v17702_v38 = vld [vmem:[#allocation77_spill] sm:$0xff] }
 0x29d   : > { %17670 = vst [vmem:[#allocation9_spill] sm:$0xff] %v15770_v61  ;;  %14466 = vtanh.f32 %v15770_v61  ;;  %v15780_v3 = vadd.f32 %v15682_v9, %v4389_v45  ;;  %v4388_v53 = vadd.f32 %v4317_v10, %v4158_v63  ;;  %v3248_v51 = vadd.f32 %v17684_v32, %v3018_v35  ;;  %v17689_v45 = vld [vmem:[#allocation47_spill] sm:$0xff]  ;;  %v17691_v35 = vld [vmem:[#allocation54_spill] sm:$0xff] }
 0x29e   : > { %v13653_v16 = vpop.f32.mrf.mxu0  ;;  %v3479_v63 = vadd.f32 %v17690_v14, %v17689_v45  ;;  %v3707_v34 = vadd.f32 %v17691_v35, %v3477_v57  ;;  %v4162_v10 = vadd.f32 %v17693_v24, %v3932_v5  ;;  %v4587_v5 = vpop.f32.mrf.mxu1  ;;  %v17704_v0 = vld [vmem:[#allocation74_spill] sm:$0xff] }
 0x29f   : > { %17676 = vst [vmem:[#allocation8_spill] sm:$0xff] %v15780_v3  ;;  %14468 = vtanh.f32 %v15780_v3  ;;  %v15790_v40 = vadd.f32 %v15695_v19, %v4388_v53  ;;  %v4391_v9 = vadd.f32 %v13653_v16, %v4161_v30  ;;  %v17688_v19 = vld [vmem:[#allocation49_spill] sm:$0xff]  ;;  %v3478_v30 = vadd.f32 %v17694_v23, %v3248_v51  ;;  %v17707_v45 = vld [vmem:[#allocation58_spill] sm:$0xff] }
 0x2a0   : > { %v4327_v22 = vpop.f32.mrf.mxu0  ;;  %v3020_v47 = vadd.f32 %v17688_v19, %v2790_v8  ;;  %v17695_v8 = vld [vmem:[#allocation55_spill] sm:$0xff]  ;;  %v3937_v6 = vadd.f32 %v15680_v62, %v3707_v34  ;;  %v17710_v24 = vld [vmem:[#allocation78_spill] sm:$0xff] }
 0x2a1   : > { %17682 = vst [vmem:[#allocation25_spill] sm:$0xff] %v15790_v40  ;;  %14470 = vtanh.f32 %v15790_v40  ;;  %v15798_v21 = vadd.f32 %v15703_v41, %v4391_v9  ;;  %v4390_v52 = vadd.f32 %v4327_v22, %v4160_v56  ;;  %v3706_v33 = vadd.f32 %v17695_v8, %v3476_v4  ;;  %v17705_v22 = vld [vmem:[#allocation57_spill] sm:$0xff] }
 0x2a2   : > { %v13656_v59 = vpop.f32.mrf.mxu0  ;;  %v3250_v16 = vadd.f32 %v17700_v7, %v3020_v47  ;;  %v3709_v56 = vadd.f32 %v17701_v55, %v3479_v63  ;;  %v4164_v4 = vadd.f32 %v17702_v38, %v3934_v54  ;;  %v13691_v63 = vpop.f32.mrf.mxu1  ;;  %v15878_v38 = vld [vmem:[%s17484_s7 + $0x28] sm:$0xff] }
 0x2a3   : > { %17686 = vst [vmem:[#allocation14_spill] sm:$0xff] %v15798_v21  ;;  %14472 = vtanh.f32 %v15798_v21  ;;  %v15808_v43 = vadd.f32 %v15715_v60, %v4390_v52  ;;  %v4393_v41 = vadd.f32 %v13656_v59, %v4163_v20  ;;  %v17698_v60 = vld [vmem:[#allocation51_spill] sm:$0xff]  ;;  %v3936_v32 = vadd.f32 %v15693_v12, %v3706_v33  ;;  %v17709_v59 = vld [vmem:[#allocation60_spill] sm:$0xff] }
 0x2a4   : > { %v4337_v53 = vpop.f32.mrf.mxu0  ;;  %v3481_v29 = vadd.f32 %v17699_v48, %v17698_v60  ;;  %v3480_v49 = vadd.f32 %v17704_v0, %v3250_v16  ;;  %v3939_v26 = vadd.f32 %v15701_v50, %v3709_v56  ;;  %v3708_v52 = vadd.f32 %v17705_v22, %v3478_v30  ;;  %v4597_v8 = vpop.f32.mrf.mxu1  ;;  %v17717_v0 = vld [vmem:[#allocation39_spill] sm:$0xff] }
 0x2a5   : > { %17692 = vst [vmem:[#allocation15_spill] sm:$0xff] %v15808_v43  ;;  %14474 = vtanh.f32 %v15808_v43  ;;  %v15817_v57 = vadd.f32 %v15728_v17, %v4393_v41  ;;  %v4392_v11 = vadd.f32 %v4337_v53, %v4162_v10 }
 0x2a6   : > { %v13659_v9 = vpop.f32.mrf.mxu0  ;;  %v3938_v47 = vadd.f32 %v15713_v27, %v3708_v52  ;;  %v3711_v14 = vadd.f32 %v17707_v45, %v3481_v29  ;;  %v3710_v41 = vadd.f32 %v17709_v59, %v3480_v49  ;;  %v4169_v10 = vadd.f32 %v17710_v24, %v3939_v26 }
 0x2a7   : > { %17697 = vst [vmem:[#allocation22_spill] sm:$0xff] %v15817_v57  ;;  %14476 = vtanh.f32 %v15817_v57  ;;  %v15827_v62 = vadd.f32 %v15747_v44, %v4392_v11  ;;  %v4395_v17 = vadd.f32 %v13659_v9, %v4165_v31  ;;  %v4167_v44 = vadd.f32 %v15617_v36, %v3937_v6  ;;  %v15873_v9 = vld [vmem:[%s17484_s7 + $0x20] sm:$0xff] }
 0x2a8   : > { %v14465_v51 = vpop.eup %14464  ;;  %v4347_v13 = vpop.f32.mrf.mxu0  ;;  %v3941_v27 = vadd.f32 %v15726_v18, %v3711_v14  ;;  %v3940_v53 = vadd.f32 %v15736_v42, %v3710_v41 }
 0x2a9   : > { %17703 = vst [vmem:[#allocation16_spill] sm:$0xff] %v15827_v62  ;;  %4657 = vst.msk [vmem:[#allocation4 + $0x10] sm:$0xff] %vm548_vm2, %v14465_v51  ;;  %14478 = vtanh.f32 %v15827_v62  ;;  %v15835_v12 = vadd.f32 %v15766_v15, %v4395_v17  ;;  %v4394_v20 = vadd.f32 %v4347_v13, %v4164_v4  ;;  %v4166_v15 = vadd.f32 %v15624_v28, %v3936_v32  ;;  %v13694_v42 = vpop.f32.mrf.mxu1  ;;  %v17716_v51 = vld [vmem:[#allocation38_spill] sm:$0xff] }
 0x2aa   : > { %v14467_v19 = vpop.eup %14466  ;;  %v13662_v50 = vpop.f32.mrf.mxu0  ;;  %v4168_v28 = vadd.f32 %v15638_v37, %v3938_v47  ;;  %v4171_v37 = vadd.f32 %v15644_v1, %v3941_v27 }
 0x2ab   : > { %17706 = vst [vmem:[#allocation17_spill] sm:$0xff] %v15835_v12  ;;  %4656 = vst.msk [vmem:[#allocation4 + $0x8] sm:$0xff] %vm548_vm2, %v14467_v19  ;;  %14480 = vtanh.f32 %v15835_v12  ;;  %v15842_v54 = vadd.f32 %v4577_v58, %v4394_v20  ;;  %v4397_v35 = vadd.f32 %v13662_v50, %v4167_v44  ;;  %v4607_v26 = vpop.f32.mrf.mxu1 }
 0x2ac   : > { %v14469_v34 = vpop.eup %14468  ;;  %v4357_v36 = vpop.f32.mrf.mxu0 }
 0x2ad   : > { %17708 = vst [vmem:[#allocation10_spill] sm:$0xff] %v15842_v54  ;;  %4659 = vst.msk [vmem:[#allocation4 + $0x20] sm:$0xff] %vm548_vm2, %v14469_v34  ;;  %14482 = vtanh.f32 %v15842_v54  ;;  %v15850_v23 = vadd.f32 %v13688_v25, %v4397_v35  ;;  %v4396_v30 = vadd.f32 %v4357_v36, %v4166_v15 }
 0x2ae   : > { %v14471_v58 = vpop.eup %14470  ;;  %v13665_v33 = vpop.f32.mrf.mxu0 }
 0x2af   : > { %17711 = vst [vmem:[#allocation24_spill] sm:$0xff] %v15850_v23  ;;  %4658 = vst.msk [vmem:[#allocation4 + $0x18] sm:$0xff] %vm548_vm2, %v14471_v58  ;;  %14484 = vtanh.f32 %v15850_v23  ;;  %v15856_v2 = vadd.f32 %v4587_v5, %v4396_v30  ;;  %v4399_v18 = vadd.f32 %v13665_v33, %v4169_v10  ;;  %v4170_v5 = vadd.f32 %v15652_v46, %v3940_v53 }
 0x2b0   : > { %v14473_v31 = vpop.eup %14472  ;;  %v4367_v6 = vpop.f32.mrf.mxu0  ;;  %v4673_v1 = vld [vmem:[#allocation4 + $0x10] sm:$0xff] }
 0x2b1   : > { %17712 = vst [vmem:[#allocation27_spill] sm:$0xff] %v15856_v2  ;;  %4661 = vst.msk [vmem:[#allocation4 + $0x30] sm:$0xff] %vm548_vm2, %v14473_v31  ;;  %14486 = vtanh.f32 %v15856_v2  ;;  %v15860_v25 = vadd.f32 %v13691_v63, %v4399_v18  ;;  %v4398_v11 = vadd.f32 %v4367_v6, %v4168_v28 }
 0x2b2   : > { %v14475_v60 = vpop.eup %14474  ;;  %v13668_v48 = vpop.f32.mrf.mxu0  ;;  %v4689_v29 = vld [vmem:[#allocation4 + $0x7] sm:$0xff]  ;;  %v4690_v16 = vld [vmem:[#allocation4 + $0xf] sm:$0xff] }
 0x2b3   : > { %17713 = vst [vmem:[#allocation11_spill] sm:$0xff] %v15860_v25  ;;  %v4672_v7 = vld [vmem:[#allocation4 + $0x8] sm:$0xff]  ;;  %4660 = vst.msk [vmem:[#allocation4 + $0x28] sm:$0xff] %vm548_vm2, %v14475_v60  ;;  %14488 = vtanh.f32 %v15860_v25  ;;  %v15865_v55 = vadd.f32 %v4597_v8, %v4398_v11  ;;  %v4401_v56 = vadd.f32 %v13668_v48, %v4171_v37  ;;  %13697 = vmatprep.mubr.msk.f32.mxu0 %vm548_vm2, %v4689_v29 }
 0x2b4   : > { %13723 = vmatprep.mubr.msk.f32.mxu1 %vm548_vm2, %v4672_v7  ;;  %v14477_v4 = vpop.eup %14476  ;;  %v4377_v32 = vpop.f32.mrf.mxu0  ;;  %13698 = vmatmul.mubr.msk.f32.vlgmr.msra.gmra.mxu0 %vm548_vm2, %v4690_v16  ;;  %v4675_v44 = vld [vmem:[#allocation4 + $0x20] sm:$0xff] }
 0x2b5   : > { %17714 = vst [vmem:[#allocation12_spill] sm:$0xff] %v15865_v55  ;;  %13724 = vmatmul.mubr.msk.f32.vlgmr.msra.gmra.mxu1 %vm548_vm2, %v4673_v1  ;;  %4663 = vst.msk [vmem:[#allocation4 + $0x40] sm:$0xff] %vm548_vm2, %v14477_v4  ;;  %14490 = vtanh.f32 %v15865_v55  ;;  %v15884_v46 = vadd.f32 %v13694_v42, %v4401_v56  ;;  %v4400_v17 = vadd.f32 %v4377_v32, %v4170_v5  ;;  %13748 = vmatpush3.msra.mxu0 %v17716_v51  ;;  %v5093_v56 = vld [vmem:[#allocation4 + $0x6] sm:$0xff]  ;;  %v5094_v51 = vld [vmem:[#allocation4 + $0xe] sm:$0xff] }
 0x2b6   : > { %13774 = vmatpush3.msra.mxu1 %v17717_v0  ;;  %v14479_v49 = vpop.eup %14478  ;;  %v4691_v22 = vld [vmem:[#allocation4 + $0x17] sm:$0xff]  ;;  %v4692_v13 = vld [vmem:[#allocation4 + $0x1f] sm:$0xff]  ;;  %13799 = vmatprep.subr.mxu0 %v15873_v9  ;;  %v5321_v0 = vld [vmem:[#allocation4 + $0xd] sm:$0xff] }
 0x2b7   : > { %17715 = vst [vmem:[#allocation18_spill] sm:$0xff] %v15884_v46  ;;  %v4674_v52 = vld [vmem:[#allocation4 + $0x18] sm:$0xff]  ;;  %13825 = vmatprep.subr.mxu1 %v15878_v38  ;;  %4662 = vst.msk [vmem:[#allocation4 + $0x38] sm:$0xff] %vm548_vm2, %v14479_v49  ;;  %14492 = vtanh.f32 %v15884_v46  ;;  %v15892_v20 = vadd.f32 %v4607_v26, %v4400_v17  ;;  %13700 = vmatprep.mubr.msk.f32.mxu0 %vm548_vm2, %v4691_v22  ;;  %v5320_v5 = vld [vmem:[#allocation4 + $0x5] sm:$0xff] }
 0x2b8   : > { %13726 = vmatprep.mubr.msk.f32.mxu1 %vm548_vm2, %v4674_v52  ;;  %v14481_v19 = vpop.eup %14480  ;;  %13701 = vmatmul.mubr.msk.f32.gmra.mxu0 %vm548_vm2, %v4692_v13  ;;  %v4677_v50 = vld [vmem:[#allocation4 + $0x30] sm:$0xff]  ;;  %v15933_v1 = vld [vmem:[#allocation4 + $0x4] sm:$0xff] }
 0x2b9   : > { %17718 = vst [vmem:[#allocation13_spill] sm:$0xff] %v15892_v20  ;;  %13727 = vmatmul.mubr.msk.f32.gmra.mxu1 %vm548_vm2, %v4675_v44  ;;  %4665 = vst.msk [vmem:[#allocation4 + $0x50] sm:$0xff] %vm548_vm2, %v14481_v19  ;;  %14494 = vtanh.f32 %v15892_v20  ;;  %v15935_v4 = vld [vmem:[#allocation4 + $0x3] sm:$0xff]  ;;  %v5095_v26 = vld [vmem:[#allocation4 + $0x16] sm:$0xff] }
 0x2ba   : > { %v14483_v47 = vpop.eup %14482  ;;  %v4693_v45 = vld [vmem:[#allocation4 + $0x27] sm:$0xff]  ;;  %v4694_v63 = vld [vmem:[#allocation4 + $0x2f] sm:$0xff]  ;;  %v5096_v13 = vld [vmem:[#allocation4 + $0x1e] sm:$0xff] }
 0x2bb   : > { %v4676_v14 = vld [vmem:[#allocation4 + $0x28] sm:$0xff]  ;;  %4664 = vst.msk [vmem:[#allocation4 + $0x48] sm:$0xff] %vm548_vm2, %v14483_v47  ;;  %13703 = vmatprep.mubr.msk.f32.mxu0 %vm548_vm2, %v4693_v45  ;;  %v15944_v49 = vld [vmem:[%s17484_s7 + $0x30] sm:$0xff]  ;;  %v5322_v22 = vld [vmem:[#allocation4 + $0x15] sm:$0xff] }
 0x2bc   : > { %13729 = vmatprep.mubr.msk.f32.mxu1 %vm548_vm2, %v4676_v14  ;;  %v14485_v35 = vpop.eup %14484  ;;  %13704 = vmatmul.mubr.msk.f32.gmra.mxu0 %vm548_vm2, %v4694_v63  ;;  %v4679_v36 = vld [vmem:[#allocation4 + $0x40] sm:$0xff]  ;;  %v15952_v52 = vld [vmem:[%s17484_s7 + $0x38] sm:$0xff] }
 0x2bd   : > { %13730 = vmatmul.mubr.msk.f32.gmra.mxu1 %vm548_vm2, %v4677_v50  ;;  %4667 = vst.msk [vmem:[#allocation4 + $0x60] sm:$0xff] %vm548_vm2, %v14485_v35  ;;  %v15937_v32 = vld [vmem:[#allocation4 + $0x2] sm:$0xff]  ;;  %v5098_v45 = vld [vmem:[#allocation4 + $0x2e] sm:$0xff] }
 0x2be   : > { %v14487_v15 = vpop.eup %14486  ;;  %v4695_v34 = vld [vmem:[#allocation4 + $0x37] sm:$0xff]  ;;  %v4696_v41 = vld [vmem:[#allocation4 + $0x3f] sm:$0xff] }
 0x2bf   : > { %v4678_v59 = vld [vmem:[#allocation4 + $0x38] sm:$0xff]  ;;  %4666 = vst.msk [vmem:[#allocation4 + $0x58] sm:$0xff] %vm548_vm2, %v14487_v15  ;;  %13706 = vmatprep.mubr.msk.f32.mxu0 %vm548_vm2, %v4695_v34  ;;  %v15939_v17 = vld [vmem:[#allocation4 + $0x1] sm:$0xff] }
 0x2c0   : > { %13732 = vmatprep.mubr.msk.f32.mxu1 %vm548_vm2, %v4678_v59  ;;  %v14489_v24 = vpop.eup %14488  ;;  %13707 = vmatmul.mubr.msk.f32.gmra.mxu0 %vm548_vm2, %v4696_v41  ;;  %v4681_v8 = vld [vmem:[#allocation4 + $0x50] sm:$0xff]  ;;  %v5323_v44 = vld [vmem:[#allocation4 + $0x1d] sm:$0xff]  ;;  %v5097_v19 = vld [vmem:[#allocation4 + $0x26] sm:$0xff] }
 0x2c1   : > { %13733 = vmatmul.mubr.msk.f32.gmra.mxu1 %vm548_vm2, %v4679_v36  ;;  %4669 = vst.msk [vmem:[#allocation4 + $0x70] sm:$0xff] %vm548_vm2, %v14489_v24  ;;  %v5324_v47 = vld [vmem:[#allocation4 + $0x25] sm:$0xff]  ;;  %v5326_v14 = vld [vmem:[#allocation4 + $0x35] sm:$0xff]  ;;  %v5327_v50 = vld [vmem:[#allocation4 + $0x3d] sm:$0xff] }
 0x2c2   : > { %v14491_v10 = vpop.eup %14490  ;;  %v4697_v27 = vld [vmem:[#allocation4 + $0x47] sm:$0xff]  ;;  %v4698_v58 = vld [vmem:[#allocation4 + $0x4f] sm:$0xff]  ;;  %v5100_v63 = vld [vmem:[#allocation4 + $0x3e] sm:$0xff] }
 0x2c3   : > { %v4680_v30 = vld [vmem:[#allocation4 + $0x48] sm:$0xff]  ;;  %4668 = vst.msk [vmem:[#allocation4 + $0x68] sm:$0xff] %vm548_vm2, %v14491_v10  ;;  %13709 = vmatprep.mubr.msk.f32.mxu0 %vm548_vm2, %v4697_v27 }
 0x2c4   : > { %13735 = vmatprep.mubr.msk.f32.mxu1 %vm548_vm2, %v4680_v30  ;;  %v14493_v33 = vpop.eup %14492  ;;  %13710 = vmatmul.mubr.msk.f32.gmra.mxu0 %vm548_vm2, %v4698_v58  ;;  %v4683_v6 = vld [vmem:[#allocation4 + $0x60] sm:$0xff]  ;;  %v5102_v34 = vld [vmem:[#allocation4 + $0x4e] sm:$0xff] }
 0x2c5   : > { %13736 = vmatmul.mubr.msk.f32.gmra.mxu1 %vm548_vm2, %v4681_v8  ;;  %4671 = vst.msk [vmem:[#allocation4 + $0x80] sm:$0xff] %vm548_vm2, %v14493_v33  ;;  %v5101_v35 = vld [vmem:[#allocation4 + $0x46] sm:$0xff] }
 0x2c6   : > { %v14495_v28 = vpop.eup %14494  ;;  %v4699_v53 = vld [vmem:[#allocation4 + $0x57] sm:$0xff]  ;;  %v4700_v31 = vld [vmem:[#allocation4 + $0x5f] sm:$0xff]  ;;  %v5329_v59 = vld [vmem:[#allocation4 + $0x4d] sm:$0xff] }
 0x2c7   : > { %v4682_v18 = vld [vmem:[#allocation4 + $0x58] sm:$0xff]  ;;  %4670 = vst.msk [vmem:[#allocation4 + $0x78] sm:$0xff] %vm548_vm2, %v14495_v28  ;;  %13712 = vmatprep.mubr.msk.f32.mxu0 %vm548_vm2, %v4699_v53  ;;  %v5328_v15 = vld [vmem:[#allocation4 + $0x45] sm:$0xff] }
 0x2c8   : > { %13738 = vmatprep.mubr.msk.f32.mxu1 %vm548_vm2, %v4682_v18  ;;  %13713 = vmatmul.mubr.msk.f32.gmra.mxu0 %vm548_vm2, %v4700_v31  ;;  %v4685_v42 = vld [vmem:[#allocation4 + $0x70] sm:$0xff]  ;;  %v5104_v24 = vld [vmem:[#allocation4 + $0x5e] sm:$0xff] }
 0x2c9   : > { %13739 = vmatmul.mubr.msk.f32.gmra.mxu1 %vm548_vm2, %v4683_v6  ;;  %v5103_v41 = vld [vmem:[#allocation4 + $0x56] sm:$0xff]  ;;  %v5548_v31 = vld [vmem:[#allocation4 + $0xc] sm:$0xff] }
 0x2ca   : > { %v4701_v11 = vld [vmem:[#allocation4 + $0x67] sm:$0xff]  ;;  %v4702_v60 = vld [vmem:[#allocation4 + $0x6f] sm:$0xff]  ;;  %v5331_v10 = vld [vmem:[#allocation4 + $0x5d] sm:$0xff] }
 0x2cb   : > { %v4684_v37 = vld [vmem:[#allocation4 + $0x68] sm:$0xff]  ;;  %13715 = vmatprep.mubr.msk.f32.mxu0 %vm548_vm2, %v4701_v11  ;;  %v5330_v36 = vld [vmem:[#allocation4 + $0x55] sm:$0xff] }
 0x2cc   : > { %13741 = vmatprep.mubr.msk.f32.mxu1 %vm548_vm2, %v4684_v37  ;;  %13716 = vmatmul.mubr.msk.f32.gmra.mxu0 %vm548_vm2, %v4702_v60  ;;  %v4687_v16 = vld [vmem:[#allocation4 + $0x80] sm:$0xff]  ;;  %v5106_v58 = vld [vmem:[#allocation4 + $0x6e] sm:$0xff] }
 0x2cd   : > { %13742 = vmatmul.mubr.msk.f32.gmra.mxu1 %vm548_vm2, %v4685_v42  ;;  %6681 = vst.msk [vmem:[#allocation4] sm:$0xff] %vm548_vm2, %v4687_v16  ;;  %v5105_v27 = vld [vmem:[#allocation4 + $0x66] sm:$0xff]  ;;  %v5549_v11 = vld [vmem:[#allocation4 + $0x14] sm:$0xff]  ;;  %v5550_v60 = vld [vmem:[#allocation4 + $0x1c] sm:$0xff] }
 0x2ce   : > { %v4703_v48 = vld [vmem:[#allocation4 + $0x77] sm:$0xff]  ;;  %v4704_v7 = vld [vmem:[#allocation4 + $0x7f] sm:$0xff]  ;;  %v5333_v8 = vld [vmem:[#allocation4 + $0x6d] sm:$0xff] }
 0x2cf   : > { %v4686_v29 = vld [vmem:[#allocation4 + $0x78] sm:$0xff]  ;;  %13718 = vmatprep.mubr.msk.f32.mxu0 %vm548_vm2, %v4703_v48  ;;  %v5332_v30 = vld [vmem:[#allocation4 + $0x65] sm:$0xff] }
 0x2d0   : > { %13744 = vmatprep.mubr.msk.f32.mxu1 %vm548_vm2, %v4686_v29  ;;  %13719 = vmatmul.mubr.msk.f32.gmra.mxu0 %vm548_vm2, %v4704_v7  ;;  %v5107_v33 = vld [vmem:[#allocation4 + $0x76] sm:$0xff]  ;;  %v5108_v53 = vld [vmem:[#allocation4 + $0x7e] sm:$0xff]  ;;  %v5775_v6 = vld [vmem:[#allocation4 + $0xb] sm:$0xff] }
 0x2d1   : > { %13745 = vmatmul.mubr.msk.f32.gmra.mxu1 %vm548_vm2, %v4687_v16  ;;  %13749 = vmatprep.mubr.msk.f32.mxu0 %vm548_vm2, %v5093_v56  ;;  %v5334_v28 = vld [vmem:[#allocation4 + $0x75] sm:$0xff]  ;;  %v5335_v18 = vld [vmem:[#allocation4 + $0x7d] sm:$0xff]  ;;  %v5552_v7 = vld [vmem:[#allocation4 + $0x2c] sm:$0xff] }
 0x2d2   : > { %13775 = vmatprep.mubr.msk.f32.mxu1 %vm548_vm2, %v5320_v5  ;;  %v5776_v37 = vld [vmem:[#allocation4 + $0x13] sm:$0xff]  ;;  %v5777_v42 = vld [vmem:[#allocation4 + $0x1b] sm:$0xff]  ;;  %v5551_v48 = vld [vmem:[#allocation4 + $0x24] sm:$0xff] }
 0x2d3   : > { %v5778_v29 = vld [vmem:[#allocation4 + $0x23] sm:$0xff]  ;;  %v5779_v16 = vld [vmem:[#allocation4 + $0x2b] sm:$0xff]  ;;  %v5553_v56 = vld [vmem:[#allocation4 + $0x34] sm:$0xff] }
 0x2d4   : > { %13750 = vmatmul.mubr.msk.f32.vlgmr.msra.gmra.mxu0 %vm548_vm2, %v5094_v51  ;;  %v5780_v5 = vld [vmem:[#allocation4 + $0x33] sm:$0xff]  ;;  %v5555_v51 = vld [vmem:[#allocation4 + $0x44] sm:$0xff] }
 0x2d5   : > { %13776 = vmatmul.mubr.msk.f32.vlgmr.msra.gmra.mxu1 %vm548_vm2, %v5321_v0  ;;  %13752 = vmatprep.mubr.msk.f32.mxu0 %vm548_vm2, %v5095_v26  ;;  %v5782_v0 = vld [vmem:[#allocation4 + $0x43] sm:$0xff]  ;;  %v5783_v26 = vld [vmem:[#allocation4 + $0x4b] sm:$0xff] }
 0x2d6   : > { %13778 = vmatprep.mubr.msk.f32.mxu1 %vm548_vm2, %v5322_v22  ;;  %13800 = vmatpush3.msra.mxu0 %v15873_v9  ;;  %v5325_v9 = vld [vmem:[#allocation4 + $0x2d] sm:$0xff] }
 0x2d7   : > { %13826 = vmatpush3.msra.mxu1 %v15878_v38  ;;  %13851 = vmatprep.subr.mxu0 %v15944_v49  ;;  %v5099_v38 = vld [vmem:[#allocation4 + $0x36] sm:$0xff] }
 0x2d8   : > { %13877 = vmatprep.subr.mxu1 %v15952_v52  ;;  %13753 = vmatmul.mubr.msk.f32.gmra.mxu0 %vm548_vm2, %v5096_v13  ;;  %v5557_v22 = vld [vmem:[#allocation4 + $0x54] sm:$0xff]  ;;  %v5558_v13 = vld [vmem:[#allocation4 + $0x5c] sm:$0xff] }
 0x2d9   : > { %13779 = vmatmul.mubr.msk.f32.gmra.mxu1 %vm548_vm2, %v5323_v44  ;;  %13755 = vmatprep.mubr.msk.f32.mxu0 %vm548_vm2, %v5097_v19  ;;  %v5785_v44 = vld [vmem:[#allocation4 + $0x5b] sm:$0xff]  ;;  %v5559_v19 = vld [vmem:[#allocation4 + $0x64] sm:$0xff] }
 0x2da   : > { %13781 = vmatprep.mubr.msk.f32.mxu1 %vm548_vm2, %v5324_v47  ;;  %v5786_v47 = vld [vmem:[#allocation4 + $0x63] sm:$0xff] }
 0x2dc   : > { %13756 = vmatmul.mubr.msk.f32.gmra.mxu0 %vm548_vm2, %v5098_v45  ;;  %v5560_v45 = vld [vmem:[#allocation4 + $0x6c] sm:$0xff] }
 0x2dd   : > { %13782 = vmatmul.mubr.msk.f32.gmra.mxu1 %vm548_vm2, %v5325_v9  ;;  %13758 = vmatprep.mubr.msk.f32.mxu0 %vm548_vm2, %v5099_v38  ;;  %v5787_v9 = vld [vmem:[#allocation4 + $0x6b] sm:$0xff]  ;;  %v5561_v38 = vld [vmem:[#allocation4 + $0x74] sm:$0xff] }
 0x2de   : > { %13784 = vmatprep.mubr.msk.f32.mxu1 %vm548_vm2, %v5326_v14  ;;  %v5788_v14 = vld [vmem:[#allocation4 + $0x73] sm:$0xff] }
 0x2e0   : > { %13759 = vmatmul.mubr.msk.f32.gmra.mxu0 %vm548_vm2, %v5100_v63  ;;  %v5562_v63 = vld [vmem:[#allocation4 + $0x7c] sm:$0xff] }
 0x2e1   : > { %13785 = vmatmul.mubr.msk.f32.gmra.mxu1 %vm548_vm2, %v5327_v50  ;;  %13761 = vmatprep.mubr.msk.f32.mxu0 %vm548_vm2, %v5101_v35  ;;  %v5789_v50 = vld [vmem:[#allocation4 + $0x7b] sm:$0xff]  ;;  %v6002_v35 = vld [vmem:[#allocation4 + $0xa] sm:$0xff] }
 0x2e2   : > { %13787 = vmatprep.mubr.msk.f32.mxu1 %vm548_vm2, %v5328_v15  ;;  %v6229_v15 = vld [vmem:[#allocation4 + $0x9] sm:$0xff] }
 0x2e4   : > { %13762 = vmatmul.mubr.msk.f32.gmra.mxu0 %vm548_vm2, %v5102_v34  ;;  %v6003_v34 = vld [vmem:[#allocation4 + $0x12] sm:$0xff] }
 0x2e5   : > { %13788 = vmatmul.mubr.msk.f32.gmra.mxu1 %vm548_vm2, %v5329_v59  ;;  %13764 = vmatprep.mubr.msk.f32.mxu0 %vm548_vm2, %v5103_v41  ;;  %v6230_v59 = vld [vmem:[#allocation4 + $0x11] sm:$0xff]  ;;  %v6004_v41 = vld [vmem:[#allocation4 + $0x1a] sm:$0xff] }
 0x2e6   : > { %13790 = vmatprep.mubr.msk.f32.mxu1 %vm548_vm2, %v5330_v36  ;;  %v6231_v36 = vld [vmem:[#allocation4 + $0x19] sm:$0xff] }
 0x2e8   : > { %13765 = vmatmul.mubr.msk.f32.gmra.mxu0 %vm548_vm2, %v5104_v24  ;;  %v6006_v24 = vld [vmem:[#allocation4 + $0x2a] sm:$0xff] }
 0x2e9   : > { %13791 = vmatmul.mubr.msk.f32.gmra.mxu1 %vm548_vm2, %v5331_v10  ;;  %13767 = vmatprep.mubr.msk.f32.mxu0 %vm548_vm2, %v5105_v27  ;;  %v6233_v10 = vld [vmem:[#allocation4 + $0x29] sm:$0xff]  ;;  %v6007_v27 = vld [vmem:[#allocation4 + $0x32] sm:$0xff] }
 0x2ea   : > { %13793 = vmatprep.mubr.msk.f32.mxu1 %vm548_vm2, %v5332_v30  ;;  %v6234_v30 = vld [vmem:[#allocation4 + $0x31] sm:$0xff] }
 0x2ec   : > { %13768 = vmatmul.mubr.msk.f32.gmra.mxu0 %vm548_vm2, %v5106_v58  ;;  %v6008_v58 = vld [vmem:[#allocation4 + $0x3a] sm:$0xff] }
 0x2ed   : > { %13794 = vmatmul.mubr.msk.f32.gmra.mxu1 %vm548_vm2, %v5333_v8  ;;  %13770 = vmatprep.mubr.msk.f32.mxu0 %vm548_vm2, %v5107_v33  ;;  %v6235_v8 = vld [vmem:[#allocation4 + $0x39] sm:$0xff]  ;;  %v6009_v33 = vld [vmem:[#allocation4 + $0x42] sm:$0xff] }
 0x2ee   : > { %13796 = vmatprep.mubr.msk.f32.mxu1 %vm548_vm2, %v5334_v28  ;;  %v6236_v28 = vld [vmem:[#allocation4 + $0x41] sm:$0xff] }
 0x2f0   : > { %13771 = vmatmul.mubr.msk.f32.gmra.mxu0 %vm548_vm2, %v5108_v53  ;;  %v6010_v53 = vld [vmem:[#allocation4 + $0x4a] sm:$0xff] }
 0x2f1   : > { %13797 = vmatmul.mubr.msk.f32.gmra.mxu1 %vm548_vm2, %v5335_v18  ;;  %13801 = vmatprep.mubr.msk.f32.mxu0 %vm548_vm2, %v15933_v1  ;;  %v5554_v1 = vld [vmem:[#allocation4 + $0x3c] sm:$0xff]  ;;  %v6237_v18 = vld [vmem:[#allocation4 + $0x49] sm:$0xff] }
 0x2f2   : > { %13827 = vmatprep.mubr.msk.f32.mxu1 %vm548_vm2, %v15935_v4  ;;  %v5781_v4 = vld [vmem:[#allocation4 + $0x3b] sm:$0xff] }
 0x2f4   : > { %13802 = vmatmul.mubr.msk.f32.vlgmr.msra.gmra.mxu0 %vm548_vm2, %v5548_v31  ;;  %v6011_v31 = vld [vmem:[#allocation4 + $0x52] sm:$0xff] }
 0x2f5   : > { %13828 = vmatmul.mubr.msk.f32.vlgmr.msra.gmra.mxu1 %vm548_vm2, %v5775_v6  ;;  %13804 = vmatprep.mubr.msk.f32.mxu0 %vm548_vm2, %v5549_v11  ;;  %v6238_v6 = vld [vmem:[#allocation4 + $0x51] sm:$0xff]  ;;  %v6012_v11 = vld [vmem:[#allocation4 + $0x5a] sm:$0xff] }
 0x2f6   : > { %13830 = vmatprep.mubr.msk.f32.mxu1 %vm548_vm2, %v5776_v37  ;;  %13852 = vmatpush3.msra.mxu0 %v15944_v49  ;;  %v5556_v49 = vld [vmem:[#allocation4 + $0x4c] sm:$0xff]  ;;  %v6239_v37 = vld [vmem:[#allocation4 + $0x59] sm:$0xff] }
 0x2f7   : > { %13878 = vmatpush3.msra.mxu1 %v15952_v52  ;;  %v5784_v52 = vld [vmem:[#allocation4 + $0x53] sm:$0xff] }
 0x2f8   : > { %13805 = vmatmul.mubr.msk.f32.gmra.mxu0 %vm548_vm2, %v5550_v60  ;;  %v6013_v60 = vld [vmem:[#allocation4 + $0x62] sm:$0xff] }
 0x2f9   : > { %13831 = vmatmul.mubr.msk.f32.gmra.mxu1 %vm548_vm2, %v5777_v42  ;;  %13807 = vmatprep.mubr.msk.f32.mxu0 %vm548_vm2, %v5551_v48  ;;  %v6240_v42 = vld [vmem:[#allocation4 + $0x61] sm:$0xff]  ;;  %v6014_v48 = vld [vmem:[#allocation4 + $0x6a] sm:$0xff] }
 0x2fa   : > { %13833 = vmatprep.mubr.msk.f32.mxu1 %vm548_vm2, %v5778_v29  ;;  %v6241_v29 = vld [vmem:[#allocation4 + $0x69] sm:$0xff] }
 0x2fc   : > { %13808 = vmatmul.mubr.msk.f32.gmra.mxu0 %vm548_vm2, %v5552_v7  ;;  %v6015_v7 = vld [vmem:[#allocation4 + $0x72] sm:$0xff] }
 0x2fd   : > { %13834 = vmatmul.mubr.msk.f32.gmra.mxu1 %vm548_vm2, %v5779_v16  ;;  %13810 = vmatprep.mubr.msk.f32.mxu0 %vm548_vm2, %v5553_v56  ;;  %v6242_v16 = vld [vmem:[#allocation4 + $0x71] sm:$0xff]  ;;  %v6016_v56 = vld [vmem:[#allocation4 + $0x7a] sm:$0xff] }
 0x2fe   : > { %13836 = vmatprep.mubr.msk.f32.mxu1 %vm548_vm2, %v5780_v5  ;;  %v6243_v5 = vld [vmem:[#allocation4 + $0x79] sm:$0xff] }
 0x300   : > { %13811 = vmatmul.mubr.msk.f32.gmra.mxu0 %vm548_vm2, %v5554_v1  ;;  %v6471_v1 = vld [vmem:[%s17485_s8] sm:$0xff] }
 0x301   : > { %13837 = vmatmul.mubr.msk.f32.gmra.mxu1 %vm548_vm2, %v5781_v4  ;;  %13813 = vmatprep.mubr.msk.f32.mxu0 %vm548_vm2, %v5555_v51 }
 0x302   : > { %13839 = vmatprep.mubr.msk.f32.mxu1 %vm548_vm2, %v5782_v0  ;;  %13903 = vmatprep.subr.mxu0 %v6471_v1 }
 0x304   : > { %13814 = vmatmul.mubr.msk.f32.gmra.mxu0 %vm548_vm2, %v5556_v49 }
 0x305   : > { %13840 = vmatmul.mubr.msk.f32.gmra.mxu1 %vm548_vm2, %v5783_v26  ;;  %13816 = vmatprep.mubr.msk.f32.mxu0 %vm548_vm2, %v5557_v22 }
 0x306   : > { %13842 = vmatprep.mubr.msk.f32.mxu1 %vm548_vm2, %v5784_v52 }
 0x308   : > { %13817 = vmatmul.mubr.msk.f32.gmra.mxu0 %vm548_vm2, %v5558_v13 }
 0x309   : > { %13843 = vmatmul.mubr.msk.f32.gmra.mxu1 %vm548_vm2, %v5785_v44  ;;  %13819 = vmatprep.mubr.msk.f32.mxu0 %vm548_vm2, %v5559_v19 }
 0x30a   : > { %13845 = vmatprep.mubr.msk.f32.mxu1 %vm548_vm2, %v5786_v47 }
 0x30c   : > { %13820 = vmatmul.mubr.msk.f32.gmra.mxu0 %vm548_vm2, %v5560_v45 }
 0x30d   : > { %13846 = vmatmul.mubr.msk.f32.gmra.mxu1 %vm548_vm2, %v5787_v9  ;;  %13822 = vmatprep.mubr.msk.f32.mxu0 %vm548_vm2, %v5561_v38 }
 0x30e   : > { %13848 = vmatprep.mubr.msk.f32.mxu1 %vm548_vm2, %v5788_v14 }
 0x310   : > { %13823 = vmatmul.mubr.msk.f32.gmra.mxu0 %vm548_vm2, %v5562_v63 }
 0x311   : > { %13849 = vmatmul.mubr.msk.f32.gmra.mxu1 %vm548_vm2, %v5789_v50  ;;  %13853 = vmatprep.mubr.msk.f32.mxu0 %vm548_vm2, %v15937_v32  ;;  %v6005_v32 = vld [vmem:[#allocation4 + $0x22] sm:$0xff] }
 0x312   : > { %13879 = vmatprep.mubr.msk.f32.mxu1 %vm548_vm2, %v15939_v17  ;;  %v6232_v17 = vld [vmem:[#allocation4 + $0x21] sm:$0xff] }
 0x314   : > { %13854 = vmatmul.mubr.msk.f32.vlgmr.msra.gmra.mxu0 %vm548_vm2, %v6002_v35 }
 0x315   : > { %13880 = vmatmul.mubr.msk.f32.vlgmr.msra.gmra.mxu1 %vm548_vm2, %v6229_v15  ;;  %13856 = vmatprep.mubr.msk.f32.mxu0 %vm548_vm2, %v6003_v34 }
 0x316   : > { %13882 = vmatprep.mubr.msk.f32.mxu1 %vm548_vm2, %v6230_v59  ;;  %13904 = vmatpush3.msra.mxu0 %v6471_v1 }
 0x318   : > { %13857 = vmatmul.mubr.msk.f32.gmra.mxu0 %vm548_vm2, %v6004_v41 }
 0x319   : > { %13883 = vmatmul.mubr.msk.f32.gmra.mxu1 %vm548_vm2, %v6231_v36  ;;  %13859 = vmatprep.mubr.msk.f32.mxu0 %vm548_vm2, %v6005_v32 }
 0x31a   : > { %13885 = vmatprep.mubr.msk.f32.mxu1 %vm548_vm2, %v6232_v17 }
 0x31c   : > { %13860 = vmatmul.mubr.msk.f32.gmra.mxu0 %vm548_vm2, %v6006_v24  ;;  %v6682_v24 = vld [vmem:[%s17486_s9] sm:$0xf] }
 0x31d   : > { %13886 = vmatmul.mubr.msk.f32.gmra.mxu1 %vm548_vm2, %v6233_v10  ;;  %13862 = vmatprep.mubr.msk.f32.mxu0 %vm548_vm2, %v6007_v27 }
 0x31e   : > { %13888 = vmatprep.mubr.msk.f32.mxu1 %vm548_vm2, %v6234_v30  ;;  %13929 = vmatprep.subr.msk.mxu1 %vm1067_vm3, %v6682_v24 }
 0x31f   : > { %13930 = vmatpush3.msk.msra.mxu1 %vm1067_vm3, %v6682_v24 }
 0x320   : > { %13863 = vmatmul.mubr.msk.f32.gmra.mxu0 %vm548_vm2, %v6008_v58 }
 0x321   : > { %13889 = vmatmul.mubr.msk.f32.gmra.mxu1 %vm548_vm2, %v6235_v8  ;;  %13865 = vmatprep.mubr.msk.f32.mxu0 %vm548_vm2, %v6009_v33 }
 0x322   : > { %13891 = vmatprep.mubr.msk.f32.mxu1 %vm548_vm2, %v6236_v28 }
 0x324   : > { %13866 = vmatmul.mubr.msk.f32.gmra.mxu0 %vm548_vm2, %v6010_v53 }
 0x325   : > { %13892 = vmatmul.mubr.msk.f32.gmra.mxu1 %vm548_vm2, %v6237_v18  ;;  %13868 = vmatprep.mubr.msk.f32.mxu0 %vm548_vm2, %v6011_v31 }
 0x326   : > { %13894 = vmatprep.mubr.msk.f32.mxu1 %vm548_vm2, %v6238_v6 }
 0x328   : > { %13869 = vmatmul.mubr.msk.f32.gmra.mxu0 %vm548_vm2, %v6012_v11 }
 0x329   : > { %13895 = vmatmul.mubr.msk.f32.gmra.mxu1 %vm548_vm2, %v6239_v37  ;;  %13871 = vmatprep.mubr.msk.f32.mxu0 %vm548_vm2, %v6013_v60 }
 0x32a   : > { %13897 = vmatprep.mubr.msk.f32.mxu1 %vm548_vm2, %v6240_v42 }
 0x32c   : > { %13872 = vmatmul.mubr.msk.f32.gmra.mxu0 %vm548_vm2, %v6014_v48 }
 0x32d   : > { %13898 = vmatmul.mubr.msk.f32.gmra.mxu1 %vm548_vm2, %v6241_v29  ;;  %13874 = vmatprep.mubr.msk.f32.mxu0 %vm548_vm2, %v6015_v7 }
 0x32e   : > { %13900 = vmatprep.mubr.msk.f32.mxu1 %vm548_vm2, %v6242_v16 }
 0x330   : > { %13875 = vmatmul.mubr.msk.f32.gmra.mxu0 %vm548_vm2, %v6016_v56 }
 0x331   : > { %13901 = vmatmul.mubr.msk.f32.gmra.mxu1 %vm548_vm2, %v6243_v5 }
 0x374   : > { %v13699_v4 = vpop.f32.mrf.mxu0 }
 0x375   : > { %v13725_v51 = vpop.f32.mrf.mxu1 }
 0x376   : > { %v16059_v0 = vadd.f32 %v13725_v51, %v13699_v4  ;;  %v16061_v49 = vpop.f32.mrf.mxu0 }
 0x377   : > { %v16063_v26 = vpop.f32.mrf.mxu1 }
 0x378   : > { %v13702_v22 = vpop.f32.mrf.mxu0 }
 0x379   : > { %v13728_v52 = vpop.f32.mrf.mxu1 }
 0x37a   : > { %v16065_v13 = vadd.f32 %v13728_v52, %v13702_v22  ;;  %v16067_v44 = vpop.f32.mrf.mxu0 }
 0x37b   : > { %v16069_v19 = vpop.f32.mrf.mxu1 }
 0x37c   : > { %v13705_v47 = vpop.f32.mrf.mxu0 }
 0x37d   : > { %v13731_v45 = vpop.f32.mrf.mxu1 }
 0x37e   : > { %v16071_v9 = vadd.f32 %v13731_v45, %v13705_v47  ;;  %v16073_v38 = vpop.f32.mrf.mxu0 }
 0x37f   : > { %v16075_v14 = vpop.f32.mrf.mxu1 }
 0x380   : > { %v13708_v63 = vpop.f32.mrf.mxu0 }
 0x381   : > { %v13734_v50 = vpop.f32.mrf.mxu1 }
 0x382   : > { %v16077_v35 = vadd.f32 %v13734_v50, %v13708_v63  ;;  %v16079_v15 = vpop.f32.mrf.mxu0 }
 0x383   : > { %v16081_v34 = vpop.f32.mrf.mxu1 }
 0x384   : > { %v13711_v59 = vpop.f32.mrf.mxu0 }
 0x385   : > { %v13737_v41 = vpop.f32.mrf.mxu1 }
 0x386   : > { %v16083_v36 = vadd.f32 %v13737_v41, %v13711_v59  ;;  %v16085_v32 = vpop.f32.mrf.mxu0 }
 0x387   : > { %v16087_v17 = vpop.f32.mrf.mxu1 }
 0x388   : > { %v13714_v10 = vpop.f32.mrf.mxu0 }
 0x389   : > { %v13740_v27 = vpop.f32.mrf.mxu1 }
 0x38a   : > { %v16094_v30 = vadd.f32 %v13740_v27, %v13714_v10  ;;  %v16096_v58 = vpop.f32.mrf.mxu0 }
 0x38b   : > { %v16098_v8 = vpop.f32.mrf.mxu1 }
 0x38c   : > { %v13717_v33 = vpop.f32.mrf.mxu0 }
 0x38d   : > { %v13743_v28 = vpop.f32.mrf.mxu1 }
 0x38e   : > { %v16100_v53 = vadd.f32 %v13743_v28, %v13717_v33  ;;  %v16102_v18 = vpop.f32.mrf.mxu0 }
 0x38f   : > { %v16104_v31 = vpop.f32.mrf.mxu1 }
 0x390   : > { %17719 = vst [vmem:[#allocation26_spill] sm:$0xff] %v16100_v53  ;;  %17720 = vst [vmem:[#allocation35_spill] sm:$0xff] %v16104_v31  ;;  %v13720_v6 = vpop.f32.mrf.mxu0 }
 0x391   : > { %v13746_v11 = vpop.f32.mrf.mxu1 }
 0x392   : > { %v16106_v37 = vadd.f32 %v13746_v11, %v13720_v6  ;;  %v16108_v60 = vpop.f32.mrf.mxu0 }
 0x393   : > { %17722 = vst [vmem:[#allocation28_spill] sm:$0xff] %v16108_v60  ;;  %v16110_v42 = vpop.f32.mrf.mxu1 }
 0x394   : > { %17721 = vst [vmem:[#allocation29_spill] sm:$0xff] %v16106_v37  ;;  %17723 = vst [vmem:[#allocation19_spill] sm:$0xff] %v16110_v42  ;;  %v13751_v48 = vpop.f32.mrf.mxu0 }
 0x395   : > { %v13777_v29 = vpop.f32.mrf.mxu1 }
 0x396   : > { %v5225_v7 = vpop.f32.mrf.mxu0 }
 0x397   : > { %v16112_v16 = vpop.f32.mrf.mxu1 }
 0x398   : > { %v13754_v56 = vpop.f32.mrf.mxu0 }
 0x399   : > { %v16114_v5 = vpop.f32.mrf.mxu1 }
 0x39a   : > { %v5235_v1 = vpop.f32.mrf.mxu0 }
 0x39b   : > { %v16116_v4 = vpop.f32.mrf.mxu1 }
 0x39c   : > { %v16118_v51 = vpop.f32.mrf.mxu0 }
 0x39d   : > { %v16120_v22 = vpop.f32.mrf.mxu1 }
 0x39e   : > { %v16122_v52 = vpop.f32.mrf.mxu0 }
 0x39f   : > { %v16124_v47 = vpop.f32.mrf.mxu1 }
 0x3a0   : > { %v16126_v45 = vpop.f32.mrf.mxu0 }
 0x3a1   : > { %v16128_v63 = vpop.f32.mrf.mxu1 }
 0x3a2   : > { %v16130_v50 = vpop.f32.mrf.mxu0 }
 0x3a3   : > { %v16132_v59 = vpop.f32.mrf.mxu1 }
 0x3a4   : > { %v16134_v41 = vpop.f32.mrf.mxu0 }
 0x3a5   : > { %v16136_v24 = vpop.f32.mrf.mxu1 }
 0x3a6   : > { %v16138_v10 = vpop.f32.mrf.mxu0 }
 0x3a7   : > { %v16140_v27 = vpop.f32.mrf.mxu1 }
 0x3a8   : > { %17724 = vst [vmem:[#allocation30_spill] sm:$0xff] %v16140_v27  ;;  %v16142_v33 = vpop.f32.mrf.mxu0 }
 0x3a9   : > { %v16144_v28 = vpop.f32.mrf.mxu1 }
 0x3aa   : > { %17725 = vst [vmem:[#allocation40_spill] sm:$0xff] %v16144_v28  ;;  %v16146_v6 = vpop.f32.mrf.mxu0 }
 0x3ab   : > { %17726 = vst [vmem:[#allocation20_spill] sm:$0xff] %v16146_v6  ;;  %v16148_v11 = vpop.f32.mrf.mxu1  ;;  %v5015_v6 = vadd.f32 %v16063_v26, %v16061_v49 }
 0x3ac   : > { %17727 = vst [vmem:[#allocation37_spill] sm:$0xff] %v16148_v11  ;;  %v16150_v46 = vpop.f32.mrf.mxu0 }
 0x3ad   : > { %17728 = vst [vmem:[#allocation31_spill] sm:$0xff] %v16150_v46  ;;  %v16152_v20 = vpop.f32.mrf.mxu1 }
 0x3ae   : > { %17729 = vst [vmem:[#allocation44_spill] sm:$0xff] %v16152_v20  ;;  %v16154_v25 = vpop.f32.mrf.mxu0 }
 0x3af   : > { %17730 = vst [vmem:[#allocation21_spill] sm:$0xff] %v16154_v25  ;;  %v16156_v55 = vpop.f32.mrf.mxu1 }
 0x3b0   : > { %17731 = vst [vmem:[#allocation63_spill] sm:$0xff] %v16156_v55  ;;  %v16158_v23 = vpop.f32.mrf.mxu0 }
 0x3b1   : > { %17732 = vst [vmem:[#allocation23_spill] sm:$0xff] %v16158_v23  ;;  %v16160_v2 = vpop.f32.mrf.mxu1 }
 0x3b2   : > { %17733 = vst [vmem:[#allocation59_spill] sm:$0xff] %v16160_v2  ;;  %v16162_v12 = vpop.f32.mrf.mxu0 }
 0x3b3   : > { %17734 = vst [vmem:[#allocation46_spill] sm:$0xff] %v16162_v12  ;;  %v16164_v54 = vpop.f32.mrf.mxu1 }
 0x3b4   : > { %17735 = vst [vmem:[#allocation32_spill] sm:$0xff] %v16164_v54  ;;  %v13803_v57 = vpop.f32.mrf.mxu0 }
 0x3b5   : > { %v13829_v62 = vpop.f32.mrf.mxu1 }
 0x3b6   : > { %v5679_v21 = vpop.f32.mrf.mxu0 }
 0x3b7   : > { %v5906_v43 = vpop.f32.mrf.mxu1 }
 0x3b8   : > { %v13806_v3 = vpop.f32.mrf.mxu0 }
 0x3b9   : > { %v13832_v40 = vpop.f32.mrf.mxu1 }
 0x3ba   : > { %v5689_v39 = vpop.f32.mrf.mxu0 }
 0x3bb   : > { %v16166_v61 = vpop.f32.mrf.mxu1 }
 0x3bc   : > { %v13809_v37 = vpop.f32.mrf.mxu0 }
 0x3bd   : > { %v16168_v20 = vpop.f32.mrf.mxu1 }
 0x3be   : > { %v5699_v55 = vpop.f32.mrf.mxu0 }
 0x3bf   : > { %v16170_v23 = vpop.f32.mrf.mxu1 }
 0x3c0   : > { %v16172_v2 = vpop.f32.mrf.mxu0 }
 0x3c1   : > { %v16174_v12 = vpop.f32.mrf.mxu1 }
 0x3c2   : > { %17736 = vst [vmem:[#allocation65_spill] sm:$0xff] %v16174_v12  ;;  %v16176_v54 = vpop.f32.mrf.mxu0  ;;  %v5305_v12 = vadd.f32 %v13751_v48, %v16059_v0 }
 0x3c3   : > { %v16178_v25 = vpop.f32.mrf.mxu1 }
 0x3c4   : > { %17737 = vst [vmem:[#allocation42_spill] sm:$0xff] %v16178_v25  ;;  %v16180_v11 = vpop.f32.mrf.mxu0 }
 0x3c5   : > { %17738 = vst [vmem:[#allocation41_spill] sm:$0xff] %v16180_v11  ;;  %v16182_v42 = vpop.f32.mrf.mxu1  ;;  %v5304_v11 = vadd.f32 %v5225_v7, %v5015_v6  ;;  %v5035_v6 = vadd.f32 %v16075_v14, %v16073_v38  ;;  %v5311_v38 = vadd.f32 %v16126_v45, %v16077_v35 }
 0x3c6   : > { %17739 = vst [vmem:[#allocation61_spill] sm:$0xff] %v16182_v42  ;;  %v16184_v60 = vpop.f32.mrf.mxu0 }
 0x3c7   : > { %17740 = vst [vmem:[#allocation48_spill] sm:$0xff] %v16184_v60  ;;  %v16186_v46 = vpop.f32.mrf.mxu1  ;;  %v5531_v0 = vadd.f32 %v16112_v16, %v5304_v11  ;;  %v5538_v35 = vadd.f32 %v16128_v63, %v5311_v38 }
 0x3c8   : > { %17741 = vst [vmem:[#allocation67_spill] sm:$0xff] %v16186_v46  ;;  %v16188_v53 = vpop.f32.mrf.mxu0  ;;  %v5025_v46 = vadd.f32 %v16069_v19, %v16067_v44 }
 0x3c9   : > { %17742 = vst [vmem:[#allocation45_spill] sm:$0xff] %v16188_v53  ;;  %v16190_v28 = vpop.f32.mrf.mxu1  ;;  %v5532_v53 = vadd.f32 %v13777_v29, %v5305_v12  ;;  %v5309_v12 = vadd.f32 %v16118_v51, %v16071_v9 }
 0x3ca   : > { %17743 = vst [vmem:[#allocation62_spill] sm:$0xff] %v16190_v28  ;;  %v16195_v27 = vpop.f32.mrf.mxu0  ;;  %v5307_v28 = vadd.f32 %v13754_v56, %v16065_v13  ;;  %v5306_v26 = vadd.f32 %v5235_v1, %v5025_v46  ;;  %v5758_v13 = vadd.f32 %v5679_v21, %v5531_v0  ;;  %v5045_v56 = vadd.f32 %v16081_v34, %v16079_v15 }
 0x3cb   : > { %v16197_v25 = vpop.f32.mrf.mxu1  ;;  %v5759_v48 = vadd.f32 %v13803_v57, %v5532_v53  ;;  %v5308_v57 = vadd.f32 %v16122_v52, %v5035_v6  ;;  %v5536_v21 = vadd.f32 %v16120_v22, %v5309_v12  ;;  %v5055_v15 = vadd.f32 %v16087_v17, %v16085_v32 }
 0x3cc   : > { %17744 = vst [vmem:[#allocation50_spill] sm:$0xff] %v16197_v25  ;;  %v16199_v31 = vpop.f32.mrf.mxu0  ;;  %v5534_v44 = vadd.f32 %v16114_v5, %v5307_v28  ;;  %v5533_v46 = vadd.f32 %v16116_v4, %v5306_v26  ;;  %v5985_v9 = vadd.f32 %v5906_v43, %v5758_v13  ;;  %v5310_v28 = vadd.f32 %v16130_v50, %v5045_v56  ;;  %v17746_v13 = vld [vmem:[#allocation30_spill] sm:$0xff]  ;;  %v17749_v56 = vld [vmem:[#allocation41_spill] sm:$0xff] }
 0x3cd   : > { %v16201_v42 = vpop.f32.mrf.mxu1  ;;  %v5986_v53 = vadd.f32 %v13829_v62, %v5759_v48  ;;  %v5535_v62 = vadd.f32 %v16124_v47, %v5308_v57  ;;  %v5763_v52 = vadd.f32 %v13809_v37, %v5536_v21  ;;  %v5313_v34 = vadd.f32 %v16134_v41, %v16083_v36  ;;  %v17747_v57 = vld [vmem:[#allocation20_spill] sm:$0xff]  ;;  %v17752_v21 = vld [vmem:[#allocation31_spill] sm:$0xff] }
 0x3ce   : > { %v16206_v60 = vpop.f32.mrf.mxu0  ;;  %v5761_v16 = vadd.f32 %v13806_v3, %v5534_v44  ;;  %v5760_v1 = vadd.f32 %v5689_v39, %v5533_v46  ;;  %v5537_v37 = vadd.f32 %v16132_v59, %v5310_v28  ;;  %v5312_v32 = vadd.f32 %v16138_v10, %v5055_v15  ;;  %v17753_v28 = vld [vmem:[#allocation42_spill] sm:$0xff]  ;;  %v17756_v15 = vld [vmem:[#allocation19_spill] sm:$0xff] }
 0x3cf   : > { %v16208_v49 = vpop.f32.mrf.mxu1  ;;  %v5762_v50 = vadd.f32 %v5699_v55, %v5535_v62  ;;  %v5990_v63 = vadd.f32 %v16168_v20, %v5763_v52  ;;  %v5765_v36 = vadd.f32 %v16172_v2, %v5538_v35  ;;  %v5315_v55 = vadd.f32 %v16142_v33, %v16094_v30  ;;  %v17745_v20 = vld [vmem:[#allocation35_spill] sm:$0xff]  ;;  %v17748_v30 = vld [vmem:[#allocation65_spill] sm:$0xff] }
 0x3d0   : > { %v16211_v25 = vpop.f32.mrf.mxu0  ;;  %v5988_v3 = vadd.f32 %v13832_v40, %v5761_v16  ;;  %v5987_v45 = vadd.f32 %v16166_v61, %v5760_v1  ;;  %v5065_v40 = vadd.f32 %v16098_v8, %v16096_v58  ;;  %v5540_v61 = vadd.f32 %v16136_v24, %v5313_v34  ;;  %v17757_v34 = vld [vmem:[#allocation37_spill] sm:$0xff] }
 0x3d1   : > { %v16213_v7 = vpop.f32.mrf.mxu1  ;;  %v5989_v59 = vadd.f32 %v16170_v23, %v5762_v50  ;;  %v5764_v10 = vadd.f32 %v16176_v54, %v5537_v37  ;;  %v5075_v2 = vadd.f32 %v17745_v20, %v16102_v18  ;;  %v5539_v46 = vadd.f32 %v17746_v13, %v5312_v32  ;;  %v17750_v23 = vld [vmem:[#allocation40_spill] sm:$0xff]  ;;  %v17751_v54 = vld [vmem:[#allocation26_spill] sm:$0xff] }
 0x3d2   : > { %v16220_v19 = vpop.f32.mrf.mxu0  ;;  %v5314_v24 = vadd.f32 %v17747_v57, %v5065_v40  ;;  %v5992_v33 = vadd.f32 %v17748_v30, %v5765_v36  ;;  %v5767_v38 = vadd.f32 %v17749_v56, %v5540_v61  ;;  %v17760_v40 = vld [vmem:[#allocation45_spill] sm:$0xff]  ;;  %v17763_v36 = vld [vmem:[#allocation23_spill] sm:$0xff] }
 0x3d3   : > { %v16222_v29 = vpop.f32.mrf.mxu1  ;;  %v17768_v56 = vld [vmem:[#allocation59_spill] sm:$0xff] }
 0x3d4   : > { %v13855_v14 = vpop.f32.mrf.mxu0 }
 0x3d5   : > { %v13881_v5 = vpop.f32.mrf.mxu1  ;;  %v6213_v51 = vadd.f32 %v13855_v14, %v5986_v53 }
 0x3d6   : > { %v6133_v4 = vpop.f32.mrf.mxu0 }
 0x3d7   : > { %v6360_v11 = vpop.f32.mrf.mxu1  ;;  %v6212_v0 = vadd.f32 %v6133_v4, %v5985_v9  ;;  %v6440_v43 = vadd.f32 %v13881_v5, %v6213_v51  ;;  %v5542_v5 = vadd.f32 %v17750_v23, %v5315_v55  ;;  %v5317_v9 = vadd.f32 %v17752_v21, %v17751_v54  ;;  %v17769_v54 = vld [vmem:[#allocation50_spill] sm:$0xff] }
 0x3d8   : > { %v13858_v39 = vpop.f32.mrf.mxu0  ;;  %v5991_v4 = vadd.f32 %v17753_v28, %v5764_v10 }
 0x3d9   : > { %v13884_v22 = vpop.f32.mrf.mxu1  ;;  %v6439_v26 = vadd.f32 %v6360_v11, %v6212_v0  ;;  %v6215_v48 = vadd.f32 %v13858_v39, %v5988_v3  ;;  %v17754_v11 = vld [vmem:[#allocation48_spill] sm:$0xff]  ;;  %v17758_v39 = vld [vmem:[#allocation21_spill] sm:$0xff]  ;;  %v5769_v37 = vadd.f32 %v17760_v40, %v5542_v5 }
 0x3da   : > { %v6143_v17 = vpop.f32.mrf.mxu0  ;;  %v5766_v62 = vadd.f32 %v17754_v11, %v5539_v46  ;;  %v17755_v0 = vld [vmem:[#allocation28_spill] sm:$0xff] }
 0x3db   : > { %v6370_v47 = vpop.f32.mrf.mxu1  ;;  %14496 = vtanh.f32 %v6439_v26  ;;  %v6214_v41 = vadd.f32 %v6143_v17, %v5987_v45  ;;  %v6442_v6 = vadd.f32 %v13884_v22, %v6215_v48  ;;  %v5085_v35 = vadd.f32 %v17756_v15, %v17755_v0  ;;  %v17759_v26 = vld [vmem:[#allocation61_spill] sm:$0xff]  ;;  %v17761_v17 = vld [vmem:[#allocation44_spill] sm:$0xff] }
 0x3dc   : > { %14498 = vtanh.f32 %v6440_v43  ;;  %v13861_v58 = vpop.f32.mrf.mxu0  ;;  %v5541_v43 = vadd.f32 %v17757_v34, %v5314_v24  ;;  %v5316_v22 = vadd.f32 %v17758_v39, %v5075_v2  ;;  %v5994_v48 = vadd.f32 %v17759_v26, %v5767_v38  ;;  %v17766_v2 = vld [vmem:[#allocation46_spill] sm:$0xff] }
 0x3dd   : > { %v13887_v8 = vpop.f32.mrf.mxu1  ;;  %v6441_v44 = vadd.f32 %v6370_v47, %v6214_v41  ;;  %v6217_v12 = vadd.f32 %v13861_v58, %v5990_v63  ;;  %v5544_v47 = vadd.f32 %v17761_v17, %v5317_v9  ;;  %v17762_v63 = vld [vmem:[#allocation29_spill] sm:$0xff]  ;;  %v17764_v58 = vld [vmem:[#allocation67_spill] sm:$0xff]  ;;  %v5318_v13 = vadd.f32 %v17766_v2, %v5085_v35  ;;  %v17767_v24 = vld [vmem:[#allocation62_spill] sm:$0xff] }
 0x3de   : > { %v6153_v53 = vpop.f32.mrf.mxu0  ;;  %v5319_v41 = vadd.f32 %v17763_v36, %v17762_v63  ;;  %v11920_v2 = vld [vmem:[%s17483_s6] ss:$0 sm:$0xff] }
 0x3df   : > { %v6380_v16 = vpop.f32.mrf.mxu1  ;;  %14500 = vtanh.f32 %v6441_v44  ;;  %v6216_v14 = vadd.f32 %v6153_v53, %v5989_v59  ;;  %v6444_v1 = vadd.f32 %v13887_v8, %v6217_v12  ;;  %v5993_v8 = vadd.f32 %v17764_v58, %v5766_v62  ;;  %v17765_v12 = vld [vmem:[#allocation63_spill] sm:$0xff] }
 0x3e0   : > { %14502 = vtanh.f32 %v6442_v6  ;;  %v13864_v18 = vpop.f32.mrf.mxu0  ;;  %v5768_v59 = vadd.f32 %v16195_v27, %v5541_v43  ;;  %v5543_v20 = vadd.f32 %v17765_v12, %v5316_v22  ;;  %v5996_v53 = vadd.f32 %v17767_v24, %v5769_v37 }
 0x3e1   : > { %v13890_v51 = vpop.f32.mrf.mxu1  ;;  %v6443_v3 = vadd.f32 %v6380_v16, %v6216_v14  ;;  %v6219_v52 = vadd.f32 %v13864_v18, %v5992_v33  ;;  %v5771_v16 = vadd.f32 %v16199_v31, %v5544_v47  ;;  %v5546_v38 = vadd.f32 %v17768_v56, %v5319_v41 }
 0x3e2   : > { %v6163_v45 = vpop.f32.mrf.mxu0  ;;  %v5995_v21 = vadd.f32 %v17769_v54, %v5768_v59  ;;  %v5770_v9 = vadd.f32 %v16206_v60, %v5543_v20 }
 0x3e3   : > { %v6390_v50 = vpop.f32.mrf.mxu1  ;;  %14504 = vtanh.f32 %v6443_v3  ;;  %v6218_v32 = vadd.f32 %v6163_v45, %v5991_v4  ;;  %v6446_v61 = vadd.f32 %v13890_v51, %v6219_v52  ;;  %v17770_v51 = vld [vmem:[#allocation32_spill] sm:$0xff]  ;;  %v5998_v11 = vadd.f32 %v16201_v42, %v5771_v16 }
 0x3e4   : > { %14506 = vtanh.f32 %v6444_v1  ;;  %v13867_v55 = vpop.f32.mrf.mxu0  ;;  %v5545_v31 = vadd.f32 %v17770_v51, %v5318_v13  ;;  %v5773_v62 = vadd.f32 %v16211_v25, %v5546_v38  ;;  %v5997_v34 = vadd.f32 %v16208_v49, %v5770_v9 }
 0x3e5   : > { %v13893_v6 = vpop.f32.mrf.mxu1  ;;  %v6445_v10 = vadd.f32 %v6390_v50, %v6218_v32  ;;  %v6221_v44 = vadd.f32 %v13867_v55, %v5994_v48 }
 0x3e6   : > { %v6173_v46 = vpop.f32.mrf.mxu0  ;;  %v5772_v43 = vadd.f32 %v16220_v19, %v5545_v31  ;;  %v6000_v25 = vadd.f32 %v16213_v7, %v5773_v62 }
 0x3e7   : > { %v6400_v57 = vpop.f32.mrf.mxu1  ;;  %14508 = vtanh.f32 %v6445_v10  ;;  %v6220_v30 = vadd.f32 %v6173_v46, %v5993_v8  ;;  %v6448_v14 = vadd.f32 %v13893_v6, %v6221_v44 }
 0x3e8   : > { %v14497_v33 = vpop.eup %14496  ;;  %14510 = vtanh.f32 %v6446_v61  ;;  %v13870_v27 = vpop.f32.mrf.mxu0  ;;  %v5999_v19 = vadd.f32 %v16222_v29, %v5772_v43 }
 0x3e9   : > { %v13896_v23 = vpop.f32.mrf.mxu1  ;;  %v14499_v5 = vpop.eup %14498  ;;  %v6447_v1 = vadd.f32 %v6400_v57, %v6220_v30  ;;  %v6223_v18 = vadd.f32 %v13870_v27, %v5996_v53  ;;  %13905 = vmatprep.mubr.msk.f32.mxu0 %vm548_vm2, %v14497_v33 }
 0x3ea   : > { %v6183_v28 = vpop.f32.mrf.mxu0  ;;  %13906 = vmatmul.mubr.msk.f32.vlgmr.msra.gmra.mxu0 %vm548_vm2, %v14499_v5 }
 0x3eb   : > { %v6410_v4 = vpop.f32.mrf.mxu1  ;;  %14512 = vtanh.f32 %v6447_v1  ;;  %v6222_v3 = vadd.f32 %v6183_v28, %v5995_v21  ;;  %v6450_v0 = vadd.f32 %v13896_v23, %v6223_v18 }
 0x3ec   : > { %v14501_v52 = vpop.eup %14500  ;;  %14514 = vtanh.f32 %v6448_v14  ;;  %v13873_v60 = vpop.f32.mrf.mxu0 }
 0x3ed   : > { %v13899_v15 = vpop.f32.mrf.mxu1  ;;  %v14503_v35 = vpop.eup %14502  ;;  %v6449_v39 = vadd.f32 %v6410_v4, %v6222_v3  ;;  %v6225_v22 = vadd.f32 %v13873_v60, %v5998_v11  ;;  %13908 = vmatprep.mubr.msk.f32.mxu0 %vm548_vm2, %v14501_v52 }
 0x3ee   : > { %v6193_v45 = vpop.f32.mrf.mxu0  ;;  %13909 = vmatmul.mubr.msk.f32.gmra.mxu0 %vm548_vm2, %v14503_v35 }
 0x3ef   : > { %v6420_v42 = vpop.f32.mrf.mxu1  ;;  %14516 = vtanh.f32 %v6449_v39  ;;  %v6224_v50 = vadd.f32 %v6193_v45, %v5997_v34  ;;  %v6452_v48 = vadd.f32 %v13899_v15, %v6225_v22 }
 0x3f0   : > { %v14505_v26 = vpop.eup %14504  ;;  %14518 = vtanh.f32 %v6450_v0  ;;  %v13876_v40 = vpop.f32.mrf.mxu0 }
 0x3f1   : > { %v13902_v37 = vpop.f32.mrf.mxu1  ;;  %v14507_v49 = vpop.eup %14506  ;;  %v6451_v32 = vadd.f32 %v6420_v42, %v6224_v50  ;;  %v6227_v17 = vadd.f32 %v13876_v40, %v6000_v25  ;;  %13911 = vmatprep.mubr.msk.f32.mxu0 %vm548_vm2, %v14505_v26 }
 0x3f2   : > { %v6203_v47 = vpop.f32.mrf.mxu0  ;;  %13912 = vmatmul.mubr.msk.f32.gmra.mxu0 %vm548_vm2, %v14507_v49 }
 0x3f3   : > { %14520 = vtanh.f32 %v6451_v32  ;;  %v6226_v63 = vadd.f32 %v6203_v47, %v5999_v19  ;;  %v6454_v36 = vadd.f32 %v13902_v37, %v6227_v17  ;;  %v6430_v41 = vpop.f32.mrf.mxu1  ;;  %v12089_v47 = vld [vmem:[%s17487_s10 + $0x4] sm:$0xf] }
 0x3f4   : > { %v14509_v7 = vpop.eup %14508  ;;  %14522 = vtanh.f32 %v6452_v48  ;;  %13955 = vmatprep.subr.msk.mxu0 %vm1067_vm3, %v12089_v47 }
 0x3f5   : > { %v14511_v61 = vpop.eup %14510  ;;  %v6453_v55 = vadd.f32 %v6430_v41, %v6226_v63  ;;  %13914 = vmatprep.mubr.msk.f32.mxu0 %vm548_vm2, %v14509_v7  ;;  %v7071_v63 = vld [vmem:[%s17487_s10] sm:$0xf]  ;;  %13956 = vmatpush3.msk.msra.mxu0 %vm1067_vm3, %v12089_v47 }
 0x3f6   : > { %13915 = vmatmul.mubr.msk.f32.gmra.mxu0 %vm548_vm2, %v14511_v61  ;;  %13981 = vmatprep.subr.msk.mxu1 %vm1067_vm3, %v7071_v63 }
 0x3f7   : > { %14524 = vtanh.f32 %v6453_v55 }
 0x3f8   : > { %v14513_v29 = vpop.eup %14512  ;;  %14526 = vtanh.f32 %v6454_v36  ;;  %v17787_v36 = vld [vmem:[#allocation9_spill] sm:$0xff] }
 0x3f9   : > { %v14515_v6 = vpop.eup %14514  ;;  %13917 = vmatprep.mubr.msk.f32.mxu0 %vm548_vm2, %v14513_v29  ;;  %v17788_v29 = vld [vmem:[#allocation7_spill] sm:$0xff] }
 0x3fa   : > { %13918 = vmatmul.mubr.msk.f32.gmra.mxu0 %vm548_vm2, %v14515_v6 }
 0x3fc   : > { %v14517_v58 = vpop.eup %14516 }
 0x3fd   : > { %v14519_v8 = vpop.eup %14518  ;;  %13920 = vmatprep.mubr.msk.f32.mxu0 %vm548_vm2, %v14517_v58  ;;  %v17789_v58 = vld [vmem:[#allocation25_spill] sm:$0xff] }
 0x3fe   : > { %13921 = vmatmul.mubr.msk.f32.gmra.mxu0 %vm548_vm2, %v14519_v8 }
 0x400   : > { %v14521_v59 = vpop.eup %14520 }
 0x401   : > { %v14523_v10 = vpop.eup %14522  ;;  %13923 = vmatprep.mubr.msk.f32.mxu0 %vm548_vm2, %v14521_v59 }
 0x402   : > { %13924 = vmatmul.mubr.msk.f32.gmra.mxu0 %vm548_vm2, %v14523_v10 }
 0x404   : > { %v14525_v44 = vpop.eup %14524 }
 0x405   : > { %v14527_v12 = vpop.eup %14526  ;;  %13926 = vmatprep.mubr.msk.f32.mxu0 %vm548_vm2, %v14525_v44  ;;  %v17790_v44 = vld [vmem:[#allocation8_spill] sm:$0xff] }
 0x406   : > { %13927 = vmatmul.mubr.msk.f32.gmra.mxu0 %vm548_vm2, %v14527_v12 }
 0x4aa   : > { %v13907_v20 = vpop.f32.mrf.mxu0 }
 0x4ab   : > { %v16307_v57 = vadd.f32 %v13907_v20, %v11920_v2  ;;  %v17791_v20 = vld [vmem:[#allocation15_spill] sm:$0xff] }
 0x4ac   : > { %v6586_v13 = vpop.f32.mrf.mxu0 }
 0x4ad   : > { %v16305_v46 = vadd.f32 %v11920_v2, %v6586_v13  ;;  %17772 = vst [vmem:[#allocation43_spill] sm:$0xff] %v16307_v57 }
 0x4ae   : > { %v13910_v24 = vpop.f32.mrf.mxu0 }
 0x4af   : > { %17771 = vst [vmem:[#allocation69_spill] sm:$0xff] %v16305_v46  ;;  %13931 = vmatprep.mubr.msk.f32.mxu1 %vm742_vm4, %v16305_v46  ;;  %v16315_v30 = vadd.f32 %v13910_v24, %v11920_v2 }
 0x4b0   : > { %v6596_v53 = vpop.f32.mrf.mxu0  ;;  %13932 = vmatmul.mubr.msk.f32.vlgmr.msra.gmra.mxu1 %vm742_vm4, %v16307_v57 }
 0x4b1   : > { %v16313_v16 = vadd.f32 %v11920_v2, %v6596_v53  ;;  %17774 = vst [vmem:[#allocation33_spill] sm:$0xff] %v16315_v30  ;;  %13982 = vmatpush3.msk.msra.mxu1 %vm1067_vm3, %v7071_v63  ;;  %v17792_v53 = vld [vmem:[#allocation14_spill] sm:$0xff] }
 0x4b2   : > { %v13913_v33 = vpop.f32.mrf.mxu0 }
 0x4b3   : > { %17773 = vst [vmem:[#allocation64_spill] sm:$0xff] %v16313_v16  ;;  %13934 = vmatprep.mubr.msk.f32.mxu1 %vm742_vm4, %v16313_v16  ;;  %v16323_v14 = vadd.f32 %v13913_v33, %v11920_v2 }
 0x4b4   : > { %v6606_v56 = vpop.f32.mrf.mxu0  ;;  %13935 = vmatmul.mubr.msk.f32.gmra.mxu1 %vm742_vm4, %v16315_v30 }
 0x4b5   : > { %v16321_v38 = vadd.f32 %v11920_v2, %v6606_v56  ;;  %17776 = vst [vmem:[#allocation71_spill] sm:$0xff] %v16323_v14  ;;  %v17793_v56 = vld [vmem:[#allocation16_spill] sm:$0xff] }
 0x4b6   : > { %v13916_v27 = vpop.f32.mrf.mxu0 }
 0x4b7   : > { %17775 = vst [vmem:[#allocation52_spill] sm:$0xff] %v16321_v38  ;;  %13937 = vmatprep.mubr.msk.f32.mxu1 %vm742_vm4, %v16321_v38  ;;  %v16331_v54 = vadd.f32 %v13916_v27, %v11920_v2 }
 0x4b8   : > { %v6616_v23 = vpop.f32.mrf.mxu0  ;;  %13938 = vmatmul.mubr.msk.f32.gmra.mxu1 %vm742_vm4, %v16323_v14 }
 0x4b9   : > { %v16329_v5 = vadd.f32 %v11920_v2, %v6616_v23  ;;  %17778 = vst [vmem:[#allocation34_spill] sm:$0xff] %v16331_v54 }
 0x4ba   : > { %v13919_v21 = vpop.f32.mrf.mxu0 }
 0x4bb   : > { %17777 = vst [vmem:[#allocation66_spill] sm:$0xff] %v16329_v5  ;;  %13940 = vmatprep.mubr.msk.f32.mxu1 %vm742_vm4, %v16329_v5  ;;  %v16339_v18 = vadd.f32 %v13919_v21, %v11920_v2 }
 0x4bc   : > { %v6626_v9 = vpop.f32.mrf.mxu0  ;;  %13941 = vmatmul.mubr.msk.f32.gmra.mxu1 %vm742_vm4, %v16331_v54 }
 0x4bd   : > { %v16337_v1 = vadd.f32 %v11920_v2, %v6626_v9  ;;  %17780 = vst [vmem:[#allocation73_spill] sm:$0xff] %v16339_v18 }
 0x4be   : > { %v13922_v51 = vpop.f32.mrf.mxu0 }
 0x4bf   : > { %17779 = vst [vmem:[#allocation53_spill] sm:$0xff] %v16337_v1  ;;  %13943 = vmatprep.mubr.msk.f32.mxu1 %vm742_vm4, %v16337_v1  ;;  %v16347_v4 = vadd.f32 %v13922_v51, %v11920_v2  ;;  %v17794_v51 = vld [vmem:[#allocation22_spill] sm:$0xff] }
 0x4c0   : > { %v6636_v31 = vpop.f32.mrf.mxu0  ;;  %13944 = vmatmul.mubr.msk.f32.gmra.mxu1 %vm742_vm4, %v16339_v18 }
 0x4c1   : > { %v16345_v28 = vadd.f32 %v11920_v2, %v6636_v31  ;;  %17782 = vst [vmem:[#allocation47_spill] sm:$0xff] %v16347_v4 }
 0x4c2   : > { %v13925_v11 = vpop.f32.mrf.mxu0 }
 0x4c3   : > { %17781 = vst [vmem:[#allocation49_spill] sm:$0xff] %v16345_v28  ;;  %13946 = vmatprep.mubr.msk.f32.mxu1 %vm742_vm4, %v16345_v28  ;;  %v16355_v52 = vadd.f32 %v13925_v11, %v11920_v2  ;;  %v17795_v11 = vld [vmem:[#allocation10_spill] sm:$0xff] }
 0x4c4   : > { %v6646_v62 = vpop.f32.mrf.mxu0  ;;  %13947 = vmatmul.mubr.msk.f32.gmra.mxu1 %vm742_vm4, %v16347_v4 }
 0x4c5   : > { %v16353_v3 = vadd.f32 %v11920_v2, %v6646_v62  ;;  %17784 = vst [vmem:[#allocation54_spill] sm:$0xff] %v16355_v52 }
 0x4c6   : > { %v13928_v0 = vpop.f32.mrf.mxu0 }
 0x4c7   : > { %17783 = vst [vmem:[#allocation68_spill] sm:$0xff] %v16353_v3  ;;  %13949 = vmatprep.mubr.msk.f32.mxu1 %vm742_vm4, %v16353_v3  ;;  %v16363_v35 = vadd.f32 %v13928_v0, %v11920_v2  ;;  %v16392_v0 = vld [vmem:[%s17487_s10 + $0x8] sm:$0xf] }
 0x4c8   : > { %v6656_v60 = vpop.f32.mrf.mxu0  ;;  %13950 = vmatmul.mubr.msk.f32.gmra.mxu1 %vm742_vm4, %v16355_v52  ;;  %14007 = vmatprep.subr.msk.mxu0 %vm1067_vm3, %v16392_v0 }
 0x4c9   : > { %v16361_v15 = vadd.f32 %v11920_v2, %v6656_v60  ;;  %17786 = vst [vmem:[#allocation70_spill] sm:$0xff] %v16363_v35  ;;  %v16399_v60 = vld [vmem:[%s17487_s10 + $0xc] sm:$0xf] }
 0x4ca   : > { %14033 = vmatprep.subr.msk.mxu1 %vm1067_vm3, %v16399_v60 }
 0x4cb   : > { %17785 = vst [vmem:[#allocation75_spill] sm:$0xff] %v16361_v15  ;;  %13952 = vmatprep.mubr.msk.f32.mxu1 %vm742_vm4, %v16361_v15 }
 0x4cc   : > { %13953 = vmatmul.mubr.msk.f32.gmra.mxu1 %vm742_vm4, %v16363_v35 }
 0x570   : > { %v13933_v34 = vpop.f32.mrf.mxu1 }
 0x572   : > { %v6800_v43 = vpop.f32.mrf.mxu1 }
 0x573   : > { %6895 = vrot.lane.b32.xlu0 %v6800_v43, %s14665_s23 }
 0x574   : > { %v13936_v39 = vpop.f32.mrf.mxu1 }
 0x576   : > { %v6810_v22 = vpop.f32.mrf.mxu1 }
 0x577   : > { %6897 = vrot.lane.b32.xlu0 %v13933_v34, %s14665_s23  ;;  %6899 = vrot.lane.b32.xlu1 %v6810_v22, %s14665_s23 }
 0x578   : > { %v13939_v45 = vpop.f32.mrf.mxu1 }
 0x57a   : > { %v6820_v42 = vpop.f32.mrf.mxu1 }
 0x57b   : > { %6901 = vrot.lane.b32.xlu1 %v13936_v39, %s14665_s23  ;;  %6903 = vrot.lane.b32.xlu0 %v6820_v42, %s14665_s23 }
 0x57c   : > { %v13942_v25 = vpop.f32.mrf.mxu1 }
 0x57e   : > { %v6830_v50 = vpop.f32.mrf.mxu1 }
 0x57f   : > { %6905 = vrot.lane.b32.xlu1 %v13939_v45, %s14665_s23  ;;  %6907 = vrot.lane.b32.xlu0 %v6830_v50, %s14665_s23  ;;  %v17796_v45 = vld [vmem:[#allocation17_spill] sm:$0xff] }
 0x580   : > { %v13945_v26 = vpop.f32.mrf.mxu1 }
 0x582   : > { %v6840_v48 = vpop.f32.mrf.mxu1 }
 0x583   : > { %6909 = vrot.lane.b32.xlu1 %v13942_v25, %s14665_s23  ;;  %6911 = vrot.lane.b32.xlu0 %v6840_v48, %s14665_s23  ;;  %v17797_v25 = vld [vmem:[#allocation27_spill] sm:$0xff] }
 0x584   : > { %v13948_v40 = vpop.f32.mrf.mxu1 }
 0x586   : > { %v6850_v37 = vpop.f32.mrf.mxu1 }
 0x587   : > { %6913 = vrot.lane.b32.xlu1 %v13945_v26, %s14665_s23  ;;  %6915 = vrot.lane.b32.xlu0 %v6850_v37, %s14665_s23 }
 0x588   : > { %v13951_v49 = vpop.f32.mrf.mxu1 }
 0x58a   : > { %v6860_v19 = vpop.f32.mrf.mxu1 }
 0x58b   : > { %6917 = vrot.lane.b32.xlu1 %v13948_v40, %s14665_s23  ;;  %6919 = vrot.lane.b32.xlu0 %v6860_v19, %s14665_s23 }
 0x58c   : > { %v13954_v32 = vpop.f32.mrf.mxu1 }
 0x58e   : > { %v6870_v17 = vpop.f32.mrf.mxu1 }
 0x58f   : > { %6921 = vrot.lane.b32.xlu1 %v13951_v49, %s14665_s23  ;;  %6923 = vrot.lane.b32.xlu0 %v6870_v17, %s14665_s23  ;;  %v17798_v49 = vld [vmem:[#allocation24_spill] sm:$0xff] }
 0x593   : > { %6925 = vrot.lane.b32.xlu1 %v13954_v32, %s14665_s23  ;;  %v17799_v32 = vld [vmem:[#allocation12_spill] sm:$0xff] }
 0x5e5   : > { %v6896_v7 = vpop.permute.xlu0 %6895 }
 0x5e6   : > { %v6943_v41 = vadd.f32 %v6896_v7, %v17787_v36 }
 0x5e8   : > { %14528 = vtanh.f32 %v6943_v41 }
 0x5e9   : > { %v6898_v61 = vpop.permute.xlu0 %6897  ;;  %v6900_v55 = vpop.permute.xlu1 %6899 }
 0x5ea   : > { %v6944_v6 = vadd.f32 %v6898_v61, %v17788_v29  ;;  %v6945_v8 = vadd.f32 %v6900_v55, %v17789_v58  ;;  %v17800_v61 = vld [vmem:[#allocation11_spill] sm:$0xff] }
 0x5ec   : > { %14530 = vtanh.f32 %v6944_v6  ;;  %v17801_v6 = vld [vmem:[#allocation13_spill] sm:$0xff] }
 0x5ed   : > { %14532 = vtanh.f32 %v6945_v8  ;;  %v6902_v59 = vpop.permute.xlu1 %6901  ;;  %v6904_v10 = vpop.permute.xlu0 %6903 }
 0x5ee   : > { %v6946_v12 = vadd.f32 %v6902_v59, %v17790_v44  ;;  %v6947_v2 = vadd.f32 %v6904_v10, %v17791_v20 }
 0x5f0   : > { %14534 = vtanh.f32 %v6946_v12 }
 0x5f1   : > { %14536 = vtanh.f32 %v6947_v2  ;;  %v6906_v13 = vpop.permute.xlu1 %6905  ;;  %v6908_v24 = vpop.permute.xlu0 %6907  ;;  %v17802_v2 = vld [vmem:[#allocation18_spill] sm:$0xff] }
 0x5f2   : > { %v6948_v33 = vadd.f32 %v6906_v13, %v17792_v53  ;;  %v6949_v27 = vadd.f32 %v6908_v24, %v17793_v56 }
 0x5f4   : > { %14538 = vtanh.f32 %v6948_v33 }
 0x5f5   : > { %v14529_v23 = vpop.eup %14528  ;;  %14540 = vtanh.f32 %v6949_v27  ;;  %v6910_v21 = vpop.permute.xlu1 %6909 }
 0x5f6   : > { %v6912_v9 = vpop.permute.xlu0 %6911  ;;  %v6950_v31 = vadd.f32 %v6910_v21, %v17794_v51  ;;  %6991 = vrot.lane.b32.xlu0 %v14529_v23, %s14666_s27 }
 0x5f7   : > { %v6951_v62 = vadd.f32 %v6912_v9, %v17795_v11 }
 0x5f8   : > { %14542 = vtanh.f32 %v6950_v31 }
 0x5f9   : > { %v14531_v34 = vpop.eup %14530  ;;  %14544 = vtanh.f32 %v6951_v62  ;;  %v6914_v43 = vpop.permute.xlu1 %6913 }
 0x5fa   : > { %v6916_v39 = vpop.permute.xlu0 %6915  ;;  %v14533_v22 = vpop.eup %14532  ;;  %v6952_v42 = vadd.f32 %v6914_v43, %v17796_v45  ;;  %6993 = vrot.lane.b32.xlu1 %v14531_v34, %s14666_s27 }
 0x5fb   : > { %v6953_v50 = vadd.f32 %v6916_v39, %v17797_v25  ;;  %6995 = vrot.lane.b32.xlu0 %v14533_v22, %s14666_s27 }
 0x5fc   : > { %14546 = vtanh.f32 %v6952_v42 }
 0x5fd   : > { %v14535_v26 = vpop.eup %14534  ;;  %14548 = vtanh.f32 %v6953_v50  ;;  %v6918_v48 = vpop.permute.xlu1 %6917 }
 0x5fe   : > { %v6920_v40 = vpop.permute.xlu0 %6919  ;;  %v14537_v37 = vpop.eup %14536  ;;  %v6954_v19 = vadd.f32 %v6918_v48, %v17798_v49  ;;  %6997 = vrot.lane.b32.xlu1 %v14535_v26, %s14666_s27 }
 0x5ff   : > { %v6955_v17 = vadd.f32 %v6920_v40, %v17799_v32  ;;  %6999 = vrot.lane.b32.xlu0 %v14537_v37, %s14666_s27  ;;  %v16435_v37 = vld [vmem:[%s17487_s10 + $0x10] sm:$0xf] }
 0x600   : > { %14550 = vtanh.f32 %v6954_v19 }
 0x601   : > { %v14539_v47 = vpop.eup %14538  ;;  %14552 = vtanh.f32 %v6955_v17  ;;  %v6922_v63 = vpop.permute.xlu1 %6921 }
 0x602   : > { %v6924_v7 = vpop.permute.xlu0 %6923  ;;  %v14541_v41 = vpop.eup %14540  ;;  %v6956_v55 = vadd.f32 %v6922_v63, %v17800_v61  ;;  %7001 = vrot.lane.b32.xlu1 %v14539_v47, %s14666_s27  ;;  %v16443_v63 = vld [vmem:[%s17487_s10 + $0x14] sm:$0xf] }
 0x603   : > { %v6957_v8 = vadd.f32 %v6924_v7, %v17801_v6  ;;  %7003 = vrot.lane.b32.xlu0 %v14541_v41, %s14666_s27 }
 0x604   : > { %14554 = vtanh.f32 %v6956_v55 }
 0x605   : > { %v14543_v59 = vpop.eup %14542  ;;  %14556 = vtanh.f32 %v6957_v8  ;;  %v6926_v10 = vpop.permute.xlu1 %6925 }
 0x606   : > { %v14545_v12 = vpop.eup %14544  ;;  %v6958_v13 = vadd.f32 %v6926_v10, %v17802_v2  ;;  %7005 = vrot.lane.b32.xlu1 %v14543_v59, %s14666_s27 }
 0x607   : > { %7007 = vrot.lane.b32.xlu0 %v14545_v12, %s14666_s27 }
 0x608   : > { %14558 = vtanh.f32 %v6958_v13 }
 0x609   : > { %v14547_v24 = vpop.eup %14546 }
 0x60a   : > { %v14549_v33 = vpop.eup %14548  ;;  %7009 = vrot.lane.b32.xlu1 %v14547_v24, %s14666_s27 }
 0x60b   : > { %7011 = vrot.lane.b32.xlu0 %v14549_v33, %s14666_s27 }
 0x60d   : > { %v14551_v27 = vpop.eup %14550 }
 0x60e   : > { %v14553_v23 = vpop.eup %14552  ;;  %7013 = vrot.lane.b32.xlu1 %v14551_v27, %s14666_s27 }
 0x60f   : > { %7015 = vrot.lane.b32.xlu0 %v14553_v23, %s14666_s27 }
 0x611   : > { %v14555_v21 = vpop.eup %14554 }
 0x612   : > { %v14557_v9 = vpop.eup %14556  ;;  %7017 = vrot.lane.b32.xlu1 %v14555_v21, %s14666_s27 }
 0x613   : > { %7019 = vrot.lane.b32.xlu0 %v14557_v9, %s14666_s27 }
 0x615   : > { %v14559_v31 = vpop.eup %14558 }
 0x616   : > { %7021 = vrot.lane.b32.xlu1 %v14559_v31, %s14666_s27  ;;  %s14668_s27 = smov 116  }
 0x668   : > { %v6992_v62 = vpop.permute.xlu0 %6991 }
 0x669   : > { %7039 = vst.msk [vmem:[#allocation5 + $0x8] sm:$0xff] %vm742_vm4, %v6992_v62 }
 0x66c   : > { %v6994_v34 = vpop.permute.xlu1 %6993 }
 0x66d   : > { %7040 = vst.msk [vmem:[#allocation5 + $0x10] sm:$0xff] %vm742_vm4, %v6994_v34  ;;  %v6996_v43 = vpop.permute.xlu0 %6995 }
 0x66e   : > { %7041 = vst.msk [vmem:[#allocation5 + $0x18] sm:$0xff] %vm742_vm4, %v6996_v43 }
 0x670   : > { %v6998_v39 = vpop.permute.xlu1 %6997  ;;  %v7072_v22 = vld [vmem:[#allocation5 + $0x7] sm:$0xff] }
 0x671   : > { %v7055_v42 = vld [vmem:[#allocation5 + $0x8] sm:$0xff]  ;;  %7042 = vst.msk [vmem:[#allocation5 + $0x20] sm:$0xff] %vm742_vm4, %v6998_v39  ;;  %v7000_v50 = vpop.permute.xlu0 %6999  ;;  %13957 = vmatprep.mubr.msk.f32.mxu0 %vm742_vm4, %v7072_v22 }
 0x672   : > { %13983 = vmatprep.mubr.msk.f32.mxu1 %vm742_vm4, %v7055_v42  ;;  %7043 = vst.msk [vmem:[#allocation5 + $0x28] sm:$0xff] %vm742_vm4, %v7000_v50 }
 0x674   : > { %v7002_v26 = vpop.permute.xlu1 %7001  ;;  %v7073_v48 = vld [vmem:[#allocation5 + $0xf] sm:$0xff] }
 0x675   : > { %v7056_v40 = vld [vmem:[#allocation5 + $0x10] sm:$0xff]  ;;  %7044 = vst.msk [vmem:[#allocation5 + $0x30] sm:$0xff] %vm742_vm4, %v7002_v26  ;;  %v7004_v19 = vpop.permute.xlu0 %7003  ;;  %13958 = vmatmul.mubr.msk.f32.vlgmr.msra.gmra.mxu0 %vm742_vm4, %v7073_v48  ;;  %v7057_v47 = vld [vmem:[#allocation5 + $0x18] sm:$0xff] }
 0x676   : > { %13984 = vmatmul.mubr.msk.f32.vlgmr.msra.gmra.mxu1 %vm742_vm4, %v7056_v40  ;;  %v7074_v17 = vld [vmem:[#allocation5 + $0x17] sm:$0xff]  ;;  %7045 = vst.msk [vmem:[#allocation5 + $0x38] sm:$0xff] %vm742_vm4, %v7004_v19  ;;  %14008 = vmatpush3.msk.msra.mxu0 %vm1067_vm3, %v16392_v0 }
 0x677   : > { %13960 = vmatprep.mubr.msk.f32.mxu0 %vm742_vm4, %v7074_v17  ;;  %13986 = vmatprep.mubr.msk.f32.mxu1 %vm742_vm4, %v7057_v47 }
 0x678   : > { %14034 = vmatpush3.msk.msra.mxu1 %vm1067_vm3, %v16399_v60  ;;  %v7006_v7 = vpop.permute.xlu1 %7005  ;;  %v7075_v41 = vld [vmem:[#allocation5 + $0x1f] sm:$0xff]  ;;  %14059 = vmatprep.subr.msk.mxu0 %vm1067_vm3, %v16435_v37 }
 0x679   : > { %v7058_v55 = vld [vmem:[#allocation5 + $0x20] sm:$0xff]  ;;  %14085 = vmatprep.subr.msk.mxu1 %vm1067_vm3, %v16443_v63  ;;  %7046 = vst.msk [vmem:[#allocation5 + $0x40] sm:$0xff] %vm742_vm4, %v7006_v7  ;;  %v7008_v8 = vpop.permute.xlu0 %7007  ;;  %13961 = vmatmul.mubr.msk.f32.gmra.mxu0 %vm742_vm4, %v7075_v41  ;;  %v7059_v59 = vld [vmem:[#allocation5 + $0x28] sm:$0xff] }
 0x67a   : > { %13987 = vmatmul.mubr.msk.f32.gmra.mxu1 %vm742_vm4, %v7058_v55  ;;  %v7076_v0 = vld [vmem:[#allocation5 + $0x27] sm:$0xff]  ;;  %7047 = vst.msk [vmem:[#allocation5 + $0x48] sm:$0xff] %vm742_vm4, %v7008_v8 }
 0x67b   : > { %13963 = vmatprep.mubr.msk.f32.mxu0 %vm742_vm4, %v7076_v0  ;;  %13989 = vmatprep.mubr.msk.f32.mxu1 %vm742_vm4, %v7059_v59  ;;  %v7482_v8 = vld [vmem:[#allocation5 + $0x6] sm:$0xff] }
 0x67c   : > { %v7010_v60 = vpop.permute.xlu1 %7009  ;;  %v7077_v10 = vld [vmem:[#allocation5 + $0x2f] sm:$0xff]  ;;  %v7712_v0 = vld [vmem:[#allocation5 + $0x5] sm:$0xff] }
 0x67d   : > { %v7060_v12 = vld [vmem:[#allocation5 + $0x30] sm:$0xff]  ;;  %7048 = vst.msk [vmem:[#allocation5 + $0x50] sm:$0xff] %vm742_vm4, %v7010_v60  ;;  %v7012_v13 = vpop.permute.xlu0 %7011  ;;  %13964 = vmatmul.mubr.msk.f32.gmra.mxu0 %vm742_vm4, %v7077_v10  ;;  %v7061_v33 = vld [vmem:[#allocation5 + $0x38] sm:$0xff]  ;;  %v16489_v59 = vld [vmem:[#allocation5 + $0x4] sm:$0xff] }
 0x67e   : > { %13990 = vmatmul.mubr.msk.f32.gmra.mxu1 %vm742_vm4, %v7060_v12  ;;  %v7078_v24 = vld [vmem:[#allocation5 + $0x37] sm:$0xff]  ;;  %7049 = vst.msk [vmem:[#allocation5 + $0x58] sm:$0xff] %vm742_vm4, %v7012_v13  ;;  %v16491_v60 = vld [vmem:[#allocation5 + $0x3] sm:$0xff] }
 0x67f   : > { %13966 = vmatprep.mubr.msk.f32.mxu0 %vm742_vm4, %v7078_v24  ;;  %13992 = vmatprep.mubr.msk.f32.mxu1 %vm742_vm4, %v7061_v33  ;;  %v16493_v10 = vld [vmem:[#allocation5 + $0x2] sm:$0xff]  ;;  %v7483_v33 = vld [vmem:[#allocation5 + $0xe] sm:$0xff] }
 0x680   : > { %v7014_v27 = vpop.permute.xlu1 %7013  ;;  %v7079_v23 = vld [vmem:[#allocation5 + $0x3f] sm:$0xff] }
 0x681   : > { %v7062_v21 = vld [vmem:[#allocation5 + $0x40] sm:$0xff]  ;;  %7050 = vst.msk [vmem:[#allocation5 + $0x60] sm:$0xff] %vm742_vm4, %v7014_v27  ;;  %v7016_v9 = vpop.permute.xlu0 %7015  ;;  %13967 = vmatmul.mubr.msk.f32.gmra.mxu0 %vm742_vm4, %v7079_v23  ;;  %v7063_v62 = vld [vmem:[#allocation5 + $0x48] sm:$0xff] }
 0x682   : > { %13993 = vmatmul.mubr.msk.f32.gmra.mxu1 %vm742_vm4, %v7062_v21  ;;  %v7080_v31 = vld [vmem:[#allocation5 + $0x47] sm:$0xff]  ;;  %7051 = vst.msk [vmem:[#allocation5 + $0x68] sm:$0xff] %vm742_vm4, %v7016_v9  ;;  %v16505_v23 = vld [vmem:[%s17487_s10 + $0x18] sm:$0xf]  ;;  %v7484_v21 = vld [vmem:[#allocation5 + $0x16] sm:$0xff] }
 0x683   : > { %13969 = vmatprep.mubr.msk.f32.mxu0 %vm742_vm4, %v7080_v31  ;;  %13995 = vmatprep.mubr.msk.f32.mxu1 %vm742_vm4, %v7063_v62  ;;  %v16495_v24 = vld [vmem:[#allocation5 + $0x1] sm:$0xff]  ;;  %v7713_v27 = vld [vmem:[#allocation5 + $0xd] sm:$0xff]  ;;  %v7714_v9 = vld [vmem:[#allocation5 + $0x15] sm:$0xff] }
 0x684   : > { %v7018_v34 = vpop.permute.xlu1 %7017  ;;  %v7081_v43 = vld [vmem:[#allocation5 + $0x4f] sm:$0xff]  ;;  %v16512_v31 = vld [vmem:[%s17487_s10 + $0x1c] sm:$0xf] }
 0x685   : > { %v7064_v39 = vld [vmem:[#allocation5 + $0x50] sm:$0xff]  ;;  %7052 = vst.msk [vmem:[#allocation5 + $0x70] sm:$0xff] %vm742_vm4, %v7018_v34  ;;  %v7020_v22 = vpop.permute.xlu0 %7019  ;;  %13970 = vmatmul.mubr.msk.f32.gmra.mxu0 %vm742_vm4, %v7081_v43  ;;  %v7065_v50 = vld [vmem:[#allocation5 + $0x58] sm:$0xff]  ;;  %v7486_v43 = vld [vmem:[#allocation5 + $0x26] sm:$0xff] }
 0x686   : > { %13996 = vmatmul.mubr.msk.f32.gmra.mxu1 %vm742_vm4, %v7064_v39  ;;  %v7082_v42 = vld [vmem:[#allocation5 + $0x57] sm:$0xff]  ;;  %7053 = vst.msk [vmem:[#allocation5 + $0x78] sm:$0xff] %vm742_vm4, %v7020_v22  ;;  %v7716_v39 = vld [vmem:[#allocation5 + $0x25] sm:$0xff] }
 0x687   : > { %13972 = vmatprep.mubr.msk.f32.mxu0 %vm742_vm4, %v7082_v42  ;;  %13998 = vmatprep.mubr.msk.f32.mxu1 %vm742_vm4, %v7065_v50  ;;  %v7485_v62 = vld [vmem:[#allocation5 + $0x1e] sm:$0xff]  ;;  %v7488_v22 = vld [vmem:[#allocation5 + $0x36] sm:$0xff] }
 0x688   : > { %v7022_v26 = vpop.permute.xlu1 %7021  ;;  %v7083_v48 = vld [vmem:[#allocation5 + $0x5f] sm:$0xff]  ;;  %v7718_v42 = vld [vmem:[#allocation5 + $0x35] sm:$0xff] }
 0x689   : > { %v7066_v40 = vld [vmem:[#allocation5 + $0x60] sm:$0xff]  ;;  %7054 = vst.msk [vmem:[#allocation5 + $0x80] sm:$0xff] %vm742_vm4, %v7022_v26  ;;  %13973 = vmatmul.mubr.msk.f32.gmra.mxu0 %vm742_vm4, %v7083_v48  ;;  %v7067_v17 = vld [vmem:[#allocation5 + $0x68] sm:$0xff] }
 0x68a   : > { %13999 = vmatmul.mubr.msk.f32.gmra.mxu1 %vm742_vm4, %v7066_v40  ;;  %v7084_v19 = vld [vmem:[#allocation5 + $0x67] sm:$0xff]  ;;  %v7715_v34 = vld [vmem:[#allocation5 + $0x1d] sm:$0xff] }
 0x68b   : > { %13975 = vmatprep.mubr.msk.f32.mxu0 %vm742_vm4, %v7084_v19  ;;  %14001 = vmatprep.mubr.msk.f32.mxu1 %vm742_vm4, %v7067_v17  ;;  %v7489_v50 = vld [vmem:[#allocation5 + $0x3e] sm:$0xff]  ;;  %v7490_v48 = vld [vmem:[#allocation5 + $0x46] sm:$0xff]  ;;  %v7491_v19 = vld [vmem:[#allocation5 + $0x4e] sm:$0xff] }
 0x68c   : > { %v7085_v47 = vld [vmem:[#allocation5 + $0x6f] sm:$0xff]  ;;  %v7719_v26 = vld [vmem:[#allocation5 + $0x3d] sm:$0xff]  ;;  %v7720_v40 = vld [vmem:[#allocation5 + $0x45] sm:$0xff] }
 0x68d   : > { %v7068_v7 = vld [vmem:[#allocation5 + $0x70] sm:$0xff]  ;;  %13976 = vmatmul.mubr.msk.f32.gmra.mxu0 %vm742_vm4, %v7085_v47  ;;  %v7069_v55 = vld [vmem:[#allocation5 + $0x78] sm:$0xff] }
 0x68e   : > { %14002 = vmatmul.mubr.msk.f32.gmra.mxu1 %vm742_vm4, %v7068_v7  ;;  %v7086_v41 = vld [vmem:[#allocation5 + $0x77] sm:$0xff]  ;;  %v7721_v17 = vld [vmem:[#allocation5 + $0x4d] sm:$0xff] }
 0x68f   : > { %13978 = vmatprep.mubr.msk.f32.mxu0 %vm742_vm4, %v7086_v41  ;;  %14004 = vmatprep.mubr.msk.f32.mxu1 %vm742_vm4, %v7069_v55  ;;  %v7492_v47 = vld [vmem:[#allocation5 + $0x56] sm:$0xff]  ;;  %v7493_v41 = vld [vmem:[#allocation5 + $0x5e] sm:$0xff] }
 0x690   : > { %v7087_v12 = vld [vmem:[#allocation5 + $0x7f] sm:$0xff]  ;;  %v7722_v7 = vld [vmem:[#allocation5 + $0x55] sm:$0xff] }
 0x691   : > { %v7070_v13 = vld [vmem:[#allocation5 + $0x80] sm:$0xff]  ;;  %13979 = vmatmul.mubr.msk.f32.gmra.mxu0 %vm742_vm4, %v7087_v12  ;;  %v7495_v12 = vld [vmem:[#allocation5 + $0x6e] sm:$0xff] }
 0x692   : > { %14005 = vmatmul.mubr.msk.f32.gmra.mxu1 %vm742_vm4, %v7070_v13  ;;  %9091 = vst.msk [vmem:[#allocation5] sm:$0xff] %vm742_vm4, %v7070_v13  ;;  %14009 = vmatprep.mubr.msk.f32.mxu0 %vm742_vm4, %v7482_v8  ;;  %v7723_v55 = vld [vmem:[#allocation5 + $0x5d] sm:$0xff]  ;;  %v7494_v8 = vld [vmem:[#allocation5 + $0x66] sm:$0xff] }
 0x693   : > { %14035 = vmatprep.mubr.msk.f32.mxu1 %vm742_vm4, %v7712_v0  ;;  %v7724_v0 = vld [vmem:[#allocation5 + $0x65] sm:$0xff]  ;;  %v7725_v13 = vld [vmem:[#allocation5 + $0x6d] sm:$0xff] }
 0x695   : > { %14010 = vmatmul.mubr.msk.f32.vlgmr.msra.gmra.mxu0 %vm742_vm4, %v7483_v33  ;;  %v7496_v33 = vld [vmem:[#allocation5 + $0x76] sm:$0xff] }
 0x696   : > { %14036 = vmatmul.mubr.msk.f32.vlgmr.msra.gmra.mxu1 %vm742_vm4, %v7713_v27  ;;  %14012 = vmatprep.mubr.msk.f32.mxu0 %vm742_vm4, %v7484_v21  ;;  %v7726_v27 = vld [vmem:[#allocation5 + $0x75] sm:$0xff]  ;;  %v7497_v21 = vld [vmem:[#allocation5 + $0x7e] sm:$0xff] }
 0x697   : > { %14038 = vmatprep.mubr.msk.f32.mxu1 %vm742_vm4, %v7714_v9  ;;  %14060 = vmatpush3.msk.msra.mxu0 %vm1067_vm3, %v16435_v37  ;;  %v7487_v37 = vld [vmem:[#allocation5 + $0x2e] sm:$0xff]  ;;  %v7727_v9 = vld [vmem:[#allocation5 + $0x7d] sm:$0xff] }
 0x698   : > { %14086 = vmatpush3.msk.msra.mxu1 %vm1067_vm3, %v16443_v63  ;;  %14111 = vmatprep.subr.msk.mxu0 %vm1067_vm3, %v16505_v23  ;;  %v7717_v63 = vld [vmem:[#allocation5 + $0x2d] sm:$0xff] }
 0x699   : > { %14137 = vmatprep.subr.msk.mxu1 %vm1067_vm3, %v16512_v31  ;;  %14013 = vmatmul.mubr.msk.f32.gmra.mxu0 %vm742_vm4, %v7485_v62  ;;  %v7943_v62 = vld [vmem:[#allocation5 + $0xc] sm:$0xff] }
 0x69a   : > { %14039 = vmatmul.mubr.msk.f32.gmra.mxu1 %vm742_vm4, %v7715_v34  ;;  %14015 = vmatprep.mubr.msk.f32.mxu0 %vm742_vm4, %v7486_v43  ;;  %v8173_v34 = vld [vmem:[#allocation5 + $0xb] sm:$0xff]  ;;  %v7944_v43 = vld [vmem:[#allocation5 + $0x14] sm:$0xff] }
 0x69b   : > { %14041 = vmatprep.mubr.msk.f32.mxu1 %vm742_vm4, %v7716_v39  ;;  %v8174_v39 = vld [vmem:[#allocation5 + $0x13] sm:$0xff] }
 0x69d   : > { %14016 = vmatmul.mubr.msk.f32.gmra.mxu0 %vm742_vm4, %v7487_v37  ;;  %v7946_v37 = vld [vmem:[#allocation5 + $0x24] sm:$0xff] }
 0x69e   : > { %14042 = vmatmul.mubr.msk.f32.gmra.mxu1 %vm742_vm4, %v7717_v63  ;;  %14018 = vmatprep.mubr.msk.f32.mxu0 %vm742_vm4, %v7488_v22  ;;  %v8176_v63 = vld [vmem:[#allocation5 + $0x23] sm:$0xff]  ;;  %v7947_v22 = vld [vmem:[#allocation5 + $0x2c] sm:$0xff] }
 0x69f   : > { %14044 = vmatprep.mubr.msk.f32.mxu1 %vm742_vm4, %v7718_v42  ;;  %v8177_v42 = vld [vmem:[#allocation5 + $0x2b] sm:$0xff] }
 0x6a1   : > { %14019 = vmatmul.mubr.msk.f32.gmra.mxu0 %vm742_vm4, %v7489_v50  ;;  %v7949_v50 = vld [vmem:[#allocation5 + $0x3c] sm:$0xff] }
 0x6a2   : > { %14045 = vmatmul.mubr.msk.f32.gmra.mxu1 %vm742_vm4, %v7719_v26  ;;  %14021 = vmatprep.mubr.msk.f32.mxu0 %vm742_vm4, %v7490_v48  ;;  %v8179_v26 = vld [vmem:[#allocation5 + $0x3b] sm:$0xff]  ;;  %v7950_v48 = vld [vmem:[#allocation5 + $0x44] sm:$0xff] }
 0x6a3   : > { %14047 = vmatprep.mubr.msk.f32.mxu1 %vm742_vm4, %v7720_v40  ;;  %v8180_v40 = vld [vmem:[#allocation5 + $0x43] sm:$0xff] }
 0x6a5   : > { %14022 = vmatmul.mubr.msk.f32.gmra.mxu0 %vm742_vm4, %v7491_v19  ;;  %v7951_v19 = vld [vmem:[#allocation5 + $0x4c] sm:$0xff] }
 0x6a6   : > { %14048 = vmatmul.mubr.msk.f32.gmra.mxu1 %vm742_vm4, %v7721_v17  ;;  %14024 = vmatprep.mubr.msk.f32.mxu0 %vm742_vm4, %v7492_v47  ;;  %v8181_v17 = vld [vmem:[#allocation5 + $0x4b] sm:$0xff]  ;;  %v7952_v47 = vld [vmem:[#allocation5 + $0x54] sm:$0xff] }
 0x6a7   : > { %14050 = vmatprep.mubr.msk.f32.mxu1 %vm742_vm4, %v7722_v7  ;;  %v8182_v7 = vld [vmem:[#allocation5 + $0x53] sm:$0xff] }
 0x6a9   : > { %14025 = vmatmul.mubr.msk.f32.gmra.mxu0 %vm742_vm4, %v7493_v41  ;;  %v7953_v41 = vld [vmem:[#allocation5 + $0x5c] sm:$0xff] }
 0x6aa   : > { %14051 = vmatmul.mubr.msk.f32.gmra.mxu1 %vm742_vm4, %v7723_v55  ;;  %14027 = vmatprep.mubr.msk.f32.mxu0 %vm742_vm4, %v7494_v8  ;;  %v8183_v55 = vld [vmem:[#allocation5 + $0x5b] sm:$0xff]  ;;  %v7954_v8 = vld [vmem:[#allocation5 + $0x64] sm:$0xff] }
 0x6ab   : > { %14053 = vmatprep.mubr.msk.f32.mxu1 %vm742_vm4, %v7724_v0  ;;  %v8184_v0 = vld [vmem:[#allocation5 + $0x63] sm:$0xff] }
 0x6ad   : > { %14028 = vmatmul.mubr.msk.f32.gmra.mxu0 %vm742_vm4, %v7495_v12  ;;  %v7955_v12 = vld [vmem:[#allocation5 + $0x6c] sm:$0xff] }
 0x6ae   : > { %14054 = vmatmul.mubr.msk.f32.gmra.mxu1 %vm742_vm4, %v7725_v13  ;;  %14030 = vmatprep.mubr.msk.f32.mxu0 %vm742_vm4, %v7496_v33  ;;  %v8185_v13 = vld [vmem:[#allocation5 + $0x6b] sm:$0xff]  ;;  %v7956_v33 = vld [vmem:[#allocation5 + $0x74] sm:$0xff] }
 0x6af   : > { %14056 = vmatprep.mubr.msk.f32.mxu1 %vm742_vm4, %v7726_v27  ;;  %v8186_v27 = vld [vmem:[#allocation5 + $0x73] sm:$0xff] }
 0x6b1   : > { %14031 = vmatmul.mubr.msk.f32.gmra.mxu0 %vm742_vm4, %v7497_v21  ;;  %v7957_v21 = vld [vmem:[#allocation5 + $0x7c] sm:$0xff] }
 0x6b2   : > { %14057 = vmatmul.mubr.msk.f32.gmra.mxu1 %vm742_vm4, %v7727_v9  ;;  %14061 = vmatprep.mubr.msk.f32.mxu0 %vm742_vm4, %v16489_v59  ;;  %v7945_v59 = vld [vmem:[#allocation5 + $0x1c] sm:$0xff] }
 0x6b3   : > { %14087 = vmatprep.mubr.msk.f32.mxu1 %vm742_vm4, %v16491_v60  ;;  %v8175_v60 = vld [vmem:[#allocation5 + $0x1b] sm:$0xff] }
 0x6b4   : > { %v8187_v9 = vld [vmem:[#allocation5 + $0x7b] sm:$0xff] }
 0x6b5   : > { %14062 = vmatmul.mubr.msk.f32.vlgmr.msra.gmra.mxu0 %vm742_vm4, %v7943_v62  ;;  %v8403_v62 = vld [vmem:[#allocation5 + $0xa] sm:$0xff] }
 0x6b6   : > { %14088 = vmatmul.mubr.msk.f32.vlgmr.msra.gmra.mxu1 %vm742_vm4, %v8173_v34  ;;  %14064 = vmatprep.mubr.msk.f32.mxu0 %vm742_vm4, %v7944_v43  ;;  %v8633_v34 = vld [vmem:[#allocation5 + $0x9] sm:$0xff]  ;;  %v8404_v43 = vld [vmem:[#allocation5 + $0x12] sm:$0xff] }
 0x6b7   : > { %14090 = vmatprep.mubr.msk.f32.mxu1 %vm742_vm4, %v8174_v39  ;;  %14112 = vmatpush3.msk.msra.mxu0 %vm1067_vm3, %v16505_v23  ;;  %v7948_v23 = vld [vmem:[#allocation5 + $0x34] sm:$0xff] }
 0x6b8   : > { %14138 = vmatpush3.msk.msra.mxu1 %vm1067_vm3, %v16512_v31  ;;  %v8178_v31 = vld [vmem:[#allocation5 + $0x33] sm:$0xff] }
 0x6b9   : > { %14065 = vmatmul.mubr.msk.f32.gmra.mxu0 %vm742_vm4, %v7945_v59  ;;  %v8634_v39 = vld [vmem:[#allocation5 + $0x11] sm:$0xff]  ;;  %v8405_v59 = vld [vmem:[#allocation5 + $0x1a] sm:$0xff] }
 0x6ba   : > { %14091 = vmatmul.mubr.msk.f32.gmra.mxu1 %vm742_vm4, %v8175_v60  ;;  %14067 = vmatprep.mubr.msk.f32.mxu0 %vm742_vm4, %v7946_v37  ;;  %v8635_v60 = vld [vmem:[#allocation5 + $0x19] sm:$0xff]  ;;  %v8407_v37 = vld [vmem:[#allocation5 + $0x2a] sm:$0xff] }
 0x6bb   : > { %14093 = vmatprep.mubr.msk.f32.mxu1 %vm742_vm4, %v8176_v63  ;;  %v8637_v63 = vld [vmem:[#allocation5 + $0x29] sm:$0xff] }
 0x6bd   : > { %14068 = vmatmul.mubr.msk.f32.gmra.mxu0 %vm742_vm4, %v7947_v22  ;;  %v8408_v22 = vld [vmem:[#allocation5 + $0x32] sm:$0xff] }
 0x6be   : > { %14094 = vmatmul.mubr.msk.f32.gmra.mxu1 %vm742_vm4, %v8177_v42  ;;  %14070 = vmatprep.mubr.msk.f32.mxu0 %vm742_vm4, %v7948_v23  ;;  %v8638_v42 = vld [vmem:[#allocation5 + $0x31] sm:$0xff]  ;;  %v8409_v23 = vld [vmem:[#allocation5 + $0x3a] sm:$0xff] }
 0x6bf   : > { %14096 = vmatprep.mubr.msk.f32.mxu1 %vm742_vm4, %v8178_v31  ;;  %v8639_v31 = vld [vmem:[#allocation5 + $0x39] sm:$0xff] }
 0x6c1   : > { %14071 = vmatmul.mubr.msk.f32.gmra.mxu0 %vm742_vm4, %v7949_v50  ;;  %v8410_v50 = vld [vmem:[#allocation5 + $0x42] sm:$0xff] }
 0x6c2   : > { %14097 = vmatmul.mubr.msk.f32.gmra.mxu1 %vm742_vm4, %v8179_v26  ;;  %14073 = vmatprep.mubr.msk.f32.mxu0 %vm742_vm4, %v7950_v48  ;;  %v8640_v26 = vld [vmem:[#allocation5 + $0x41] sm:$0xff]  ;;  %v8411_v48 = vld [vmem:[#allocation5 + $0x4a] sm:$0xff] }
 0x6c3   : > { %14099 = vmatprep.mubr.msk.f32.mxu1 %vm742_vm4, %v8180_v40  ;;  %v8641_v40 = vld [vmem:[#allocation5 + $0x49] sm:$0xff] }
 0x6c5   : > { %14074 = vmatmul.mubr.msk.f32.gmra.mxu0 %vm742_vm4, %v7951_v19  ;;  %v8412_v19 = vld [vmem:[#allocation5 + $0x52] sm:$0xff] }
 0x6c6   : > { %14100 = vmatmul.mubr.msk.f32.gmra.mxu1 %vm742_vm4, %v8181_v17  ;;  %14076 = vmatprep.mubr.msk.f32.mxu0 %vm742_vm4, %v7952_v47  ;;  %v8642_v17 = vld [vmem:[#allocation5 + $0x51] sm:$0xff]  ;;  %v8413_v47 = vld [vmem:[#allocation5 + $0x5a] sm:$0xff] }
 0x6c7   : > { %14102 = vmatprep.mubr.msk.f32.mxu1 %vm742_vm4, %v8182_v7  ;;  %v8643_v7 = vld [vmem:[#allocation5 + $0x59] sm:$0xff] }
 0x6c9   : > { %14077 = vmatmul.mubr.msk.f32.gmra.mxu0 %vm742_vm4, %v7953_v41  ;;  %v8414_v41 = vld [vmem:[#allocation5 + $0x62] sm:$0xff] }
 0x6ca   : > { %14103 = vmatmul.mubr.msk.f32.gmra.mxu1 %vm742_vm4, %v8183_v55  ;;  %14079 = vmatprep.mubr.msk.f32.mxu0 %vm742_vm4, %v7954_v8  ;;  %v8644_v55 = vld [vmem:[#allocation5 + $0x61] sm:$0xff]  ;;  %v8415_v8 = vld [vmem:[#allocation5 + $0x6a] sm:$0xff] }
 0x6cb   : > { %14105 = vmatprep.mubr.msk.f32.mxu1 %vm742_vm4, %v8184_v0  ;;  %v8645_v0 = vld [vmem:[#allocation5 + $0x69] sm:$0xff] }
 0x6cd   : > { %14080 = vmatmul.mubr.msk.f32.gmra.mxu0 %vm742_vm4, %v7955_v12  ;;  %v8416_v12 = vld [vmem:[#allocation5 + $0x72] sm:$0xff] }
 0x6ce   : > { %14106 = vmatmul.mubr.msk.f32.gmra.mxu1 %vm742_vm4, %v8185_v13  ;;  %14082 = vmatprep.mubr.msk.f32.mxu0 %vm742_vm4, %v7956_v33  ;;  %v8646_v13 = vld [vmem:[#allocation5 + $0x71] sm:$0xff]  ;;  %v8417_v33 = vld [vmem:[#allocation5 + $0x7a] sm:$0xff] }
 0x6cf   : > { %14108 = vmatprep.mubr.msk.f32.mxu1 %vm742_vm4, %v8186_v27  ;;  %v8647_v27 = vld [vmem:[#allocation5 + $0x79] sm:$0xff] }
 0x6d1   : > { %14083 = vmatmul.mubr.msk.f32.gmra.mxu0 %vm742_vm4, %v7957_v21  ;;  %v8878_v21 = vld [vmem:[%s17488_s11] sm:$0xf] }
 0x6d2   : > { %14109 = vmatmul.mubr.msk.f32.gmra.mxu1 %vm742_vm4, %v8187_v9  ;;  %14113 = vmatprep.mubr.msk.f32.mxu0 %vm742_vm4, %v16493_v10  ;;  %v8406_v10 = vld [vmem:[#allocation5 + $0x22] sm:$0xff] }
 0x6d3   : > { %14139 = vmatprep.mubr.msk.f32.mxu1 %vm742_vm4, %v16495_v24  ;;  %v8636_v24 = vld [vmem:[#allocation5 + $0x21] sm:$0xff]  ;;  %14163 = vmatprep.subr.msk.mxu0 %vm1067_vm3, %v8878_v21 }
 0x6d5   : > { %14114 = vmatmul.mubr.msk.f32.vlgmr.msra.gmra.mxu0 %vm742_vm4, %v8403_v62 }
 0x6d6   : > { %14140 = vmatmul.mubr.msk.f32.vlgmr.msra.gmra.mxu1 %vm742_vm4, %v8633_v34  ;;  %14116 = vmatprep.mubr.msk.f32.mxu0 %vm742_vm4, %v8404_v43 }
 0x6d7   : > { %14142 = vmatprep.mubr.msk.f32.mxu1 %vm742_vm4, %v8634_v39  ;;  %14164 = vmatpush3.msk.msra.mxu0 %vm1067_vm3, %v8878_v21 }
 0x6d9   : > { %14117 = vmatmul.mubr.msk.f32.gmra.mxu0 %vm742_vm4, %v8405_v59 }
 0x6da   : > { %14143 = vmatmul.mubr.msk.f32.gmra.mxu1 %vm742_vm4, %v8635_v60  ;;  %14119 = vmatprep.mubr.msk.f32.mxu0 %vm742_vm4, %v8406_v10 }
 0x6db   : > { %14145 = vmatprep.mubr.msk.f32.mxu1 %vm742_vm4, %v8636_v24 }
 0x6dd   : > { %14120 = vmatmul.mubr.msk.f32.gmra.mxu0 %vm742_vm4, %v8407_v37 }
 0x6de   : > { %14146 = vmatmul.mubr.msk.f32.gmra.mxu1 %vm742_vm4, %v8637_v63  ;;  %14122 = vmatprep.mubr.msk.f32.mxu0 %vm742_vm4, %v8408_v22 }
 0x6df   : > { %14148 = vmatprep.mubr.msk.f32.mxu1 %vm742_vm4, %v8638_v42 }
 0x6e1   : > { %14123 = vmatmul.mubr.msk.f32.gmra.mxu0 %vm742_vm4, %v8409_v23 }
 0x6e2   : > { %14149 = vmatmul.mubr.msk.f32.gmra.mxu1 %vm742_vm4, %v8639_v31  ;;  %14125 = vmatprep.mubr.msk.f32.mxu0 %vm742_vm4, %v8410_v50 }
 0x6e3   : > { %14151 = vmatprep.mubr.msk.f32.mxu1 %vm742_vm4, %v8640_v26 }
 0x6e5   : > { %14126 = vmatmul.mubr.msk.f32.gmra.mxu0 %vm742_vm4, %v8411_v48 }
 0x6e6   : > { %14152 = vmatmul.mubr.msk.f32.gmra.mxu1 %vm742_vm4, %v8641_v40  ;;  %14128 = vmatprep.mubr.msk.f32.mxu0 %vm742_vm4, %v8412_v19 }
 0x6e7   : > { %14154 = vmatprep.mubr.msk.f32.mxu1 %vm742_vm4, %v8642_v17 }
 0x6e9   : > { %14129 = vmatmul.mubr.msk.f32.gmra.mxu0 %vm742_vm4, %v8413_v47 }
 0x6ea   : > { %14155 = vmatmul.mubr.msk.f32.gmra.mxu1 %vm742_vm4, %v8643_v7  ;;  %14131 = vmatprep.mubr.msk.f32.mxu0 %vm742_vm4, %v8414_v41 }
 0x6eb   : > { %14157 = vmatprep.mubr.msk.f32.mxu1 %vm742_vm4, %v8644_v55 }
 0x6ed   : > { %14132 = vmatmul.mubr.msk.f32.gmra.mxu0 %vm742_vm4, %v8415_v8  ;;  %v9092_v8 = vld [vmem:[%s17489_s12] sm:$0xf] }
 0x6ee   : > { %14158 = vmatmul.mubr.msk.f32.gmra.mxu1 %vm742_vm4, %v8645_v0  ;;  %14134 = vmatprep.mubr.msk.f32.mxu0 %vm742_vm4, %v8416_v12 }
 0x6ef   : > { %14160 = vmatprep.mubr.msk.f32.mxu1 %vm742_vm4, %v8646_v13  ;;  %14189 = vmatprep.subr.msk.mxu1 %vm1067_vm3, %v9092_v8 }
 0x6f0   : > { %14190 = vmatpush3.msk.msra.mxu1 %vm1067_vm3, %v9092_v8 }
 0x6f1   : > { %14135 = vmatmul.mubr.msk.f32.gmra.mxu0 %vm742_vm4, %v8417_v33 }
 0x6f2   : > { %14161 = vmatmul.mubr.msk.f32.gmra.mxu1 %vm742_vm4, %v8647_v27 }
 0x735   : > { %v13959_v9 = vpop.f32.mrf.mxu0 }
 0x736   : > { %v13985_v62 = vpop.f32.mrf.mxu1 }
 0x737   : > { %v16627_v34 = vadd.f32 %v13985_v62, %v13959_v9  ;;  %v16629_v43 = vpop.f32.mrf.mxu0 }
 0x738   : > { %v16631_v39 = vpop.f32.mrf.mxu1 }
 0x739   : > { %v13962_v59 = vpop.f32.mrf.mxu0 }
 0x73a   : > { %v13988_v60 = vpop.f32.mrf.mxu1 }
 0x73b   : > { %v16633_v10 = vadd.f32 %v13988_v60, %v13962_v59  ;;  %v16635_v24 = vpop.f32.mrf.mxu0 }
 0x73c   : > { %v16637_v37 = vpop.f32.mrf.mxu1 }
 0x73d   : > { %v13965_v63 = vpop.f32.mrf.mxu0 }
 0x73e   : > { %v13991_v22 = vpop.f32.mrf.mxu1 }
 0x73f   : > { %v16639_v42 = vadd.f32 %v13991_v22, %v13965_v63  ;;  %v16641_v23 = vpop.f32.mrf.mxu0 }
 0x740   : > { %v16643_v31 = vpop.f32.mrf.mxu1 }
 0x741   : > { %v13968_v50 = vpop.f32.mrf.mxu0 }
 0x742   : > { %v13994_v26 = vpop.f32.mrf.mxu1 }
 0x743   : > { %v16645_v48 = vadd.f32 %v13994_v26, %v13968_v50  ;;  %v16647_v40 = vpop.f32.mrf.mxu0 }
 0x744   : > { %v16649_v19 = vpop.f32.mrf.mxu1 }
 0x745   : > { %v13971_v17 = vpop.f32.mrf.mxu0 }
 0x746   : > { %v13997_v47 = vpop.f32.mrf.mxu1 }
 0x747   : > { %v16651_v7 = vadd.f32 %v13997_v47, %v13971_v17  ;;  %v16653_v41 = vpop.f32.mrf.mxu0 }
 0x748   : > { %v16655_v55 = vpop.f32.mrf.mxu1 }
 0x749   : > { %v13974_v0 = vpop.f32.mrf.mxu0 }
 0x74a   : > { %v14000_v12 = vpop.f32.mrf.mxu1 }
 0x74b   : > { %v16662_v13 = vadd.f32 %v14000_v12, %v13974_v0  ;;  %v16664_v33 = vpop.f32.mrf.mxu0 }
 0x74c   : > { %v16666_v27 = vpop.f32.mrf.mxu1 }
 0x74d   : > { %v13977_v21 = vpop.f32.mrf.mxu0 }
 0x74e   : > { %v14003_v9 = vpop.f32.mrf.mxu1 }
 0x74f   : > { %v16668_v62 = vadd.f32 %v14003_v9, %v13977_v21  ;;  %v16670_v59 = vpop.f32.mrf.mxu0 }
 0x750   : > { %v16672_v60 = vpop.f32.mrf.mxu1 }
 0x751   : > { %17803 = vst [vmem:[#allocation55_spill] sm:$0xff] %v16668_v62  ;;  %17804 = vst [vmem:[#allocation76_spill] sm:$0xff] %v16672_v60  ;;  %v13980_v63 = vpop.f32.mrf.mxu0 }
 0x752   : > { %v14006_v22 = vpop.f32.mrf.mxu1 }
 0x753   : > { %v16674_v50 = vadd.f32 %v14006_v22, %v13980_v63  ;;  %v16676_v26 = vpop.f32.mrf.mxu0 }
 0x754   : > { %17806 = vst [vmem:[#allocation72_spill] sm:$0xff] %v16676_v26  ;;  %v16678_v17 = vpop.f32.mrf.mxu1 }
 0x755   : > { %17805 = vst [vmem:[#allocation51_spill] sm:$0xff] %v16674_v50  ;;  %17807 = vst [vmem:[#allocation36_spill] sm:$0xff] %v16678_v17  ;;  %v14011_v47 = vpop.f32.mrf.mxu0 }
 0x756   : > { %v14037_v8 = vpop.f32.mrf.mxu1 }
 0x757   : > { %v7617_v0 = vpop.f32.mrf.mxu0 }
 0x758   : > { %v16680_v12 = vpop.f32.mrf.mxu1 }
 0x759   : > { %v14014_v6 = vpop.f32.mrf.mxu0 }
 0x75a   : > { %v16682_v21 = vpop.f32.mrf.mxu1 }
 0x75b   : > { %v7627_v9 = vpop.f32.mrf.mxu0 }
 0x75c   : > { %v16684_v2 = vpop.f32.mrf.mxu1 }
 0x75d   : > { %v16686_v32 = vpop.f32.mrf.mxu0 }
 0x75e   : > { %v16688_v61 = vpop.f32.mrf.mxu1 }
 0x75f   : > { %v16690_v63 = vpop.f32.mrf.mxu0 }
 0x760   : > { %v16692_v22 = vpop.f32.mrf.mxu1 }
 0x761   : > { %v16694_v25 = vpop.f32.mrf.mxu0 }
 0x762   : > { %v16696_v49 = vpop.f32.mrf.mxu1 }
 0x763   : > { %v16698_v11 = vpop.f32.mrf.mxu0 }
 0x764   : > { %v16700_v45 = vpop.f32.mrf.mxu1 }
 0x765   : > { %v16702_v56 = vpop.f32.mrf.mxu0 }
 0x766   : > { %v16704_v51 = vpop.f32.mrf.mxu1 }
 0x767   : > { %v16706_v20 = vpop.f32.mrf.mxu0 }
 0x768   : > { %v16708_v53 = vpop.f32.mrf.mxu1 }
 0x769   : > { %17808 = vst [vmem:[#allocation56_spill] sm:$0xff] %v16708_v53  ;;  %v16710_v58 = vpop.f32.mrf.mxu0 }
 0x76a   : > { %v16712_v44 = vpop.f32.mrf.mxu1 }
 0x76b   : > { %17809 = vst [vmem:[#allocation77_spill] sm:$0xff] %v16712_v44  ;;  %v16714_v36 = vpop.f32.mrf.mxu0 }
 0x76c   : > { %17810 = vst [vmem:[#allocation74_spill] sm:$0xff] %v16714_v36  ;;  %v16716_v29 = vpop.f32.mrf.mxu1  ;;  %v7404_v36 = vadd.f32 %v16631_v39, %v16629_v43 }
 0x76d   : > { %17811 = vst [vmem:[#allocation57_spill] sm:$0xff] %v16716_v29  ;;  %v16718_v35 = vpop.f32.mrf.mxu0 }
 0x76e   : > { %17812 = vst [vmem:[#allocation58_spill] sm:$0xff] %v16718_v35  ;;  %v16720_v15 = vpop.f32.mrf.mxu1 }
 0x76f   : > { %17813 = vst [vmem:[#allocation60_spill] sm:$0xff] %v16720_v15  ;;  %v16722_v52 = vpop.f32.mrf.mxu0 }
 0x770   : > { %17814 = vst [vmem:[#allocation78_spill] sm:$0xff] %v16722_v52  ;;  %v16724_v3 = vpop.f32.mrf.mxu1 }
 0x771   : > { %17815 = vst [vmem:[#allocation38_spill] sm:$0xff] %v16724_v3  ;;  %v16726_v4 = vpop.f32.mrf.mxu0 }
 0x772   : > { %17816 = vst [vmem:[#allocation39_spill] sm:$0xff] %v16726_v4  ;;  %v16728_v28 = vpop.f32.mrf.mxu1 }
 0x773   : > { %17817 = vst [vmem:[#allocation35_spill] sm:$0xff] %v16728_v28  ;;  %v16730_v18 = vpop.f32.mrf.mxu0 }
 0x774   : > { %17818 = vst [vmem:[#allocation30_spill] sm:$0xff] %v16730_v18  ;;  %v16732_v1 = vpop.f32.mrf.mxu1 }
 0x775   : > { %17819 = vst [vmem:[#allocation20_spill] sm:$0xff] %v16732_v1  ;;  %v14063_v54 = vpop.f32.mrf.mxu0 }
 0x776   : > { %v14089_v5 = vpop.f32.mrf.mxu1 }
 0x777   : > { %v8077_v14 = vpop.f32.mrf.mxu0 }
 0x778   : > { %v8307_v38 = vpop.f32.mrf.mxu1 }
 0x779   : > { %v14066_v30 = vpop.f32.mrf.mxu0 }
 0x77a   : > { %v14092_v16 = vpop.f32.mrf.mxu1 }
 0x77b   : > { %v8087_v57 = vpop.f32.mrf.mxu0 }
 0x77c   : > { %v16734_v46 = vpop.f32.mrf.mxu1 }
 0x77d   : > { %v14069_v50 = vpop.f32.mrf.mxu0 }
 0x77e   : > { %v16736_v15 = vpop.f32.mrf.mxu1 }
 0x77f   : > { %v8097_v3 = vpop.f32.mrf.mxu0 }
 0x780   : > { %v16738_v4 = vpop.f32.mrf.mxu1 }
 0x781   : > { %v16740_v28 = vpop.f32.mrf.mxu0 }
 0x782   : > { %v16742_v18 = vpop.f32.mrf.mxu1 }
 0x783   : > { %17820 = vst [vmem:[#allocation65_spill] sm:$0xff] %v16742_v18  ;;  %v16744_v1 = vpop.f32.mrf.mxu0  ;;  %v7697_v18 = vadd.f32 %v14011_v47, %v16627_v34 }
 0x784   : > { %v16746_v52 = vpop.f32.mrf.mxu1 }
 0x785   : > { %17821 = vst [vmem:[#allocation41_spill] sm:$0xff] %v16746_v52  ;;  %v16748_v29 = vpop.f32.mrf.mxu0 }
 0x786   : > { %17822 = vst [vmem:[#allocation40_spill] sm:$0xff] %v16748_v29  ;;  %v16750_v17 = vpop.f32.mrf.mxu1  ;;  %v7696_v29 = vadd.f32 %v7617_v0, %v7404_v36  ;;  %v7424_v0 = vadd.f32 %v16643_v31, %v16641_v23 }
 0x787   : > { %17823 = vst [vmem:[#allocation26_spill] sm:$0xff] %v16750_v17  ;;  %v16752_v26 = vpop.f32.mrf.mxu0 }
 0x788   : > { %17824 = vst [vmem:[#allocation31_spill] sm:$0xff] %v16752_v26  ;;  %v16754_v35 = vpop.f32.mrf.mxu1  ;;  %v7926_v34 = vadd.f32 %v16680_v12, %v7696_v29 }
 0x789   : > { %17825 = vst [vmem:[#allocation42_spill] sm:$0xff] %v16754_v35  ;;  %v16756_v62 = vpop.f32.mrf.mxu0  ;;  %v7414_v35 = vadd.f32 %v16637_v37, %v16635_v24 }
 0x78a   : > { %17826 = vst [vmem:[#allocation48_spill] sm:$0xff] %v16756_v62  ;;  %v16758_v44 = vpop.f32.mrf.mxu1  ;;  %v7927_v62 = vadd.f32 %v14037_v8, %v7697_v18  ;;  %v7701_v18 = vadd.f32 %v16686_v32, %v16639_v42  ;;  %v7434_v8 = vadd.f32 %v16649_v19, %v16647_v40  ;;  %v7444_v40 = vadd.f32 %v16655_v55, %v16653_v41 }
 0x78b   : > { %17827 = vst [vmem:[#allocation28_spill] sm:$0xff] %v16758_v44  ;;  %v16763_v53 = vpop.f32.mrf.mxu0  ;;  %v7699_v44 = vadd.f32 %v14014_v6, %v16633_v10  ;;  %v7698_v39 = vadd.f32 %v7627_v9, %v7414_v35  ;;  %v8156_v6 = vadd.f32 %v8077_v14, %v7926_v34 }
 0x78c   : > { %v16765_v52 = vpop.f32.mrf.mxu1  ;;  %v8157_v47 = vadd.f32 %v14063_v54, %v7927_v62  ;;  %v7700_v54 = vadd.f32 %v16690_v63, %v7424_v0  ;;  %v7931_v14 = vadd.f32 %v16688_v61, %v7701_v18  ;;  %v7705_v61 = vadd.f32 %v16702_v56, %v16651_v7 }
 0x78d   : > { %17828 = vst [vmem:[#allocation19_spill] sm:$0xff] %v16765_v52  ;;  %v16767_v60 = vpop.f32.mrf.mxu0  ;;  %v7929_v24 = vadd.f32 %v16682_v21, %v7699_v44  ;;  %v7928_v35 = vadd.f32 %v16684_v2, %v7698_v39  ;;  %v7703_v44 = vadd.f32 %v16694_v25, %v16645_v48  ;;  %v8386_v32 = vadd.f32 %v8307_v38, %v8156_v6  ;;  %v17830_v6 = vld [vmem:[#allocation56_spill] sm:$0xff] }
 0x78e   : > { %v16769_v17 = vpop.f32.mrf.mxu1  ;;  %v8387_v29 = vadd.f32 %v14089_v5, %v8157_v47  ;;  %v7702_v21 = vadd.f32 %v16698_v11, %v7434_v8  ;;  %v7930_v5 = vadd.f32 %v16692_v22, %v7700_v54  ;;  %v8161_v63 = vadd.f32 %v14069_v50, %v7931_v14  ;;  %v17831_v54 = vld [vmem:[#allocation74_spill] sm:$0xff]  ;;  %v17833_v8 = vld [vmem:[#allocation40_spill] sm:$0xff] }
 0x78f   : > { %v16774_v26 = vpop.f32.mrf.mxu0  ;;  %v8159_v62 = vadd.f32 %v14066_v30, %v7929_v24  ;;  %v8158_v42 = vadd.f32 %v8087_v57, %v7928_v35  ;;  %v7933_v25 = vadd.f32 %v16696_v49, %v7703_v44  ;;  %v7704_v41 = vadd.f32 %v16706_v20, %v7444_v40  ;;  %v17836_v14 = vld [vmem:[#allocation58_spill] sm:$0xff]  ;;  %v17840_v40 = vld [vmem:[#allocation36_spill] sm:$0xff] }
 0x790   : > { %v16776_v43 = vpop.f32.mrf.mxu1  ;;  %v8160_v19 = vadd.f32 %v8097_v3, %v7930_v5  ;;  %v7932_v50 = vadd.f32 %v16700_v45, %v7702_v21  ;;  %v8391_v22 = vadd.f32 %v16736_v15, %v8161_v63  ;;  %v7707_v3 = vadd.f32 %v16710_v58, %v16662_v13  ;;  %v17829_v15 = vld [vmem:[#allocation76_spill] sm:$0xff]  ;;  %v17832_v58 = vld [vmem:[#allocation65_spill] sm:$0xff] }
 0x791   : > { %v16779_v52 = vpop.f32.mrf.mxu0  ;;  %v8389_v30 = vadd.f32 %v14092_v16, %v8159_v62  ;;  %v8388_v11 = vadd.f32 %v16734_v46, %v8158_v42  ;;  %v7454_v16 = vadd.f32 %v16666_v27, %v16664_v33  ;;  %v8163_v56 = vadd.f32 %v16740_v28, %v7933_v25  ;;  %v17837_v21 = vld [vmem:[#allocation41_spill] sm:$0xff] }
 0x792   : > { %v16781_v36 = vpop.f32.mrf.mxu1  ;;  %v7935_v46 = vadd.f32 %v16704_v51, %v7705_v61  ;;  %v8390_v45 = vadd.f32 %v16738_v4, %v8160_v19  ;;  %v8162_v20 = vadd.f32 %v16744_v1, %v7932_v50  ;;  %v7464_v28 = vadd.f32 %v17829_v15, %v16670_v59  ;;  %v17834_v4 = vld [vmem:[#allocation77_spill] sm:$0xff]  ;;  %v17835_v1 = vld [vmem:[#allocation55_spill] sm:$0xff] }
 0x793   : > { %v16788_v10 = vpop.f32.mrf.mxu0  ;;  %v7934_v35 = vadd.f32 %v17830_v6, %v7704_v41  ;;  %v7706_v51 = vadd.f32 %v17831_v54, %v7454_v16  ;;  %v8393_v13 = vadd.f32 %v17832_v58, %v8163_v56  ;;  %v17841_v61 = vld [vmem:[#allocation57_spill] sm:$0xff]  ;;  %v17844_v16 = vld [vmem:[#allocation48_spill] sm:$0xff]  ;;  %v17847_v56 = vld [vmem:[#allocation39_spill] sm:$0xff] }
 0x794   : > { %v16790_v37 = vpop.f32.mrf.mxu1  ;;  %v8165_v44 = vadd.f32 %v17833_v8, %v7935_v46  ;;  %v17852_v8 = vld [vmem:[#allocation35_spill] sm:$0xff] }
 0x795   : > { %v14115_v23 = vpop.f32.mrf.mxu0 }
 0x796   : > { %v14141_v31 = vpop.f32.mrf.mxu1  ;;  %v8617_v12 = vadd.f32 %v14115_v23, %v8387_v29 }
 0x797   : > { %v8537_v2 = vpop.f32.mrf.mxu0 }
 0x798   : > { %v8767_v9 = vpop.f32.mrf.mxu1  ;;  %v8616_v34 = vadd.f32 %v8537_v2, %v8386_v32  ;;  %v8847_v38 = vadd.f32 %v14141_v31, %v8617_v12  ;;  %v7937_v31 = vadd.f32 %v17834_v4, %v7707_v3  ;;  %v7709_v32 = vadd.f32 %v17836_v14, %v17835_v1  ;;  %v17853_v1 = vld [vmem:[#allocation19_spill] sm:$0xff] }
 0x799   : > { %v14118_v57 = vpop.f32.mrf.mxu0  ;;  %v8392_v2 = vadd.f32 %v17837_v21, %v8162_v20 }
 0x79a   : > { %v14144_v48 = vpop.f32.mrf.mxu1  ;;  %v8846_v39 = vadd.f32 %v8767_v9, %v8616_v34  ;;  %v8619_v47 = vadd.f32 %v14118_v57, %v8389_v30  ;;  %v17838_v9 = vld [vmem:[#allocation31_spill] sm:$0xff]  ;;  %v17839_v34 = vld [vmem:[#allocation72_spill] sm:$0xff]  ;;  %v17842_v57 = vld [vmem:[#allocation78_spill] sm:$0xff]  ;;  %v8167_v50 = vadd.f32 %v17844_v16, %v7937_v31 }
 0x79b   : > { %v8547_v55 = vpop.f32.mrf.mxu0  ;;  %v8164_v5 = vadd.f32 %v17838_v9, %v7934_v35  ;;  %v7474_v25 = vadd.f32 %v17840_v40, %v17839_v34 }
 0x79c   : > { %v8777_v49 = vpop.f32.mrf.mxu1  ;;  %14560 = vtanh.f32 %v8846_v39  ;;  %v8618_v7 = vadd.f32 %v8547_v55, %v8388_v11  ;;  %v8849_v0 = vadd.f32 %v14144_v48, %v8619_v47  ;;  %v7708_v48 = vadd.f32 %v17842_v57, %v7464_v28  ;;  %v17843_v39 = vld [vmem:[#allocation26_spill] sm:$0xff]  ;;  %v17845_v55 = vld [vmem:[#allocation60_spill] sm:$0xff] }
 0x79d   : > { %14562 = vtanh.f32 %v8847_v38  ;;  %v14121_v33 = vpop.f32.mrf.mxu0  ;;  %v7936_v38 = vadd.f32 %v17841_v61, %v7706_v51  ;;  %v8395_v47 = vadd.f32 %v17843_v39, %v8165_v44  ;;  %v17850_v28 = vld [vmem:[#allocation30_spill] sm:$0xff]  ;;  %v17851_v51 = vld [vmem:[#allocation28_spill] sm:$0xff] }
 0x79e   : > { %v14147_v27 = vpop.f32.mrf.mxu1  ;;  %v8848_v24 = vadd.f32 %v8777_v49, %v8618_v7  ;;  %v8621_v18 = vadd.f32 %v14121_v33, %v8391_v22  ;;  %v7939_v49 = vadd.f32 %v17845_v55, %v7709_v32  ;;  %v17846_v22 = vld [vmem:[#allocation51_spill] sm:$0xff]  ;;  %v17848_v33 = vld [vmem:[#allocation42_spill] sm:$0xff]  ;;  %v7710_v6 = vadd.f32 %v17850_v28, %v7474_v25 }
 0x79f   : > { %v8557_v29 = vpop.f32.mrf.mxu0  ;;  %v7711_v7 = vadd.f32 %v17847_v56, %v17846_v22 }
 0x7a0   : > { %v8787_v62 = vpop.f32.mrf.mxu1  ;;  %14564 = vtanh.f32 %v8848_v24  ;;  %v8620_v23 = vadd.f32 %v8557_v29, %v8390_v45  ;;  %v8851_v42 = vadd.f32 %v14147_v27, %v8621_v18  ;;  %v8394_v27 = vadd.f32 %v17848_v33, %v8164_v5  ;;  %v17849_v18 = vld [vmem:[#allocation38_spill] sm:$0xff] }
 0x7a1   : > { %14566 = vtanh.f32 %v8849_v0  ;;  %v14124_v59 = vpop.f32.mrf.mxu0  ;;  %v8166_v45 = vadd.f32 %v16763_v53, %v7936_v38  ;;  %v7938_v15 = vadd.f32 %v17849_v18, %v7708_v48  ;;  %v8397_v29 = vadd.f32 %v17851_v51, %v8167_v50 }
 0x7a2   : > { %v14150_v12 = vpop.f32.mrf.mxu1  ;;  %v8850_v30 = vadd.f32 %v8787_v62, %v8620_v23  ;;  %v8623_v63 = vadd.f32 %v14124_v59, %v8393_v13  ;;  %v8169_v62 = vadd.f32 %v16767_v60, %v7939_v49  ;;  %v7941_v44 = vadd.f32 %v17852_v8, %v7711_v7  ;;  %v17861_v8 = vld [vmem:[#allocation33_spill] sm:$0xff] }
 0x7a3   : > { %v8567_v11 = vpop.f32.mrf.mxu0  ;;  %v8396_v14 = vadd.f32 %v17853_v1, %v8166_v45  ;;  %v8168_v32 = vadd.f32 %v16774_v26, %v7938_v15  ;;  %v17865_v1 = vld [vmem:[#allocation71_spill] sm:$0xff] }
 0x7a4   : > { %v8797_v19 = vpop.f32.mrf.mxu1  ;;  %14568 = vtanh.f32 %v8850_v30  ;;  %v8622_v41 = vadd.f32 %v8567_v11, %v8392_v2  ;;  %v8853_v46 = vadd.f32 %v14150_v12, %v8623_v63  ;;  %v17854_v12 = vld [vmem:[#allocation20_spill] sm:$0xff]  ;;  %v8399_v9 = vadd.f32 %v16769_v17, %v8169_v62 }
 0x7a5   : > { %14570 = vtanh.f32 %v8851_v42  ;;  %v14127_v3 = vpop.f32.mrf.mxu0  ;;  %v7940_v60 = vadd.f32 %v17854_v12, %v7710_v6  ;;  %v8171_v5 = vadd.f32 %v16779_v52, %v7941_v44  ;;  %v8398_v61 = vadd.f32 %v16776_v43, %v8168_v32  ;;  %v17855_v6 = vld [vmem:[#allocation69_spill] sm:$0xff] }
 0x7a6   : > { %v14153_v0 = vpop.f32.mrf.mxu1  ;;  %v8852_v20 = vadd.f32 %v8797_v19, %v8622_v41  ;;  %v8625_v24 = vadd.f32 %v14127_v3, %v8395_v47 }
 0x7a7   : > { %v8577_v35 = vpop.f32.mrf.mxu0  ;;  %v8170_v38 = vadd.f32 %v16788_v10, %v7940_v60  ;;  %v8401_v52 = vadd.f32 %v16781_v36, %v8171_v5  ;;  %v17869_v60 = vld [vmem:[#allocation34_spill] sm:$0xff]  ;;  %v17871_v5 = vld [vmem:[#allocation53_spill] sm:$0xff] }
 0x7a8   : > { %v8807_v54 = vpop.f32.mrf.mxu1  ;;  %14572 = vtanh.f32 %v8852_v20  ;;  %v8624_v58 = vadd.f32 %v8577_v35, %v8394_v27  ;;  %v8855_v23 = vadd.f32 %v14153_v0, %v8625_v24 }
 0x7a9   : > { %v14561_v13 = vpop.eup %14560  ;;  %14574 = vtanh.f32 %v8853_v46  ;;  %v14130_v53 = vpop.f32.mrf.mxu0  ;;  %v8400_v10 = vadd.f32 %v16790_v37, %v8170_v38  ;;  %v17877_v38 = vld [vmem:[#allocation47_spill] sm:$0xff] }
 0x7aa   : > { %v14156_v4 = vpop.f32.mrf.mxu1  ;;  %v14563_v31 = vpop.eup %14562  ;;  %v8854_v42 = vadd.f32 %v8807_v54, %v8624_v58  ;;  %v8627_v59 = vadd.f32 %v14130_v53, %v8397_v29  ;;  %14165 = vmatprep.mubr.msk.f32.mxu0 %vm742_vm4, %v14561_v13  ;;  %v17857_v54 = vld [vmem:[#allocation43_spill] sm:$0xff]  ;;  %v17859_v58 = vld [vmem:[#allocation64_spill] sm:$0xff] }
 0x7ab   : > { %v8587_v21 = vpop.f32.mrf.mxu0  ;;  %14166 = vmatmul.mubr.msk.f32.vlgmr.msra.gmra.mxu0 %vm742_vm4, %v14563_v31 }
 0x7ac   : > { %v8817_v2 = vpop.f32.mrf.mxu1  ;;  %14576 = vtanh.f32 %v8854_v42  ;;  %v8626_v30 = vadd.f32 %v8587_v21, %v8396_v14  ;;  %v8857_v34 = vadd.f32 %v14156_v4, %v8627_v59  ;;  %v17863_v4 = vld [vmem:[#allocation52_spill] sm:$0xff]  ;;  %v17867_v59 = vld [vmem:[#allocation66_spill] sm:$0xff] }
 0x7ad   : > { %v14565_v63 = vpop.eup %14564  ;;  %14578 = vtanh.f32 %v8855_v23  ;;  %v14133_v26 = vpop.f32.mrf.mxu0 }
 0x7ae   : > { %v14159_v40 = vpop.f32.mrf.mxu1  ;;  %v14567_v25 = vpop.eup %14566  ;;  %v8856_v57 = vadd.f32 %v8817_v2, %v8626_v30  ;;  %v8629_v48 = vadd.f32 %v14133_v26, %v8399_v9  ;;  %14168 = vmatprep.mubr.msk.f32.mxu0 %vm742_vm4, %v14565_v63  ;;  %v17873_v63 = vld [vmem:[#allocation73_spill] sm:$0xff] }
 0x7af   : > { %v8597_v11 = vpop.f32.mrf.mxu0  ;;  %14169 = vmatmul.mubr.msk.f32.gmra.mxu0 %vm742_vm4, %v14567_v25  ;;  %v17875_v25 = vld [vmem:[#allocation49_spill] sm:$0xff] }
 0x7b0   : > { %v8827_v17 = vpop.f32.mrf.mxu1  ;;  %14580 = vtanh.f32 %v8856_v57  ;;  %v8628_v19 = vadd.f32 %v8597_v11, %v8398_v61  ;;  %v8859_v47 = vadd.f32 %v14159_v40, %v8629_v48 }
 0x7b1   : > { %v14569_v39 = vpop.eup %14568  ;;  %14582 = vtanh.f32 %v8857_v34  ;;  %v14136_v16 = vpop.f32.mrf.mxu0 }
 0x7b2   : > { %v14162_v50 = vpop.f32.mrf.mxu1  ;;  %v14571_v43 = vpop.eup %14570  ;;  %v8858_v41 = vadd.f32 %v8827_v17, %v8628_v19  ;;  %v8631_v55 = vadd.f32 %v14136_v16, %v8401_v52  ;;  %14171 = vmatprep.mubr.msk.f32.mxu0 %vm742_vm4, %v14569_v39  ;;  %v17879_v17 = vld [vmem:[#allocation68_spill] sm:$0xff]  ;;  %v17881_v19 = vld [vmem:[#allocation54_spill] sm:$0xff] }
 0x7b3   : > { %v8607_v49 = vpop.f32.mrf.mxu0  ;;  %14172 = vmatmul.mubr.msk.f32.gmra.mxu0 %vm742_vm4, %v14571_v43 }
 0x7b4   : > { %14584 = vtanh.f32 %v8858_v41  ;;  %v8630_v22 = vadd.f32 %v8607_v49, %v8400_v10  ;;  %v8861_v56 = vadd.f32 %v14162_v50, %v8631_v55  ;;  %v8837_v7 = vpop.f32.mrf.mxu1  ;;  %v17883_v50 = vld [vmem:[#allocation75_spill] sm:$0xff]  ;;  %v17885_v10 = vld [vmem:[#allocation70_spill] sm:$0xff] }
 0x7b5   : > { %v14573_v36 = vpop.eup %14572  ;;  %14586 = vtanh.f32 %v8859_v47 }
 0x7b6   : > { %v14575_v46 = vpop.eup %14574  ;;  %v8860_v3 = vadd.f32 %v8837_v7, %v8630_v22  ;;  %14174 = vmatprep.mubr.msk.f32.mxu0 %vm742_vm4, %v14573_v36 }
 0x7b7   : > { %14175 = vmatmul.mubr.msk.f32.gmra.mxu0 %vm742_vm4, %v14575_v46 }
 0x7b8   : > { %14588 = vtanh.f32 %v8860_v3 }
 0x7b9   : > { %v14577_v37 = vpop.eup %14576  ;;  %14590 = vtanh.f32 %v8861_v56 }
 0x7ba   : > { %v14579_v0 = vpop.eup %14578  ;;  %14177 = vmatprep.mubr.msk.f32.mxu0 %vm742_vm4, %v14577_v37 }
 0x7bb   : > { %14178 = vmatmul.mubr.msk.f32.gmra.mxu0 %vm742_vm4, %v14579_v0 }
 0x7bd   : > { %v14581_v33 = vpop.eup %14580 }
 0x7be   : > { %v14583_v27 = vpop.eup %14582  ;;  %14180 = vmatprep.mubr.msk.f32.mxu0 %vm742_vm4, %v14581_v33 }
 0x7bf   : > { %14181 = vmatmul.mubr.msk.f32.gmra.mxu0 %vm742_vm4, %v14583_v27 }
 0x7c1   : > { %v14585_v45 = vpop.eup %14584 }
 0x7c2   : > { %v14587_v20 = vpop.eup %14586  ;;  %14183 = vmatprep.mubr.msk.f32.mxu0 %vm742_vm4, %v14585_v45 }
 0x7c3   : > { %14184 = vmatmul.mubr.msk.f32.gmra.mxu0 %vm742_vm4, %v14587_v20 }
 0x7c5   : > { %v14589_v24 = vpop.eup %14588 }
 0x7c6   : > { %v14591_v18 = vpop.eup %14590  ;;  %14186 = vmatprep.mubr.msk.f32.mxu0 %vm742_vm4, %v14589_v24 }
 0x7c7   : > { %14187 = vmatmul.mubr.msk.f32.gmra.mxu0 %vm742_vm4, %v14591_v18 }
 0x86b   : > { %v14167_v15 = vpop.f32.mrf.mxu0 }
 0x86c   : > { %v16874_v51 = vadd.f32 %v14167_v15, %v17857_v54  ;;  %v12266_v15 = vld [vmem:[%s17490_s13 + $0x4] sm:$0xf]  ;;  %v17887_v54 = vld [vmem:[#allocation7_spill] sm:$0xff] }
 0x86d   : > { %v8996_v28 = vpop.f32.mrf.mxu0  ;;  %14215 = vmatprep.subr.msk.mxu0 %vm1067_vm3, %v12266_v15 }
 0x86e   : > { %v16871_v35 = vadd.f32 %v8996_v28, %v17855_v6  ;;  %17858 = vst [vmem:[#allocation21_spill] sm:$0xff] %v16874_v51  ;;  %v9481_v28 = vld [vmem:[%s17490_s13] sm:$0xf]  ;;  %14216 = vmatpush3.msk.msra.mxu0 %vm1067_vm3, %v12266_v15 }
 0x86f   : > { %v14170_v29 = vpop.f32.mrf.mxu0  ;;  %14241 = vmatprep.subr.msk.mxu1 %vm1067_vm3, %v9481_v28 }
 0x870   : > { %17856 = vst [vmem:[#allocation37_spill] sm:$0xff] %v16871_v35  ;;  %14191 = vmatprep.mubr.msk.f32.mxu1 %vm742_vm4, %v16871_v35  ;;  %v16884_v44 = vadd.f32 %v14170_v29, %v17861_v8 }
 0x871   : > { %v9006_v62 = vpop.f32.mrf.mxu0  ;;  %14192 = vmatmul.mubr.msk.f32.vlgmr.msra.gmra.mxu1 %vm742_vm4, %v16874_v51 }
 0x872   : > { %v16881_v13 = vadd.f32 %v9006_v62, %v17859_v58  ;;  %17862 = vst [vmem:[#allocation45_spill] sm:$0xff] %v16884_v44  ;;  %14242 = vmatpush3.msk.msra.mxu1 %vm1067_vm3, %v9481_v28  ;;  %v17888_v58 = vld [vmem:[#allocation9_spill] sm:$0xff] }
 0x873   : > { %v14173_v23 = vpop.f32.mrf.mxu0 }
 0x874   : > { %17860 = vst [vmem:[#allocation61_spill] sm:$0xff] %v16881_v13  ;;  %14194 = vmatprep.mubr.msk.f32.mxu1 %vm742_vm4, %v16881_v13  ;;  %v16894_v14 = vadd.f32 %v14173_v23, %v17865_v1 }
 0x875   : > { %v9016_v53 = vpop.f32.mrf.mxu0  ;;  %14195 = vmatmul.mubr.msk.f32.gmra.mxu1 %vm742_vm4, %v16884_v44 }
 0x876   : > { %v16891_v31 = vadd.f32 %v9016_v53, %v17863_v4  ;;  %17866 = vst [vmem:[#allocation29_spill] sm:$0xff] %v16894_v14  ;;  %v17889_v53 = vld [vmem:[#allocation8_spill] sm:$0xff] }
 0x877   : > { %v14176_v32 = vpop.f32.mrf.mxu0 }
 0x878   : > { %17864 = vst [vmem:[#allocation44_spill] sm:$0xff] %v16891_v31  ;;  %14197 = vmatprep.mubr.msk.f32.mxu1 %vm742_vm4, %v16891_v31  ;;  %v16904_v21 = vadd.f32 %v14176_v32, %v17869_v60  ;;  %v17890_v32 = vld [vmem:[#allocation25_spill] sm:$0xff]  ;;  %v17891_v60 = vld [vmem:[#allocation14_spill] sm:$0xff] }
 0x879   : > { %v9026_v42 = vpop.f32.mrf.mxu0  ;;  %14198 = vmatmul.mubr.msk.f32.gmra.mxu1 %vm742_vm4, %v16894_v14 }
 0x87a   : > { %v16901_v12 = vadd.f32 %v9026_v42, %v17867_v59  ;;  %17870 = vst [vmem:[#allocation67_spill] sm:$0xff] %v16904_v21 }
 0x87b   : > { %v14179_v2 = vpop.f32.mrf.mxu0 }
 0x87c   : > { %17868 = vst [vmem:[#allocation23_spill] sm:$0xff] %v16901_v12  ;;  %14200 = vmatprep.mubr.msk.f32.mxu1 %vm742_vm4, %v16901_v12  ;;  %v16914_v34 = vadd.f32 %v14179_v2, %v17873_v63 }
 0x87d   : > { %v9036_v9 = vpop.f32.mrf.mxu0  ;;  %14201 = vmatmul.mubr.msk.f32.gmra.mxu1 %vm742_vm4, %v16904_v21 }
 0x87e   : > { %v16911_v30 = vadd.f32 %v9036_v9, %v17871_v5  ;;  %17874 = vst [vmem:[#allocation46_spill] sm:$0xff] %v16914_v34  ;;  %v17892_v5 = vld [vmem:[#allocation15_spill] sm:$0xff] }
 0x87f   : > { %v14182_v26 = vpop.f32.mrf.mxu0 }
 0x880   : > { %17872 = vst [vmem:[#allocation63_spill] sm:$0xff] %v16911_v30  ;;  %14203 = vmatprep.mubr.msk.f32.mxu1 %vm742_vm4, %v16911_v30  ;;  %v16924_v57 = vadd.f32 %v14182_v26, %v17877_v38 }
 0x881   : > { %v9046_v40 = vpop.f32.mrf.mxu0  ;;  %14204 = vmatmul.mubr.msk.f32.gmra.mxu1 %vm742_vm4, %v16914_v34 }
 0x882   : > { %v16921_v61 = vadd.f32 %v9046_v40, %v17875_v25  ;;  %17878 = vst [vmem:[#allocation59_spill] sm:$0xff] %v16924_v57  ;;  %v17893_v40 = vld [vmem:[#allocation22_spill] sm:$0xff] }
 0x883   : > { %v14185_v48 = vpop.f32.mrf.mxu0 }
 0x884   : > { %17876 = vst [vmem:[#allocation62_spill] sm:$0xff] %v16921_v61  ;;  %14206 = vmatprep.mubr.msk.f32.mxu1 %vm742_vm4, %v16921_v61  ;;  %v16934_v39 = vadd.f32 %v14185_v48, %v17881_v19  ;;  %v16986_v48 = vld [vmem:[%s17490_s13 + $0x8] sm:$0xf] }
 0x885   : > { %v9056_v11 = vpop.f32.mrf.mxu0  ;;  %14207 = vmatmul.mubr.msk.f32.gmra.mxu1 %vm742_vm4, %v16924_v57  ;;  %14267 = vmatprep.subr.msk.mxu0 %vm1067_vm3, %v16986_v48 }
 0x886   : > { %v16931_v52 = vadd.f32 %v9056_v11, %v17879_v17  ;;  %17882 = vst [vmem:[#allocation32_spill] sm:$0xff] %v16934_v39  ;;  %v17894_v11 = vld [vmem:[#allocation16_spill] sm:$0xff] }
 0x887   : > { %v14188_v47 = vpop.f32.mrf.mxu0 }
 0x888   : > { %17880 = vst [vmem:[#allocation50_spill] sm:$0xff] %v16931_v52  ;;  %14209 = vmatprep.mubr.msk.f32.mxu1 %vm742_vm4, %v16931_v52  ;;  %v16944_v41 = vadd.f32 %v14188_v47, %v17885_v10 }
 0x889   : > { %v9066_v16 = vpop.f32.mrf.mxu0  ;;  %14210 = vmatmul.mubr.msk.f32.gmra.mxu1 %vm742_vm4, %v16934_v39 }
 0x88a   : > { %v16941_v43 = vadd.f32 %v9066_v16, %v17883_v50  ;;  %17886 = vst [vmem:[#allocation56_spill] sm:$0xff] %v16944_v41  ;;  %v16994_v16 = vld [vmem:[%s17490_s13 + $0xc] sm:$0xf]  ;;  %v17895_v50 = vld [vmem:[#allocation17_spill] sm:$0xff] }
 0x88b   : > { %14293 = vmatprep.subr.msk.mxu1 %vm1067_vm3, %v16994_v16 }
 0x88c   : > { %17884 = vst [vmem:[#allocation76_spill] sm:$0xff] %v16941_v43  ;;  %14212 = vmatprep.mubr.msk.f32.mxu1 %vm742_vm4, %v16941_v43 }
 0x88d   : > { %14213 = vmatmul.mubr.msk.f32.gmra.mxu1 %vm742_vm4, %v16944_v41 }
 0x931   : > { %v14193_v55 = vpop.f32.mrf.mxu1 }
 0x932   : > { %9307 = vrot.lane.b32.xlu1 %v14193_v55, %s14667_s19 }
 0x933   : > { %v9210_v49 = vpop.f32.mrf.mxu1 }
 0x934   : > { %9305 = vrot.lane.b32.xlu0 %v9210_v49, %s14667_s19 }
 0x935   : > { %v14196_v22 = vpop.f32.mrf.mxu1 }
 0x936   : > { %9311 = vrot.lane.b32.xlu1 %v14196_v22, %s14667_s19  ;;  %v17896_v22 = vld [vmem:[#allocation10_spill] sm:$0xff] }
 0x937   : > { %v9220_v36 = vpop.f32.mrf.mxu1 }
 0x938   : > { %9309 = vrot.lane.b32.xlu0 %v9220_v36, %s14667_s19 }
 0x939   : > { %v14199_v56 = vpop.f32.mrf.mxu1 }
 0x93a   : > { %9315 = vrot.lane.b32.xlu1 %v14199_v56, %s14667_s19 }
 0x93b   : > { %v9230_v7 = vpop.f32.mrf.mxu1 }
 0x93c   : > { %9313 = vrot.lane.b32.xlu0 %v9230_v7, %s14667_s19 }
 0x93d   : > { %v14202_v46 = vpop.f32.mrf.mxu1 }
 0x93e   : > { %9319 = vrot.lane.b32.xlu1 %v14202_v46, %s14667_s19  ;;  %v17897_v46 = vld [vmem:[#allocation24_spill] sm:$0xff] }
 0x93f   : > { %v9240_v3 = vpop.f32.mrf.mxu1 }
 0x940   : > { %9317 = vrot.lane.b32.xlu0 %v9240_v3, %s14667_s19 }
 0x941   : > { %v14205_v37 = vpop.f32.mrf.mxu1 }
 0x942   : > { %9323 = vrot.lane.b32.xlu1 %v14205_v37, %s14667_s19 }
 0x943   : > { %v9250_v0 = vpop.f32.mrf.mxu1 }
 0x944   : > { %9321 = vrot.lane.b32.xlu0 %v9250_v0, %s14667_s19 }
 0x945   : > { %v14208_v33 = vpop.f32.mrf.mxu1 }
 0x946   : > { %9327 = vrot.lane.b32.xlu1 %v14208_v33, %s14667_s19  ;;  %v17898_v33 = vld [vmem:[#allocation27_spill] sm:$0xff] }
 0x947   : > { %v9260_v27 = vpop.f32.mrf.mxu1 }
 0x948   : > { %9325 = vrot.lane.b32.xlu0 %v9260_v27, %s14667_s19 }
 0x949   : > { %v14211_v45 = vpop.f32.mrf.mxu1 }
 0x94a   : > { %9331 = vrot.lane.b32.xlu1 %v14211_v45, %s14667_s19 }
 0x94b   : > { %v9270_v20 = vpop.f32.mrf.mxu1 }
 0x94c   : > { %9329 = vrot.lane.b32.xlu0 %v9270_v20, %s14667_s19 }
 0x94d   : > { %v14214_v24 = vpop.f32.mrf.mxu1 }
 0x94e   : > { %9335 = vrot.lane.b32.xlu1 %v14214_v24, %s14667_s19  ;;  %v17899_v24 = vld [vmem:[#allocation11_spill] sm:$0xff] }
 0x94f   : > { %v9280_v18 = vpop.f32.mrf.mxu1 }
 0x950   : > { %9333 = vrot.lane.b32.xlu0 %v9280_v18, %s14667_s19 }
 0x9a4   : > { %v9308_v6 = vpop.permute.xlu1 %9307 }
 0x9a5   : > { %v9354_v29 = vadd.f32 %v9308_v6, %v17887_v54  ;;  %v17900_v6 = vld [vmem:[#allocation12_spill] sm:$0xff] }
 0x9a6   : > { %v9306_v62 = vpop.permute.xlu0 %9305 }
 0x9a7   : > { %14592 = vtanh.f32 %v9354_v29  ;;  %v9353_v8 = vadd.f32 %v9306_v62, %v17888_v58  ;;  %v17901_v58 = vld [vmem:[#allocation18_spill] sm:$0xff] }
 0x9a8   : > { %v9312_v23 = vpop.permute.xlu1 %9311 }
 0x9a9   : > { %14594 = vtanh.f32 %v9353_v8  ;;  %v9356_v4 = vadd.f32 %v9312_v23, %v17889_v53 }
 0x9aa   : > { %v9310_v1 = vpop.permute.xlu0 %9309 }
 0x9ab   : > { %14596 = vtanh.f32 %v9356_v4  ;;  %v9355_v42 = vadd.f32 %v9310_v1, %v17890_v32  ;;  %v17902_v4 = vld [vmem:[#allocation13_spill] sm:$0xff] }
 0x9ac   : > { %v9316_v59 = vpop.permute.xlu1 %9315 }
 0x9ad   : > { %14598 = vtanh.f32 %v9355_v42  ;;  %v9358_v2 = vadd.f32 %v9316_v59, %v17891_v60 }
 0x9ae   : > { %v9314_v9 = vpop.permute.xlu0 %9313 }
 0x9af   : > { %14600 = vtanh.f32 %v9358_v2  ;;  %v9357_v63 = vadd.f32 %v9314_v9, %v17892_v5 }
 0x9b0   : > { %v9320_v26 = vpop.permute.xlu1 %9319 }
 0x9b1   : > { %14602 = vtanh.f32 %v9357_v63  ;;  %v9360_v25 = vadd.f32 %v9320_v26, %v17893_v40 }
 0x9b2   : > { %v9318_v38 = vpop.permute.xlu0 %9317 }
 0x9b3   : > { %14604 = vtanh.f32 %v9360_v25  ;;  %v9359_v17 = vadd.f32 %v9318_v38, %v17894_v11 }
 0x9b4   : > { %v14593_v19 = vpop.eup %14592  ;;  %v9324_v47 = vpop.permute.xlu1 %9323 }
 0x9b5   : > { %14606 = vtanh.f32 %v9359_v17  ;;  %v9362_v10 = vadd.f32 %v9324_v47, %v17895_v50  ;;  %9403 = vrot.lane.b32.xlu1 %v14593_v19, %s14668_s27 }
 0x9b6   : > { %v14595_v55 = vpop.eup %14594  ;;  %v9322_v49 = vpop.permute.xlu0 %9321 }
 0x9b7   : > { %14608 = vtanh.f32 %v9362_v10  ;;  %v9361_v36 = vadd.f32 %v9322_v49, %v17896_v22  ;;  %9401 = vrot.lane.b32.xlu0 %v14595_v55, %s14668_s27  ;;  %v17033_v55 = vld [vmem:[%s17490_s13 + $0x10] sm:$0xf]  ;;  %v17038_v49 = vld [vmem:[%s17490_s13 + $0x14] sm:$0xf] }
 0x9b8   : > { %v14597_v56 = vpop.eup %14596  ;;  %v9328_v7 = vpop.permute.xlu1 %9327 }
 0x9b9   : > { %14610 = vtanh.f32 %v9361_v36  ;;  %v9364_v3 = vadd.f32 %v9328_v7, %v17897_v46  ;;  %9407 = vrot.lane.b32.xlu1 %v14597_v56, %s14668_s27 }
 0x9ba   : > { %v14599_v37 = vpop.eup %14598  ;;  %v9326_v0 = vpop.permute.xlu0 %9325 }
 0x9bb   : > { %14612 = vtanh.f32 %v9364_v3  ;;  %v9363_v27 = vadd.f32 %v9326_v0, %v17898_v33  ;;  %9405 = vrot.lane.b32.xlu0 %v14599_v37, %s14668_s27 }
 0x9bc   : > { %v14601_v45 = vpop.eup %14600  ;;  %v9332_v20 = vpop.permute.xlu1 %9331 }
 0x9bd   : > { %14614 = vtanh.f32 %v9363_v27  ;;  %v9366_v18 = vadd.f32 %v9332_v20, %v17899_v24  ;;  %9411 = vrot.lane.b32.xlu1 %v14601_v45, %s14668_s27 }
 0x9be   : > { %v14603_v15 = vpop.eup %14602  ;;  %v9330_v28 = vpop.permute.xlu0 %9329 }
 0x9bf   : > { %14616 = vtanh.f32 %v9366_v18  ;;  %v9365_v54 = vadd.f32 %v9330_v28, %v17900_v6  ;;  %9409 = vrot.lane.b32.xlu0 %v14603_v15, %s14668_s27 }
 0x9c0   : > { %v14605_v29 = vpop.eup %14604  ;;  %v9336_v62 = vpop.permute.xlu1 %9335 }
 0x9c1   : > { %14618 = vtanh.f32 %v9365_v54  ;;  %v9368_v8 = vadd.f32 %v9336_v62, %v17901_v58  ;;  %9415 = vrot.lane.b32.xlu1 %v14605_v29, %s14668_s27 }
 0x9c2   : > { %v14607_v23 = vpop.eup %14606  ;;  %v9334_v53 = vpop.permute.xlu0 %9333 }
 0x9c3   : > { %14620 = vtanh.f32 %v9368_v8  ;;  %v9367_v1 = vadd.f32 %v9334_v53, %v17902_v4  ;;  %9413 = vrot.lane.b32.xlu0 %v14607_v23, %s14668_s27 }
 0x9c4   : > { %v14609_v32 = vpop.eup %14608 }
 0x9c5   : > { %14622 = vtanh.f32 %v9367_v1  ;;  %9419 = vrot.lane.b32.xlu1 %v14609_v32, %s14668_s27 }
 0x9c6   : > { %v14611_v42 = vpop.eup %14610 }
 0x9c7   : > { %9417 = vrot.lane.b32.xlu0 %v14611_v42, %s14668_s27 }
 0x9c8   : > { %v14613_v59 = vpop.eup %14612 }
 0x9c9   : > { %9423 = vrot.lane.b32.xlu1 %v14613_v59, %s14668_s27 }
 0x9ca   : > { %v14615_v60 = vpop.eup %14614 }
 0x9cb   : > { %9421 = vrot.lane.b32.xlu0 %v14615_v60, %s14668_s27 }
 0x9cc   : > { %v14617_v2 = vpop.eup %14616 }
 0x9cd   : > { %9427 = vrot.lane.b32.xlu1 %v14617_v2, %s14668_s27 }
 0x9ce   : > { %v14619_v9 = vpop.eup %14618 }
 0x9cf   : > { %9425 = vrot.lane.b32.xlu0 %v14619_v9, %s14668_s27 }
 0x9d0   : > { %v14621_v5 = vpop.eup %14620 }
 0x9d1   : > { %9431 = vrot.lane.b32.xlu1 %v14621_v5, %s14668_s27 }
 0x9d2   : > { %v14623_v63 = vpop.eup %14622 }
 0x9d3   : > { %9429 = vrot.lane.b32.xlu0 %v14623_v63, %s14668_s27 }
 0xa27   : > { %v9404_v26 = vpop.permute.xlu1 %9403 }
 0xa28   : > { %9450 = vst.msk [vmem:[#allocation6 + $0x10] sm:$0xff] %vm742_vm4, %v9404_v26 }
 0xa29   : > { %v9402_v40 = vpop.permute.xlu0 %9401 }
 0xa2a   : > { %9449 = vst.msk [vmem:[#allocation6 + $0x8] sm:$0xff] %vm742_vm4, %v9402_v40 }
 0xa2b   : > { %v9408_v25 = vpop.permute.xlu1 %9407 }
 0xa2c   : > { %9452 = vst.msk [vmem:[#allocation6 + $0x20] sm:$0xff] %vm742_vm4, %v9408_v25 }
 0xa2d   : > { %v9406_v38 = vpop.permute.xlu0 %9405 }
 0xa2e   : > { %9451 = vst.msk [vmem:[#allocation6 + $0x18] sm:$0xff] %vm742_vm4, %v9406_v38 }
 0xa2f   : > { %v9412_v11 = vpop.permute.xlu1 %9411  ;;  %v9466_v10 = vld [vmem:[#allocation6 + $0x10] sm:$0xff] }
 0xa30   : > { %9454 = vst.msk [vmem:[#allocation6 + $0x30] sm:$0xff] %vm742_vm4, %v9412_v11 }
 0xa31   : > { %v9410_v17 = vpop.permute.xlu0 %9409  ;;  %v9482_v19 = vld [vmem:[#allocation6 + $0x7] sm:$0xff]  ;;  %v9483_v50 = vld [vmem:[#allocation6 + $0xf] sm:$0xff] }
 0xa32   : > { %v9465_v47 = vld [vmem:[#allocation6 + $0x8] sm:$0xff]  ;;  %9453 = vst.msk [vmem:[#allocation6 + $0x28] sm:$0xff] %vm742_vm4, %v9410_v17  ;;  %14217 = vmatprep.mubr.msk.f32.mxu0 %vm742_vm4, %v9482_v19 }
 0xa33   : > { %14243 = vmatprep.mubr.msk.f32.mxu1 %vm742_vm4, %v9465_v47  ;;  %v9416_v22 = vpop.permute.xlu1 %9415  ;;  %14218 = vmatmul.mubr.msk.f32.vlgmr.msra.gmra.mxu0 %vm742_vm4, %v9483_v50  ;;  %v9892_v25 = vld [vmem:[#allocation6 + $0x6] sm:$0xff]  ;;  %v9893_v50 = vld [vmem:[#allocation6 + $0xe] sm:$0xff] }
 0xa34   : > { %14244 = vmatmul.mubr.msk.f32.vlgmr.msra.gmra.mxu1 %vm742_vm4, %v9466_v10  ;;  %9456 = vst.msk [vmem:[#allocation6 + $0x40] sm:$0xff] %vm742_vm4, %v9416_v22  ;;  %14268 = vmatpush3.msk.msra.mxu0 %vm1067_vm3, %v16986_v48  ;;  %v9468_v48 = vld [vmem:[#allocation6 + $0x20] sm:$0xff]  ;;  %v10123_v10 = vld [vmem:[#allocation6 + $0xd] sm:$0xff]  ;;  %v17101_v22 = vld [vmem:[%s17490_s13 + $0x18] sm:$0xf] }
 0xa35   : > { %14294 = vmatpush3.msk.msra.mxu1 %vm1067_vm3, %v16994_v16  ;;  %v9414_v36 = vpop.permute.xlu0 %9413  ;;  %v9484_v56 = vld [vmem:[#allocation6 + $0x17] sm:$0xff]  ;;  %v9485_v46 = vld [vmem:[#allocation6 + $0x1f] sm:$0xff]  ;;  %14319 = vmatprep.subr.msk.mxu0 %vm1067_vm3, %v17033_v55 }
 0xa36   : > { %v9467_v7 = vld [vmem:[#allocation6 + $0x18] sm:$0xff]  ;;  %14345 = vmatprep.subr.msk.mxu1 %vm1067_vm3, %v17038_v49  ;;  %9455 = vst.msk [vmem:[#allocation6 + $0x38] sm:$0xff] %vm742_vm4, %v9414_v36  ;;  %14220 = vmatprep.mubr.msk.f32.mxu0 %vm742_vm4, %v9484_v56  ;;  %v10122_v38 = vld [vmem:[#allocation6 + $0x5] sm:$0xff] }
 0xa37   : > { %14246 = vmatprep.mubr.msk.f32.mxu1 %vm742_vm4, %v9467_v7  ;;  %v9420_v3 = vpop.permute.xlu1 %9419  ;;  %14221 = vmatmul.mubr.msk.f32.gmra.mxu0 %vm742_vm4, %v9485_v46  ;;  %v9470_v27 = vld [vmem:[#allocation6 + $0x30] sm:$0xff]  ;;  %v17090_v11 = vld [vmem:[#allocation6 + $0x4] sm:$0xff]  ;;  %v17109_v7 = vld [vmem:[%s17490_s13 + $0x1c] sm:$0xf] }
 0xa38   : > { %14247 = vmatmul.mubr.msk.f32.gmra.mxu1 %vm742_vm4, %v9468_v48  ;;  %9458 = vst.msk [vmem:[#allocation6 + $0x50] sm:$0xff] %vm742_vm4, %v9420_v3  ;;  %v17092_v17 = vld [vmem:[#allocation6 + $0x3] sm:$0xff]  ;;  %v9894_v36 = vld [vmem:[#allocation6 + $0x16] sm:$0xff] }
 0xa39   : > { %v9418_v16 = vpop.permute.xlu0 %9417  ;;  %v9486_v37 = vld [vmem:[#allocation6 + $0x27] sm:$0xff]  ;;  %v9487_v33 = vld [vmem:[#allocation6 + $0x2f] sm:$0xff]  ;;  %v9895_v46 = vld [vmem:[#allocation6 + $0x1e] sm:$0xff] }
 0xa3a   : > { %v9469_v0 = vld [vmem:[#allocation6 + $0x28] sm:$0xff]  ;;  %9457 = vst.msk [vmem:[#allocation6 + $0x48] sm:$0xff] %vm742_vm4, %v9418_v16  ;;  %14223 = vmatprep.mubr.msk.f32.mxu0 %vm742_vm4, %v9486_v37  ;;  %v10124_v56 = vld [vmem:[#allocation6 + $0x15] sm:$0xff]  ;;  %v10125_v48 = vld [vmem:[#allocation6 + $0x1d] sm:$0xff] }
 0xa3b   : > { %14249 = vmatprep.mubr.msk.f32.mxu1 %vm742_vm4, %v9469_v0  ;;  %v9424_v45 = vpop.permute.xlu1 %9423  ;;  %14224 = vmatmul.mubr.msk.f32.gmra.mxu0 %vm742_vm4, %v9487_v33  ;;  %v9472_v28 = vld [vmem:[#allocation6 + $0x40] sm:$0xff] }
 0xa3c   : > { %14250 = vmatmul.mubr.msk.f32.gmra.mxu1 %vm742_vm4, %v9470_v27  ;;  %9460 = vst.msk [vmem:[#allocation6 + $0x60] sm:$0xff] %vm742_vm4, %v9424_v45  ;;  %v17094_v19 = vld [vmem:[#allocation6 + $0x2] sm:$0xff] }
 0xa3d   : > { %v9422_v20 = vpop.permute.xlu0 %9421  ;;  %v9488_v24 = vld [vmem:[#allocation6 + $0x37] sm:$0xff]  ;;  %v9489_v15 = vld [vmem:[#allocation6 + $0x3f] sm:$0xff] }
 0xa3e   : > { %v9471_v18 = vld [vmem:[#allocation6 + $0x38] sm:$0xff]  ;;  %9459 = vst.msk [vmem:[#allocation6 + $0x58] sm:$0xff] %vm742_vm4, %v9422_v20  ;;  %14226 = vmatprep.mubr.msk.f32.mxu0 %vm742_vm4, %v9488_v24  ;;  %v17096_v47 = vld [vmem:[#allocation6 + $0x1] sm:$0xff] }
 0xa3f   : > { %14252 = vmatprep.mubr.msk.f32.mxu1 %vm742_vm4, %v9471_v18  ;;  %v9428_v6 = vpop.permute.xlu1 %9427  ;;  %14227 = vmatmul.mubr.msk.f32.gmra.mxu0 %vm742_vm4, %v9489_v15  ;;  %v9474_v8 = vld [vmem:[#allocation6 + $0x50] sm:$0xff]  ;;  %v9896_v3 = vld [vmem:[#allocation6 + $0x26] sm:$0xff]  ;;  %v9899_v33 = vld [vmem:[#allocation6 + $0x3e] sm:$0xff] }
 0xa40   : > { %14253 = vmatmul.mubr.msk.f32.gmra.mxu1 %vm742_vm4, %v9472_v28  ;;  %9462 = vst.msk [vmem:[#allocation6 + $0x70] sm:$0xff] %vm742_vm4, %v9428_v6  ;;  %v10126_v16 = vld [vmem:[#allocation6 + $0x25] sm:$0xff]  ;;  %v9898_v37 = vld [vmem:[#allocation6 + $0x36] sm:$0xff] }
 0xa41   : > { %v9426_v54 = vpop.permute.xlu0 %9425  ;;  %v9490_v29 = vld [vmem:[#allocation6 + $0x47] sm:$0xff]  ;;  %v9491_v58 = vld [vmem:[#allocation6 + $0x4f] sm:$0xff]  ;;  %v10129_v27 = vld [vmem:[#allocation6 + $0x3d] sm:$0xff] }
 0xa42   : > { %v9473_v62 = vld [vmem:[#allocation6 + $0x48] sm:$0xff]  ;;  %9461 = vst.msk [vmem:[#allocation6 + $0x68] sm:$0xff] %vm742_vm4, %v9426_v54  ;;  %14229 = vmatprep.mubr.msk.f32.mxu0 %vm742_vm4, %v9490_v29  ;;  %v10128_v0 = vld [vmem:[#allocation6 + $0x35] sm:$0xff] }
 0xa43   : > { %14255 = vmatprep.mubr.msk.f32.mxu1 %vm742_vm4, %v9473_v62  ;;  %v9432_v23 = vpop.permute.xlu1 %9431  ;;  %14230 = vmatmul.mubr.msk.f32.gmra.mxu0 %vm742_vm4, %v9491_v58  ;;  %v9476_v42 = vld [vmem:[#allocation6 + $0x60] sm:$0xff]  ;;  %v9901_v24 = vld [vmem:[#allocation6 + $0x4e] sm:$0xff] }
 0xa44   : > { %14256 = vmatmul.mubr.msk.f32.gmra.mxu1 %vm742_vm4, %v9474_v8  ;;  %9464 = vst.msk [vmem:[#allocation6 + $0x80] sm:$0xff] %vm742_vm4, %v9432_v23  ;;  %v9900_v45 = vld [vmem:[#allocation6 + $0x46] sm:$0xff] }
 0xa45   : > { %v9430_v53 = vpop.permute.xlu0 %9429  ;;  %v9492_v4 = vld [vmem:[#allocation6 + $0x57] sm:$0xff]  ;;  %v9493_v32 = vld [vmem:[#allocation6 + $0x5f] sm:$0xff]  ;;  %v10131_v18 = vld [vmem:[#allocation6 + $0x4d] sm:$0xff] }
 0xa46   : > { %v9475_v1 = vld [vmem:[#allocation6 + $0x58] sm:$0xff]  ;;  %9463 = vst.msk [vmem:[#allocation6 + $0x78] sm:$0xff] %vm742_vm4, %v9430_v53  ;;  %14232 = vmatprep.mubr.msk.f32.mxu0 %vm742_vm4, %v9492_v4  ;;  %v10130_v20 = vld [vmem:[#allocation6 + $0x45] sm:$0xff] }
 0xa47   : > { %14258 = vmatprep.mubr.msk.f32.mxu1 %vm742_vm4, %v9475_v1  ;;  %14233 = vmatmul.mubr.msk.f32.gmra.mxu0 %vm742_vm4, %v9493_v32  ;;  %v9478_v9 = vld [vmem:[#allocation6 + $0x70] sm:$0xff]  ;;  %v9903_v6 = vld [vmem:[#allocation6 + $0x5e] sm:$0xff] }
 0xa48   : > { %14259 = vmatmul.mubr.msk.f32.gmra.mxu1 %vm742_vm4, %v9476_v42  ;;  %v9902_v15 = vld [vmem:[#allocation6 + $0x56] sm:$0xff]  ;;  %v10353_v32 = vld [vmem:[#allocation6 + $0xc] sm:$0xff] }
 0xa49   : > { %v9494_v59 = vld [vmem:[#allocation6 + $0x67] sm:$0xff]  ;;  %v9495_v2 = vld [vmem:[#allocation6 + $0x6f] sm:$0xff]  ;;  %v10133_v54 = vld [vmem:[#allocation6 + $0x5d] sm:$0xff] }
 0xa4a   : > { %v9477_v60 = vld [vmem:[#allocation6 + $0x68] sm:$0xff]  ;;  %14235 = vmatprep.mubr.msk.f32.mxu0 %vm742_vm4, %v9494_v59  ;;  %v10132_v28 = vld [vmem:[#allocation6 + $0x55] sm:$0xff] }
 0xa4b   : > { %14261 = vmatprep.mubr.msk.f32.mxu1 %vm742_vm4, %v9477_v60  ;;  %14236 = vmatmul.mubr.msk.f32.gmra.mxu0 %vm742_vm4, %v9495_v2  ;;  %v9480_v40 = vld [vmem:[#allocation6 + $0x80] sm:$0xff]  ;;  %v9905_v58 = vld [vmem:[#allocation6 + $0x6e] sm:$0xff] }
 0xa4c   : > { %14262 = vmatmul.mubr.msk.f32.gmra.mxu1 %vm742_vm4, %v9478_v9  ;;  %11501 = vst.msk [vmem:[#allocation6] sm:$0xff] %vm742_vm4, %v9480_v40  ;;  %v9904_v29 = vld [vmem:[#allocation6 + $0x66] sm:$0xff]  ;;  %v10354_v59 = vld [vmem:[#allocation6 + $0x14] sm:$0xff]  ;;  %v10355_v2 = vld [vmem:[#allocation6 + $0x1c] sm:$0xff] }
 0xa4d   : > { %v9496_v5 = vld [vmem:[#allocation6 + $0x77] sm:$0xff]  ;;  %v9497_v26 = vld [vmem:[#allocation6 + $0x7f] sm:$0xff]  ;;  %v10135_v8 = vld [vmem:[#allocation6 + $0x6d] sm:$0xff] }
 0xa4e   : > { %v9479_v63 = vld [vmem:[#allocation6 + $0x78] sm:$0xff]  ;;  %14238 = vmatprep.mubr.msk.f32.mxu0 %vm742_vm4, %v9496_v5  ;;  %v10134_v62 = vld [vmem:[#allocation6 + $0x65] sm:$0xff] }
 0xa4f   : > { %14264 = vmatprep.mubr.msk.f32.mxu1 %vm742_vm4, %v9479_v63  ;;  %14239 = vmatmul.mubr.msk.f32.gmra.mxu0 %vm742_vm4, %v9497_v26  ;;  %v9906_v23 = vld [vmem:[#allocation6 + $0x76] sm:$0xff]  ;;  %v9907_v4 = vld [vmem:[#allocation6 + $0x7e] sm:$0xff]  ;;  %v10583_v42 = vld [vmem:[#allocation6 + $0xb] sm:$0xff] }
 0xa50   : > { %14265 = vmatmul.mubr.msk.f32.gmra.mxu1 %vm742_vm4, %v9480_v40  ;;  %14269 = vmatprep.mubr.msk.f32.mxu0 %vm742_vm4, %v9892_v25  ;;  %v10136_v53 = vld [vmem:[#allocation6 + $0x75] sm:$0xff]  ;;  %v10137_v1 = vld [vmem:[#allocation6 + $0x7d] sm:$0xff]  ;;  %v10357_v26 = vld [vmem:[#allocation6 + $0x2c] sm:$0xff] }
 0xa51   : > { %14295 = vmatprep.mubr.msk.f32.mxu1 %vm742_vm4, %v10122_v38  ;;  %v10584_v60 = vld [vmem:[#allocation6 + $0x13] sm:$0xff]  ;;  %v10585_v9 = vld [vmem:[#allocation6 + $0x1b] sm:$0xff]  ;;  %v10356_v5 = vld [vmem:[#allocation6 + $0x24] sm:$0xff] }
 0xa52   : > { %v10586_v63 = vld [vmem:[#allocation6 + $0x23] sm:$0xff]  ;;  %v10587_v40 = vld [vmem:[#allocation6 + $0x2b] sm:$0xff]  ;;  %v10358_v25 = vld [vmem:[#allocation6 + $0x34] sm:$0xff] }
 0xa53   : > { %14270 = vmatmul.mubr.msk.f32.vlgmr.msra.gmra.mxu0 %vm742_vm4, %v9893_v50  ;;  %v10588_v38 = vld [vmem:[#allocation6 + $0x33] sm:$0xff]  ;;  %v10360_v50 = vld [vmem:[#allocation6 + $0x44] sm:$0xff] }
 0xa54   : > { %14296 = vmatmul.mubr.msk.f32.vlgmr.msra.gmra.mxu1 %vm742_vm4, %v10123_v10  ;;  %14272 = vmatprep.mubr.msk.f32.mxu0 %vm742_vm4, %v9894_v36  ;;  %v10590_v10 = vld [vmem:[#allocation6 + $0x43] sm:$0xff]  ;;  %v10591_v36 = vld [vmem:[#allocation6 + $0x4b] sm:$0xff] }
 0xa55   : > { %14298 = vmatprep.mubr.msk.f32.mxu1 %vm742_vm4, %v10124_v56  ;;  %14320 = vmatpush3.msk.msra.mxu0 %vm1067_vm3, %v17033_v55  ;;  %v9897_v55 = vld [vmem:[#allocation6 + $0x2e] sm:$0xff] }
 0xa56   : > { %14346 = vmatpush3.msk.msra.mxu1 %vm1067_vm3, %v17038_v49  ;;  %14371 = vmatprep.subr.msk.mxu0 %vm1067_vm3, %v17101_v22  ;;  %v10127_v49 = vld [vmem:[#allocation6 + $0x2d] sm:$0xff] }
 0xa57   : > { %14397 = vmatprep.subr.msk.mxu1 %vm1067_vm3, %v17109_v7  ;;  %14273 = vmatmul.mubr.msk.f32.gmra.mxu0 %vm742_vm4, %v9895_v46  ;;  %v10362_v56 = vld [vmem:[#allocation6 + $0x54] sm:$0xff]  ;;  %v10363_v46 = vld [vmem:[#allocation6 + $0x5c] sm:$0xff] }
 0xa58   : > { %14299 = vmatmul.mubr.msk.f32.gmra.mxu1 %vm742_vm4, %v10125_v48  ;;  %14275 = vmatprep.mubr.msk.f32.mxu0 %vm742_vm4, %v9896_v3  ;;  %v10593_v48 = vld [vmem:[#allocation6 + $0x5b] sm:$0xff]  ;;  %v10364_v3 = vld [vmem:[#allocation6 + $0x64] sm:$0xff] }
 0xa59   : > { %14301 = vmatprep.mubr.msk.f32.mxu1 %vm742_vm4, %v10126_v16  ;;  %v10594_v16 = vld [vmem:[#allocation6 + $0x63] sm:$0xff] }
 0xa5b   : > { %14276 = vmatmul.mubr.msk.f32.gmra.mxu0 %vm742_vm4, %v9897_v55  ;;  %v10365_v55 = vld [vmem:[#allocation6 + $0x6c] sm:$0xff] }
 0xa5c   : > { %14302 = vmatmul.mubr.msk.f32.gmra.mxu1 %vm742_vm4, %v10127_v49  ;;  %14278 = vmatprep.mubr.msk.f32.mxu0 %vm742_vm4, %v9898_v37  ;;  %v10595_v49 = vld [vmem:[#allocation6 + $0x6b] sm:$0xff]  ;;  %v10366_v37 = vld [vmem:[#allocation6 + $0x74] sm:$0xff] }
 0xa5d   : > { %14304 = vmatprep.mubr.msk.f32.mxu1 %vm742_vm4, %v10128_v0  ;;  %v10596_v0 = vld [vmem:[#allocation6 + $0x73] sm:$0xff] }
 0xa5f   : > { %14279 = vmatmul.mubr.msk.f32.gmra.mxu0 %vm742_vm4, %v9899_v33  ;;  %v10367_v33 = vld [vmem:[#allocation6 + $0x7c] sm:$0xff] }
 0xa60   : > { %14305 = vmatmul.mubr.msk.f32.gmra.mxu1 %vm742_vm4, %v10129_v27  ;;  %14281 = vmatprep.mubr.msk.f32.mxu0 %vm742_vm4, %v9900_v45  ;;  %v10597_v27 = vld [vmem:[#allocation6 + $0x7b] sm:$0xff]  ;;  %v10813_v45 = vld [vmem:[#allocation6 + $0xa] sm:$0xff] }
 0xa61   : > { %14307 = vmatprep.mubr.msk.f32.mxu1 %vm742_vm4, %v10130_v20  ;;  %v11043_v20 = vld [vmem:[#allocation6 + $0x9] sm:$0xff] }
 0xa63   : > { %14282 = vmatmul.mubr.msk.f32.gmra.mxu0 %vm742_vm4, %v9901_v24  ;;  %v10814_v24 = vld [vmem:[#allocation6 + $0x12] sm:$0xff] }
 0xa64   : > { %14308 = vmatmul.mubr.msk.f32.gmra.mxu1 %vm742_vm4, %v10131_v18  ;;  %14284 = vmatprep.mubr.msk.f32.mxu0 %vm742_vm4, %v9902_v15  ;;  %v11044_v18 = vld [vmem:[#allocation6 + $0x11] sm:$0xff]  ;;  %v10815_v15 = vld [vmem:[#allocation6 + $0x1a] sm:$0xff] }
 0xa65   : > { %14310 = vmatprep.mubr.msk.f32.mxu1 %vm742_vm4, %v10132_v28  ;;  %v11045_v28 = vld [vmem:[#allocation6 + $0x19] sm:$0xff] }
 0xa67   : > { %14285 = vmatmul.mubr.msk.f32.gmra.mxu0 %vm742_vm4, %v9903_v6  ;;  %v10817_v6 = vld [vmem:[#allocation6 + $0x2a] sm:$0xff] }
 0xa68   : > { %14311 = vmatmul.mubr.msk.f32.gmra.mxu1 %vm742_vm4, %v10133_v54  ;;  %14287 = vmatprep.mubr.msk.f32.mxu0 %vm742_vm4, %v9904_v29  ;;  %v11047_v54 = vld [vmem:[#allocation6 + $0x29] sm:$0xff]  ;;  %v10818_v29 = vld [vmem:[#allocation6 + $0x32] sm:$0xff] }
 0xa69   : > { %14313 = vmatprep.mubr.msk.f32.mxu1 %vm742_vm4, %v10134_v62  ;;  %v11048_v62 = vld [vmem:[#allocation6 + $0x31] sm:$0xff] }
 0xa6b   : > { %14288 = vmatmul.mubr.msk.f32.gmra.mxu0 %vm742_vm4, %v9905_v58  ;;  %v10819_v58 = vld [vmem:[#allocation6 + $0x3a] sm:$0xff] }
 0xa6c   : > { %14314 = vmatmul.mubr.msk.f32.gmra.mxu1 %vm742_vm4, %v10135_v8  ;;  %14290 = vmatprep.mubr.msk.f32.mxu0 %vm742_vm4, %v9906_v23  ;;  %v11049_v8 = vld [vmem:[#allocation6 + $0x39] sm:$0xff]  ;;  %v10820_v23 = vld [vmem:[#allocation6 + $0x42] sm:$0xff] }
 0xa6d   : > { %14316 = vmatprep.mubr.msk.f32.mxu1 %vm742_vm4, %v10136_v53  ;;  %v11050_v53 = vld [vmem:[#allocation6 + $0x41] sm:$0xff] }
 0xa6f   : > { %14291 = vmatmul.mubr.msk.f32.gmra.mxu0 %vm742_vm4, %v9907_v4  ;;  %v10821_v4 = vld [vmem:[#allocation6 + $0x4a] sm:$0xff] }
 0xa70   : > { %14317 = vmatmul.mubr.msk.f32.gmra.mxu1 %vm742_vm4, %v10137_v1  ;;  %14321 = vmatprep.mubr.msk.f32.mxu0 %vm742_vm4, %v17090_v11  ;;  %v10359_v11 = vld [vmem:[#allocation6 + $0x3c] sm:$0xff]  ;;  %v11051_v1 = vld [vmem:[#allocation6 + $0x49] sm:$0xff] }
 0xa71   : > { %14347 = vmatprep.mubr.msk.f32.mxu1 %vm742_vm4, %v17092_v17  ;;  %v10589_v17 = vld [vmem:[#allocation6 + $0x3b] sm:$0xff] }
 0xa73   : > { %14322 = vmatmul.mubr.msk.f32.vlgmr.msra.gmra.mxu0 %vm742_vm4, %v10353_v32  ;;  %v10822_v32 = vld [vmem:[#allocation6 + $0x52] sm:$0xff] }
 0xa74   : > { %14348 = vmatmul.mubr.msk.f32.vlgmr.msra.gmra.mxu1 %vm742_vm4, %v10583_v42  ;;  %14324 = vmatprep.mubr.msk.f32.mxu0 %vm742_vm4, %v10354_v59  ;;  %v11052_v42 = vld [vmem:[#allocation6 + $0x51] sm:$0xff]  ;;  %v10823_v59 = vld [vmem:[#allocation6 + $0x5a] sm:$0xff] }
 0xa75   : > { %14350 = vmatprep.mubr.msk.f32.mxu1 %vm742_vm4, %v10584_v60  ;;  %14372 = vmatpush3.msk.msra.mxu0 %vm1067_vm3, %v17101_v22  ;;  %v10361_v22 = vld [vmem:[#allocation6 + $0x4c] sm:$0xff]  ;;  %v11053_v60 = vld [vmem:[#allocation6 + $0x59] sm:$0xff] }
 0xa76   : > { %14398 = vmatpush3.msk.msra.mxu1 %vm1067_vm3, %v17109_v7  ;;  %v10592_v7 = vld [vmem:[#allocation6 + $0x53] sm:$0xff] }
 0xa77   : > { %14325 = vmatmul.mubr.msk.f32.gmra.mxu0 %vm742_vm4, %v10355_v2  ;;  %v10824_v2 = vld [vmem:[#allocation6 + $0x62] sm:$0xff] }
 0xa78   : > { %14351 = vmatmul.mubr.msk.f32.gmra.mxu1 %vm742_vm4, %v10585_v9  ;;  %14327 = vmatprep.mubr.msk.f32.mxu0 %vm742_vm4, %v10356_v5  ;;  %v11054_v9 = vld [vmem:[#allocation6 + $0x61] sm:$0xff]  ;;  %v10825_v5 = vld [vmem:[#allocation6 + $0x6a] sm:$0xff] }
 0xa79   : > { %14353 = vmatprep.mubr.msk.f32.mxu1 %vm742_vm4, %v10586_v63  ;;  %v11055_v63 = vld [vmem:[#allocation6 + $0x69] sm:$0xff] }
 0xa7b   : > { %14328 = vmatmul.mubr.msk.f32.gmra.mxu0 %vm742_vm4, %v10357_v26  ;;  %v10826_v26 = vld [vmem:[#allocation6 + $0x72] sm:$0xff] }
 0xa7c   : > { %14354 = vmatmul.mubr.msk.f32.gmra.mxu1 %vm742_vm4, %v10587_v40  ;;  %14330 = vmatprep.mubr.msk.f32.mxu0 %vm742_vm4, %v10358_v25  ;;  %v11056_v40 = vld [vmem:[#allocation6 + $0x71] sm:$0xff]  ;;  %v10827_v25 = vld [vmem:[#allocation6 + $0x7a] sm:$0xff] }
 0xa7d   : > { %14356 = vmatprep.mubr.msk.f32.mxu1 %vm742_vm4, %v10588_v38  ;;  %v11057_v38 = vld [vmem:[#allocation6 + $0x79] sm:$0xff] }
 0xa7f   : > { %14331 = vmatmul.mubr.msk.f32.gmra.mxu0 %vm742_vm4, %v10359_v11  ;;  %v11288_v11 = vld [vmem:[%s17491_s14] sm:$0xf] }
 0xa80   : > { %14357 = vmatmul.mubr.msk.f32.gmra.mxu1 %vm742_vm4, %v10589_v17  ;;  %14333 = vmatprep.mubr.msk.f32.mxu0 %vm742_vm4, %v10360_v50 }
 0xa81   : > { %14359 = vmatprep.mubr.msk.f32.mxu1 %vm742_vm4, %v10590_v10  ;;  %14423 = vmatprep.subr.msk.mxu0 %vm1067_vm3, %v11288_v11 }
 0xa83   : > { %14334 = vmatmul.mubr.msk.f32.gmra.mxu0 %vm742_vm4, %v10361_v22 }
 0xa84   : > { %14360 = vmatmul.mubr.msk.f32.gmra.mxu1 %vm742_vm4, %v10591_v36  ;;  %14336 = vmatprep.mubr.msk.f32.mxu0 %vm742_vm4, %v10362_v56 }
 0xa85   : > { %14362 = vmatprep.mubr.msk.f32.mxu1 %vm742_vm4, %v10592_v7 }
 0xa87   : > { %14337 = vmatmul.mubr.msk.f32.gmra.mxu0 %vm742_vm4, %v10363_v46 }
 0xa88   : > { %14363 = vmatmul.mubr.msk.f32.gmra.mxu1 %vm742_vm4, %v10593_v48  ;;  %14339 = vmatprep.mubr.msk.f32.mxu0 %vm742_vm4, %v10364_v3 }
 0xa89   : > { %14365 = vmatprep.mubr.msk.f32.mxu1 %vm742_vm4, %v10594_v16 }
 0xa8b   : > { %14340 = vmatmul.mubr.msk.f32.gmra.mxu0 %vm742_vm4, %v10365_v55 }
 0xa8c   : > { %14366 = vmatmul.mubr.msk.f32.gmra.mxu1 %vm742_vm4, %v10595_v49  ;;  %14342 = vmatprep.mubr.msk.f32.mxu0 %vm742_vm4, %v10366_v37 }
 0xa8d   : > { %14368 = vmatprep.mubr.msk.f32.mxu1 %vm742_vm4, %v10596_v0 }
 0xa8f   : > { %14343 = vmatmul.mubr.msk.f32.gmra.mxu0 %vm742_vm4, %v10367_v33 }
 0xa90   : > { %14369 = vmatmul.mubr.msk.f32.gmra.mxu1 %vm742_vm4, %v10597_v27  ;;  %14373 = vmatprep.mubr.msk.f32.mxu0 %vm742_vm4, %v17094_v19  ;;  %v10816_v19 = vld [vmem:[#allocation6 + $0x22] sm:$0xff] }
 0xa91   : > { %14399 = vmatprep.mubr.msk.f32.mxu1 %vm742_vm4, %v17096_v47  ;;  %v11046_v47 = vld [vmem:[#allocation6 + $0x21] sm:$0xff] }
 0xa93   : > { %14374 = vmatmul.mubr.msk.f32.vlgmr.msra.gmra.mxu0 %vm742_vm4, %v10813_v45 }
 0xa94   : > { %14400 = vmatmul.mubr.msk.f32.vlgmr.msra.gmra.mxu1 %vm742_vm4, %v11043_v20  ;;  %14376 = vmatprep.mubr.msk.f32.mxu0 %vm742_vm4, %v10814_v24 }
 0xa95   : > { %14402 = vmatprep.mubr.msk.f32.mxu1 %vm742_vm4, %v11044_v18  ;;  %14424 = vmatpush3.msk.msra.mxu0 %vm1067_vm3, %v11288_v11 }
 0xa97   : > { %14377 = vmatmul.mubr.msk.f32.gmra.mxu0 %vm742_vm4, %v10815_v15 }
 0xa98   : > { %14403 = vmatmul.mubr.msk.f32.gmra.mxu1 %vm742_vm4, %v11045_v28  ;;  %14379 = vmatprep.mubr.msk.f32.mxu0 %vm742_vm4, %v10816_v19 }
 0xa99   : > { %14405 = vmatprep.mubr.msk.f32.mxu1 %vm742_vm4, %v11046_v47 }
 0xa9b   : > { %14380 = vmatmul.mubr.msk.f32.gmra.mxu0 %vm742_vm4, %v10817_v6 }
 0xa9c   : > { %14406 = vmatmul.mubr.msk.f32.gmra.mxu1 %vm742_vm4, %v11047_v54  ;;  %14382 = vmatprep.mubr.msk.f32.mxu0 %vm742_vm4, %v10818_v29 }
 0xa9d   : > { %14408 = vmatprep.mubr.msk.f32.mxu1 %vm742_vm4, %v11048_v62 }
 0xa9f   : > { %14383 = vmatmul.mubr.msk.f32.gmra.mxu0 %vm742_vm4, %v10819_v58 }
 0xaa0   : > { %14409 = vmatmul.mubr.msk.f32.gmra.mxu1 %vm742_vm4, %v11049_v8  ;;  %14385 = vmatprep.mubr.msk.f32.mxu0 %vm742_vm4, %v10820_v23 }
 0xaa1   : > { %14411 = vmatprep.mubr.msk.f32.mxu1 %vm742_vm4, %v11050_v53 }
 0xaa3   : > { %14386 = vmatmul.mubr.msk.f32.gmra.mxu0 %vm742_vm4, %v10821_v4 }
 0xaa4   : > { %14412 = vmatmul.mubr.msk.f32.gmra.mxu1 %vm742_vm4, %v11051_v1  ;;  %14388 = vmatprep.mubr.msk.f32.mxu0 %vm742_vm4, %v10822_v32 }
 0xaa5   : > { %14414 = vmatprep.mubr.msk.f32.mxu1 %vm742_vm4, %v11052_v42 }
 0xaa7   : > { %14389 = vmatmul.mubr.msk.f32.gmra.mxu0 %vm742_vm4, %v10823_v59 }
 0xaa8   : > { %14415 = vmatmul.mubr.msk.f32.gmra.mxu1 %vm742_vm4, %v11053_v60  ;;  %14391 = vmatprep.mubr.msk.f32.mxu0 %vm742_vm4, %v10824_v2 }
 0xaa9   : > { %14417 = vmatprep.mubr.msk.f32.mxu1 %vm742_vm4, %v11054_v9 }
 0xaab   : > { %14392 = vmatmul.mubr.msk.f32.gmra.mxu0 %vm742_vm4, %v10825_v5 }
 0xaac   : > { %14418 = vmatmul.mubr.msk.f32.gmra.mxu1 %vm742_vm4, %v11055_v63  ;;  %14394 = vmatprep.mubr.msk.f32.mxu0 %vm742_vm4, %v10826_v26 }
 0xaad   : > { %14420 = vmatprep.mubr.msk.f32.mxu1 %vm742_vm4, %v11056_v40 }
 0xaaf   : > { %14395 = vmatmul.mubr.msk.f32.gmra.mxu0 %vm742_vm4, %v10827_v25 }
 0xab0   : > { %14421 = vmatmul.mubr.msk.f32.gmra.mxu1 %vm742_vm4, %v11057_v38 }
 0xaf3   : > { %v14219_v17 = vpop.f32.mrf.mxu0 }
 0xaf4   : > { %v14245_v50 = vpop.f32.mrf.mxu1 }
 0xaf5   : > { %v17224_v10 = vadd.f32 %v14245_v50, %v14219_v17  ;;  %v9617_v22 = vpop.f32.mrf.mxu0 }
 0xaf6   : > { %v9813_v36 = vpop.f32.mrf.mxu1 }
 0xaf7   : > { %v17226_v56 = vadd.f32 %v9813_v36, %v9617_v22  ;;  %v14222_v7 = vpop.f32.mrf.mxu0 }
 0xaf8   : > { %v14248_v46 = vpop.f32.mrf.mxu1 }
 0xaf9   : > { %v17228_v48 = vadd.f32 %v14248_v46, %v14222_v7  ;;  %v9627_v3 = vpop.f32.mrf.mxu0 }
 0xafa   : > { %v9823_v16 = vpop.f32.mrf.mxu1 }
 0xafb   : > { %v17230_v55 = vadd.f32 %v9823_v16, %v9627_v3  ;;  %v14225_v49 = vpop.f32.mrf.mxu0 }
 0xafc   : > { %v14251_v37 = vpop.f32.mrf.mxu1 }
 0xafd   : > { %v17232_v0 = vadd.f32 %v14251_v37, %v14225_v49  ;;  %v9637_v33 = vpop.f32.mrf.mxu0 }
 0xafe   : > { %v9833_v27 = vpop.f32.mrf.mxu1 }
 0xaff   : > { %v17234_v45 = vadd.f32 %v9833_v27, %v9637_v33  ;;  %v14228_v20 = vpop.f32.mrf.mxu0 }
 0xb00   : > { %v14254_v24 = vpop.f32.mrf.mxu1 }
 0xb01   : > { %v17236_v18 = vadd.f32 %v14254_v24, %v14228_v20  ;;  %v9647_v15 = vpop.f32.mrf.mxu0 }
 0xb02   : > { %v9843_v28 = vpop.f32.mrf.mxu1 }
 0xb03   : > { %v17238_v19 = vadd.f32 %v9843_v28, %v9647_v15  ;;  %v14231_v47 = vpop.f32.mrf.mxu0 }
 0xb04   : > { %v14257_v6 = vpop.f32.mrf.mxu1 }
 0xb05   : > { %v17240_v54 = vadd.f32 %v14257_v6, %v14231_v47  ;;  %v9657_v29 = vpop.f32.mrf.mxu0 }
 0xb06   : > { %v9853_v62 = vpop.f32.mrf.mxu1 }
 0xb07   : > { %v17242_v58 = vadd.f32 %v9853_v62, %v9657_v29  ;;  %v14234_v8 = vpop.f32.mrf.mxu0 }
 0xb08   : > { %v14260_v23 = vpop.f32.mrf.mxu1 }
 0xb09   : > { %v17244_v53 = vadd.f32 %v14260_v23, %v14234_v8  ;;  %v9667_v4 = vpop.f32.mrf.mxu0 }
 0xb0a   : > { %v9863_v1 = vpop.f32.mrf.mxu1 }
 0xb0b   : > { %v17246_v32 = vadd.f32 %v9863_v1, %v9667_v4  ;;  %v14237_v42 = vpop.f32.mrf.mxu0 }
 0xb0c   : > { %v14263_v59 = vpop.f32.mrf.mxu1 }
 0xb0d   : > { %v17248_v60 = vadd.f32 %v14263_v59, %v14237_v42  ;;  %v9677_v2 = vpop.f32.mrf.mxu0 }
 0xb0e   : > { %v9873_v9 = vpop.f32.mrf.mxu1 }
 0xb0f   : > { %v17250_v5 = vadd.f32 %v9873_v9, %v9677_v2  ;;  %v14240_v63 = vpop.f32.mrf.mxu0 }
 0xb10   : > { %v14266_v26 = vpop.f32.mrf.mxu1 }
 0xb11   : > { %17903 = vst [vmem:[#allocation74_spill] sm:$0xff] %v17250_v5  ;;  %v17252_v40 = vadd.f32 %v14266_v26, %v14240_v63  ;;  %v9687_v25 = vpop.f32.mrf.mxu0 }
 0xb12   : > { %v9883_v38 = vpop.f32.mrf.mxu1 }
 0xb13   : > { %17904 = vst [vmem:[#allocation65_spill] sm:$0xff] %v17252_v40  ;;  %v17254_v11 = vadd.f32 %v9883_v38, %v9687_v25  ;;  %v14271_v17 = vpop.f32.mrf.mxu0 }
 0xb14   : > { %v14297_v50 = vpop.f32.mrf.mxu1  ;;  %v10107_v40 = vadd.f32 %v14271_v17, %v17224_v10 }
 0xb15   : > { %17905 = vst [vmem:[#allocation40_spill] sm:$0xff] %v17254_v11  ;;  %v10027_v22 = vpop.f32.mrf.mxu0 }
 0xb16   : > { %v10257_v36 = vpop.f32.mrf.mxu1  ;;  %v10106_v5 = vadd.f32 %v10027_v22, %v17226_v56 }
 0xb17   : > { %v14274_v7 = vpop.f32.mrf.mxu0 }
 0xb18   : > { %v17256_v46 = vpop.f32.mrf.mxu1 }
 0xb19   : > { %v10037_v3 = vpop.f32.mrf.mxu0 }
 0xb1a   : > { %v17258_v16 = vpop.f32.mrf.mxu1  ;;  %v10108_v10 = vadd.f32 %v10037_v3, %v17230_v55 }
 0xb1b   : > { %v14277_v49 = vpop.f32.mrf.mxu0 }
 0xb1c   : > { %v17260_v37 = vpop.f32.mrf.mxu1  ;;  %v10111_v22 = vadd.f32 %v14277_v49, %v17232_v0 }
 0xb1d   : > { %v17262_v33 = vpop.f32.mrf.mxu0 }
 0xb1e   : > { %v17264_v27 = vpop.f32.mrf.mxu1 }
 0xb1f   : > { %v17266_v20 = vpop.f32.mrf.mxu0 }
 0xb20   : > { %v17268_v24 = vpop.f32.mrf.mxu1 }
 0xb21   : > { %v17270_v15 = vpop.f32.mrf.mxu0 }
 0xb22   : > { %v17272_v28 = vpop.f32.mrf.mxu1 }
 0xb23   : > { %v17274_v47 = vpop.f32.mrf.mxu0 }
 0xb24   : > { %v17276_v6 = vpop.f32.mrf.mxu1 }
 0xb25   : > { %v17278_v29 = vpop.f32.mrf.mxu0 }
 0xb26   : > { %v17280_v62 = vpop.f32.mrf.mxu1 }
 0xb27   : > { %v17282_v8 = vpop.f32.mrf.mxu0 }
 0xb28   : > { %v17284_v23 = vpop.f32.mrf.mxu1 }
 0xb29   : > { %v17286_v4 = vpop.f32.mrf.mxu0 }
 0xb2a   : > { %v17288_v1 = vpop.f32.mrf.mxu1 }
 0xb2b   : > { %17906 = vst [vmem:[#allocation77_spill] sm:$0xff] %v17288_v1  ;;  %v17290_v42 = vpop.f32.mrf.mxu0 }
 0xb2c   : > { %v17292_v59 = vpop.f32.mrf.mxu1 }
 0xb2d   : > { %17907 = vst [vmem:[#allocation55_spill] sm:$0xff] %v17292_v59  ;;  %v17294_v2 = vpop.f32.mrf.mxu0 }
 0xb2e   : > { %17908 = vst [vmem:[#allocation58_spill] sm:$0xff] %v17294_v2  ;;  %v17296_v9 = vpop.f32.mrf.mxu1 }
 0xb2f   : > { %17909 = vst [vmem:[#allocation41_spill] sm:$0xff] %v17296_v9  ;;  %v17298_v63 = vpop.f32.mrf.mxu0 }
 0xb30   : > { %17910 = vst [vmem:[#allocation31_spill] sm:$0xff] %v17298_v63  ;;  %v17300_v26 = vpop.f32.mrf.mxu1 }
 0xb31   : > { %17911 = vst [vmem:[#allocation72_spill] sm:$0xff] %v17300_v26  ;;  %v17302_v25 = vpop.f32.mrf.mxu0 }
 0xb32   : > { %17912 = vst [vmem:[#allocation36_spill] sm:$0xff] %v17302_v25  ;;  %v17304_v38 = vpop.f32.mrf.mxu1 }
 0xb33   : > { %17913 = vst [vmem:[#allocation57_spill] sm:$0xff] %v17304_v38  ;;  %v14323_v43 = vpop.f32.mrf.mxu0 }
 0xb34   : > { %v14349_v41 = vpop.f32.mrf.mxu1 }
 0xb35   : > { %v10487_v52 = vpop.f32.mrf.mxu0 }
 0xb36   : > { %v10717_v39 = vpop.f32.mrf.mxu1 }
 0xb37   : > { %v14326_v61 = vpop.f32.mrf.mxu0 }
 0xb38   : > { %v14352_v57 = vpop.f32.mrf.mxu1 }
 0xb39   : > { %v10497_v30 = vpop.f32.mrf.mxu0 }
 0xb3a   : > { %v10727_v34 = vpop.f32.mrf.mxu1 }
 0xb3b   : > { %v14329_v12 = vpop.f32.mrf.mxu0 }
 0xb3c   : > { %v17306_v21 = vpop.f32.mrf.mxu1 }
 0xb3d   : > { %v10507_v31 = vpop.f32.mrf.mxu0 }
 0xb3e   : > { %v17308_v14 = vpop.f32.mrf.mxu1 }
 0xb3f   : > { %v14332_v13 = vpop.f32.mrf.mxu0 }
 0xb40   : > { %v17310_v44 = vpop.f32.mrf.mxu1 }
 0xb41   : > { %v17312_v35 = vpop.f32.mrf.mxu0 }
 0xb42   : > { %v17314_v51 = vpop.f32.mrf.mxu1 }
 0xb43   : > { %17914 = vst [vmem:[#allocation78_spill] sm:$0xff] %v17314_v51  ;;  %v17316_v38 = vpop.f32.mrf.mxu0 }
 0xb44   : > { %v17318_v26 = vpop.f32.mrf.mxu1 }
 0xb45   : > { %17915 = vst [vmem:[#allocation26_spill] sm:$0xff] %v17318_v26  ;;  %v17320_v25 = vpop.f32.mrf.mxu0  ;;  %v10337_v26 = vadd.f32 %v14297_v50, %v10107_v40  ;;  %v10338_v50 = vadd.f32 %v17258_v16, %v10108_v10 }
 0xb46   : > { %17916 = vst [vmem:[#allocation48_spill] sm:$0xff] %v17320_v25  ;;  %v17322_v11 = vpop.f32.mrf.mxu1  ;;  %v10109_v25 = vadd.f32 %v14274_v7, %v17228_v48 }
 0xb47   : > { %17917 = vst [vmem:[#allocation60_spill] sm:$0xff] %v17322_v11  ;;  %v17324_v9 = vpop.f32.mrf.mxu0  ;;  %v10567_v17 = vadd.f32 %v14323_v43, %v10337_v26 }
 0xb48   : > { %17918 = vst [vmem:[#allocation51_spill] sm:$0xff] %v17324_v9  ;;  %v17326_v63 = vpop.f32.mrf.mxu1  ;;  %v10339_v56 = vadd.f32 %v17256_v46, %v10109_v25  ;;  %v10341_v46 = vadd.f32 %v17260_v37, %v10111_v22 }
 0xb49   : > { %17919 = vst [vmem:[#allocation39_spill] sm:$0xff] %v17326_v63  ;;  %v17329_v59 = vpop.f32.mrf.mxu0  ;;  %v10336_v63 = vadd.f32 %v10257_v36, %v10106_v5  ;;  %v10110_v5 = vadd.f32 %v17262_v33, %v17234_v45  ;;  %v10797_v55 = vadd.f32 %v14349_v41, %v10567_v17  ;;  %v10113_v36 = vadd.f32 %v17266_v20, %v17236_v18 }
 0xb4a   : > { %17920 = vst [vmem:[#allocation42_spill] sm:$0xff] %v17329_v59  ;;  %v17331_v2 = vpop.f32.mrf.mxu1  ;;  %v10569_v43 = vadd.f32 %v14326_v61, %v10339_v56  ;;  %v10571_v41 = vadd.f32 %v14329_v12, %v10341_v46  ;;  %v10115_v18 = vadd.f32 %v17274_v47, %v17240_v54 }
 0xb4b   : > { %17921 = vst [vmem:[#allocation38_spill] sm:$0xff] %v17331_v2  ;;  %v17334_v1 = vpop.f32.mrf.mxu0  ;;  %v10340_v25 = vadd.f32 %v17264_v27, %v10110_v5  ;;  %v10343_v33 = vadd.f32 %v17268_v24, %v10113_v36  ;;  %v10114_v27 = vadd.f32 %v17278_v29, %v17242_v58 }
 0xb4c   : > { %v17336_v51 = vpop.f32.mrf.mxu1  ;;  %v10799_v45 = vadd.f32 %v14352_v57, %v10569_v43  ;;  %v10345_v54 = vadd.f32 %v17276_v6, %v10115_v18  ;;  %v17932_v18 = vld [vmem:[#allocation31_spill] sm:$0xff] }
 0xb4d   : > { %17922 = vst [vmem:[#allocation30_spill] sm:$0xff] %v17336_v51  ;;  %v17339_v11 = vpop.f32.mrf.mxu0  ;;  %v10566_v51 = vadd.f32 %v10487_v52, %v10336_v63  ;;  %v10568_v52 = vadd.f32 %v10497_v30, %v10338_v50  ;;  %v10112_v63 = vadd.f32 %v17270_v15, %v17238_v19  ;;  %v10801_v15 = vadd.f32 %v17306_v21, %v10571_v41  ;;  %v17930_v41 = vld [vmem:[#allocation55_spill] sm:$0xff] }
 0xb4e   : > { %v17341_v9 = vpop.f32.mrf.mxu1  ;;  %v10573_v24 = vadd.f32 %v14332_v13, %v10343_v33  ;;  %v10344_v21 = vadd.f32 %v17280_v62, %v10114_v27  ;;  %v10116_v13 = vadd.f32 %v17286_v4, %v17246_v32  ;;  %v17924_v32 = vld [vmem:[#allocation48_spill] sm:$0xff]  ;;  %v17931_v33 = vld [vmem:[#allocation65_spill] sm:$0xff] }
 0xb4f   : > { %v17344_v59 = vpop.f32.mrf.mxu0  ;;  %v10796_v0 = vadd.f32 %v10717_v39, %v10566_v51  ;;  %v10798_v30 = vadd.f32 %v10727_v34, %v10568_v52  ;;  %v10570_v39 = vadd.f32 %v10507_v31, %v10340_v25  ;;  %v10342_v19 = vadd.f32 %v17272_v28, %v10112_v63 }
 0xb50   : > { %v17346_v2 = vpop.f32.mrf.mxu1  ;;  %v10117_v34 = vadd.f32 %v17282_v8, %v17244_v53  ;;  %v10575_v53 = vadd.f32 %v17316_v38, %v10345_v54  ;;  %v10574_v4 = vadd.f32 %v17924_v32, %v10344_v21  ;;  %v17926_v38 = vld [vmem:[#allocation74_spill] sm:$0xff] }
 0xb51   : > { %v17350_v40 = vpop.f32.mrf.mxu0  ;;  %v10800_v28 = vadd.f32 %v17308_v14, %v10570_v39  ;;  %v10572_v58 = vadd.f32 %v17312_v35, %v10342_v19  ;;  %v10119_v35 = vadd.f32 %v17290_v42, %v17248_v60  ;;  %v17929_v60 = vld [vmem:[#allocation51_spill] sm:$0xff]  ;;  %v17933_v39 = vld [vmem:[#allocation60_spill] sm:$0xff] }
 0xb52   : > { %v17352_v48 = vpop.f32.mrf.mxu1  ;;  %v10347_v43 = vadd.f32 %v17284_v23, %v10117_v34 }
 0xb53   : > { %v14375_v7 = vpop.f32.mrf.mxu0 }
 0xb54   : > { %v14401_v3 = vpop.f32.mrf.mxu1  ;;  %v11027_v49 = vadd.f32 %v14375_v7, %v10797_v55  ;;  %v10803_v55 = vadd.f32 %v17310_v44, %v10573_v24  ;;  %v17923_v7 = vld [vmem:[#allocation78_spill] sm:$0xff]  ;;  %v17925_v44 = vld [vmem:[#allocation77_spill] sm:$0xff]  ;;  %v10577_v42 = vadd.f32 %v17929_v60, %v10347_v43  ;;  %v17936_v24 = vld [vmem:[#allocation40_spill] sm:$0xff] }
 0xb55   : > { %v10947_v26 = vpop.f32.mrf.mxu0  ;;  %v10346_v52 = vadd.f32 %v17925_v44, %v10116_v13 }
 0xb56   : > { %v11177_v16 = vpop.f32.mrf.mxu1  ;;  %v11026_v61 = vadd.f32 %v10947_v26, %v10796_v0  ;;  %v11257_v20 = vadd.f32 %v14401_v3, %v11027_v49  ;;  %v10802_v3 = vadd.f32 %v17923_v7, %v10572_v58  ;;  %v17927_v49 = vld [vmem:[#allocation58_spill] sm:$0xff] }
 0xb57   : > { %v14378_v37 = vpop.f32.mrf.mxu0  ;;  %v10118_v63 = vadd.f32 %v17927_v49, %v17926_v38 }
 0xb58   : > { %v14404_v51 = vpop.f32.mrf.mxu1  ;;  %v11256_v10 = vadd.f32 %v11177_v16, %v11026_v61  ;;  %v11029_v17 = vadd.f32 %v14378_v37, %v10799_v45  ;;  %v17928_v16 = vld [vmem:[#allocation26_spill] sm:$0xff]  ;;  %v10349_v61 = vadd.f32 %v17930_v41, %v10119_v35 }
 0xb59   : > { %v10957_v57 = vpop.f32.mrf.mxu0  ;;  %v10805_v25 = vadd.f32 %v17928_v16, %v10575_v53  ;;  %v17940_v53 = vld [vmem:[#allocation38_spill] sm:$0xff] }
 0xb5a   : > { %v11187_v12 = vpop.f32.mrf.mxu1  ;;  %14624 = vtanh.f32 %v11256_v10  ;;  %v11028_v56 = vadd.f32 %v10957_v57, %v10798_v30  ;;  %v11259_v31 = vadd.f32 %v14404_v51, %v11029_v17  ;;  %v10804_v10 = vadd.f32 %v17933_v39, %v10574_v4  ;;  %v17934_v17 = vld [vmem:[#allocation42_spill] sm:$0xff] }
 0xb5b   : > { %14626 = vtanh.f32 %v11257_v20  ;;  %v14381_v47 = vpop.f32.mrf.mxu0  ;;  %v10121_v20 = vadd.f32 %v17932_v18, %v17931_v33  ;;  %v10576_v19 = vadd.f32 %v17934_v17, %v10346_v52 }
 0xb5c   : > { %v14407_v22 = vpop.f32.mrf.mxu1  ;;  %v11258_v29 = vadd.f32 %v11187_v12, %v11028_v56  ;;  %v11031_v50 = vadd.f32 %v14381_v47, %v10801_v15  ;;  %v17935_v12 = vld [vmem:[#allocation41_spill] sm:$0xff]  ;;  %v17937_v56 = vld [vmem:[#allocation36_spill] sm:$0xff]  ;;  %v17938_v47 = vld [vmem:[#allocation39_spill] sm:$0xff] }
 0xb5d   : > { %v10967_v5 = vpop.f32.mrf.mxu0  ;;  %v10348_v15 = vadd.f32 %v17935_v12, %v10118_v63  ;;  %v10120_v54 = vadd.f32 %v17937_v56, %v17936_v24 }
 0xb5e   : > { %v11197_v6 = vpop.f32.mrf.mxu1  ;;  %14628 = vtanh.f32 %v11258_v29  ;;  %v11030_v8 = vadd.f32 %v10967_v5, %v10800_v28  ;;  %v11261_v14 = vadd.f32 %v14407_v22, %v11031_v50  ;;  %v10807_v22 = vadd.f32 %v17938_v47, %v10577_v42  ;;  %v17939_v50 = vld [vmem:[#allocation72_spill] sm:$0xff]  ;;  %v17944_v47 = vld [vmem:[#allocation37_spill] sm:$0xff] }
 0xb5f   : > { %14630 = vtanh.f32 %v11259_v31  ;;  %v14384_v36 = vpop.f32.mrf.mxu0  ;;  %v10579_v28 = vadd.f32 %v17334_v1, %v10349_v61  ;;  %v10351_v21 = vadd.f32 %v17939_v50, %v10121_v20  ;;  %v10578_v43 = vadd.f32 %v17339_v11, %v10348_v15 }
 0xb60   : > { %v14410_v62 = vpop.f32.mrf.mxu1  ;;  %v11260_v46 = vadd.f32 %v11197_v6, %v11030_v8  ;;  %v11033_v0 = vadd.f32 %v14384_v36, %v10803_v55  ;;  %v10806_v8 = vadd.f32 %v17940_v53, %v10576_v19  ;;  %v17941_v36 = vld [vmem:[#allocation57_spill] sm:$0xff] }
 0xb61   : > { %v10977_v26 = vpop.f32.mrf.mxu0  ;;  %v10350_v1 = vadd.f32 %v17941_v36, %v10120_v54  ;;  %v10581_v4 = vadd.f32 %v17344_v59, %v10351_v21  ;;  %v10808_v49 = vadd.f32 %v17341_v9, %v10578_v43  ;;  %v17943_v54 = vld [vmem:[#allocation21_spill] sm:$0xff] }
 0xb62   : > { %v11207_v23 = vpop.f32.mrf.mxu1  ;;  %14632 = vtanh.f32 %v11260_v46  ;;  %v11032_v45 = vadd.f32 %v10977_v26, %v10802_v3  ;;  %v11263_v37 = vadd.f32 %v14410_v62, %v11033_v0  ;;  %v17942_v3 = vld [vmem:[#allocation30_spill] sm:$0xff]  ;;  %v17946_v21 = vld [vmem:[#allocation61_spill] sm:$0xff] }
 0xb63   : > { %14634 = vtanh.f32 %v11261_v14  ;;  %v14387_v51 = vpop.f32.mrf.mxu0  ;;  %v10809_v32 = vadd.f32 %v17942_v3, %v10579_v28  ;;  %v10580_v63 = vadd.f32 %v17350_v40, %v10350_v1  ;;  %v10811_v59 = vadd.f32 %v17346_v2, %v10581_v4 }
 0xb64   : > { %v14413_v30 = vpop.f32.mrf.mxu1  ;;  %v11262_v27 = vadd.f32 %v11207_v23, %v11032_v45  ;;  %v11035_v57 = vadd.f32 %v14387_v51, %v10805_v25 }
 0xb65   : > { %v10987_v34 = vpop.f32.mrf.mxu0  ;;  %v10810_v40 = vadd.f32 %v17352_v48, %v10580_v63  ;;  %v17954_v63 = vld [vmem:[#allocation62_spill] sm:$0xff] }
 0xb66   : > { %v11217_v31 = vpop.f32.mrf.mxu1  ;;  %14636 = vtanh.f32 %v11262_v27  ;;  %v11034_v58 = vadd.f32 %v10987_v34, %v10804_v10  ;;  %v11265_v13 = vadd.f32 %v14413_v30, %v11035_v57 }
 0xb67   : > { %v14625_v29 = vpop.eup %14624  ;;  %14638 = vtanh.f32 %v11263_v37  ;;  %v14390_v5 = vpop.f32.mrf.mxu0 }
 0xb68   : > { %v14416_v6 = vpop.f32.mrf.mxu1  ;;  %v14627_v55 = vpop.eup %14626  ;;  %v11264_v35 = vadd.f32 %v11217_v31, %v11034_v58  ;;  %v11037_v14 = vadd.f32 %v14390_v5, %v10807_v22  ;;  %14425 = vmatprep.mubr.msk.f32.mxu0 %vm742_vm4, %v14625_v29  ;;  %v17945_v58 = vld [vmem:[#allocation45_spill] sm:$0xff] }
 0xb69   : > { %v10997_v62 = vpop.f32.mrf.mxu0  ;;  %14426 = vmatmul.mubr.msk.f32.vlgmr.msra.gmra.mxu0 %vm742_vm4, %v14627_v55 }
 0xb6a   : > { %v11227_v7 = vpop.f32.mrf.mxu1  ;;  %14640 = vtanh.f32 %v11264_v35  ;;  %v11036_v46 = vadd.f32 %v10997_v62, %v10806_v8  ;;  %v11267_v44 = vadd.f32 %v14416_v6, %v11037_v14  ;;  %v17947_v6 = vld [vmem:[#allocation29_spill] sm:$0xff]  ;;  %v17948_v8 = vld [vmem:[#allocation44_spill] sm:$0xff]  ;;  %v17949_v14 = vld [vmem:[#allocation67_spill] sm:$0xff] }
 0xb6b   : > { %v14629_v0 = vpop.eup %14628  ;;  %14642 = vtanh.f32 %v11265_v13  ;;  %v14393_v11 = vpop.f32.mrf.mxu0  ;;  %v17950_v62 = vld [vmem:[#allocation23_spill] sm:$0xff] }
 0xb6c   : > { %v14419_v52 = vpop.f32.mrf.mxu1  ;;  %v14631_v38 = vpop.eup %14630  ;;  %v11266_v26 = vadd.f32 %v11227_v7, %v11036_v46  ;;  %v11039_v23 = vadd.f32 %v14393_v11, %v10809_v32  ;;  %14428 = vmatprep.mubr.msk.f32.mxu0 %vm742_vm4, %v14629_v0  ;;  %v17951_v32 = vld [vmem:[#allocation46_spill] sm:$0xff]  ;;  %v17952_v0 = vld [vmem:[#allocation63_spill] sm:$0xff] }
 0xb6d   : > { %v11007_v16 = vpop.f32.mrf.mxu0  ;;  %14429 = vmatmul.mubr.msk.f32.gmra.mxu0 %vm742_vm4, %v14631_v38 }
 0xb6e   : > { %v11237_v25 = vpop.f32.mrf.mxu1  ;;  %14644 = vtanh.f32 %v11266_v26  ;;  %v11038_v60 = vadd.f32 %v11007_v16, %v10808_v49  ;;  %v11269_v45 = vadd.f32 %v14419_v52, %v11039_v23  ;;  %v17953_v52 = vld [vmem:[#allocation59_spill] sm:$0xff]  ;;  %v17955_v16 = vld [vmem:[#allocation32_spill] sm:$0xff] }
 0xb6f   : > { %v14633_v42 = vpop.eup %14632  ;;  %14646 = vtanh.f32 %v11267_v44  ;;  %v14396_v41 = vpop.f32.mrf.mxu0 }
 0xb70   : > { %v14422_v61 = vpop.f32.mrf.mxu1  ;;  %v14635_v9 = vpop.eup %14634  ;;  %v11268_v33 = vadd.f32 %v11237_v25, %v11038_v60  ;;  %v11041_v18 = vadd.f32 %v14396_v41, %v10811_v59  ;;  %14431 = vmatprep.mubr.msk.f32.mxu0 %vm742_vm4, %v14633_v42  ;;  %v17956_v60 = vld [vmem:[#allocation50_spill] sm:$0xff]  ;;  %v17957_v41 = vld [vmem:[#allocation56_spill] sm:$0xff] }
 0xb71   : > { %v11017_v20 = vpop.f32.mrf.mxu0  ;;  %14432 = vmatmul.mubr.msk.f32.gmra.mxu0 %vm742_vm4, %v14635_v9 }
 0xb72   : > { %14648 = vtanh.f32 %v11268_v33  ;;  %v11040_v37 = vadd.f32 %v11017_v20, %v10810_v40  ;;  %v11271_v51 = vadd.f32 %v14422_v61, %v11041_v18  ;;  %v11247_v30 = vpop.f32.mrf.mxu1  ;;  %v17958_v40 = vld [vmem:[#allocation76_spill] sm:$0xff] }
 0xb73   : > { %v14637_v2 = vpop.eup %14636  ;;  %14650 = vtanh.f32 %v11269_v45 }
 0xb74   : > { %v14639_v39 = vpop.eup %14638  ;;  %v11270_v10 = vadd.f32 %v11247_v30, %v11040_v37  ;;  %14434 = vmatprep.mubr.msk.f32.mxu0 %vm742_vm4, %v14637_v2 }
 0xb75   : > { %14435 = vmatmul.mubr.msk.f32.gmra.mxu0 %vm742_vm4, %v14639_v39 }
 0xb76   : > { %14652 = vtanh.f32 %v11270_v10 }
 0xb77   : > { %v14641_v48 = vpop.eup %14640  ;;  %14654 = vtanh.f32 %v11271_v51 }
 0xb78   : > { %v14643_v17 = vpop.eup %14642  ;;  %14437 = vmatprep.mubr.msk.f32.mxu0 %vm742_vm4, %v14641_v48 }
 0xb79   : > { %14438 = vmatmul.mubr.msk.f32.gmra.mxu0 %vm742_vm4, %v14643_v17 }
 0xb7b   : > { %v14645_v19 = vpop.eup %14644 }
 0xb7c   : > { %v14647_v27 = vpop.eup %14646  ;;  %14440 = vmatprep.mubr.msk.f32.mxu0 %vm742_vm4, %v14645_v19 }
 0xb7d   : > { %14441 = vmatmul.mubr.msk.f32.gmra.mxu0 %vm742_vm4, %v14647_v27 }
 0xb7f   : > { %v14649_v57 = vpop.eup %14648 }
 0xb80   : > { %v14651_v12 = vpop.eup %14650  ;;  %14443 = vmatprep.mubr.msk.f32.mxu0 %vm742_vm4, %v14649_v57 }
 0xb81   : > { %14444 = vmatmul.mubr.msk.f32.gmra.mxu0 %vm742_vm4, %v14651_v12 }
 0xb83   : > { %v14653_v15 = vpop.eup %14652 }
 0xb84   : > { %v14655_v24 = vpop.eup %14654  ;;  %14446 = vmatprep.mubr.msk.f32.mxu0 %vm742_vm4, %v14653_v15 }
 0xb85   : > { %14447 = vmatmul.mubr.msk.f32.gmra.mxu0 %vm742_vm4, %v14655_v24 }
 0xc29   : > { %v14427_v56 = vpop.f32.mrf.mxu0 }
 0xc2a   : > { %v11486_v34 = vadd.f32 %v14427_v56, %v17943_v54 }
 0xc2b   : > { %v11406_v31 = vpop.f32.mrf.mxu0 }
 0xc2c   : > { %11507 = vst.msk [vmem:[%s14770_s30 + $0x8] sm:$0xff] %vm742_vm4, %v11486_v34  ;;  %v11485_v22 = vadd.f32 %v11406_v31, %v17944_v47 }
 0xc2d   : > { %v14430_v28 = vpop.f32.mrf.mxu0 }
 0xc2e   : > { %11506 = vst.msk [vmem:[%s14770_s30] sm:$0xff] %vm742_vm4, %v11485_v22  ;;  %v11488_v29 = vadd.f32 %v14430_v28, %v17945_v58 }
 0xc2f   : > { %v11416_v50 = vpop.f32.mrf.mxu0 }
 0xc30   : > { %11509 = vst.msk [vmem:[%s14770_s30 + $0x18] sm:$0xff] %vm742_vm4, %v11488_v29  ;;  %v11487_v13 = vadd.f32 %v11416_v50, %v17946_v21 }
 0xc31   : > { %v14433_v5 = vpop.f32.mrf.mxu0 }
 0xc32   : > { %11508 = vst.msk [vmem:[%s14770_s30 + $0x10] sm:$0xff] %vm742_vm4, %v11487_v13  ;;  %v11490_v55 = vadd.f32 %v14433_v5, %v17947_v6 }
 0xc33   : > { %v11426_v53 = vpop.f32.mrf.mxu0 }
 0xc34   : > { %11511 = vst.msk [vmem:[%s14770_s30 + $0x28] sm:$0xff] %vm742_vm4, %v11490_v55  ;;  %v11489_v43 = vadd.f32 %v11426_v53, %v17948_v8 }
 0xc35   : > { %v14436_v35 = vpop.f32.mrf.mxu0 }
 0xc36   : > { %11510 = vst.msk [vmem:[%s14770_s30 + $0x20] sm:$0xff] %vm742_vm4, %v11489_v43  ;;  %v11492_v36 = vadd.f32 %v14436_v35, %v17949_v14 }
 0xc37   : > { %v11436_v1 = vpop.f32.mrf.mxu0 }
 0xc38   : > { %11513 = vst.msk [vmem:[%s14770_s30 + $0x38] sm:$0xff] %vm742_vm4, %v11492_v36  ;;  %v11491_v7 = vadd.f32 %v11436_v1, %v17950_v62 }
 0xc39   : > { %v14439_v3 = vpop.f32.mrf.mxu0 }
 0xc3a   : > { %11512 = vst.msk [vmem:[%s14770_s30 + $0x30] sm:$0xff] %vm742_vm4, %v11491_v7  ;;  %v11494_v4 = vadd.f32 %v14439_v3, %v17951_v32 }
 0xc3b   : > { %v11446_v46 = vpop.f32.mrf.mxu0 }
 0xc3c   : > { %11515 = vst.msk [vmem:[%s14770_s30 + $0x48] sm:$0xff] %vm742_vm4, %v11494_v4  ;;  %v11493_v44 = vadd.f32 %v11446_v46, %v17952_v0 }
 0xc3d   : > { %v14442_v11 = vpop.f32.mrf.mxu0 }
 0xc3e   : > { %11514 = vst.msk [vmem:[%s14770_s30 + $0x40] sm:$0xff] %vm742_vm4, %v11493_v44  ;;  %v11496_v38 = vadd.f32 %v14442_v11, %v17953_v52 }
 0xc3f   : > { %v11456_v49 = vpop.f32.mrf.mxu0 }
 0xc40   : > { %11517 = vst.msk [vmem:[%s14770_s30 + $0x58] sm:$0xff] %vm742_vm4, %v11496_v38  ;;  %v11495_v26 = vadd.f32 %v11456_v49, %v17954_v63 }
 0xc41   : > { %v14445_v23 = vpop.f32.mrf.mxu0 }
 0xc42   : > { %11516 = vst.msk [vmem:[%s14770_s30 + $0x50] sm:$0xff] %vm742_vm4, %v11495_v26  ;;  %v11498_v25 = vadd.f32 %v14445_v23, %v17955_v16 }
 0xc43   : > { %v11466_v59 = vpop.f32.mrf.mxu0 }
 0xc44   : > { %11519 = vst.msk [vmem:[%s14770_s30 + $0x68] sm:$0xff] %vm742_vm4, %v11498_v25  ;;  %v11497_v42 = vadd.f32 %v11466_v59, %v17956_v60 }
 0xc45   : > { %v14448_v45 = vpop.f32.mrf.mxu0 }
 0xc46   : > { %11518 = vst.msk [vmem:[%s14770_s30 + $0x60] sm:$0xff] %vm742_vm4, %v11497_v42  ;;  %v11500_v61 = vadd.f32 %v14448_v45, %v17957_v41 }
 0xc47   : > { %v11476_v9 = vpop.f32.mrf.mxu0 }
 0xc48   : > { %11521 = vst.msk [vmem:[%s14770_s30 + $0x78] sm:$0xff] %vm742_vm4, %v11500_v61  ;;  %v11499_v33 = vadd.f32 %v11476_v9, %v17958_v40 }
 0xc4a   : > { %11520 = vst.msk [vmem:[%s14770_s30 + $0x70] sm:$0xff] %vm742_vm4, %v11499_v33 }
 0xc4b PF: > { %s25_s18 = sadd.s32 1, %s14662_s18  }
 0xc4c   : > { %p22_p5 = scmp.ge.s32.totalorder %s25_s18, 4  }
 0xc4e   :  { %24 = sbr.rel (!%p22_p5) target bundleno = 1 (0x1), region = 152 }

</bundles_post_ra>
